<compile_context>
chip_gen: v7x
topology: tpu7x:2x2x1
jax: 0.10.0
libtpu: 0.0.40
codegen_flags: <defaults>
</compile_context>

<pallas_src>
import functools
import math

import jax
import jax.numpy as jnp
from jax.experimental import pallas as pl
from jax.experimental.pallas import tpu as pltpu

# ----------------------------- model config (small, synthetic) ---------------
BATCH = 2
IMG_C, IMG_H, IMG_W = 3, 32, 32
PATCH = 8
VIT_DIM, VIT_HEADS, VIT_LAYERS = 128, 2, 2          # head_dim = 64
VIT_MLP = 4 * VIT_DIM
NQ = 8                        # Q-Former query tokens (32 in the real model)
QF_DIM, QF_HEADS, QF_LAYERS = 128, 2, 2             # head_dim = 64
QF_MLP = 4 * QF_DIM
NUM_PATCHES = (IMG_H // PATCH) * (IMG_W // PATCH)   # 16
SEQ = NUM_PATCHES + 1                               # 17 (cls + patches)
# TODO(synk): real BLIP2 uses feat_dim=768, ViT-g (1408-dim, 39 blocks) and a
# 12-layer pretrained Q-Former; shapes are scaled down (lane-aligned) here.


# ----------------------------- in-kernel helpers ------------------------------
def _ln(x, g, b, eps):
    """LayerNorm over the last axis; x f32, g/b (1, D) f32."""
    mu = jnp.mean(x, axis=-1, keepdims=True)
    var = jnp.mean((x - mu) * (x - mu), axis=-1, keepdims=True)
    return (x - mu) * jax.lax.rsqrt(var + eps) * g + b


def _linear(x_f32, w_bf16, b_f32):
    """x @ W + b with bf16 MXU operands and f32 accumulation."""
    return jnp.dot(x_f32.astype(jnp.bfloat16), w_bf16,
                   preferred_element_type=jnp.float32) + b_f32


def _gelu(x):
    # tanh-approximate GELU in f32 (EUP tanh); differs from erf-GELU by <1e-3.
    c = 0.7978845608028654
    return 0.5 * x * (1.0 + jnp.tanh(c * (x + 0.044715 * x * x * x)))


def _attn_proj(q, k, v, wo, bo, nh, scale):
    """All-head attention + output projection for one batch element.

    q: (Tq, D), k/v: (Tk, D) f32; wo: (D, D) bf16; bo: (1, D) f32.
    Heads are static lane slices (dh = 64); each head's context is projected by
    the matching row-block of wo and accumulated in f32 — no lane concat, no
    transposes.
    """
    D = q.shape[-1]
    dh = D // nh
    out = None
    for h in range(nh):
        sl = slice(h * dh, (h + 1) * dh)
        qh = q[:, sl].astype(jnp.bfloat16)
        kh = k[:, sl].astype(jnp.bfloat16)
        vh = v[:, sl].astype(jnp.bfloat16)
        s = jax.lax.dot_general(qh, kh, (((1,), (1,)), ((), ())),
                                preferred_element_type=jnp.float32) * scale
        m = jnp.max(s, axis=-1, keepdims=True)
        p = jnp.exp(s - m)
        p = p * pl.reciprocal(jnp.sum(p, axis=-1, keepdims=True), approx=True)
        ctx = jnp.dot(p.astype(jnp.bfloat16), vh,
                      preferred_element_type=jnp.float32)
        head_out = jnp.dot(ctx.astype(jnp.bfloat16), wo[sl, :],
                           preferred_element_type=jnp.float32)
        out = head_out if out is None else out + head_out
    return out + bo


# ----------------------------- the fused kernel --------------------------------
def _blip2_kernel(patch_ref, pw, pb, cls_tok, pos,
                  v_ln1g, v_ln1b, v_wqkv, v_bqkv, v_wo, v_bo,
                  v_ln2g, v_ln2b, v_w1, v_b1, v_w2, v_b2,
                  lnv_g, lnv_b,
                  qtok, qln_g, qln_b,
                  s_wqkv, s_bqkv, s_wo, s_bo, s_lng, s_lnb,
                  c_wq, c_bq, c_wkv, c_bkv, c_wo, c_bo, c_lng, c_lnb,
                  f_w1, f_b1, f_w2, f_b2, f_lng, f_lnb,
                  o_ref, xbuf,
                  *, vit_layers, qf_layers, vit_heads, qf_heads):
    P = patch_ref.shape[1]
    D = pw.shape[-1]
    v_scale = 1.0 / math.sqrt(D // vit_heads)
    q_scale = 1.0 / math.sqrt(D // qf_heads)

    # ---- patch projection + cls-token prepend + positional embedding --------
    proj = _linear(patch_ref[0], pw[...], pb[...])            # (P, D) f32
    xbuf[pl.ds(0, 1), :] = cls_tok[...] + pos[pl.ds(0, 1), :]
    xbuf[pl.ds(1, P), :] = proj + pos[pl.ds(1, P), :]
    x = xbuf[...]                                             # (T, D) f32

    # ---- ViT blocks (pre-LN, EVA-style), statically unrolled ------------------
    for l in range(vit_layers):
        h = _ln(x, v_ln1g[l], v_ln1b[l], 1e-6)
        qkv = _linear(h, v_wqkv[l], v_bqkv[l])                # (T, 3D) fused QKV
        x = x + _attn_proj(qkv[:, :D], qkv[:, D:2 * D], qkv[:, 2 * D:],
                           v_wo[l], v_bo[l], vit_heads, v_scale)
        h = _ln(x, v_ln2g[l], v_ln2b[l], 1e-6)
        x = x + _linear(_gelu(_linear(h, v_w1[l], v_b1[l])), v_w2[l], v_b2[l])

    img = _ln(x, lnv_g[...], lnv_b[...], 1e-6)                # ln_vision

    # ---- Q-Former (post-LN BERT blocks with cross-attention) ------------------
    q = _ln(qtok[...], qln_g[...], qln_b[...], 1e-12)         # (NQ, D)
    for l in range(qf_layers):
        # self-attention among query tokens
        qkv = _linear(q, s_wqkv[l], s_bqkv[l])
        a = _attn_proj(qkv[:, :D], qkv[:, D:2 * D], qkv[:, 2 * D:],
                       s_wo[l], s_bo[l], qf_heads, q_scale)
        q = _ln(q + a, s_lng[l], s_lnb[l], 1e-12)
        # cross-attention: queries attend to ln_vision(image tokens)
        qq = _linear(q, c_wq[l], c_bq[l])
        kv = _linear(img, c_wkv[l], c_bkv[l])                 # (Tv, 2D) fused K/V
        a = _attn_proj(qq, kv[:, :D], kv[:, D:],
                       c_wo[l], c_bo[l], qf_heads, q_scale)
        q = _ln(q + a, c_lng[l], c_lnb[l], 1e-12)
        # FFN
        h = _linear(_gelu(_linear(q, f_w1[l], f_b1[l])), f_w2[l], f_b2[l])
        q = _ln(q + h, f_lng[l], f_lnb[l], 1e-12)

    # image_embeds[:, 0, :] — lane-dense (1, 128) write
    o_ref[0] = q[0:1, :].astype(o_ref.dtype)


# ----------------------------- pallas_call wrapper -----------------------------
_PARALLEL = pltpu.CompilerParams(dimension_semantics=("parallel",))


def _w_spec(shape):
    """Broadcast (weight) spec: full-array block, same block for every batch."""
    nd = len(shape)
    return pl.BlockSpec(tuple(shape), lambda b, nd=nd: (0,) * nd)


def patchify(images, p):
    """NCHW -> (B, num_patches, C*p*p), matching Conv2d(stride=patch) flattening."""
    B, C, H, W = images.shape
    x = images.reshape(B, C, H // p, p, W // p, p)
    x = x.transpose(0, 2, 4, 1, 3, 5)                 # B, H/p, W/p, C, p, p
    return x.reshape(B, (H // p) * (W // p), C * p * p)


def blip2_image_forward(params, images):
    B = images.shape[0]
    patches = patchify(images, PATCH)                 # (B, P, C*p*p)
    cpp = patches.shape[-1]

    kern = functools.partial(_blip2_kernel,
                             vit_layers=VIT_LAYERS, qf_layers=QF_LAYERS,
                             vit_heads=VIT_HEADS, qf_heads=QF_HEADS)
    args = (patches,
            params["patch_w"], params["patch_b"],
            params["cls_token"], params["pos_embed"],
            params["v_ln1_g"], params["v_ln1_b"],
            params["v_wqkv"], params["v_bqkv"],
            params["v_wo"], params["v_bo"],
            params["v_ln2_g"], params["v_ln2_b"],
            params["v_w1"], params["v_b1"], params["v_w2"], params["v_b2"],
            params["ln_vision_g"], params["ln_vision_b"],
            params["query_tokens"], params["qf_emb_ln_g"], params["qf_emb_ln_b"],
            params["s_wqkv"], params["s_bqkv"], params["s_wo"], params["s_bo"],
            params["s_lng"], params["s_lnb"],
            params["c_wq"], params["c_bq"], params["c_wkv"], params["c_bkv"],
            params["c_wo"], params["c_bo"], params["c_lng"], params["c_lnb"],
            params["f_w1"], params["f_b1"], params["f_w2"], params["f_b2"],
            params["f_lng"], params["f_lnb"])
    in_specs = ([pl.BlockSpec((1, NUM_PATCHES, cpp), lambda b: (b, 0, 0))]
                + [_w_spec(a.shape) for a in args[1:]])

    out = pl.pallas_call(
        kern,
        out_shape=jax.ShapeDtypeStruct((B, 1, QF_DIM), jnp.float32),
        grid=(B,),
        in_specs=in_specs,
        out_specs=pl.BlockSpec((1, 1, QF_DIM), lambda b: (b, 0, 0)),
        scratch_shapes=[pltpu.VMEM((SEQ, VIT_DIM), jnp.float32)],
        compiler_params=_PARALLEL,
    )(*args)
    return out[:, 0, :]                               # (B, D) == image_embeds[:, 0, :]


# ----------------------------- deterministic parameter init ------------------
def _normal(key, shape, scale=0.02):
    return scale * jax.random.normal(key, shape, jnp.float32)


def _wbf16(key, shape):
    return _normal(key, shape).astype(jnp.bfloat16)   # MXU operand dtype


def init_params(key):
    keys = iter(jax.random.split(key, 32))
    ones = lambda *s: jnp.ones(s, jnp.float32)
    zeros = lambda *s: jnp.zeros(s, jnp.float32)
    L, Lq = VIT_LAYERS, QF_LAYERS
    D, M = VIT_DIM, VIT_MLP
    Dq, Mq = QF_DIM, QF_MLP
    return {
        # --- visual encoder ---
        "patch_w": _wbf16(next(keys), (IMG_C * PATCH * PATCH, D)),
        "patch_b": zeros(1, D),
        "cls_token": _normal(next(keys), (1, D)),
        "pos_embed": _normal(next(keys), (SEQ, D)),
        # stacked per-layer ViT weights (leading layer axis)
        "v_ln1_g": ones(L, 1, D), "v_ln1_b": zeros(L, 1, D),
        "v_wqkv": _wbf16(next(keys), (L, D, 3 * D)),          # fused Q/K/V
        "v_bqkv": zeros(L, 1, 3 * D),
        "v_wo": _wbf16(next(keys), (L, D, D)), "v_bo": zeros(L, 1, D),
        "v_ln2_g": ones(L, 1, D), "v_ln2_b": zeros(L, 1, D),
        "v_w1": _wbf16(next(keys), (L, D, M)), "v_b1": zeros(L, 1, M),
        "v_w2": _wbf16(next(keys), (L, M, D)), "v_b2": zeros(L, 1, D),
        "ln_vision_g": ones(1, D), "ln_vision_b": zeros(1, D),
        # --- Q-Former ---
        "query_tokens": _normal(next(keys), (NQ, Dq)),
        "qf_emb_ln_g": ones(1, Dq), "qf_emb_ln_b": zeros(1, Dq),
        "s_wqkv": _wbf16(next(keys), (Lq, Dq, 3 * Dq)),       # fused Q/K/V
        "s_bqkv": zeros(Lq, 1, 3 * Dq),
        "s_wo": _wbf16(next(keys), (Lq, Dq, Dq)), "s_bo": zeros(Lq, 1, Dq),
        "s_lng": ones(Lq, 1, Dq), "s_lnb": zeros(Lq, 1, Dq),
        "c_wq": _wbf16(next(keys), (Lq, Dq, Dq)), "c_bq": zeros(Lq, 1, Dq),
        "c_wkv": _wbf16(next(keys), (Lq, D, 2 * Dq)),         # fused K/V
        "c_bkv": zeros(Lq, 1, 2 * Dq),
        "c_wo": _wbf16(next(keys), (Lq, Dq, Dq)), "c_bo": zeros(Lq, 1, Dq),
        "c_lng": ones(Lq, 1, Dq), "c_lnb": zeros(Lq, 1, Dq),
        "f_w1": _wbf16(next(keys), (Lq, Dq, Mq)), "f_b1": zeros(Lq, 1, Mq),
        "f_w2": _wbf16(next(keys), (Lq, Mq, Dq)), "f_b2": zeros(Lq, 1, Dq),
        "f_lng": ones(Lq, 1, Dq), "f_lnb": zeros(Lq, 1, Dq),
    }


# ----------------------------- main -------------------------------------------
if __name__ == "__main__":
    images = jax.random.normal(jax.random.PRNGKey(0),
                               (BATCH, IMG_C, IMG_H, IMG_W), jnp.float32)
    params = init_params(jax.random.PRNGKey(1))

    out = jax.jit(blip2_image_forward)(params, images)
    out = jax.block_until_ready(out)

    assert out.shape == (BATCH, QF_DIM), out.shape
    assert out.dtype == jnp.float32
    assert bool(jnp.all(jnp.isfinite(out)))
    print("KERNEL_OK")
</pallas_src>

<mosaic_0001>
module attributes {stable_mosaic.version = 11 : i64} {
  func.func @_blip2_kernel(%arg0: i32, %arg1: memref<1x16x192xf32, #tpu.memory_space<vmem>>, %arg2: memref<192x128xbf16, #tpu.memory_space<vmem>>, %arg3: memref<1x128xf32, #tpu.memory_space<vmem>>, %arg4: memref<1x128xf32, #tpu.memory_space<vmem>>, %arg5: memref<17x128xf32, #tpu.memory_space<vmem>>, %arg6: memref<2x1x128xf32, #tpu.memory_space<vmem>>, %arg7: memref<2x1x128xf32, #tpu.memory_space<vmem>>, %arg8: memref<2x128x384xbf16, #tpu.memory_space<vmem>>, %arg9: memref<2x1x384xf32, #tpu.memory_space<vmem>>, %arg10: memref<2x128x128xbf16, #tpu.memory_space<vmem>>, %arg11: memref<2x1x128xf32, #tpu.memory_space<vmem>>, %arg12: memref<2x1x128xf32, #tpu.memory_space<vmem>>, %arg13: memref<2x1x128xf32, #tpu.memory_space<vmem>>, %arg14: memref<2x128x512xbf16, #tpu.memory_space<vmem>>, %arg15: memref<2x1x512xf32, #tpu.memory_space<vmem>>, %arg16: memref<2x512x128xbf16, #tpu.memory_space<vmem>>, %arg17: memref<2x1x128xf32, #tpu.memory_space<vmem>>, %arg18: memref<1x128xf32, #tpu.memory_space<vmem>>, %arg19: memref<1x128xf32, #tpu.memory_space<vmem>>, %arg20: memref<8x128xf32, #tpu.memory_space<vmem>>, %arg21: memref<1x128xf32, #tpu.memory_space<vmem>>, %arg22: memref<1x128xf32, #tpu.memory_space<vmem>>, %arg23: memref<2x128x384xbf16, #tpu.memory_space<vmem>>, %arg24: memref<2x1x384xf32, #tpu.memory_space<vmem>>, %arg25: memref<2x128x128xbf16, #tpu.memory_space<vmem>>, %arg26: memref<2x1x128xf32, #tpu.memory_space<vmem>>, %arg27: memref<2x1x128xf32, #tpu.memory_space<vmem>>, %arg28: memref<2x1x128xf32, #tpu.memory_space<vmem>>, %arg29: memref<2x128x128xbf16, #tpu.memory_space<vmem>>, %arg30: memref<2x1x128xf32, #tpu.memory_space<vmem>>, %arg31: memref<2x128x256xbf16, #tpu.memory_space<vmem>>, %arg32: memref<2x1x256xf32, #tpu.memory_space<vmem>>, %arg33: memref<2x128x128xbf16, #tpu.memory_space<vmem>>, %arg34: memref<2x1x128xf32, #tpu.memory_space<vmem>>, %arg35: memref<2x1x128xf32, #tpu.memory_space<vmem>>, %arg36: memref<2x1x128xf32, #tpu.memory_space<vmem>>, %arg37: memref<2x128x512xbf16, #tpu.memory_space<vmem>>, %arg38: memref<2x1x512xf32, #tpu.memory_space<vmem>>, %arg39: memref<2x512x128xbf16, #tpu.memory_space<vmem>>, %arg40: memref<2x1x128xf32, #tpu.memory_space<vmem>>, %arg41: memref<2x1x128xf32, #tpu.memory_space<vmem>>, %arg42: memref<2x1x128xf32, #tpu.memory_space<vmem>>, %arg43: memref<1x1x128xf32, #tpu.memory_space<vmem>>, %arg44: memref<17x128xf32, #tpu.memory_space<vmem>>) attributes {dimension_semantics = [#tpu.dimension_semantics<parallel>], iteration_bounds = array<i64: 2>, scalar_prefetch = 0 : i64, scratch_operands = 1 : i64, tpu.core_type = #tpu.core_type<tc>, window_params = [{transform_indices = @transform_0, window_bounds = array<i64: 1, 16, 192>}, {pipeline_mode = #tpu.pipeline_mode<synchronous>, transform_indices = @transform_1, window_bounds = array<i64: 192, 128>}, {pipeline_mode = #tpu.pipeline_mode<synchronous>, transform_indices = @transform_2, window_bounds = array<i64: 1, 128>}, {pipeline_mode = #tpu.pipeline_mode<synchronous>, transform_indices = @transform_3, window_bounds = array<i64: 1, 128>}, {pipeline_mode = #tpu.pipeline_mode<synchronous>, transform_indices = @transform_4, window_bounds = array<i64: 17, 128>}, {pipeline_mode = #tpu.pipeline_mode<synchronous>, transform_indices = @transform_5, window_bounds = array<i64: 2, 1, 128>}, {pipeline_mode = #tpu.pipeline_mode<synchronous>, transform_indices = @transform_6, window_bounds = array<i64: 2, 1, 128>}, {pipeline_mode = #tpu.pipeline_mode<synchronous>, transform_indices = @transform_7, window_bounds = array<i64: 2, 128, 384>}, {pipeline_mode = #tpu.pipeline_mode<synchronous>, transform_indices = @transform_8, window_bounds = array<i64: 2, 1, 384>}, {pipeline_mode = #tpu.pipeline_mode<synchronous>, transform_indices = @transform_9, window_bounds = array<i64: 2, 128, 128>}, {pipeline_mode = #tpu.pipeline_mode<synchronous>, transform_indices = @transform_10, window_bounds = array<i64: 2, 1, 128>}, {pipeline_mode = #tpu.pipeline_mode<synchronous>, transform_indices = @transform_11, window_bounds = array<i64: 2, 1, 128>}, {pipeline_mode = #tpu.pipeline_mode<synchronous>, transform_indices = @transform_12, window_bounds = array<i64: 2, 1, 128>}, {pipeline_mode = #tpu.pipeline_mode<synchronous>, transform_indices = @transform_13, window_bounds = array<i64: 2, 128, 512>}, {pipeline_mode = #tpu.pipeline_mode<synchronous>, transform_indices = @transform_14, window_bounds = array<i64: 2, 1, 512>}, {pipeline_mode = #tpu.pipeline_mode<synchronous>, transform_indices = @transform_15, window_bounds = array<i64: 2, 512, 128>}, {pipeline_mode = #tpu.pipeline_mode<synchronous>, transform_indices = @transform_16, window_bounds = array<i64: 2, 1, 128>}, {pipeline_mode = #tpu.pipeline_mode<synchronous>, transform_indices = @transform_17, window_bounds = array<i64: 1, 128>}, {pipeline_mode = #tpu.pipeline_mode<synchronous>, transform_indices = @transform_18, window_bounds = array<i64: 1, 128>}, {pipeline_mode = #tpu.pipeline_mode<synchronous>, transform_indices = @transform_19, window_bounds = array<i64: 8, 128>}, {pipeline_mode = #tpu.pipeline_mode<synchronous>, transform_indices = @transform_20, window_bounds = array<i64: 1, 128>}, {pipeline_mode = #tpu.pipeline_mode<synchronous>, transform_indices = @transform_21, window_bounds = array<i64: 1, 128>}, {pipeline_mode = #tpu.pipeline_mode<synchronous>, transform_indices = @transform_22, window_bounds = array<i64: 2, 128, 384>}, {pipeline_mode = #tpu.pipeline_mode<synchronous>, transform_indices = @transform_23, window_bounds = array<i64: 2, 1, 384>}, {pipeline_mode = #tpu.pipeline_mode<synchronous>, transform_indices = @transform_24, window_bounds = array<i64: 2, 128, 128>}, {pipeline_mode = #tpu.pipeline_mode<synchronous>, transform_indices = @transform_25, window_bounds = array<i64: 2, 1, 128>}, {pipeline_mode = #tpu.pipeline_mode<synchronous>, transform_indices = @transform_26, window_bounds = array<i64: 2, 1, 128>}, {pipeline_mode = #tpu.pipeline_mode<synchronous>, transform_indices = @transform_27, window_bounds = array<i64: 2, 1, 128>}, {pipeline_mode = #tpu.pipeline_mode<synchronous>, transform_indices = @transform_28, window_bounds = array<i64: 2, 128, 128>}, {pipeline_mode = #tpu.pipeline_mode<synchronous>, transform_indices = @transform_29, window_bounds = array<i64: 2, 1, 128>}, {pipeline_mode = #tpu.pipeline_mode<synchronous>, transform_indices = @transform_30, window_bounds = array<i64: 2, 128, 256>}, {pipeline_mode = #tpu.pipeline_mode<synchronous>, transform_indices = @transform_31, window_bounds = array<i64: 2, 1, 256>}, {pipeline_mode = #tpu.pipeline_mode<synchronous>, transform_indices = @transform_32, window_bounds = array<i64: 2, 128, 128>}, {pipeline_mode = #tpu.pipeline_mode<synchronous>, transform_indices = @transform_33, window_bounds = array<i64: 2, 1, 128>}, {pipeline_mode = #tpu.pipeline_mode<synchronous>, transform_indices = @transform_34, window_bounds = array<i64: 2, 1, 128>}, {pipeline_mode = #tpu.pipeline_mode<synchronous>, transform_indices = @transform_35, window_bounds = array<i64: 2, 1, 128>}, {pipeline_mode = #tpu.pipeline_mode<synchronous>, transform_indices = @transform_36, window_bounds = array<i64: 2, 128, 512>}, {pipeline_mode = #tpu.pipeline_mode<synchronous>, transform_indices = @transform_37, window_bounds = array<i64: 2, 1, 512>}, {pipeline_mode = #tpu.pipeline_mode<synchronous>, transform_indices = @transform_38, window_bounds = array<i64: 2, 512, 128>}, {pipeline_mode = #tpu.pipeline_mode<synchronous>, transform_indices = @transform_39, window_bounds = array<i64: 2, 1, 128>}, {pipeline_mode = #tpu.pipeline_mode<synchronous>, transform_indices = @transform_40, window_bounds = array<i64: 2, 1, 128>}, {pipeline_mode = #tpu.pipeline_mode<synchronous>, transform_indices = @transform_41, window_bounds = array<i64: 2, 1, 128>}, {transform_indices = @transform_42, window_bounds = array<i64: 1, 1, 128>}]} {
    %c0 = arith.constant 0 : index
    %c0_0 = arith.constant 0 : index
    %c0_1 = arith.constant 0 : index
    %0 = vector.load %arg1[%c0, %c0_0, %c0_1] : memref<1x16x192xf32, #tpu.memory_space<vmem>>, vector<1x16x192xf32>
    %1 = vector.shape_cast %0 : vector<1x16x192xf32> to vector<16x192xf32>
    %c0_2 = arith.constant 0 : index
    %c0_3 = arith.constant 0 : index
    %2 = vector.load %arg2[%c0_2, %c0_3] : memref<192x128xbf16, #tpu.memory_space<vmem>>, vector<192x128xbf16>
    %c0_4 = arith.constant 0 : index
    %c0_5 = arith.constant 0 : index
    %3 = vector.load %arg3[%c0_4, %c0_5] : memref<1x128xf32, #tpu.memory_space<vmem>>, vector<1x128xf32>
    %4 = arith.truncf %1 : vector<16x192xf32> to vector<16x192xbf16>
    %cst = arith.constant dense<0.000000e+00> : vector<16x128xf32>
    %5 = tpu.matmul %4, %2, %cst {dimension_numbers = #tpu.dot_dimension_numbers<[1], [0], [0], [1], [0, 0, 1, 1], [], []>} : vector<16x192xbf16>, vector<192x128xbf16>, vector<16x128xf32> -> vector<16x128xf32>
    %6 = vector.broadcast %3 : vector<1x128xf32> to vector<16x128xf32>
    %7 = arith.addf %5, %6 : vector<16x128xf32>
    %c0_6 = arith.constant 0 : index
    %c0_7 = arith.constant 0 : index
    %8 = vector.load %arg4[%c0_6, %c0_7] : memref<1x128xf32, #tpu.memory_space<vmem>>, vector<1x128xf32>
    %c0_8 = arith.constant 0 : index
    %c0_9 = arith.constant 0 : index
    %9 = vector.load %arg5[%c0_8, %c0_9] : memref<17x128xf32, #tpu.memory_space<vmem>>, vector<1x128xf32>
    %10 = arith.addf %8, %9 : vector<1x128xf32>
    %c0_10 = arith.constant 0 : index
    %c0_11 = arith.constant 0 : index
    %11 = vector.load %arg44[%c0_10, %c0_11] : memref<17x128xf32, #tpu.memory_space<vmem>>, vector<1x128xf32>
    tpu.vector_store %arg44[%c0_10, %c0_11], %10 {strides = array<i32>} : memref<17x128xf32, #tpu.memory_space<vmem>>, vector<1x128xf32>,
    %c1 = arith.constant 1 : index
    %c0_12 = arith.constant 0 : index
    %12 = vector.load %arg5[%c1, %c0_12] : memref<17x128xf32, #tpu.memory_space<vmem>>, vector<16x128xf32>
    %13 = arith.addf %7, %12 : vector<16x128xf32>
    %c1_13 = arith.constant 1 : index
    %c0_14 = arith.constant 0 : index
    %14 = vector.load %arg44[%c1_13, %c0_14] : memref<17x128xf32, #tpu.memory_space<vmem>>, vector<16x128xf32>
    tpu.vector_store %arg44[%c1_13, %c0_14], %13 {strides = array<i32>} : memref<17x128xf32, #tpu.memory_space<vmem>>, vector<16x128xf32>,
    %c0_15 = arith.constant 0 : index
    %c0_16 = arith.constant 0 : index
    %15 = vector.load %arg44[%c0_15, %c0_16] : memref<17x128xf32, #tpu.memory_space<vmem>>, vector<17x128xf32>
    %c0_17 = arith.constant 0 : index
    %c0_18 = arith.constant 0 : index
    %c0_19 = arith.constant 0 : index
    %16 = vector.load %arg6[%c0_17, %c0_18, %c0_19] : memref<2x1x128xf32, #tpu.memory_space<vmem>>, vector<1x1x128xf32>
    %17 = vector.shape_cast %16 : vector<1x1x128xf32> to vector<1x128xf32>
    %c0_20 = arith.constant 0 : index
    %c0_21 = arith.constant 0 : index
    %c0_22 = arith.constant 0 : index
    %18 = vector.load %arg7[%c0_20, %c0_21, %c0_22] : memref<2x1x128xf32, #tpu.memory_space<vmem>>, vector<1x1x128xf32>
    %19 = vector.shape_cast %18 : vector<1x1x128xf32> to vector<1x128xf32>
    %cst_23 = arith.constant dense<0.000000e+00> : vector<17xf32>
    %20 = vector.multi_reduction <add>, %15, %cst_23 [1] : vector<17x128xf32> to vector<17xf32>
    %21 = vector.shape_cast %20 : vector<17xf32> to vector<17x1xf32>
    %cst_24 = arith.constant 1.280000e+02 : f32
    %22 = vector.broadcast %cst_24 : f32 to vector<17x1xf32>
    %23 = arith.divf %21, %22 : vector<17x1xf32>
    %24 = vector.broadcast %23 : vector<17x1xf32> to vector<17x128xf32>
    %25 = arith.subf %15, %24 : vector<17x128xf32>
    %26 = vector.broadcast %23 : vector<17x1xf32> to vector<17x128xf32>
    %27 = arith.subf %15, %26 : vector<17x128xf32>
    %28 = arith.mulf %25, %27 : vector<17x128xf32>
    %cst_25 = arith.constant dense<0.000000e+00> : vector<17xf32>
    %29 = vector.multi_reduction <add>, %28, %cst_25 [1] : vector<17x128xf32> to vector<17xf32>
    %30 = vector.shape_cast %29 : vector<17xf32> to vector<17x1xf32>
    %cst_26 = arith.constant 1.280000e+02 : f32
    %31 = vector.broadcast %cst_26 : f32 to vector<17x1xf32>
    %32 = arith.divf %30, %31 : vector<17x1xf32>
    %33 = vector.broadcast %23 : vector<17x1xf32> to vector<17x128xf32>
    %34 = arith.subf %15, %33 : vector<17x128xf32>
    %cst_27 = arith.constant 9.99999997E-7 : f32
    %35 = vector.broadcast %cst_27 : f32 to vector<17x1xf32>
    %36 = arith.addf %32, %35 : vector<17x1xf32>
    %37 = math.rsqrt %36 : vector<17x1xf32>
    %38 = vector.broadcast %37 : vector<17x1xf32> to vector<17x128xf32>
    %39 = arith.mulf %34, %38 : vector<17x128xf32>
    %40 = vector.broadcast %17 : vector<1x128xf32> to vector<17x128xf32>
    %41 = arith.mulf %39, %40 : vector<17x128xf32>
    %42 = vector.broadcast %19 : vector<1x128xf32> to vector<17x128xf32>
    %43 = arith.addf %41, %42 : vector<17x128xf32>
    %c0_28 = arith.constant 0 : index
    %c0_29 = arith.constant 0 : index
    %c0_30 = arith.constant 0 : index
    %44 = vector.load %arg8[%c0_28, %c0_29, %c0_30] : memref<2x128x384xbf16, #tpu.memory_space<vmem>>, vector<1x128x384xbf16>
    %45 = vector.shape_cast %44 : vector<1x128x384xbf16> to vector<128x384xbf16>
    %c0_31 = arith.constant 0 : index
    %c0_32 = arith.constant 0 : index
    %c0_33 = arith.constant 0 : index
    %46 = vector.load %arg9[%c0_31, %c0_32, %c0_33] : memref<2x1x384xf32, #tpu.memory_space<vmem>>, vector<1x1x384xf32>
    %47 = vector.shape_cast %46 : vector<1x1x384xf32> to vector<1x384xf32>
    %48 = arith.truncf %43 : vector<17x128xf32> to vector<17x128xbf16>
    %cst_34 = arith.constant dense<0.000000e+00> : vector<17x384xf32>
    %49 = tpu.matmul %48, %45, %cst_34 {dimension_numbers = #tpu.dot_dimension_numbers<[1], [0], [0], [1], [0, 0, 1, 1], [], []>} : vector<17x128xbf16>, vector<128x384xbf16>, vector<17x384xf32> -> vector<17x384xf32>
    %50 = vector.broadcast %47 : vector<1x384xf32> to vector<17x384xf32>
    %51 = arith.addf %49, %50 : vector<17x384xf32>
    %52 = vector.extract_strided_slice %51 {offsets = [0, 0], sizes = [17, 128], strides = [1, 1]} : vector<17x384xf32> to vector<17x128xf32>
    %53 = vector.extract_strided_slice %51 {offsets = [0, 128], sizes = [17, 128], strides = [1, 1]} : vector<17x384xf32> to vector<17x128xf32>
    %54 = vector.extract_strided_slice %51 {offsets = [0, 256], sizes = [17, 128], strides = [1, 1]} : vector<17x384xf32> to vector<17x128xf32>
    %c0_35 = arith.constant 0 : index
    %c0_36 = arith.constant 0 : index
    %c0_37 = arith.constant 0 : index
    %55 = vector.load %arg10[%c0_35, %c0_36, %c0_37] : memref<2x128x128xbf16, #tpu.memory_space<vmem>>, vector<1x128x128xbf16>
    %56 = vector.shape_cast %55 : vector<1x128x128xbf16> to vector<128x128xbf16>
    %c0_38 = arith.constant 0 : index
    %c0_39 = arith.constant 0 : index
    %c0_40 = arith.constant 0 : index
    %57 = vector.load %arg11[%c0_38, %c0_39, %c0_40] : memref<2x1x128xf32, #tpu.memory_space<vmem>>, vector<1x1x128xf32>
    %58 = vector.shape_cast %57 : vector<1x1x128xf32> to vector<1x128xf32>
    %59 = vector.extract_strided_slice %52 {offsets = [0, 0], sizes = [17, 64], strides = [1, 1]} : vector<17x128xf32> to vector<17x64xf32>
    %60 = arith.truncf %59 : vector<17x64xf32> to vector<17x64xbf16>
    %61 = vector.extract_strided_slice %53 {offsets = [0, 0], sizes = [17, 64], strides = [1, 1]} : vector<17x128xf32> to vector<17x64xf32>
    %62 = arith.truncf %61 : vector<17x64xf32> to vector<17x64xbf16>
    %63 = vector.extract_strided_slice %54 {offsets = [0, 0], sizes = [17, 64], strides = [1, 1]} : vector<17x128xf32> to vector<17x64xf32>
    %64 = arith.truncf %63 : vector<17x64xf32> to vector<17x64xbf16>
    %cst_41 = arith.constant dense<0.000000e+00> : vector<17x17xf32>
    %65 = tpu.matmul %60, %62, %cst_41 {dimension_numbers = #tpu.dot_dimension_numbers<[1], [1], [0], [0], [0, 0, 1, 0], [], []>} : vector<17x64xbf16>, vector<17x64xbf16>, vector<17x17xf32> -> vector<17x17xf32>
    %cst_42 = arith.constant 1.250000e-01 : f32
    %66 = vector.broadcast %cst_42 : f32 to vector<17x17xf32>
    %67 = arith.mulf %65, %66 : vector<17x17xf32>
    %cst_43 = arith.constant dense<0xFF800000> : vector<17xf32>
    %68 = vector.multi_reduction <maximumf>, %67, %cst_43 [1] : vector<17x17xf32> to vector<17xf32>
    %69 = vector.shape_cast %68 : vector<17xf32> to vector<17x1xf32>
    %70 = vector.broadcast %69 : vector<17x1xf32> to vector<17x17xf32>
    %71 = arith.subf %67, %70 : vector<17x17xf32>
    %72 = math.exp %71 : vector<17x17xf32>
    %cst_44 = arith.constant dense<0.000000e+00> : vector<17xf32>
    %73 = vector.multi_reduction <add>, %72, %cst_44 [1] : vector<17x17xf32> to vector<17xf32>
    %74 = vector.shape_cast %73 : vector<17xf32> to vector<17x1xf32>
    %75 = tpu.reciprocal %74 {approx = true} : vector<17x1xf32> -> vector<17x1xf32>
    %76 = vector.broadcast %75 : vector<17x1xf32> to vector<17x17xf32>
    %77 = arith.mulf %72, %76 : vector<17x17xf32>
    %78 = arith.truncf %77 : vector<17x17xf32> to vector<17x17xbf16>
    %cst_45 = arith.constant dense<0.000000e+00> : vector<17x64xf32>
    %79 = tpu.matmul %78, %64, %cst_45 {dimension_numbers = #tpu.dot_dimension_numbers<[1], [0], [0], [1], [0, 0, 1, 1], [], []>} : vector<17x17xbf16>, vector<17x64xbf16>, vector<17x64xf32> -> vector<17x64xf32>
    %80 = arith.truncf %79 : vector<17x64xf32> to vector<17x64xbf16>
    %81 = vector.extract_strided_slice %56 {offsets = [0, 0], sizes = [64, 128], strides = [1, 1]} : vector<128x128xbf16> to vector<64x128xbf16>
    %cst_46 = arith.constant dense<0.000000e+00> : vector<17x128xf32>
    %82 = tpu.matmul %80, %81, %cst_46 {dimension_numbers = #tpu.dot_dimension_numbers<[1], [0], [0], [1], [0, 0, 1, 1], [], []>} : vector<17x64xbf16>, vector<64x128xbf16>, vector<17x128xf32> -> vector<17x128xf32>
    %83 = vector.extract_strided_slice %52 {offsets = [0, 64], sizes = [17, 64], strides = [1, 1]} : vector<17x128xf32> to vector<17x64xf32>
    %84 = arith.truncf %83 : vector<17x64xf32> to vector<17x64xbf16>
    %85 = vector.extract_strided_slice %53 {offsets = [0, 64], sizes = [17, 64], strides = [1, 1]} : vector<17x128xf32> to vector<17x64xf32>
    %86 = arith.truncf %85 : vector<17x64xf32> to vector<17x64xbf16>
    %87 = vector.extract_strided_slice %54 {offsets = [0, 64], sizes = [17, 64], strides = [1, 1]} : vector<17x128xf32> to vector<17x64xf32>
    %88 = arith.truncf %87 : vector<17x64xf32> to vector<17x64xbf16>
    %cst_47 = arith.constant dense<0.000000e+00> : vector<17x17xf32>
    %89 = tpu.matmul %84, %86, %cst_47 {dimension_numbers = #tpu.dot_dimension_numbers<[1], [1], [0], [0], [0, 0, 1, 0], [], []>} : vector<17x64xbf16>, vector<17x64xbf16>, vector<17x17xf32> -> vector<17x17xf32>
    %cst_48 = arith.constant 1.250000e-01 : f32
    %90 = vector.broadcast %cst_48 : f32 to vector<17x17xf32>
    %91 = arith.mulf %89, %90 : vector<17x17xf32>
    %cst_49 = arith.constant dense<0xFF800000> : vector<17xf32>
    %92 = vector.multi_reduction <maximumf>, %91, %cst_49 [1] : vector<17x17xf32> to vector<17xf32>
    %93 = vector.shape_cast %92 : vector<17xf32> to vector<17x1xf32>
    %94 = vector.broadcast %93 : vector<17x1xf32> to vector<17x17xf32>
    %95 = arith.subf %91, %94 : vector<17x17xf32>
    %96 = math.exp %95 : vector<17x17xf32>
    %cst_50 = arith.constant dense<0.000000e+00> : vector<17xf32>
    %97 = vector.multi_reduction <add>, %96, %cst_50 [1] : vector<17x17xf32> to vector<17xf32>
    %98 = vector.shape_cast %97 : vector<17xf32> to vector<17x1xf32>
    %99 = tpu.reciprocal %98 {approx = true} : vector<17x1xf32> -> vector<17x1xf32>
    %100 = vector.broadcast %99 : vector<17x1xf32> to vector<17x17xf32>
    %101 = arith.mulf %96, %100 : vector<17x17xf32>
    %102 = arith.truncf %101 : vector<17x17xf32> to vector<17x17xbf16>
    %cst_51 = arith.constant dense<0.000000e+00> : vector<17x64xf32>
    %103 = tpu.matmul %102, %88, %cst_51 {dimension_numbers = #tpu.dot_dimension_numbers<[1], [0], [0], [1], [0, 0, 1, 1], [], []>} : vector<17x17xbf16>, vector<17x64xbf16>, vector<17x64xf32> -> vector<17x64xf32>
    %104 = arith.truncf %103 : vector<17x64xf32> to vector<17x64xbf16>
    %105 = vector.extract_strided_slice %56 {offsets = [64, 0], sizes = [64, 128], strides = [1, 1]} : vector<128x128xbf16> to vector<64x128xbf16>
    %cst_52 = arith.constant dense<0.000000e+00> : vector<17x128xf32>
    %106 = tpu.matmul %104, %105, %cst_52 {dimension_numbers = #tpu.dot_dimension_numbers<[1], [0], [0], [1], [0, 0, 1, 1], [], []>} : vector<17x64xbf16>, vector<64x128xbf16>, vector<17x128xf32> -> vector<17x128xf32>
    %107 = arith.addf %82, %106 : vector<17x128xf32>
    %108 = vector.broadcast %58 : vector<1x128xf32> to vector<17x128xf32>
    %109 = arith.addf %107, %108 : vector<17x128xf32>
    %110 = arith.addf %15, %109 : vector<17x128xf32>
    %c0_53 = arith.constant 0 : index
    %c0_54 = arith.constant 0 : index
    %c0_55 = arith.constant 0 : index
    %111 = vector.load %arg12[%c0_53, %c0_54, %c0_55] : memref<2x1x128xf32, #tpu.memory_space<vmem>>, vector<1x1x128xf32>
    %112 = vector.shape_cast %111 : vector<1x1x128xf32> to vector<1x128xf32>
    %c0_56 = arith.constant 0 : index
    %c0_57 = arith.constant 0 : index
    %c0_58 = arith.constant 0 : index
    %113 = vector.load %arg13[%c0_56, %c0_57, %c0_58] : memref<2x1x128xf32, #tpu.memory_space<vmem>>, vector<1x1x128xf32>
    %114 = vector.shape_cast %113 : vector<1x1x128xf32> to vector<1x128xf32>
    %cst_59 = arith.constant dense<0.000000e+00> : vector<17xf32>
    %115 = vector.multi_reduction <add>, %110, %cst_59 [1] : vector<17x128xf32> to vector<17xf32>
    %116 = vector.shape_cast %115 : vector<17xf32> to vector<17x1xf32>
    %cst_60 = arith.constant 1.280000e+02 : f32
    %117 = vector.broadcast %cst_60 : f32 to vector<17x1xf32>
    %118 = arith.divf %116, %117 : vector<17x1xf32>
    %119 = vector.broadcast %118 : vector<17x1xf32> to vector<17x128xf32>
    %120 = arith.subf %110, %119 : vector<17x128xf32>
    %121 = vector.broadcast %118 : vector<17x1xf32> to vector<17x128xf32>
    %122 = arith.subf %110, %121 : vector<17x128xf32>
    %123 = arith.mulf %120, %122 : vector<17x128xf32>
    %cst_61 = arith.constant dense<0.000000e+00> : vector<17xf32>
    %124 = vector.multi_reduction <add>, %123, %cst_61 [1] : vector<17x128xf32> to vector<17xf32>
    %125 = vector.shape_cast %124 : vector<17xf32> to vector<17x1xf32>
    %cst_62 = arith.constant 1.280000e+02 : f32
    %126 = vector.broadcast %cst_62 : f32 to vector<17x1xf32>
    %127 = arith.divf %125, %126 : vector<17x1xf32>
    %128 = vector.broadcast %118 : vector<17x1xf32> to vector<17x128xf32>
    %129 = arith.subf %110, %128 : vector<17x128xf32>
    %cst_63 = arith.constant 9.99999997E-7 : f32
    %130 = vector.broadcast %cst_63 : f32 to vector<17x1xf32>
    %131 = arith.addf %127, %130 : vector<17x1xf32>
    %132 = math.rsqrt %131 : vector<17x1xf32>
    %133 = vector.broadcast %132 : vector<17x1xf32> to vector<17x128xf32>
    %134 = arith.mulf %129, %133 : vector<17x128xf32>
    %135 = vector.broadcast %112 : vector<1x128xf32> to vector<17x128xf32>
    %136 = arith.mulf %134, %135 : vector<17x128xf32>
    %137 = vector.broadcast %114 : vector<1x128xf32> to vector<17x128xf32>
    %138 = arith.addf %136, %137 : vector<17x128xf32>
    %c0_64 = arith.constant 0 : index
    %c0_65 = arith.constant 0 : index
    %c0_66 = arith.constant 0 : index
    %139 = vector.load %arg14[%c0_64, %c0_65, %c0_66] : memref<2x128x512xbf16, #tpu.memory_space<vmem>>, vector<1x128x512xbf16>
    %140 = vector.shape_cast %139 : vector<1x128x512xbf16> to vector<128x512xbf16>
    %c0_67 = arith.constant 0 : index
    %c0_68 = arith.constant 0 : index
    %c0_69 = arith.constant 0 : index
    %141 = vector.load %arg15[%c0_67, %c0_68, %c0_69] : memref<2x1x512xf32, #tpu.memory_space<vmem>>, vector<1x1x512xf32>
    %142 = vector.shape_cast %141 : vector<1x1x512xf32> to vector<1x512xf32>
    %143 = arith.truncf %138 : vector<17x128xf32> to vector<17x128xbf16>
    %cst_70 = arith.constant dense<0.000000e+00> : vector<17x512xf32>
    %144 = tpu.matmul %143, %140, %cst_70 {dimension_numbers = #tpu.dot_dimension_numbers<[1], [0], [0], [1], [0, 0, 1, 1], [], []>} : vector<17x128xbf16>, vector<128x512xbf16>, vector<17x512xf32> -> vector<17x512xf32>
    %145 = vector.broadcast %142 : vector<1x512xf32> to vector<17x512xf32>
    %146 = arith.addf %144, %145 : vector<17x512xf32>
    %cst_71 = arith.constant 5.000000e-01 : f32
    %147 = vector.broadcast %cst_71 : f32 to vector<17x512xf32>
    %148 = arith.mulf %147, %146 : vector<17x512xf32>
    %cst_72 = arith.constant 4.471500e-02 : f32
    %149 = vector.broadcast %cst_72 : f32 to vector<17x512xf32>
    %150 = arith.mulf %149, %146 : vector<17x512xf32>
    %151 = arith.mulf %150, %146 : vector<17x512xf32>
    %152 = arith.mulf %151, %146 : vector<17x512xf32>
    %153 = arith.addf %146, %152 : vector<17x512xf32>
    %cst_73 = arith.constant 0.797884583 : f32
    %154 = vector.broadcast %cst_73 : f32 to vector<17x512xf32>
    %155 = arith.mulf %154, %153 : vector<17x512xf32>
    %156 = math.tanh %155 : vector<17x512xf32>
    %cst_74 = arith.constant 1.000000e+00 : f32
    %157 = vector.broadcast %cst_74 : f32 to vector<17x512xf32>
    %158 = arith.addf %157, %156 : vector<17x512xf32>
    %159 = arith.mulf %148, %158 : vector<17x512xf32>
    %c0_75 = arith.constant 0 : index
    %c0_76 = arith.constant 0 : index
    %c0_77 = arith.constant 0 : index
    %160 = vector.load %arg16[%c0_75, %c0_76, %c0_77] : memref<2x512x128xbf16, #tpu.memory_space<vmem>>, vector<1x512x128xbf16>
    %161 = vector.shape_cast %160 : vector<1x512x128xbf16> to vector<512x128xbf16>
    %c0_78 = arith.constant 0 : index
    %c0_79 = arith.constant 0 : index
    %c0_80 = arith.constant 0 : index
    %162 = vector.load %arg17[%c0_78, %c0_79, %c0_80] : memref<2x1x128xf32, #tpu.memory_space<vmem>>, vector<1x1x128xf32>
    %163 = vector.shape_cast %162 : vector<1x1x128xf32> to vector<1x128xf32>
    %164 = arith.truncf %159 : vector<17x512xf32> to vector<17x512xbf16>
    %cst_81 = arith.constant dense<0.000000e+00> : vector<17x128xf32>
    %165 = tpu.matmul %164, %161, %cst_81 {dimension_numbers = #tpu.dot_dimension_numbers<[1], [0], [0], [1], [0, 0, 1, 1], [], []>} : vector<17x512xbf16>, vector<512x128xbf16>, vector<17x128xf32> -> vector<17x128xf32>
    %166 = vector.broadcast %163 : vector<1x128xf32> to vector<17x128xf32>
    %167 = arith.addf %165, %166 : vector<17x128xf32>
    %168 = arith.addf %110, %167 : vector<17x128xf32>
    %c1_82 = arith.constant 1 : index
    %c0_83 = arith.constant 0 : index
    %c0_84 = arith.constant 0 : index
    %169 = vector.load %arg6[%c1_82, %c0_83, %c0_84] : memref<2x1x128xf32, #tpu.memory_space<vmem>>, vector<1x1x128xf32>
    %170 = vector.shape_cast %169 : vector<1x1x128xf32> to vector<1x128xf32>
    %c1_85 = arith.constant 1 : index
    %c0_86 = arith.constant 0 : index
    %c0_87 = arith.constant 0 : index
    %171 = vector.load %arg7[%c1_85, %c0_86, %c0_87] : memref<2x1x128xf32, #tpu.memory_space<vmem>>, vector<1x1x128xf32>
    %172 = vector.shape_cast %171 : vector<1x1x128xf32> to vector<1x128xf32>
    %cst_88 = arith.constant dense<0.000000e+00> : vector<17xf32>
    %173 = vector.multi_reduction <add>, %168, %cst_88 [1] : vector<17x128xf32> to vector<17xf32>
    %174 = vector.shape_cast %173 : vector<17xf32> to vector<17x1xf32>
    %cst_89 = arith.constant 1.280000e+02 : f32
    %175 = vector.broadcast %cst_89 : f32 to vector<17x1xf32>
    %176 = arith.divf %174, %175 : vector<17x1xf32>
    %177 = vector.broadcast %176 : vector<17x1xf32> to vector<17x128xf32>
    %178 = arith.subf %168, %177 : vector<17x128xf32>
    %179 = vector.broadcast %176 : vector<17x1xf32> to vector<17x128xf32>
    %180 = arith.subf %168, %179 : vector<17x128xf32>
    %181 = arith.mulf %178, %180 : vector<17x128xf32>
    %cst_90 = arith.constant dense<0.000000e+00> : vector<17xf32>
    %182 = vector.multi_reduction <add>, %181, %cst_90 [1] : vector<17x128xf32> to vector<17xf32>
    %183 = vector.shape_cast %182 : vector<17xf32> to vector<17x1xf32>
    %cst_91 = arith.constant 1.280000e+02 : f32
    %184 = vector.broadcast %cst_91 : f32 to vector<17x1xf32>
    %185 = arith.divf %183, %184 : vector<17x1xf32>
    %186 = vector.broadcast %176 : vector<17x1xf32> to vector<17x128xf32>
    %187 = arith.subf %168, %186 : vector<17x128xf32>
    %cst_92 = arith.constant 9.99999997E-7 : f32
    %188 = vector.broadcast %cst_92 : f32 to vector<17x1xf32>
    %189 = arith.addf %185, %188 : vector<17x1xf32>
    %190 = math.rsqrt %189 : vector<17x1xf32>
    %191 = vector.broadcast %190 : vector<17x1xf32> to vector<17x128xf32>
    %192 = arith.mulf %187, %191 : vector<17x128xf32>
    %193 = vector.broadcast %170 : vector<1x128xf32> to vector<17x128xf32>
    %194 = arith.mulf %192, %193 : vector<17x128xf32>
    %195 = vector.broadcast %172 : vector<1x128xf32> to vector<17x128xf32>
    %196 = arith.addf %194, %195 : vector<17x128xf32>
    %c1_93 = arith.constant 1 : index
    %c0_94 = arith.constant 0 : index
    %c0_95 = arith.constant 0 : index
    %197 = vector.load %arg8[%c1_93, %c0_94, %c0_95] : memref<2x128x384xbf16, #tpu.memory_space<vmem>>, vector<1x128x384xbf16>
    %198 = vector.shape_cast %197 : vector<1x128x384xbf16> to vector<128x384xbf16>
    %c1_96 = arith.constant 1 : index
    %c0_97 = arith.constant 0 : index
    %c0_98 = arith.constant 0 : index
    %199 = vector.load %arg9[%c1_96, %c0_97, %c0_98] : memref<2x1x384xf32, #tpu.memory_space<vmem>>, vector<1x1x384xf32>
    %200 = vector.shape_cast %199 : vector<1x1x384xf32> to vector<1x384xf32>
    %201 = arith.truncf %196 : vector<17x128xf32> to vector<17x128xbf16>
    %cst_99 = arith.constant dense<0.000000e+00> : vector<17x384xf32>
    %202 = tpu.matmul %201, %198, %cst_99 {dimension_numbers = #tpu.dot_dimension_numbers<[1], [0], [0], [1], [0, 0, 1, 1], [], []>} : vector<17x128xbf16>, vector<128x384xbf16>, vector<17x384xf32> -> vector<17x384xf32>
    %203 = vector.broadcast %200 : vector<1x384xf32> to vector<17x384xf32>
    %204 = arith.addf %202, %203 : vector<17x384xf32>
    %205 = vector.extract_strided_slice %204 {offsets = [0, 0], sizes = [17, 128], strides = [1, 1]} : vector<17x384xf32> to vector<17x128xf32>
    %206 = vector.extract_strided_slice %204 {offsets = [0, 128], sizes = [17, 128], strides = [1, 1]} : vector<17x384xf32> to vector<17x128xf32>
    %207 = vector.extract_strided_slice %204 {offsets = [0, 256], sizes = [17, 128], strides = [1, 1]} : vector<17x384xf32> to vector<17x128xf32>
    %c1_100 = arith.constant 1 : index
    %c0_101 = arith.constant 0 : index
    %c0_102 = arith.constant 0 : index
    %208 = vector.load %arg10[%c1_100, %c0_101, %c0_102] : memref<2x128x128xbf16, #tpu.memory_space<vmem>>, vector<1x128x128xbf16>
    %209 = vector.shape_cast %208 : vector<1x128x128xbf16> to vector<128x128xbf16>
    %c1_103 = arith.constant 1 : index
    %c0_104 = arith.constant 0 : index
    %c0_105 = arith.constant 0 : index
    %210 = vector.load %arg11[%c1_103, %c0_104, %c0_105] : memref<2x1x128xf32, #tpu.memory_space<vmem>>, vector<1x1x128xf32>
    %211 = vector.shape_cast %210 : vector<1x1x128xf32> to vector<1x128xf32>
    %212 = vector.extract_strided_slice %205 {offsets = [0, 0], sizes = [17, 64], strides = [1, 1]} : vector<17x128xf32> to vector<17x64xf32>
    %213 = arith.truncf %212 : vector<17x64xf32> to vector<17x64xbf16>
    %214 = vector.extract_strided_slice %206 {offsets = [0, 0], sizes = [17, 64], strides = [1, 1]} : vector<17x128xf32> to vector<17x64xf32>
    %215 = arith.truncf %214 : vector<17x64xf32> to vector<17x64xbf16>
    %216 = vector.extract_strided_slice %207 {offsets = [0, 0], sizes = [17, 64], strides = [1, 1]} : vector<17x128xf32> to vector<17x64xf32>
    %217 = arith.truncf %216 : vector<17x64xf32> to vector<17x64xbf16>
    %cst_106 = arith.constant dense<0.000000e+00> : vector<17x17xf32>
    %218 = tpu.matmul %213, %215, %cst_106 {dimension_numbers = #tpu.dot_dimension_numbers<[1], [1], [0], [0], [0, 0, 1, 0], [], []>} : vector<17x64xbf16>, vector<17x64xbf16>, vector<17x17xf32> -> vector<17x17xf32>
    %cst_107 = arith.constant 1.250000e-01 : f32
    %219 = vector.broadcast %cst_107 : f32 to vector<17x17xf32>
    %220 = arith.mulf %218, %219 : vector<17x17xf32>
    %cst_108 = arith.constant dense<0xFF800000> : vector<17xf32>
    %221 = vector.multi_reduction <maximumf>, %220, %cst_108 [1] : vector<17x17xf32> to vector<17xf32>
    %222 = vector.shape_cast %221 : vector<17xf32> to vector<17x1xf32>
    %223 = vector.broadcast %222 : vector<17x1xf32> to vector<17x17xf32>
    %224 = arith.subf %220, %223 : vector<17x17xf32>
    %225 = math.exp %224 : vector<17x17xf32>
    %cst_109 = arith.constant dense<0.000000e+00> : vector<17xf32>
    %226 = vector.multi_reduction <add>, %225, %cst_109 [1] : vector<17x17xf32> to vector<17xf32>
    %227 = vector.shape_cast %226 : vector<17xf32> to vector<17x1xf32>
    %228 = tpu.reciprocal %227 {approx = true} : vector<17x1xf32> -> vector<17x1xf32>
    %229 = vector.broadcast %228 : vector<17x1xf32> to vector<17x17xf32>
    %230 = arith.mulf %225, %229 : vector<17x17xf32>
    %231 = arith.truncf %230 : vector<17x17xf32> to vector<17x17xbf16>
    %cst_110 = arith.constant dense<0.000000e+00> : vector<17x64xf32>
    %232 = tpu.matmul %231, %217, %cst_110 {dimension_numbers = #tpu.dot_dimension_numbers<[1], [0], [0], [1], [0, 0, 1, 1], [], []>} : vector<17x17xbf16>, vector<17x64xbf16>, vector<17x64xf32> -> vector<17x64xf32>
    %233 = arith.truncf %232 : vector<17x64xf32> to vector<17x64xbf16>
    %234 = vector.extract_strided_slice %209 {offsets = [0, 0], sizes = [64, 128], strides = [1, 1]} : vector<128x128xbf16> to vector<64x128xbf16>
    %cst_111 = arith.constant dense<0.000000e+00> : vector<17x128xf32>
    %235 = tpu.matmul %233, %234, %cst_111 {dimension_numbers = #tpu.dot_dimension_numbers<[1], [0], [0], [1], [0, 0, 1, 1], [], []>} : vector<17x64xbf16>, vector<64x128xbf16>, vector<17x128xf32> -> vector<17x128xf32>
    %236 = vector.extract_strided_slice %205 {offsets = [0, 64], sizes = [17, 64], strides = [1, 1]} : vector<17x128xf32> to vector<17x64xf32>
    %237 = arith.truncf %236 : vector<17x64xf32> to vector<17x64xbf16>
    %238 = vector.extract_strided_slice %206 {offsets = [0, 64], sizes = [17, 64], strides = [1, 1]} : vector<17x128xf32> to vector<17x64xf32>
    %239 = arith.truncf %238 : vector<17x64xf32> to vector<17x64xbf16>
    %240 = vector.extract_strided_slice %207 {offsets = [0, 64], sizes = [17, 64], strides = [1, 1]} : vector<17x128xf32> to vector<17x64xf32>
    %241 = arith.truncf %240 : vector<17x64xf32> to vector<17x64xbf16>
    %cst_112 = arith.constant dense<0.000000e+00> : vector<17x17xf32>
    %242 = tpu.matmul %237, %239, %cst_112 {dimension_numbers = #tpu.dot_dimension_numbers<[1], [1], [0], [0], [0, 0, 1, 0], [], []>} : vector<17x64xbf16>, vector<17x64xbf16>, vector<17x17xf32> -> vector<17x17xf32>
    %cst_113 = arith.constant 1.250000e-01 : f32
    %243 = vector.broadcast %cst_113 : f32 to vector<17x17xf32>
    %244 = arith.mulf %242, %243 : vector<17x17xf32>
    %cst_114 = arith.constant dense<0xFF800000> : vector<17xf32>
    %245 = vector.multi_reduction <maximumf>, %244, %cst_114 [1] : vector<17x17xf32> to vector<17xf32>
    %246 = vector.shape_cast %245 : vector<17xf32> to vector<17x1xf32>
    %247 = vector.broadcast %246 : vector<17x1xf32> to vector<17x17xf32>
    %248 = arith.subf %244, %247 : vector<17x17xf32>
    %249 = math.exp %248 : vector<17x17xf32>
    %cst_115 = arith.constant dense<0.000000e+00> : vector<17xf32>
    %250 = vector.multi_reduction <add>, %249, %cst_115 [1] : vector<17x17xf32> to vector<17xf32>
    %251 = vector.shape_cast %250 : vector<17xf32> to vector<17x1xf32>
    %252 = tpu.reciprocal %251 {approx = true} : vector<17x1xf32> -> vector<17x1xf32>
    %253 = vector.broadcast %252 : vector<17x1xf32> to vector<17x17xf32>
    %254 = arith.mulf %249, %253 : vector<17x17xf32>
    %255 = arith.truncf %254 : vector<17x17xf32> to vector<17x17xbf16>
    %cst_116 = arith.constant dense<0.000000e+00> : vector<17x64xf32>
    %256 = tpu.matmul %255, %241, %cst_116 {dimension_numbers = #tpu.dot_dimension_numbers<[1], [0], [0], [1], [0, 0, 1, 1], [], []>} : vector<17x17xbf16>, vector<17x64xbf16>, vector<17x64xf32> -> vector<17x64xf32>
    %257 = arith.truncf %256 : vector<17x64xf32> to vector<17x64xbf16>
    %258 = vector.extract_strided_slice %209 {offsets = [64, 0], sizes = [64, 128], strides = [1, 1]} : vector<128x128xbf16> to vector<64x128xbf16>
    %cst_117 = arith.constant dense<0.000000e+00> : vector<17x128xf32>
    %259 = tpu.matmul %257, %258, %cst_117 {dimension_numbers = #tpu.dot_dimension_numbers<[1], [0], [0], [1], [0, 0, 1, 1], [], []>} : vector<17x64xbf16>, vector<64x128xbf16>, vector<17x128xf32> -> vector<17x128xf32>
    %260 = arith.addf %235, %259 : vector<17x128xf32>
    %261 = vector.broadcast %211 : vector<1x128xf32> to vector<17x128xf32>
    %262 = arith.addf %260, %261 : vector<17x128xf32>
    %263 = arith.addf %168, %262 : vector<17x128xf32>
    %c1_118 = arith.constant 1 : index
    %c0_119 = arith.constant 0 : index
    %c0_120 = arith.constant 0 : index
    %264 = vector.load %arg12[%c1_118, %c0_119, %c0_120] : memref<2x1x128xf32, #tpu.memory_space<vmem>>, vector<1x1x128xf32>
    %265 = vector.shape_cast %264 : vector<1x1x128xf32> to vector<1x128xf32>
    %c1_121 = arith.constant 1 : index
    %c0_122 = arith.constant 0 : index
    %c0_123 = arith.constant 0 : index
    %266 = vector.load %arg13[%c1_121, %c0_122, %c0_123] : memref<2x1x128xf32, #tpu.memory_space<vmem>>, vector<1x1x128xf32>
    %267 = vector.shape_cast %266 : vector<1x1x128xf32> to vector<1x128xf32>
    %cst_124 = arith.constant dense<0.000000e+00> : vector<17xf32>
    %268 = vector.multi_reduction <add>, %263, %cst_124 [1] : vector<17x128xf32> to vector<17xf32>
    %269 = vector.shape_cast %268 : vector<17xf32> to vector<17x1xf32>
    %cst_125 = arith.constant 1.280000e+02 : f32
    %270 = vector.broadcast %cst_125 : f32 to vector<17x1xf32>
    %271 = arith.divf %269, %270 : vector<17x1xf32>
    %272 = vector.broadcast %271 : vector<17x1xf32> to vector<17x128xf32>
    %273 = arith.subf %263, %272 : vector<17x128xf32>
    %274 = vector.broadcast %271 : vector<17x1xf32> to vector<17x128xf32>
    %275 = arith.subf %263, %274 : vector<17x128xf32>
    %276 = arith.mulf %273, %275 : vector<17x128xf32>
    %cst_126 = arith.constant dense<0.000000e+00> : vector<17xf32>
    %277 = vector.multi_reduction <add>, %276, %cst_126 [1] : vector<17x128xf32> to vector<17xf32>
    %278 = vector.shape_cast %277 : vector<17xf32> to vector<17x1xf32>
    %cst_127 = arith.constant 1.280000e+02 : f32
    %279 = vector.broadcast %cst_127 : f32 to vector<17x1xf32>
    %280 = arith.divf %278, %279 : vector<17x1xf32>
    %281 = vector.broadcast %271 : vector<17x1xf32> to vector<17x128xf32>
    %282 = arith.subf %263, %281 : vector<17x128xf32>
    %cst_128 = arith.constant 9.99999997E-7 : f32
    %283 = vector.broadcast %cst_128 : f32 to vector<17x1xf32>
    %284 = arith.addf %280, %283 : vector<17x1xf32>
    %285 = math.rsqrt %284 : vector<17x1xf32>
    %286 = vector.broadcast %285 : vector<17x1xf32> to vector<17x128xf32>
    %287 = arith.mulf %282, %286 : vector<17x128xf32>
    %288 = vector.broadcast %265 : vector<1x128xf32> to vector<17x128xf32>
    %289 = arith.mulf %287, %288 : vector<17x128xf32>
    %290 = vector.broadcast %267 : vector<1x128xf32> to vector<17x128xf32>
    %291 = arith.addf %289, %290 : vector<17x128xf32>
    %c1_129 = arith.constant 1 : index
    %c0_130 = arith.constant 0 : index
    %c0_131 = arith.constant 0 : index
    %292 = vector.load %arg14[%c1_129, %c0_130, %c0_131] : memref<2x128x512xbf16, #tpu.memory_space<vmem>>, vector<1x128x512xbf16>
    %293 = vector.shape_cast %292 : vector<1x128x512xbf16> to vector<128x512xbf16>
    %c1_132 = arith.constant 1 : index
    %c0_133 = arith.constant 0 : index
    %c0_134 = arith.constant 0 : index
    %294 = vector.load %arg15[%c1_132, %c0_133, %c0_134] : memref<2x1x512xf32, #tpu.memory_space<vmem>>, vector<1x1x512xf32>
    %295 = vector.shape_cast %294 : vector<1x1x512xf32> to vector<1x512xf32>
    %296 = arith.truncf %291 : vector<17x128xf32> to vector<17x128xbf16>
    %cst_135 = arith.constant dense<0.000000e+00> : vector<17x512xf32>
    %297 = tpu.matmul %296, %293, %cst_135 {dimension_numbers = #tpu.dot_dimension_numbers<[1], [0], [0], [1], [0, 0, 1, 1], [], []>} : vector<17x128xbf16>, vector<128x512xbf16>, vector<17x512xf32> -> vector<17x512xf32>
    %298 = vector.broadcast %295 : vector<1x512xf32> to vector<17x512xf32>
    %299 = arith.addf %297, %298 : vector<17x512xf32>
    %cst_136 = arith.constant 5.000000e-01 : f32
    %300 = vector.broadcast %cst_136 : f32 to vector<17x512xf32>
    %301 = arith.mulf %300, %299 : vector<17x512xf32>
    %cst_137 = arith.constant 4.471500e-02 : f32
    %302 = vector.broadcast %cst_137 : f32 to vector<17x512xf32>
    %303 = arith.mulf %302, %299 : vector<17x512xf32>
    %304 = arith.mulf %303, %299 : vector<17x512xf32>
    %305 = arith.mulf %304, %299 : vector<17x512xf32>
    %306 = arith.addf %299, %305 : vector<17x512xf32>
    %cst_138 = arith.constant 0.797884583 : f32
    %307 = vector.broadcast %cst_138 : f32 to vector<17x512xf32>
    %308 = arith.mulf %307, %306 : vector<17x512xf32>
    %309 = math.tanh %308 : vector<17x512xf32>
    %cst_139 = arith.constant 1.000000e+00 : f32
    %310 = vector.broadcast %cst_139 : f32 to vector<17x512xf32>
    %311 = arith.addf %310, %309 : vector<17x512xf32>
    %312 = arith.mulf %301, %311 : vector<17x512xf32>
    %c1_140 = arith.constant 1 : index
    %c0_141 = arith.constant 0 : index
    %c0_142 = arith.constant 0 : index
    %313 = vector.load %arg16[%c1_140, %c0_141, %c0_142] : memref<2x512x128xbf16, #tpu.memory_space<vmem>>, vector<1x512x128xbf16>
    %314 = vector.shape_cast %313 : vector<1x512x128xbf16> to vector<512x128xbf16>
    %c1_143 = arith.constant 1 : index
    %c0_144 = arith.constant 0 : index
    %c0_145 = arith.constant 0 : index
    %315 = vector.load %arg17[%c1_143, %c0_144, %c0_145] : memref<2x1x128xf32, #tpu.memory_space<vmem>>, vector<1x1x128xf32>
    %316 = vector.shape_cast %315 : vector<1x1x128xf32> to vector<1x128xf32>
    %317 = arith.truncf %312 : vector<17x512xf32> to vector<17x512xbf16>
    %cst_146 = arith.constant dense<0.000000e+00> : vector<17x128xf32>
    %318 = tpu.matmul %317, %314, %cst_146 {dimension_numbers = #tpu.dot_dimension_numbers<[1], [0], [0], [1], [0, 0, 1, 1], [], []>} : vector<17x512xbf16>, vector<512x128xbf16>, vector<17x128xf32> -> vector<17x128xf32>
    %319 = vector.broadcast %316 : vector<1x128xf32> to vector<17x128xf32>
    %320 = arith.addf %318, %319 : vector<17x128xf32>
    %321 = arith.addf %263, %320 : vector<17x128xf32>
    %c0_147 = arith.constant 0 : index
    %c0_148 = arith.constant 0 : index
    %322 = vector.load %arg18[%c0_147, %c0_148] : memref<1x128xf32, #tpu.memory_space<vmem>>, vector<1x128xf32>
    %c0_149 = arith.constant 0 : index
    %c0_150 = arith.constant 0 : index
    %323 = vector.load %arg19[%c0_149, %c0_150] : memref<1x128xf32, #tpu.memory_space<vmem>>, vector<1x128xf32>
    %cst_151 = arith.constant dense<0.000000e+00> : vector<17xf32>
    %324 = vector.multi_reduction <add>, %321, %cst_151 [1] : vector<17x128xf32> to vector<17xf32>
    %325 = vector.shape_cast %324 : vector<17xf32> to vector<17x1xf32>
    %cst_152 = arith.constant 1.280000e+02 : f32
    %326 = vector.broadcast %cst_152 : f32 to vector<17x1xf32>
    %327 = arith.divf %325, %326 : vector<17x1xf32>
    %328 = vector.broadcast %327 : vector<17x1xf32> to vector<17x128xf32>
    %329 = arith.subf %321, %328 : vector<17x128xf32>
    %330 = vector.broadcast %327 : vector<17x1xf32> to vector<17x128xf32>
    %331 = arith.subf %321, %330 : vector<17x128xf32>
    %332 = arith.mulf %329, %331 : vector<17x128xf32>
    %cst_153 = arith.constant dense<0.000000e+00> : vector<17xf32>
    %333 = vector.multi_reduction <add>, %332, %cst_153 [1] : vector<17x128xf32> to vector<17xf32>
    %334 = vector.shape_cast %333 : vector<17xf32> to vector<17x1xf32>
    %cst_154 = arith.constant 1.280000e+02 : f32
    %335 = vector.broadcast %cst_154 : f32 to vector<17x1xf32>
    %336 = arith.divf %334, %335 : vector<17x1xf32>
    %337 = vector.broadcast %327 : vector<17x1xf32> to vector<17x128xf32>
    %338 = arith.subf %321, %337 : vector<17x128xf32>
    %cst_155 = arith.constant 9.99999997E-7 : f32
    %339 = vector.broadcast %cst_155 : f32 to vector<17x1xf32>
    %340 = arith.addf %336, %339 : vector<17x1xf32>
    %341 = math.rsqrt %340 : vector<17x1xf32>
    %342 = vector.broadcast %341 : vector<17x1xf32> to vector<17x128xf32>
    %343 = arith.mulf %338, %342 : vector<17x128xf32>
    %344 = vector.broadcast %322 : vector<1x128xf32> to vector<17x128xf32>
    %345 = arith.mulf %343, %344 : vector<17x128xf32>
    %346 = vector.broadcast %323 : vector<1x128xf32> to vector<17x128xf32>
    %347 = arith.addf %345, %346 : vector<17x128xf32>
    %c0_156 = arith.constant 0 : index
    %c0_157 = arith.constant 0 : index
    %348 = vector.load %arg20[%c0_156, %c0_157] : memref<8x128xf32, #tpu.memory_space<vmem>>, vector<8x128xf32>
    %c0_158 = arith.constant 0 : index
    %c0_159 = arith.constant 0 : index
    %349 = vector.load %arg21[%c0_158, %c0_159] : memref<1x128xf32, #tpu.memory_space<vmem>>, vector<1x128xf32>
    %c0_160 = arith.constant 0 : index
    %c0_161 = arith.constant 0 : index
    %350 = vector.load %arg22[%c0_160, %c0_161] : memref<1x128xf32, #tpu.memory_space<vmem>>, vector<1x128xf32>
    %cst_162 = arith.constant dense<0.000000e+00> : vector<8xf32>
    %351 = vector.multi_reduction <add>, %348, %cst_162 [1] : vector<8x128xf32> to vector<8xf32>
    %352 = vector.shape_cast %351 : vector<8xf32> to vector<8x1xf32>
    %cst_163 = arith.constant 1.280000e+02 : f32
    %353 = vector.broadcast %cst_163 : f32 to vector<8x1xf32>
    %354 = arith.divf %352, %353 : vector<8x1xf32>
    %355 = vector.broadcast %354 : vector<8x1xf32> to vector<8x128xf32>
    %356 = arith.subf %348, %355 : vector<8x128xf32>
    %357 = vector.broadcast %354 : vector<8x1xf32> to vector<8x128xf32>
    %358 = arith.subf %348, %357 : vector<8x128xf32>
    %359 = arith.mulf %356, %358 : vector<8x128xf32>
    %cst_164 = arith.constant dense<0.000000e+00> : vector<8xf32>
    %360 = vector.multi_reduction <add>, %359, %cst_164 [1] : vector<8x128xf32> to vector<8xf32>
    %361 = vector.shape_cast %360 : vector<8xf32> to vector<8x1xf32>
    %cst_165 = arith.constant 1.280000e+02 : f32
    %362 = vector.broadcast %cst_165 : f32 to vector<8x1xf32>
    %363 = arith.divf %361, %362 : vector<8x1xf32>
    %364 = vector.broadcast %354 : vector<8x1xf32> to vector<8x128xf32>
    %365 = arith.subf %348, %364 : vector<8x128xf32>
    %cst_166 = arith.constant 9.99999996E-13 : f32
    %366 = vector.broadcast %cst_166 : f32 to vector<8x1xf32>
    %367 = arith.addf %363, %366 : vector<8x1xf32>
    %368 = math.rsqrt %367 : vector<8x1xf32>
    %369 = vector.broadcast %368 : vector<8x1xf32> to vector<8x128xf32>
    %370 = arith.mulf %365, %369 : vector<8x128xf32>
    %371 = vector.broadcast %349 : vector<1x128xf32> to vector<8x128xf32>
    %372 = arith.mulf %370, %371 : vector<8x128xf32>
    %373 = vector.broadcast %350 : vector<1x128xf32> to vector<8x128xf32>
    %374 = arith.addf %372, %373 : vector<8x128xf32>
    %c0_167 = arith.constant 0 : index
    %c0_168 = arith.constant 0 : index
    %c0_169 = arith.constant 0 : index
    %375 = vector.load %arg23[%c0_167, %c0_168, %c0_169] : memref<2x128x384xbf16, #tpu.memory_space<vmem>>, vector<1x128x384xbf16>
    %376 = vector.shape_cast %375 : vector<1x128x384xbf16> to vector<128x384xbf16>
    %c0_170 = arith.constant 0 : index
    %c0_171 = arith.constant 0 : index
    %c0_172 = arith.constant 0 : index
    %377 = vector.load %arg24[%c0_170, %c0_171, %c0_172] : memref<2x1x384xf32, #tpu.memory_space<vmem>>, vector<1x1x384xf32>
    %378 = vector.shape_cast %377 : vector<1x1x384xf32> to vector<1x384xf32>
    %379 = arith.truncf %374 : vector<8x128xf32> to vector<8x128xbf16>
    %cst_173 = arith.constant dense<0.000000e+00> : vector<8x384xf32>
    %380 = tpu.matmul %379, %376, %cst_173 {dimension_numbers = #tpu.dot_dimension_numbers<[1], [0], [0], [1], [0, 0, 1, 1], [], []>} : vector<8x128xbf16>, vector<128x384xbf16>, vector<8x384xf32> -> vector<8x384xf32>
    %381 = vector.broadcast %378 : vector<1x384xf32> to vector<8x384xf32>
    %382 = arith.addf %380, %381 : vector<8x384xf32>
    %383 = vector.extract_strided_slice %382 {offsets = [0, 0], sizes = [8, 128], strides = [1, 1]} : vector<8x384xf32> to vector<8x128xf32>
    %384 = vector.extract_strided_slice %382 {offsets = [0, 128], sizes = [8, 128], strides = [1, 1]} : vector<8x384xf32> to vector<8x128xf32>
    %385 = vector.extract_strided_slice %382 {offsets = [0, 256], sizes = [8, 128], strides = [1, 1]} : vector<8x384xf32> to vector<8x128xf32>
    %c0_174 = arith.constant 0 : index
    %c0_175 = arith.constant 0 : index
    %c0_176 = arith.constant 0 : index
    %386 = vector.load %arg25[%c0_174, %c0_175, %c0_176] : memref<2x128x128xbf16, #tpu.memory_space<vmem>>, vector<1x128x128xbf16>
    %387 = vector.shape_cast %386 : vector<1x128x128xbf16> to vector<128x128xbf16>
    %c0_177 = arith.constant 0 : index
    %c0_178 = arith.constant 0 : index
    %c0_179 = arith.constant 0 : index
    %388 = vector.load %arg26[%c0_177, %c0_178, %c0_179] : memref<2x1x128xf32, #tpu.memory_space<vmem>>, vector<1x1x128xf32>
    %389 = vector.shape_cast %388 : vector<1x1x128xf32> to vector<1x128xf32>
    %390 = vector.extract_strided_slice %383 {offsets = [0, 0], sizes = [8, 64], strides = [1, 1]} : vector<8x128xf32> to vector<8x64xf32>
    %391 = arith.truncf %390 : vector<8x64xf32> to vector<8x64xbf16>
    %392 = vector.extract_strided_slice %384 {offsets = [0, 0], sizes = [8, 64], strides = [1, 1]} : vector<8x128xf32> to vector<8x64xf32>
    %393 = arith.truncf %392 : vector<8x64xf32> to vector<8x64xbf16>
    %394 = vector.extract_strided_slice %385 {offsets = [0, 0], sizes = [8, 64], strides = [1, 1]} : vector<8x128xf32> to vector<8x64xf32>
    %395 = arith.truncf %394 : vector<8x64xf32> to vector<8x64xbf16>
    %cst_180 = arith.constant dense<0.000000e+00> : vector<8x8xf32>
    %396 = tpu.matmul %391, %393, %cst_180 {dimension_numbers = #tpu.dot_dimension_numbers<[1], [1], [0], [0], [0, 0, 1, 0], [], []>} : vector<8x64xbf16>, vector<8x64xbf16>, vector<8x8xf32> -> vector<8x8xf32>
    %cst_181 = arith.constant 1.250000e-01 : f32
    %397 = vector.broadcast %cst_181 : f32 to vector<8x8xf32>
    %398 = arith.mulf %396, %397 : vector<8x8xf32>
    %cst_182 = arith.constant dense<0xFF800000> : vector<8xf32>
    %399 = vector.multi_reduction <maximumf>, %398, %cst_182 [1] : vector<8x8xf32> to vector<8xf32>
    %400 = vector.shape_cast %399 : vector<8xf32> to vector<8x1xf32>
    %401 = vector.broadcast %400 : vector<8x1xf32> to vector<8x8xf32>
    %402 = arith.subf %398, %401 : vector<8x8xf32>
    %403 = math.exp %402 : vector<8x8xf32>
    %cst_183 = arith.constant dense<0.000000e+00> : vector<8xf32>
    %404 = vector.multi_reduction <add>, %403, %cst_183 [1] : vector<8x8xf32> to vector<8xf32>
    %405 = vector.shape_cast %404 : vector<8xf32> to vector<8x1xf32>
    %406 = tpu.reciprocal %405 {approx = true} : vector<8x1xf32> -> vector<8x1xf32>
    %407 = vector.broadcast %406 : vector<8x1xf32> to vector<8x8xf32>
    %408 = arith.mulf %403, %407 : vector<8x8xf32>
    %409 = arith.truncf %408 : vector<8x8xf32> to vector<8x8xbf16>
    %cst_184 = arith.constant dense<0.000000e+00> : vector<8x64xf32>
    %410 = tpu.matmul %409, %395, %cst_184 {dimension_numbers = #tpu.dot_dimension_numbers<[1], [0], [0], [1], [0, 0, 1, 1], [], []>} : vector<8x8xbf16>, vector<8x64xbf16>, vector<8x64xf32> -> vector<8x64xf32>
    %411 = arith.truncf %410 : vector<8x64xf32> to vector<8x64xbf16>
    %412 = vector.extract_strided_slice %387 {offsets = [0, 0], sizes = [64, 128], strides = [1, 1]} : vector<128x128xbf16> to vector<64x128xbf16>
    %cst_185 = arith.constant dense<0.000000e+00> : vector<8x128xf32>
    %413 = tpu.matmul %411, %412, %cst_185 {dimension_numbers = #tpu.dot_dimension_numbers<[1], [0], [0], [1], [0, 0, 1, 1], [], []>} : vector<8x64xbf16>, vector<64x128xbf16>, vector<8x128xf32> -> vector<8x128xf32>
    %414 = vector.extract_strided_slice %383 {offsets = [0, 64], sizes = [8, 64], strides = [1, 1]} : vector<8x128xf32> to vector<8x64xf32>
    %415 = arith.truncf %414 : vector<8x64xf32> to vector<8x64xbf16>
    %416 = vector.extract_strided_slice %384 {offsets = [0, 64], sizes = [8, 64], strides = [1, 1]} : vector<8x128xf32> to vector<8x64xf32>
    %417 = arith.truncf %416 : vector<8x64xf32> to vector<8x64xbf16>
    %418 = vector.extract_strided_slice %385 {offsets = [0, 64], sizes = [8, 64], strides = [1, 1]} : vector<8x128xf32> to vector<8x64xf32>
    %419 = arith.truncf %418 : vector<8x64xf32> to vector<8x64xbf16>
    %cst_186 = arith.constant dense<0.000000e+00> : vector<8x8xf32>
    %420 = tpu.matmul %415, %417, %cst_186 {dimension_numbers = #tpu.dot_dimension_numbers<[1], [1], [0], [0], [0, 0, 1, 0], [], []>} : vector<8x64xbf16>, vector<8x64xbf16>, vector<8x8xf32> -> vector<8x8xf32>
    %cst_187 = arith.constant 1.250000e-01 : f32
    %421 = vector.broadcast %cst_187 : f32 to vector<8x8xf32>
    %422 = arith.mulf %420, %421 : vector<8x8xf32>
    %cst_188 = arith.constant dense<0xFF800000> : vector<8xf32>
    %423 = vector.multi_reduction <maximumf>, %422, %cst_188 [1] : vector<8x8xf32> to vector<8xf32>
    %424 = vector.shape_cast %423 : vector<8xf32> to vector<8x1xf32>
    %425 = vector.broadcast %424 : vector<8x1xf32> to vector<8x8xf32>
    %426 = arith.subf %422, %425 : vector<8x8xf32>
    %427 = math.exp %426 : vector<8x8xf32>
    %cst_189 = arith.constant dense<0.000000e+00> : vector<8xf32>
    %428 = vector.multi_reduction <add>, %427, %cst_189 [1] : vector<8x8xf32> to vector<8xf32>
    %429 = vector.shape_cast %428 : vector<8xf32> to vector<8x1xf32>
    %430 = tpu.reciprocal %429 {approx = true} : vector<8x1xf32> -> vector<8x1xf32>
    %431 = vector.broadcast %430 : vector<8x1xf32> to vector<8x8xf32>
    %432 = arith.mulf %427, %431 : vector<8x8xf32>
    %433 = arith.truncf %432 : vector<8x8xf32> to vector<8x8xbf16>
    %cst_190 = arith.constant dense<0.000000e+00> : vector<8x64xf32>
    %434 = tpu.matmul %433, %419, %cst_190 {dimension_numbers = #tpu.dot_dimension_numbers<[1], [0], [0], [1], [0, 0, 1, 1], [], []>} : vector<8x8xbf16>, vector<8x64xbf16>, vector<8x64xf32> -> vector<8x64xf32>
    %435 = arith.truncf %434 : vector<8x64xf32> to vector<8x64xbf16>
    %436 = vector.extract_strided_slice %387 {offsets = [64, 0], sizes = [64, 128], strides = [1, 1]} : vector<128x128xbf16> to vector<64x128xbf16>
    %cst_191 = arith.constant dense<0.000000e+00> : vector<8x128xf32>
    %437 = tpu.matmul %435, %436, %cst_191 {dimension_numbers = #tpu.dot_dimension_numbers<[1], [0], [0], [1], [0, 0, 1, 1], [], []>} : vector<8x64xbf16>, vector<64x128xbf16>, vector<8x128xf32> -> vector<8x128xf32>
    %438 = arith.addf %413, %437 : vector<8x128xf32>
    %439 = vector.broadcast %389 : vector<1x128xf32> to vector<8x128xf32>
    %440 = arith.addf %438, %439 : vector<8x128xf32>
    %441 = arith.addf %374, %440 : vector<8x128xf32>
    %c0_192 = arith.constant 0 : index
    %c0_193 = arith.constant 0 : index
    %c0_194 = arith.constant 0 : index
    %442 = vector.load %arg27[%c0_192, %c0_193, %c0_194] : memref<2x1x128xf32, #tpu.memory_space<vmem>>, vector<1x1x128xf32>
    %443 = vector.shape_cast %442 : vector<1x1x128xf32> to vector<1x128xf32>
    %c0_195 = arith.constant 0 : index
    %c0_196 = arith.constant 0 : index
    %c0_197 = arith.constant 0 : index
    %444 = vector.load %arg28[%c0_195, %c0_196, %c0_197] : memref<2x1x128xf32, #tpu.memory_space<vmem>>, vector<1x1x128xf32>
    %445 = vector.shape_cast %444 : vector<1x1x128xf32> to vector<1x128xf32>
    %cst_198 = arith.constant dense<0.000000e+00> : vector<8xf32>
    %446 = vector.multi_reduction <add>, %441, %cst_198 [1] : vector<8x128xf32> to vector<8xf32>
    %447 = vector.shape_cast %446 : vector<8xf32> to vector<8x1xf32>
    %cst_199 = arith.constant 1.280000e+02 : f32
    %448 = vector.broadcast %cst_199 : f32 to vector<8x1xf32>
    %449 = arith.divf %447, %448 : vector<8x1xf32>
    %450 = vector.broadcast %449 : vector<8x1xf32> to vector<8x128xf32>
    %451 = arith.subf %441, %450 : vector<8x128xf32>
    %452 = vector.broadcast %449 : vector<8x1xf32> to vector<8x128xf32>
    %453 = arith.subf %441, %452 : vector<8x128xf32>
    %454 = arith.mulf %451, %453 : vector<8x128xf32>
    %cst_200 = arith.constant dense<0.000000e+00> : vector<8xf32>
    %455 = vector.multi_reduction <add>, %454, %cst_200 [1] : vector<8x128xf32> to vector<8xf32>
    %456 = vector.shape_cast %455 : vector<8xf32> to vector<8x1xf32>
    %cst_201 = arith.constant 1.280000e+02 : f32
    %457 = vector.broadcast %cst_201 : f32 to vector<8x1xf32>
    %458 = arith.divf %456, %457 : vector<8x1xf32>
    %459 = vector.broadcast %449 : vector<8x1xf32> to vector<8x128xf32>
    %460 = arith.subf %441, %459 : vector<8x128xf32>
    %cst_202 = arith.constant 9.99999996E-13 : f32
    %461 = vector.broadcast %cst_202 : f32 to vector<8x1xf32>
    %462 = arith.addf %458, %461 : vector<8x1xf32>
    %463 = math.rsqrt %462 : vector<8x1xf32>
    %464 = vector.broadcast %463 : vector<8x1xf32> to vector<8x128xf32>
    %465 = arith.mulf %460, %464 : vector<8x128xf32>
    %466 = vector.broadcast %443 : vector<1x128xf32> to vector<8x128xf32>
    %467 = arith.mulf %465, %466 : vector<8x128xf32>
    %468 = vector.broadcast %445 : vector<1x128xf32> to vector<8x128xf32>
    %469 = arith.addf %467, %468 : vector<8x128xf32>
    %c0_203 = arith.constant 0 : index
    %c0_204 = arith.constant 0 : index
    %c0_205 = arith.constant 0 : index
    %470 = vector.load %arg29[%c0_203, %c0_204, %c0_205] : memref<2x128x128xbf16, #tpu.memory_space<vmem>>, vector<1x128x128xbf16>
    %471 = vector.shape_cast %470 : vector<1x128x128xbf16> to vector<128x128xbf16>
    %c0_206 = arith.constant 0 : index
    %c0_207 = arith.constant 0 : index
    %c0_208 = arith.constant 0 : index
    %472 = vector.load %arg30[%c0_206, %c0_207, %c0_208] : memref<2x1x128xf32, #tpu.memory_space<vmem>>, vector<1x1x128xf32>
    %473 = vector.shape_cast %472 : vector<1x1x128xf32> to vector<1x128xf32>
    %474 = arith.truncf %469 : vector<8x128xf32> to vector<8x128xbf16>
    %cst_209 = arith.constant dense<0.000000e+00> : vector<8x128xf32>
    %475 = tpu.matmul %474, %471, %cst_209 {dimension_numbers = #tpu.dot_dimension_numbers<[1], [0], [0], [1], [0, 0, 1, 1], [], []>} : vector<8x128xbf16>, vector<128x128xbf16>, vector<8x128xf32> -> vector<8x128xf32>
    %476 = vector.broadcast %473 : vector<1x128xf32> to vector<8x128xf32>
    %477 = arith.addf %475, %476 : vector<8x128xf32>
    %c0_210 = arith.constant 0 : index
    %c0_211 = arith.constant 0 : index
    %c0_212 = arith.constant 0 : index
    %478 = vector.load %arg31[%c0_210, %c0_211, %c0_212] : memref<2x128x256xbf16, #tpu.memory_space<vmem>>, vector<1x128x256xbf16>
    %479 = vector.shape_cast %478 : vector<1x128x256xbf16> to vector<128x256xbf16>
    %c0_213 = arith.constant 0 : index
    %c0_214 = arith.constant 0 : index
    %c0_215 = arith.constant 0 : index
    %480 = vector.load %arg32[%c0_213, %c0_214, %c0_215] : memref<2x1x256xf32, #tpu.memory_space<vmem>>, vector<1x1x256xf32>
    %481 = vector.shape_cast %480 : vector<1x1x256xf32> to vector<1x256xf32>
    %482 = arith.truncf %347 : vector<17x128xf32> to vector<17x128xbf16>
    %cst_216 = arith.constant dense<0.000000e+00> : vector<17x256xf32>
    %483 = tpu.matmul %482, %479, %cst_216 {dimension_numbers = #tpu.dot_dimension_numbers<[1], [0], [0], [1], [0, 0, 1, 1], [], []>} : vector<17x128xbf16>, vector<128x256xbf16>, vector<17x256xf32> -> vector<17x256xf32>
    %484 = vector.broadcast %481 : vector<1x256xf32> to vector<17x256xf32>
    %485 = arith.addf %483, %484 : vector<17x256xf32>
    %486 = vector.extract_strided_slice %485 {offsets = [0, 0], sizes = [17, 128], strides = [1, 1]} : vector<17x256xf32> to vector<17x128xf32>
    %487 = vector.extract_strided_slice %485 {offsets = [0, 128], sizes = [17, 128], strides = [1, 1]} : vector<17x256xf32> to vector<17x128xf32>
    %c0_217 = arith.constant 0 : index
    %c0_218 = arith.constant 0 : index
    %c0_219 = arith.constant 0 : index
    %488 = vector.load %arg33[%c0_217, %c0_218, %c0_219] : memref<2x128x128xbf16, #tpu.memory_space<vmem>>, vector<1x128x128xbf16>
    %489 = vector.shape_cast %488 : vector<1x128x128xbf16> to vector<128x128xbf16>
    %c0_220 = arith.constant 0 : index
    %c0_221 = arith.constant 0 : index
    %c0_222 = arith.constant 0 : index
    %490 = vector.load %arg34[%c0_220, %c0_221, %c0_222] : memref<2x1x128xf32, #tpu.memory_space<vmem>>, vector<1x1x128xf32>
    %491 = vector.shape_cast %490 : vector<1x1x128xf32> to vector<1x128xf32>
    %492 = vector.extract_strided_slice %477 {offsets = [0, 0], sizes = [8, 64], strides = [1, 1]} : vector<8x128xf32> to vector<8x64xf32>
    %493 = arith.truncf %492 : vector<8x64xf32> to vector<8x64xbf16>
    %494 = vector.extract_strided_slice %486 {offsets = [0, 0], sizes = [17, 64], strides = [1, 1]} : vector<17x128xf32> to vector<17x64xf32>
    %495 = arith.truncf %494 : vector<17x64xf32> to vector<17x64xbf16>
    %496 = vector.extract_strided_slice %487 {offsets = [0, 0], sizes = [17, 64], strides = [1, 1]} : vector<17x128xf32> to vector<17x64xf32>
    %497 = arith.truncf %496 : vector<17x64xf32> to vector<17x64xbf16>
    %cst_223 = arith.constant dense<0.000000e+00> : vector<8x17xf32>
    %498 = tpu.matmul %493, %495, %cst_223 {dimension_numbers = #tpu.dot_dimension_numbers<[1], [1], [0], [0], [0, 0, 1, 0], [], []>} : vector<8x64xbf16>, vector<17x64xbf16>, vector<8x17xf32> -> vector<8x17xf32>
    %cst_224 = arith.constant 1.250000e-01 : f32
    %499 = vector.broadcast %cst_224 : f32 to vector<8x17xf32>
    %500 = arith.mulf %498, %499 : vector<8x17xf32>
    %cst_225 = arith.constant dense<0xFF800000> : vector<8xf32>
    %501 = vector.multi_reduction <maximumf>, %500, %cst_225 [1] : vector<8x17xf32> to vector<8xf32>
    %502 = vector.shape_cast %501 : vector<8xf32> to vector<8x1xf32>
    %503 = vector.broadcast %502 : vector<8x1xf32> to vector<8x17xf32>
    %504 = arith.subf %500, %503 : vector<8x17xf32>
    %505 = math.exp %504 : vector<8x17xf32>
    %cst_226 = arith.constant dense<0.000000e+00> : vector<8xf32>
    %506 = vector.multi_reduction <add>, %505, %cst_226 [1] : vector<8x17xf32> to vector<8xf32>
    %507 = vector.shape_cast %506 : vector<8xf32> to vector<8x1xf32>
    %508 = tpu.reciprocal %507 {approx = true} : vector<8x1xf32> -> vector<8x1xf32>
    %509 = vector.broadcast %508 : vector<8x1xf32> to vector<8x17xf32>
    %510 = arith.mulf %505, %509 : vector<8x17xf32>
    %511 = arith.truncf %510 : vector<8x17xf32> to vector<8x17xbf16>
    %cst_227 = arith.constant dense<0.000000e+00> : vector<8x64xf32>
    %512 = tpu.matmul %511, %497, %cst_227 {dimension_numbers = #tpu.dot_dimension_numbers<[1], [0], [0], [1], [0, 0, 1, 1], [], []>} : vector<8x17xbf16>, vector<17x64xbf16>, vector<8x64xf32> -> vector<8x64xf32>
    %513 = arith.truncf %512 : vector<8x64xf32> to vector<8x64xbf16>
    %514 = vector.extract_strided_slice %489 {offsets = [0, 0], sizes = [64, 128], strides = [1, 1]} : vector<128x128xbf16> to vector<64x128xbf16>
    %cst_228 = arith.constant dense<0.000000e+00> : vector<8x128xf32>
    %515 = tpu.matmul %513, %514, %cst_228 {dimension_numbers = #tpu.dot_dimension_numbers<[1], [0], [0], [1], [0, 0, 1, 1], [], []>} : vector<8x64xbf16>, vector<64x128xbf16>, vector<8x128xf32> -> vector<8x128xf32>
    %516 = vector.extract_strided_slice %477 {offsets = [0, 64], sizes = [8, 64], strides = [1, 1]} : vector<8x128xf32> to vector<8x64xf32>
    %517 = arith.truncf %516 : vector<8x64xf32> to vector<8x64xbf16>
    %518 = vector.extract_strided_slice %486 {offsets = [0, 64], sizes = [17, 64], strides = [1, 1]} : vector<17x128xf32> to vector<17x64xf32>
    %519 = arith.truncf %518 : vector<17x64xf32> to vector<17x64xbf16>
    %520 = vector.extract_strided_slice %487 {offsets = [0, 64], sizes = [17, 64], strides = [1, 1]} : vector<17x128xf32> to vector<17x64xf32>
    %521 = arith.truncf %520 : vector<17x64xf32> to vector<17x64xbf16>
    %cst_229 = arith.constant dense<0.000000e+00> : vector<8x17xf32>
    %522 = tpu.matmul %517, %519, %cst_229 {dimension_numbers = #tpu.dot_dimension_numbers<[1], [1], [0], [0], [0, 0, 1, 0], [], []>} : vector<8x64xbf16>, vector<17x64xbf16>, vector<8x17xf32> -> vector<8x17xf32>
    %cst_230 = arith.constant 1.250000e-01 : f32
    %523 = vector.broadcast %cst_230 : f32 to vector<8x17xf32>
    %524 = arith.mulf %522, %523 : vector<8x17xf32>
    %cst_231 = arith.constant dense<0xFF800000> : vector<8xf32>
    %525 = vector.multi_reduction <maximumf>, %524, %cst_231 [1] : vector<8x17xf32> to vector<8xf32>
    %526 = vector.shape_cast %525 : vector<8xf32> to vector<8x1xf32>
    %527 = vector.broadcast %526 : vector<8x1xf32> to vector<8x17xf32>
    %528 = arith.subf %524, %527 : vector<8x17xf32>
    %529 = math.exp %528 : vector<8x17xf32>
    %cst_232 = arith.constant dense<0.000000e+00> : vector<8xf32>
    %530 = vector.multi_reduction <add>, %529, %cst_232 [1] : vector<8x17xf32> to vector<8xf32>
    %531 = vector.shape_cast %530 : vector<8xf32> to vector<8x1xf32>
    %532 = tpu.reciprocal %531 {approx = true} : vector<8x1xf32> -> vector<8x1xf32>
    %533 = vector.broadcast %532 : vector<8x1xf32> to vector<8x17xf32>
    %534 = arith.mulf %529, %533 : vector<8x17xf32>
    %535 = arith.truncf %534 : vector<8x17xf32> to vector<8x17xbf16>
    %cst_233 = arith.constant dense<0.000000e+00> : vector<8x64xf32>
    %536 = tpu.matmul %535, %521, %cst_233 {dimension_numbers = #tpu.dot_dimension_numbers<[1], [0], [0], [1], [0, 0, 1, 1], [], []>} : vector<8x17xbf16>, vector<17x64xbf16>, vector<8x64xf32> -> vector<8x64xf32>
    %537 = arith.truncf %536 : vector<8x64xf32> to vector<8x64xbf16>
    %538 = vector.extract_strided_slice %489 {offsets = [64, 0], sizes = [64, 128], strides = [1, 1]} : vector<128x128xbf16> to vector<64x128xbf16>
    %cst_234 = arith.constant dense<0.000000e+00> : vector<8x128xf32>
    %539 = tpu.matmul %537, %538, %cst_234 {dimension_numbers = #tpu.dot_dimension_numbers<[1], [0], [0], [1], [0, 0, 1, 1], [], []>} : vector<8x64xbf16>, vector<64x128xbf16>, vector<8x128xf32> -> vector<8x128xf32>
    %540 = arith.addf %515, %539 : vector<8x128xf32>
    %541 = vector.broadcast %491 : vector<1x128xf32> to vector<8x128xf32>
    %542 = arith.addf %540, %541 : vector<8x128xf32>
    %543 = arith.addf %469, %542 : vector<8x128xf32>
    %c0_235 = arith.constant 0 : index
    %c0_236 = arith.constant 0 : index
    %c0_237 = arith.constant 0 : index
    %544 = vector.load %arg35[%c0_235, %c0_236, %c0_237] : memref<2x1x128xf32, #tpu.memory_space<vmem>>, vector<1x1x128xf32>
    %545 = vector.shape_cast %544 : vector<1x1x128xf32> to vector<1x128xf32>
    %c0_238 = arith.constant 0 : index
    %c0_239 = arith.constant 0 : index
    %c0_240 = arith.constant 0 : index
    %546 = vector.load %arg36[%c0_238, %c0_239, %c0_240] : memref<2x1x128xf32, #tpu.memory_space<vmem>>, vector<1x1x128xf32>
    %547 = vector.shape_cast %546 : vector<1x1x128xf32> to vector<1x128xf32>
    %cst_241 = arith.constant dense<0.000000e+00> : vector<8xf32>
    %548 = vector.multi_reduction <add>, %543, %cst_241 [1] : vector<8x128xf32> to vector<8xf32>
    %549 = vector.shape_cast %548 : vector<8xf32> to vector<8x1xf32>
    %cst_242 = arith.constant 1.280000e+02 : f32
    %550 = vector.broadcast %cst_242 : f32 to vector<8x1xf32>
    %551 = arith.divf %549, %550 : vector<8x1xf32>
    %552 = vector.broadcast %551 : vector<8x1xf32> to vector<8x128xf32>
    %553 = arith.subf %543, %552 : vector<8x128xf32>
    %554 = vector.broadcast %551 : vector<8x1xf32> to vector<8x128xf32>
    %555 = arith.subf %543, %554 : vector<8x128xf32>
    %556 = arith.mulf %553, %555 : vector<8x128xf32>
    %cst_243 = arith.constant dense<0.000000e+00> : vector<8xf32>
    %557 = vector.multi_reduction <add>, %556, %cst_243 [1] : vector<8x128xf32> to vector<8xf32>
    %558 = vector.shape_cast %557 : vector<8xf32> to vector<8x1xf32>
    %cst_244 = arith.constant 1.280000e+02 : f32
    %559 = vector.broadcast %cst_244 : f32 to vector<8x1xf32>
    %560 = arith.divf %558, %559 : vector<8x1xf32>
    %561 = vector.broadcast %551 : vector<8x1xf32> to vector<8x128xf32>
    %562 = arith.subf %543, %561 : vector<8x128xf32>
    %cst_245 = arith.constant 9.99999996E-13 : f32
    %563 = vector.broadcast %cst_245 : f32 to vector<8x1xf32>
    %564 = arith.addf %560, %563 : vector<8x1xf32>
    %565 = math.rsqrt %564 : vector<8x1xf32>
    %566 = vector.broadcast %565 : vector<8x1xf32> to vector<8x128xf32>
    %567 = arith.mulf %562, %566 : vector<8x128xf32>
    %568 = vector.broadcast %545 : vector<1x128xf32> to vector<8x128xf32>
    %569 = arith.mulf %567, %568 : vector<8x128xf32>
    %570 = vector.broadcast %547 : vector<1x128xf32> to vector<8x128xf32>
    %571 = arith.addf %569, %570 : vector<8x128xf32>
    %c0_246 = arith.constant 0 : index
    %c0_247 = arith.constant 0 : index
    %c0_248 = arith.constant 0 : index
    %572 = vector.load %arg37[%c0_246, %c0_247, %c0_248] : memref<2x128x512xbf16, #tpu.memory_space<vmem>>, vector<1x128x512xbf16>
    %573 = vector.shape_cast %572 : vector<1x128x512xbf16> to vector<128x512xbf16>
    %c0_249 = arith.constant 0 : index
    %c0_250 = arith.constant 0 : index
    %c0_251 = arith.constant 0 : index
    %574 = vector.load %arg38[%c0_249, %c0_250, %c0_251] : memref<2x1x512xf32, #tpu.memory_space<vmem>>, vector<1x1x512xf32>
    %575 = vector.shape_cast %574 : vector<1x1x512xf32> to vector<1x512xf32>
    %576 = arith.truncf %571 : vector<8x128xf32> to vector<8x128xbf16>
    %cst_252 = arith.constant dense<0.000000e+00> : vector<8x512xf32>
    %577 = tpu.matmul %576, %573, %cst_252 {dimension_numbers = #tpu.dot_dimension_numbers<[1], [0], [0], [1], [0, 0, 1, 1], [], []>} : vector<8x128xbf16>, vector<128x512xbf16>, vector<8x512xf32> -> vector<8x512xf32>
    %578 = vector.broadcast %575 : vector<1x512xf32> to vector<8x512xf32>
    %579 = arith.addf %577, %578 : vector<8x512xf32>
    %cst_253 = arith.constant 5.000000e-01 : f32
    %580 = vector.broadcast %cst_253 : f32 to vector<8x512xf32>
    %581 = arith.mulf %580, %579 : vector<8x512xf32>
    %cst_254 = arith.constant 4.471500e-02 : f32
    %582 = vector.broadcast %cst_254 : f32 to vector<8x512xf32>
    %583 = arith.mulf %582, %579 : vector<8x512xf32>
    %584 = arith.mulf %583, %579 : vector<8x512xf32>
    %585 = arith.mulf %584, %579 : vector<8x512xf32>
    %586 = arith.addf %579, %585 : vector<8x512xf32>
    %cst_255 = arith.constant 0.797884583 : f32
    %587 = vector.broadcast %cst_255 : f32 to vector<8x512xf32>
    %588 = arith.mulf %587, %586 : vector<8x512xf32>
    %589 = math.tanh %588 : vector<8x512xf32>
    %cst_256 = arith.constant 1.000000e+00 : f32
    %590 = vector.broadcast %cst_256 : f32 to vector<8x512xf32>
    %591 = arith.addf %590, %589 : vector<8x512xf32>
    %592 = arith.mulf %581, %591 : vector<8x512xf32>
    %c0_257 = arith.constant 0 : index
    %c0_258 = arith.constant 0 : index
    %c0_259 = arith.constant 0 : index
    %593 = vector.load %arg39[%c0_257, %c0_258, %c0_259] : memref<2x512x128xbf16, #tpu.memory_space<vmem>>, vector<1x512x128xbf16>
    %594 = vector.shape_cast %593 : vector<1x512x128xbf16> to vector<512x128xbf16>
    %c0_260 = arith.constant 0 : index
    %c0_261 = arith.constant 0 : index
    %c0_262 = arith.constant 0 : index
    %595 = vector.load %arg40[%c0_260, %c0_261, %c0_262] : memref<2x1x128xf32, #tpu.memory_space<vmem>>, vector<1x1x128xf32>
    %596 = vector.shape_cast %595 : vector<1x1x128xf32> to vector<1x128xf32>
    %597 = arith.truncf %592 : vector<8x512xf32> to vector<8x512xbf16>
    %cst_263 = arith.constant dense<0.000000e+00> : vector<8x128xf32>
    %598 = tpu.matmul %597, %594, %cst_263 {dimension_numbers = #tpu.dot_dimension_numbers<[1], [0], [0], [1], [0, 0, 1, 1], [], []>} : vector<8x512xbf16>, vector<512x128xbf16>, vector<8x128xf32> -> vector<8x128xf32>
    %599 = vector.broadcast %596 : vector<1x128xf32> to vector<8x128xf32>
    %600 = arith.addf %598, %599 : vector<8x128xf32>
    %601 = arith.addf %571, %600 : vector<8x128xf32>
    %c0_264 = arith.constant 0 : index
    %c0_265 = arith.constant 0 : index
    %c0_266 = arith.constant 0 : index
    %602 = vector.load %arg41[%c0_264, %c0_265, %c0_266] : memref<2x1x128xf32, #tpu.memory_space<vmem>>, vector<1x1x128xf32>
    %603 = vector.shape_cast %602 : vector<1x1x128xf32> to vector<1x128xf32>
    %c0_267 = arith.constant 0 : index
    %c0_268 = arith.constant 0 : index
    %c0_269 = arith.constant 0 : index
    %604 = vector.load %arg42[%c0_267, %c0_268, %c0_269] : memref<2x1x128xf32, #tpu.memory_space<vmem>>, vector<1x1x128xf32>
    %605 = vector.shape_cast %604 : vector<1x1x128xf32> to vector<1x128xf32>
    %cst_270 = arith.constant dense<0.000000e+00> : vector<8xf32>
    %606 = vector.multi_reduction <add>, %601, %cst_270 [1] : vector<8x128xf32> to vector<8xf32>
    %607 = vector.shape_cast %606 : vector<8xf32> to vector<8x1xf32>
    %cst_271 = arith.constant 1.280000e+02 : f32
    %608 = vector.broadcast %cst_271 : f32 to vector<8x1xf32>
    %609 = arith.divf %607, %608 : vector<8x1xf32>
    %610 = vector.broadcast %609 : vector<8x1xf32> to vector<8x128xf32>
    %611 = arith.subf %601, %610 : vector<8x128xf32>
    %612 = vector.broadcast %609 : vector<8x1xf32> to vector<8x128xf32>
    %613 = arith.subf %601, %612 : vector<8x128xf32>
    %614 = arith.mulf %611, %613 : vector<8x128xf32>
    %cst_272 = arith.constant dense<0.000000e+00> : vector<8xf32>
    %615 = vector.multi_reduction <add>, %614, %cst_272 [1] : vector<8x128xf32> to vector<8xf32>
    %616 = vector.shape_cast %615 : vector<8xf32> to vector<8x1xf32>
    %cst_273 = arith.constant 1.280000e+02 : f32
    %617 = vector.broadcast %cst_273 : f32 to vector<8x1xf32>
    %618 = arith.divf %616, %617 : vector<8x1xf32>
    %619 = vector.broadcast %609 : vector<8x1xf32> to vector<8x128xf32>
    %620 = arith.subf %601, %619 : vector<8x128xf32>
    %cst_274 = arith.constant 9.99999996E-13 : f32
    %621 = vector.broadcast %cst_274 : f32 to vector<8x1xf32>
    %622 = arith.addf %618, %621 : vector<8x1xf32>
    %623 = math.rsqrt %622 : vector<8x1xf32>
    %624 = vector.broadcast %623 : vector<8x1xf32> to vector<8x128xf32>
    %625 = arith.mulf %620, %624 : vector<8x128xf32>
    %626 = vector.broadcast %603 : vector<1x128xf32> to vector<8x128xf32>
    %627 = arith.mulf %625, %626 : vector<8x128xf32>
    %628 = vector.broadcast %605 : vector<1x128xf32> to vector<8x128xf32>
    %629 = arith.addf %627, %628 : vector<8x128xf32>
    %c1_275 = arith.constant 1 : index
    %c0_276 = arith.constant 0 : index
    %c0_277 = arith.constant 0 : index
    %630 = vector.load %arg23[%c1_275, %c0_276, %c0_277] : memref<2x128x384xbf16, #tpu.memory_space<vmem>>, vector<1x128x384xbf16>
    %631 = vector.shape_cast %630 : vector<1x128x384xbf16> to vector<128x384xbf16>
    %c1_278 = arith.constant 1 : index
    %c0_279 = arith.constant 0 : index
    %c0_280 = arith.constant 0 : index
    %632 = vector.load %arg24[%c1_278, %c0_279, %c0_280] : memref<2x1x384xf32, #tpu.memory_space<vmem>>, vector<1x1x384xf32>
    %633 = vector.shape_cast %632 : vector<1x1x384xf32> to vector<1x384xf32>
    %634 = arith.truncf %629 : vector<8x128xf32> to vector<8x128xbf16>
    %cst_281 = arith.constant dense<0.000000e+00> : vector<8x384xf32>
    %635 = tpu.matmul %634, %631, %cst_281 {dimension_numbers = #tpu.dot_dimension_numbers<[1], [0], [0], [1], [0, 0, 1, 1], [], []>} : vector<8x128xbf16>, vector<128x384xbf16>, vector<8x384xf32> -> vector<8x384xf32>
    %636 = vector.broadcast %633 : vector<1x384xf32> to vector<8x384xf32>
    %637 = arith.addf %635, %636 : vector<8x384xf32>
    %638 = vector.extract_strided_slice %637 {offsets = [0, 0], sizes = [8, 128], strides = [1, 1]} : vector<8x384xf32> to vector<8x128xf32>
    %639 = vector.extract_strided_slice %637 {offsets = [0, 128], sizes = [8, 128], strides = [1, 1]} : vector<8x384xf32> to vector<8x128xf32>
    %640 = vector.extract_strided_slice %637 {offsets = [0, 256], sizes = [8, 128], strides = [1, 1]} : vector<8x384xf32> to vector<8x128xf32>
    %c1_282 = arith.constant 1 : index
    %c0_283 = arith.constant 0 : index
    %c0_284 = arith.constant 0 : index
    %641 = vector.load %arg25[%c1_282, %c0_283, %c0_284] : memref<2x128x128xbf16, #tpu.memory_space<vmem>>, vector<1x128x128xbf16>
    %642 = vector.shape_cast %641 : vector<1x128x128xbf16> to vector<128x128xbf16>
    %c1_285 = arith.constant 1 : index
    %c0_286 = arith.constant 0 : index
    %c0_287 = arith.constant 0 : index
    %643 = vector.load %arg26[%c1_285, %c0_286, %c0_287] : memref<2x1x128xf32, #tpu.memory_space<vmem>>, vector<1x1x128xf32>
    %644 = vector.shape_cast %643 : vector<1x1x128xf32> to vector<1x128xf32>
    %645 = vector.extract_strided_slice %638 {offsets = [0, 0], sizes = [8, 64], strides = [1, 1]} : vector<8x128xf32> to vector<8x64xf32>
    %646 = arith.truncf %645 : vector<8x64xf32> to vector<8x64xbf16>
    %647 = vector.extract_strided_slice %639 {offsets = [0, 0], sizes = [8, 64], strides = [1, 1]} : vector<8x128xf32> to vector<8x64xf32>
    %648 = arith.truncf %647 : vector<8x64xf32> to vector<8x64xbf16>
    %649 = vector.extract_strided_slice %640 {offsets = [0, 0], sizes = [8, 64], strides = [1, 1]} : vector<8x128xf32> to vector<8x64xf32>
    %650 = arith.truncf %649 : vector<8x64xf32> to vector<8x64xbf16>
    %cst_288 = arith.constant dense<0.000000e+00> : vector<8x8xf32>
    %651 = tpu.matmul %646, %648, %cst_288 {dimension_numbers = #tpu.dot_dimension_numbers<[1], [1], [0], [0], [0, 0, 1, 0], [], []>} : vector<8x64xbf16>, vector<8x64xbf16>, vector<8x8xf32> -> vector<8x8xf32>
    %cst_289 = arith.constant 1.250000e-01 : f32
    %652 = vector.broadcast %cst_289 : f32 to vector<8x8xf32>
    %653 = arith.mulf %651, %652 : vector<8x8xf32>
    %cst_290 = arith.constant dense<0xFF800000> : vector<8xf32>
    %654 = vector.multi_reduction <maximumf>, %653, %cst_290 [1] : vector<8x8xf32> to vector<8xf32>
    %655 = vector.shape_cast %654 : vector<8xf32> to vector<8x1xf32>
    %656 = vector.broadcast %655 : vector<8x1xf32> to vector<8x8xf32>
    %657 = arith.subf %653, %656 : vector<8x8xf32>
    %658 = math.exp %657 : vector<8x8xf32>
    %cst_291 = arith.constant dense<0.000000e+00> : vector<8xf32>
    %659 = vector.multi_reduction <add>, %658, %cst_291 [1] : vector<8x8xf32> to vector<8xf32>
    %660 = vector.shape_cast %659 : vector<8xf32> to vector<8x1xf32>
    %661 = tpu.reciprocal %660 {approx = true} : vector<8x1xf32> -> vector<8x1xf32>
    %662 = vector.broadcast %661 : vector<8x1xf32> to vector<8x8xf32>
    %663 = arith.mulf %658, %662 : vector<8x8xf32>
    %664 = arith.truncf %663 : vector<8x8xf32> to vector<8x8xbf16>
    %cst_292 = arith.constant dense<0.000000e+00> : vector<8x64xf32>
    %665 = tpu.matmul %664, %650, %cst_292 {dimension_numbers = #tpu.dot_dimension_numbers<[1], [0], [0], [1], [0, 0, 1, 1], [], []>} : vector<8x8xbf16>, vector<8x64xbf16>, vector<8x64xf32> -> vector<8x64xf32>
    %666 = arith.truncf %665 : vector<8x64xf32> to vector<8x64xbf16>
    %667 = vector.extract_strided_slice %642 {offsets = [0, 0], sizes = [64, 128], strides = [1, 1]} : vector<128x128xbf16> to vector<64x128xbf16>
    %cst_293 = arith.constant dense<0.000000e+00> : vector<8x128xf32>
    %668 = tpu.matmul %666, %667, %cst_293 {dimension_numbers = #tpu.dot_dimension_numbers<[1], [0], [0], [1], [0, 0, 1, 1], [], []>} : vector<8x64xbf16>, vector<64x128xbf16>, vector<8x128xf32> -> vector<8x128xf32>
    %669 = vector.extract_strided_slice %638 {offsets = [0, 64], sizes = [8, 64], strides = [1, 1]} : vector<8x128xf32> to vector<8x64xf32>
    %670 = arith.truncf %669 : vector<8x64xf32> to vector<8x64xbf16>
    %671 = vector.extract_strided_slice %639 {offsets = [0, 64], sizes = [8, 64], strides = [1, 1]} : vector<8x128xf32> to vector<8x64xf32>
    %672 = arith.truncf %671 : vector<8x64xf32> to vector<8x64xbf16>
    %673 = vector.extract_strided_slice %640 {offsets = [0, 64], sizes = [8, 64], strides = [1, 1]} : vector<8x128xf32> to vector<8x64xf32>
    %674 = arith.truncf %673 : vector<8x64xf32> to vector<8x64xbf16>
    %cst_294 = arith.constant dense<0.000000e+00> : vector<8x8xf32>
    %675 = tpu.matmul %670, %672, %cst_294 {dimension_numbers = #tpu.dot_dimension_numbers<[1], [1], [0], [0], [0, 0, 1, 0], [], []>} : vector<8x64xbf16>, vector<8x64xbf16>, vector<8x8xf32> -> vector<8x8xf32>
    %cst_295 = arith.constant 1.250000e-01 : f32
    %676 = vector.broadcast %cst_295 : f32 to vector<8x8xf32>
    %677 = arith.mulf %675, %676 : vector<8x8xf32>
    %cst_296 = arith.constant dense<0xFF800000> : vector<8xf32>
    %678 = vector.multi_reduction <maximumf>, %677, %cst_296 [1] : vector<8x8xf32> to vector<8xf32>
    %679 = vector.shape_cast %678 : vector<8xf32> to vector<8x1xf32>
    %680 = vector.broadcast %679 : vector<8x1xf32> to vector<8x8xf32>
    %681 = arith.subf %677, %680 : vector<8x8xf32>
    %682 = math.exp %681 : vector<8x8xf32>
    %cst_297 = arith.constant dense<0.000000e+00> : vector<8xf32>
    %683 = vector.multi_reduction <add>, %682, %cst_297 [1] : vector<8x8xf32> to vector<8xf32>
    %684 = vector.shape_cast %683 : vector<8xf32> to vector<8x1xf32>
    %685 = tpu.reciprocal %684 {approx = true} : vector<8x1xf32> -> vector<8x1xf32>
    %686 = vector.broadcast %685 : vector<8x1xf32> to vector<8x8xf32>
    %687 = arith.mulf %682, %686 : vector<8x8xf32>
    %688 = arith.truncf %687 : vector<8x8xf32> to vector<8x8xbf16>
    %cst_298 = arith.constant dense<0.000000e+00> : vector<8x64xf32>
    %689 = tpu.matmul %688, %674, %cst_298 {dimension_numbers = #tpu.dot_dimension_numbers<[1], [0], [0], [1], [0, 0, 1, 1], [], []>} : vector<8x8xbf16>, vector<8x64xbf16>, vector<8x64xf32> -> vector<8x64xf32>
    %690 = arith.truncf %689 : vector<8x64xf32> to vector<8x64xbf16>
    %691 = vector.extract_strided_slice %642 {offsets = [64, 0], sizes = [64, 128], strides = [1, 1]} : vector<128x128xbf16> to vector<64x128xbf16>
    %cst_299 = arith.constant dense<0.000000e+00> : vector<8x128xf32>
    %692 = tpu.matmul %690, %691, %cst_299 {dimension_numbers = #tpu.dot_dimension_numbers<[1], [0], [0], [1], [0, 0, 1, 1], [], []>} : vector<8x64xbf16>, vector<64x128xbf16>, vector<8x128xf32> -> vector<8x128xf32>
    %693 = arith.addf %668, %692 : vector<8x128xf32>
    %694 = vector.broadcast %644 : vector<1x128xf32> to vector<8x128xf32>
    %695 = arith.addf %693, %694 : vector<8x128xf32>
    %696 = arith.addf %629, %695 : vector<8x128xf32>
    %c1_300 = arith.constant 1 : index
    %c0_301 = arith.constant 0 : index
    %c0_302 = arith.constant 0 : index
    %697 = vector.load %arg27[%c1_300, %c0_301, %c0_302] : memref<2x1x128xf32, #tpu.memory_space<vmem>>, vector<1x1x128xf32>
    %698 = vector.shape_cast %697 : vector<1x1x128xf32> to vector<1x128xf32>
    %c1_303 = arith.constant 1 : index
    %c0_304 = arith.constant 0 : index
    %c0_305 = arith.constant 0 : index
    %699 = vector.load %arg28[%c1_303, %c0_304, %c0_305] : memref<2x1x128xf32, #tpu.memory_space<vmem>>, vector<1x1x128xf32>
    %700 = vector.shape_cast %699 : vector<1x1x128xf32> to vector<1x128xf32>
    %cst_306 = arith.constant dense<0.000000e+00> : vector<8xf32>
    %701 = vector.multi_reduction <add>, %696, %cst_306 [1] : vector<8x128xf32> to vector<8xf32>
    %702 = vector.shape_cast %701 : vector<8xf32> to vector<8x1xf32>
    %cst_307 = arith.constant 1.280000e+02 : f32
    %703 = vector.broadcast %cst_307 : f32 to vector<8x1xf32>
    %704 = arith.divf %702, %703 : vector<8x1xf32>
    %705 = vector.broadcast %704 : vector<8x1xf32> to vector<8x128xf32>
    %706 = arith.subf %696, %705 : vector<8x128xf32>
    %707 = vector.broadcast %704 : vector<8x1xf32> to vector<8x128xf32>
    %708 = arith.subf %696, %707 : vector<8x128xf32>
    %709 = arith.mulf %706, %708 : vector<8x128xf32>
    %cst_308 = arith.constant dense<0.000000e+00> : vector<8xf32>
    %710 = vector.multi_reduction <add>, %709, %cst_308 [1] : vector<8x128xf32> to vector<8xf32>
    %711 = vector.shape_cast %710 : vector<8xf32> to vector<8x1xf32>
    %cst_309 = arith.constant 1.280000e+02 : f32
    %712 = vector.broadcast %cst_309 : f32 to vector<8x1xf32>
    %713 = arith.divf %711, %712 : vector<8x1xf32>
    %714 = vector.broadcast %704 : vector<8x1xf32> to vector<8x128xf32>
    %715 = arith.subf %696, %714 : vector<8x128xf32>
    %cst_310 = arith.constant 9.99999996E-13 : f32
    %716 = vector.broadcast %cst_310 : f32 to vector<8x1xf32>
    %717 = arith.addf %713, %716 : vector<8x1xf32>
    %718 = math.rsqrt %717 : vector<8x1xf32>
    %719 = vector.broadcast %718 : vector<8x1xf32> to vector<8x128xf32>
    %720 = arith.mulf %715, %719 : vector<8x128xf32>
    %721 = vector.broadcast %698 : vector<1x128xf32> to vector<8x128xf32>
    %722 = arith.mulf %720, %721 : vector<8x128xf32>
    %723 = vector.broadcast %700 : vector<1x128xf32> to vector<8x128xf32>
    %724 = arith.addf %722, %723 : vector<8x128xf32>
    %c1_311 = arith.constant 1 : index
    %c0_312 = arith.constant 0 : index
    %c0_313 = arith.constant 0 : index
    %725 = vector.load %arg29[%c1_311, %c0_312, %c0_313] : memref<2x128x128xbf16, #tpu.memory_space<vmem>>, vector<1x128x128xbf16>
    %726 = vector.shape_cast %725 : vector<1x128x128xbf16> to vector<128x128xbf16>
    %c1_314 = arith.constant 1 : index
    %c0_315 = arith.constant 0 : index
    %c0_316 = arith.constant 0 : index
    %727 = vector.load %arg30[%c1_314, %c0_315, %c0_316] : memref<2x1x128xf32, #tpu.memory_space<vmem>>, vector<1x1x128xf32>
    %728 = vector.shape_cast %727 : vector<1x1x128xf32> to vector<1x128xf32>
    %729 = arith.truncf %724 : vector<8x128xf32> to vector<8x128xbf16>
    %cst_317 = arith.constant dense<0.000000e+00> : vector<8x128xf32>
    %730 = tpu.matmul %729, %726, %cst_317 {dimension_numbers = #tpu.dot_dimension_numbers<[1], [0], [0], [1], [0, 0, 1, 1], [], []>} : vector<8x128xbf16>, vector<128x128xbf16>, vector<8x128xf32> -> vector<8x128xf32>
    %731 = vector.broadcast %728 : vector<1x128xf32> to vector<8x128xf32>
    %732 = arith.addf %730, %731 : vector<8x128xf32>
    %c1_318 = arith.constant 1 : index
    %c0_319 = arith.constant 0 : index
    %c0_320 = arith.constant 0 : index
    %733 = vector.load %arg31[%c1_318, %c0_319, %c0_320] : memref<2x128x256xbf16, #tpu.memory_space<vmem>>, vector<1x128x256xbf16>
    %734 = vector.shape_cast %733 : vector<1x128x256xbf16> to vector<128x256xbf16>
    %c1_321 = arith.constant 1 : index
    %c0_322 = arith.constant 0 : index
    %c0_323 = arith.constant 0 : index
    %735 = vector.load %arg32[%c1_321, %c0_322, %c0_323] : memref<2x1x256xf32, #tpu.memory_space<vmem>>, vector<1x1x256xf32>
    %736 = vector.shape_cast %735 : vector<1x1x256xf32> to vector<1x256xf32>
    %737 = arith.truncf %347 : vector<17x128xf32> to vector<17x128xbf16>
    %cst_324 = arith.constant dense<0.000000e+00> : vector<17x256xf32>
    %738 = tpu.matmul %737, %734, %cst_324 {dimension_numbers = #tpu.dot_dimension_numbers<[1], [0], [0], [1], [0, 0, 1, 1], [], []>} : vector<17x128xbf16>, vector<128x256xbf16>, vector<17x256xf32> -> vector<17x256xf32>
    %739 = vector.broadcast %736 : vector<1x256xf32> to vector<17x256xf32>
    %740 = arith.addf %738, %739 : vector<17x256xf32>
    %741 = vector.extract_strided_slice %740 {offsets = [0, 0], sizes = [17, 128], strides = [1, 1]} : vector<17x256xf32> to vector<17x128xf32>
    %742 = vector.extract_strided_slice %740 {offsets = [0, 128], sizes = [17, 128], strides = [1, 1]} : vector<17x256xf32> to vector<17x128xf32>
    %c1_325 = arith.constant 1 : index
    %c0_326 = arith.constant 0 : index
    %c0_327 = arith.constant 0 : index
    %743 = vector.load %arg33[%c1_325, %c0_326, %c0_327] : memref<2x128x128xbf16, #tpu.memory_space<vmem>>, vector<1x128x128xbf16>
    %744 = vector.shape_cast %743 : vector<1x128x128xbf16> to vector<128x128xbf16>
    %c1_328 = arith.constant 1 : index
    %c0_329 = arith.constant 0 : index
    %c0_330 = arith.constant 0 : index
    %745 = vector.load %arg34[%c1_328, %c0_329, %c0_330] : memref<2x1x128xf32, #tpu.memory_space<vmem>>, vector<1x1x128xf32>
    %746 = vector.shape_cast %745 : vector<1x1x128xf32> to vector<1x128xf32>
    %747 = vector.extract_strided_slice %732 {offsets = [0, 0], sizes = [8, 64], strides = [1, 1]} : vector<8x128xf32> to vector<8x64xf32>
    %748 = arith.truncf %747 : vector<8x64xf32> to vector<8x64xbf16>
    %749 = vector.extract_strided_slice %741 {offsets = [0, 0], sizes = [17, 64], strides = [1, 1]} : vector<17x128xf32> to vector<17x64xf32>
    %750 = arith.truncf %749 : vector<17x64xf32> to vector<17x64xbf16>
    %751 = vector.extract_strided_slice %742 {offsets = [0, 0], sizes = [17, 64], strides = [1, 1]} : vector<17x128xf32> to vector<17x64xf32>
    %752 = arith.truncf %751 : vector<17x64xf32> to vector<17x64xbf16>
    %cst_331 = arith.constant dense<0.000000e+00> : vector<8x17xf32>
    %753 = tpu.matmul %748, %750, %cst_331 {dimension_numbers = #tpu.dot_dimension_numbers<[1], [1], [0], [0], [0, 0, 1, 0], [], []>} : vector<8x64xbf16>, vector<17x64xbf16>, vector<8x17xf32> -> vector<8x17xf32>
    %cst_332 = arith.constant 1.250000e-01 : f32
    %754 = vector.broadcast %cst_332 : f32 to vector<8x17xf32>
    %755 = arith.mulf %753, %754 : vector<8x17xf32>
    %cst_333 = arith.constant dense<0xFF800000> : vector<8xf32>
    %756 = vector.multi_reduction <maximumf>, %755, %cst_333 [1] : vector<8x17xf32> to vector<8xf32>
    %757 = vector.shape_cast %756 : vector<8xf32> to vector<8x1xf32>
    %758 = vector.broadcast %757 : vector<8x1xf32> to vector<8x17xf32>
    %759 = arith.subf %755, %758 : vector<8x17xf32>
    %760 = math.exp %759 : vector<8x17xf32>
    %cst_334 = arith.constant dense<0.000000e+00> : vector<8xf32>
    %761 = vector.multi_reduction <add>, %760, %cst_334 [1] : vector<8x17xf32> to vector<8xf32>
    %762 = vector.shape_cast %761 : vector<8xf32> to vector<8x1xf32>
    %763 = tpu.reciprocal %762 {approx = true} : vector<8x1xf32> -> vector<8x1xf32>
    %764 = vector.broadcast %763 : vector<8x1xf32> to vector<8x17xf32>
    %765 = arith.mulf %760, %764 : vector<8x17xf32>
    %766 = arith.truncf %765 : vector<8x17xf32> to vector<8x17xbf16>
    %cst_335 = arith.constant dense<0.000000e+00> : vector<8x64xf32>
    %767 = tpu.matmul %766, %752, %cst_335 {dimension_numbers = #tpu.dot_dimension_numbers<[1], [0], [0], [1], [0, 0, 1, 1], [], []>} : vector<8x17xbf16>, vector<17x64xbf16>, vector<8x64xf32> -> vector<8x64xf32>
    %768 = arith.truncf %767 : vector<8x64xf32> to vector<8x64xbf16>
    %769 = vector.extract_strided_slice %744 {offsets = [0, 0], sizes = [64, 128], strides = [1, 1]} : vector<128x128xbf16> to vector<64x128xbf16>
    %cst_336 = arith.constant dense<0.000000e+00> : vector<8x128xf32>
    %770 = tpu.matmul %768, %769, %cst_336 {dimension_numbers = #tpu.dot_dimension_numbers<[1], [0], [0], [1], [0, 0, 1, 1], [], []>} : vector<8x64xbf16>, vector<64x128xbf16>, vector<8x128xf32> -> vector<8x128xf32>
    %771 = vector.extract_strided_slice %732 {offsets = [0, 64], sizes = [8, 64], strides = [1, 1]} : vector<8x128xf32> to vector<8x64xf32>
    %772 = arith.truncf %771 : vector<8x64xf32> to vector<8x64xbf16>
    %773 = vector.extract_strided_slice %741 {offsets = [0, 64], sizes = [17, 64], strides = [1, 1]} : vector<17x128xf32> to vector<17x64xf32>
    %774 = arith.truncf %773 : vector<17x64xf32> to vector<17x64xbf16>
    %775 = vector.extract_strided_slice %742 {offsets = [0, 64], sizes = [17, 64], strides = [1, 1]} : vector<17x128xf32> to vector<17x64xf32>
    %776 = arith.truncf %775 : vector<17x64xf32> to vector<17x64xbf16>
    %cst_337 = arith.constant dense<0.000000e+00> : vector<8x17xf32>
    %777 = tpu.matmul %772, %774, %cst_337 {dimension_numbers = #tpu.dot_dimension_numbers<[1], [1], [0], [0], [0, 0, 1, 0], [], []>} : vector<8x64xbf16>, vector<17x64xbf16>, vector<8x17xf32> -> vector<8x17xf32>
    %cst_338 = arith.constant 1.250000e-01 : f32
    %778 = vector.broadcast %cst_338 : f32 to vector<8x17xf32>
    %779 = arith.mulf %777, %778 : vector<8x17xf32>
    %cst_339 = arith.constant dense<0xFF800000> : vector<8xf32>
    %780 = vector.multi_reduction <maximumf>, %779, %cst_339 [1] : vector<8x17xf32> to vector<8xf32>
    %781 = vector.shape_cast %780 : vector<8xf32> to vector<8x1xf32>
    %782 = vector.broadcast %781 : vector<8x1xf32> to vector<8x17xf32>
    %783 = arith.subf %779, %782 : vector<8x17xf32>
    %784 = math.exp %783 : vector<8x17xf32>
    %cst_340 = arith.constant dense<0.000000e+00> : vector<8xf32>
    %785 = vector.multi_reduction <add>, %784, %cst_340 [1] : vector<8x17xf32> to vector<8xf32>
    %786 = vector.shape_cast %785 : vector<8xf32> to vector<8x1xf32>
    %787 = tpu.reciprocal %786 {approx = true} : vector<8x1xf32> -> vector<8x1xf32>
    %788 = vector.broadcast %787 : vector<8x1xf32> to vector<8x17xf32>
    %789 = arith.mulf %784, %788 : vector<8x17xf32>
    %790 = arith.truncf %789 : vector<8x17xf32> to vector<8x17xbf16>
    %cst_341 = arith.constant dense<0.000000e+00> : vector<8x64xf32>
    %791 = tpu.matmul %790, %776, %cst_341 {dimension_numbers = #tpu.dot_dimension_numbers<[1], [0], [0], [1], [0, 0, 1, 1], [], []>} : vector<8x17xbf16>, vector<17x64xbf16>, vector<8x64xf32> -> vector<8x64xf32>
    %792 = arith.truncf %791 : vector<8x64xf32> to vector<8x64xbf16>
    %793 = vector.extract_strided_slice %744 {offsets = [64, 0], sizes = [64, 128], strides = [1, 1]} : vector<128x128xbf16> to vector<64x128xbf16>
    %cst_342 = arith.constant dense<0.000000e+00> : vector<8x128xf32>
    %794 = tpu.matmul %792, %793, %cst_342 {dimension_numbers = #tpu.dot_dimension_numbers<[1], [0], [0], [1], [0, 0, 1, 1], [], []>} : vector<8x64xbf16>, vector<64x128xbf16>, vector<8x128xf32> -> vector<8x128xf32>
    %795 = arith.addf %770, %794 : vector<8x128xf32>
    %796 = vector.broadcast %746 : vector<1x128xf32> to vector<8x128xf32>
    %797 = arith.addf %795, %796 : vector<8x128xf32>
    %798 = arith.addf %724, %797 : vector<8x128xf32>
    %c1_343 = arith.constant 1 : index
    %c0_344 = arith.constant 0 : index
    %c0_345 = arith.constant 0 : index
    %799 = vector.load %arg35[%c1_343, %c0_344, %c0_345] : memref<2x1x128xf32, #tpu.memory_space<vmem>>, vector<1x1x128xf32>
    %800 = vector.shape_cast %799 : vector<1x1x128xf32> to vector<1x128xf32>
    %c1_346 = arith.constant 1 : index
    %c0_347 = arith.constant 0 : index
    %c0_348 = arith.constant 0 : index
    %801 = vector.load %arg36[%c1_346, %c0_347, %c0_348] : memref<2x1x128xf32, #tpu.memory_space<vmem>>, vector<1x1x128xf32>
    %802 = vector.shape_cast %801 : vector<1x1x128xf32> to vector<1x128xf32>
    %cst_349 = arith.constant dense<0.000000e+00> : vector<8xf32>
    %803 = vector.multi_reduction <add>, %798, %cst_349 [1] : vector<8x128xf32> to vector<8xf32>
    %804 = vector.shape_cast %803 : vector<8xf32> to vector<8x1xf32>
    %cst_350 = arith.constant 1.280000e+02 : f32
    %805 = vector.broadcast %cst_350 : f32 to vector<8x1xf32>
    %806 = arith.divf %804, %805 : vector<8x1xf32>
    %807 = vector.broadcast %806 : vector<8x1xf32> to vector<8x128xf32>
    %808 = arith.subf %798, %807 : vector<8x128xf32>
    %809 = vector.broadcast %806 : vector<8x1xf32> to vector<8x128xf32>
    %810 = arith.subf %798, %809 : vector<8x128xf32>
    %811 = arith.mulf %808, %810 : vector<8x128xf32>
    %cst_351 = arith.constant dense<0.000000e+00> : vector<8xf32>
    %812 = vector.multi_reduction <add>, %811, %cst_351 [1] : vector<8x128xf32> to vector<8xf32>
    %813 = vector.shape_cast %812 : vector<8xf32> to vector<8x1xf32>
    %cst_352 = arith.constant 1.280000e+02 : f32
    %814 = vector.broadcast %cst_352 : f32 to vector<8x1xf32>
    %815 = arith.divf %813, %814 : vector<8x1xf32>
    %816 = vector.broadcast %806 : vector<8x1xf32> to vector<8x128xf32>
    %817 = arith.subf %798, %816 : vector<8x128xf32>
    %cst_353 = arith.constant 9.99999996E-13 : f32
    %818 = vector.broadcast %cst_353 : f32 to vector<8x1xf32>
    %819 = arith.addf %815, %818 : vector<8x1xf32>
    %820 = math.rsqrt %819 : vector<8x1xf32>
    %821 = vector.broadcast %820 : vector<8x1xf32> to vector<8x128xf32>
    %822 = arith.mulf %817, %821 : vector<8x128xf32>
    %823 = vector.broadcast %800 : vector<1x128xf32> to vector<8x128xf32>
    %824 = arith.mulf %822, %823 : vector<8x128xf32>
    %825 = vector.broadcast %802 : vector<1x128xf32> to vector<8x128xf32>
    %826 = arith.addf %824, %825 : vector<8x128xf32>
    %c1_354 = arith.constant 1 : index
    %c0_355 = arith.constant 0 : index
    %c0_356 = arith.constant 0 : index
    %827 = vector.load %arg37[%c1_354, %c0_355, %c0_356] : memref<2x128x512xbf16, #tpu.memory_space<vmem>>, vector<1x128x512xbf16>
    %828 = vector.shape_cast %827 : vector<1x128x512xbf16> to vector<128x512xbf16>
    %c1_357 = arith.constant 1 : index
    %c0_358 = arith.constant 0 : index
    %c0_359 = arith.constant 0 : index
    %829 = vector.load %arg38[%c1_357, %c0_358, %c0_359] : memref<2x1x512xf32, #tpu.memory_space<vmem>>, vector<1x1x512xf32>
    %830 = vector.shape_cast %829 : vector<1x1x512xf32> to vector<1x512xf32>
    %831 = arith.truncf %826 : vector<8x128xf32> to vector<8x128xbf16>
    %cst_360 = arith.constant dense<0.000000e+00> : vector<8x512xf32>
    %832 = tpu.matmul %831, %828, %cst_360 {dimension_numbers = #tpu.dot_dimension_numbers<[1], [0], [0], [1], [0, 0, 1, 1], [], []>} : vector<8x128xbf16>, vector<128x512xbf16>, vector<8x512xf32> -> vector<8x512xf32>
    %833 = vector.broadcast %830 : vector<1x512xf32> to vector<8x512xf32>
    %834 = arith.addf %832, %833 : vector<8x512xf32>
    %cst_361 = arith.constant 5.000000e-01 : f32
    %835 = vector.broadcast %cst_361 : f32 to vector<8x512xf32>
    %836 = arith.mulf %835, %834 : vector<8x512xf32>
    %cst_362 = arith.constant 4.471500e-02 : f32
    %837 = vector.broadcast %cst_362 : f32 to vector<8x512xf32>
    %838 = arith.mulf %837, %834 : vector<8x512xf32>
    %839 = arith.mulf %838, %834 : vector<8x512xf32>
    %840 = arith.mulf %839, %834 : vector<8x512xf32>
    %841 = arith.addf %834, %840 : vector<8x512xf32>
    %cst_363 = arith.constant 0.797884583 : f32
    %842 = vector.broadcast %cst_363 : f32 to vector<8x512xf32>
    %843 = arith.mulf %842, %841 : vector<8x512xf32>
    %844 = math.tanh %843 : vector<8x512xf32>
    %cst_364 = arith.constant 1.000000e+00 : f32
    %845 = vector.broadcast %cst_364 : f32 to vector<8x512xf32>
    %846 = arith.addf %845, %844 : vector<8x512xf32>
    %847 = arith.mulf %836, %846 : vector<8x512xf32>
    %c1_365 = arith.constant 1 : index
    %c0_366 = arith.constant 0 : index
    %c0_367 = arith.constant 0 : index
    %848 = vector.load %arg39[%c1_365, %c0_366, %c0_367] : memref<2x512x128xbf16, #tpu.memory_space<vmem>>, vector<1x512x128xbf16>
    %849 = vector.shape_cast %848 : vector<1x512x128xbf16> to vector<512x128xbf16>
    %c1_368 = arith.constant 1 : index
    %c0_369 = arith.constant 0 : index
    %c0_370 = arith.constant 0 : index
    %850 = vector.load %arg40[%c1_368, %c0_369, %c0_370] : memref<2x1x128xf32, #tpu.memory_space<vmem>>, vector<1x1x128xf32>
    %851 = vector.shape_cast %850 : vector<1x1x128xf32> to vector<1x128xf32>
    %852 = arith.truncf %847 : vector<8x512xf32> to vector<8x512xbf16>
    %cst_371 = arith.constant dense<0.000000e+00> : vector<8x128xf32>
    %853 = tpu.matmul %852, %849, %cst_371 {dimension_numbers = #tpu.dot_dimension_numbers<[1], [0], [0], [1], [0, 0, 1, 1], [], []>} : vector<8x512xbf16>, vector<512x128xbf16>, vector<8x128xf32> -> vector<8x128xf32>
    %854 = vector.broadcast %851 : vector<1x128xf32> to vector<8x128xf32>
    %855 = arith.addf %853, %854 : vector<8x128xf32>
    %856 = arith.addf %826, %855 : vector<8x128xf32>
    %c1_372 = arith.constant 1 : index
    %c0_373 = arith.constant 0 : index
    %c0_374 = arith.constant 0 : index
    %857 = vector.load %arg41[%c1_372, %c0_373, %c0_374] : memref<2x1x128xf32, #tpu.memory_space<vmem>>, vector<1x1x128xf32>
    %858 = vector.shape_cast %857 : vector<1x1x128xf32> to vector<1x128xf32>
    %c1_375 = arith.constant 1 : index
    %c0_376 = arith.constant 0 : index
    %c0_377 = arith.constant 0 : index
    %859 = vector.load %arg42[%c1_375, %c0_376, %c0_377] : memref<2x1x128xf32, #tpu.memory_space<vmem>>, vector<1x1x128xf32>
    %860 = vector.shape_cast %859 : vector<1x1x128xf32> to vector<1x128xf32>
    %cst_378 = arith.constant dense<0.000000e+00> : vector<8xf32>
    %861 = vector.multi_reduction <add>, %856, %cst_378 [1] : vector<8x128xf32> to vector<8xf32>
    %862 = vector.shape_cast %861 : vector<8xf32> to vector<8x1xf32>
    %cst_379 = arith.constant 1.280000e+02 : f32
    %863 = vector.broadcast %cst_379 : f32 to vector<8x1xf32>
    %864 = arith.divf %862, %863 : vector<8x1xf32>
    %865 = vector.broadcast %864 : vector<8x1xf32> to vector<8x128xf32>
    %866 = arith.subf %856, %865 : vector<8x128xf32>
    %867 = vector.broadcast %864 : vector<8x1xf32> to vector<8x128xf32>
    %868 = arith.subf %856, %867 : vector<8x128xf32>
    %869 = arith.mulf %866, %868 : vector<8x128xf32>
    %cst_380 = arith.constant dense<0.000000e+00> : vector<8xf32>
    %870 = vector.multi_reduction <add>, %869, %cst_380 [1] : vector<8x128xf32> to vector<8xf32>
    %871 = vector.shape_cast %870 : vector<8xf32> to vector<8x1xf32>
    %cst_381 = arith.constant 1.280000e+02 : f32
    %872 = vector.broadcast %cst_381 : f32 to vector<8x1xf32>
    %873 = arith.divf %871, %872 : vector<8x1xf32>
    %874 = vector.broadcast %864 : vector<8x1xf32> to vector<8x128xf32>
    %875 = arith.subf %856, %874 : vector<8x128xf32>
    %cst_382 = arith.constant 9.99999996E-13 : f32
    %876 = vector.broadcast %cst_382 : f32 to vector<8x1xf32>
    %877 = arith.addf %873, %876 : vector<8x1xf32>
    %878 = math.rsqrt %877 : vector<8x1xf32>
    %879 = vector.broadcast %878 : vector<8x1xf32> to vector<8x128xf32>
    %880 = arith.mulf %875, %879 : vector<8x128xf32>
    %881 = vector.broadcast %858 : vector<1x128xf32> to vector<8x128xf32>
    %882 = arith.mulf %880, %881 : vector<8x128xf32>
    %883 = vector.broadcast %860 : vector<1x128xf32> to vector<8x128xf32>
    %884 = arith.addf %882, %883 : vector<8x128xf32>
    %885 = vector.extract_strided_slice %884 {offsets = [0, 0], sizes = [1, 128], strides = [1, 1]} : vector<8x128xf32> to vector<1x128xf32>
    %c0_383 = arith.constant 0 : index
    %c0_384 = arith.constant 0 : index
    %c0_385 = arith.constant 0 : index
    %886 = vector.load %arg43[%c0_383, %c0_384, %c0_385] : memref<1x1x128xf32, #tpu.memory_space<vmem>>, vector<1x1x128xf32>
    %887 = vector.shape_cast %886 : vector<1x1x128xf32> to vector<1x128xf32>
    %888 = vector.shape_cast %885 : vector<1x128xf32> to vector<1x1x128xf32>
    tpu.vector_store %arg43[%c0_383, %c0_384, %c0_385], %888 {strides = array<i32>} : memref<1x1x128xf32, #tpu.memory_space<vmem>>, vector<1x1x128xf32>,
    return
  }
  func.func @transform_0(%arg0: i32) -> (i32, i32, i32) {
    %c0_i32 = arith.constant 0 : i32
    %c0_i32_0 = arith.constant 0 : i32
    %c0_i32_1 = arith.constant 0 : i32
    return %arg0, %c0_i32, %c0_i32_0 : i32, i32, i32
  }
  func.func @transform_1(%arg0: i32) -> (i32, i32) {
    %c0_i32 = arith.constant 0 : i32
    %c0_i32_0 = arith.constant 0 : i32
    %c0_i32_1 = arith.constant 0 : i32
    return %c0_i32, %c0_i32_0 : i32, i32
  }
  func.func @transform_2(%arg0: i32) -> (i32, i32) {
    %c0_i32 = arith.constant 0 : i32
    %c0_i32_0 = arith.constant 0 : i32
    %c0_i32_1 = arith.constant 0 : i32
    return %c0_i32, %c0_i32_0 : i32, i32
  }
  func.func @transform_3(%arg0: i32) -> (i32, i32) {
    %c0_i32 = arith.constant 0 : i32
    %c0_i32_0 = arith.constant 0 : i32
    %c0_i32_1 = arith.constant 0 : i32
    return %c0_i32, %c0_i32_0 : i32, i32
  }
  func.func @transform_4(%arg0: i32) -> (i32, i32) {
    %c0_i32 = arith.constant 0 : i32
    %c0_i32_0 = arith.constant 0 : i32
    %c0_i32_1 = arith.constant 0 : i32
    return %c0_i32, %c0_i32_0 : i32, i32
  }
  func.func @transform_5(%arg0: i32) -> (i32, i32, i32) {
    %c0_i32 = arith.constant 0 : i32
    %c0_i32_0 = arith.constant 0 : i32
    %c0_i32_1 = arith.constant 0 : i32
    %c0_i32_2 = arith.constant 0 : i32
    return %c0_i32, %c0_i32_0, %c0_i32_1 : i32, i32, i32
  }
  func.func @transform_6(%arg0: i32) -> (i32, i32, i32) {
    %c0_i32 = arith.constant 0 : i32
    %c0_i32_0 = arith.constant 0 : i32
    %c0_i32_1 = arith.constant 0 : i32
    %c0_i32_2 = arith.constant 0 : i32
    return %c0_i32, %c0_i32_0, %c0_i32_1 : i32, i32, i32
  }
  func.func @transform_7(%arg0: i32) -> (i32, i32, i32) {
    %c0_i32 = arith.constant 0 : i32
    %c0_i32_0 = arith.constant 0 : i32
    %c0_i32_1 = arith.constant 0 : i32
    %c0_i32_2 = arith.constant 0 : i32
    return %c0_i32, %c0_i32_0, %c0_i32_1 : i32, i32, i32
  }
  func.func @transform_8(%arg0: i32) -> (i32, i32, i32) {
    %c0_i32 = arith.constant 0 : i32
    %c0_i32_0 = arith.constant 0 : i32
    %c0_i32_1 = arith.constant 0 : i32
    %c0_i32_2 = arith.constant 0 : i32
    return %c0_i32, %c0_i32_0, %c0_i32_1 : i32, i32, i32
  }
  func.func @transform_9(%arg0: i32) -> (i32, i32, i32) {
    %c0_i32 = arith.constant 0 : i32
    %c0_i32_0 = arith.constant 0 : i32
    %c0_i32_1 = arith.constant 0 : i32
    %c0_i32_2 = arith.constant 0 : i32
    return %c0_i32, %c0_i32_0, %c0_i32_1 : i32, i32, i32
  }
  func.func @transform_10(%arg0: i32) -> (i32, i32, i32) {
    %c0_i32 = arith.constant 0 : i32
    %c0_i32_0 = arith.constant 0 : i32
    %c0_i32_1 = arith.constant 0 : i32
    %c0_i32_2 = arith.constant 0 : i32
    return %c0_i32, %c0_i32_0, %c0_i32_1 : i32, i32, i32
  }
  func.func @transform_11(%arg0: i32) -> (i32, i32, i32) {
    %c0_i32 = arith.constant 0 : i32
    %c0_i32_0 = arith.constant 0 : i32
    %c0_i32_1 = arith.constant 0 : i32
    %c0_i32_2 = arith.constant 0 : i32
    return %c0_i32, %c0_i32_0, %c0_i32_1 : i32, i32, i32
  }
  func.func @transform_12(%arg0: i32) -> (i32, i32, i32) {
    %c0_i32 = arith.constant 0 : i32
    %c0_i32_0 = arith.constant 0 : i32
    %c0_i32_1 = arith.constant 0 : i32
    %c0_i32_2 = arith.constant 0 : i32
    return %c0_i32, %c0_i32_0, %c0_i32_1 : i32, i32, i32
  }
  func.func @transform_13(%arg0: i32) -> (i32, i32, i32) {
    %c0_i32 = arith.constant 0 : i32
    %c0_i32_0 = arith.constant 0 : i32
    %c0_i32_1 = arith.constant 0 : i32
    %c0_i32_2 = arith.constant 0 : i32
    return %c0_i32, %c0_i32_0, %c0_i32_1 : i32, i32, i32
  }
  func.func @transform_14(%arg0: i32) -> (i32, i32, i32) {
    %c0_i32 = arith.constant 0 : i32
    %c0_i32_0 = arith.constant 0 : i32
    %c0_i32_1 = arith.constant 0 : i32
    %c0_i32_2 = arith.constant 0 : i32
    return %c0_i32, %c0_i32_0, %c0_i32_1 : i32, i32, i32
  }
  func.func @transform_15(%arg0: i32) -> (i32, i32, i32) {
    %c0_i32 = arith.constant 0 : i32
    %c0_i32_0 = arith.constant 0 : i32
    %c0_i32_1 = arith.constant 0 : i32
    %c0_i32_2 = arith.constant 0 : i32
    return %c0_i32, %c0_i32_0, %c0_i32_1 : i32, i32, i32
  }
  func.func @transform_16(%arg0: i32) -> (i32, i32, i32) {
    %c0_i32 = arith.constant 0 : i32
    %c0_i32_0 = arith.constant 0 : i32
    %c0_i32_1 = arith.constant 0 : i32
    %c0_i32_2 = arith.constant 0 : i32
    return %c0_i32, %c0_i32_0, %c0_i32_1 : i32, i32, i32
  }
  func.func @transform_17(%arg0: i32) -> (i32, i32) {
    %c0_i32 = arith.constant 0 : i32
    %c0_i32_0 = arith.constant 0 : i32
    %c0_i32_1 = arith.constant 0 : i32
    return %c0_i32, %c0_i32_0 : i32, i32
  }
  func.func @transform_18(%arg0: i32) -> (i32, i32) {
    %c0_i32 = arith.constant 0 : i32
    %c0_i32_0 = arith.constant 0 : i32
    %c0_i32_1 = arith.constant 0 : i32
    return %c0_i32, %c0_i32_0 : i32, i32
  }
  func.func @transform_19(%arg0: i32) -> (i32, i32) {
    %c0_i32 = arith.constant 0 : i32
    %c0_i32_0 = arith.constant 0 : i32
    %c0_i32_1 = arith.constant 0 : i32
    return %c0_i32, %c0_i32_0 : i32, i32
  }
  func.func @transform_20(%arg0: i32) -> (i32, i32) {
    %c0_i32 = arith.constant 0 : i32
    %c0_i32_0 = arith.constant 0 : i32
    %c0_i32_1 = arith.constant 0 : i32
    return %c0_i32, %c0_i32_0 : i32, i32
  }
  func.func @transform_21(%arg0: i32) -> (i32, i32) {
    %c0_i32 = arith.constant 0 : i32
    %c0_i32_0 = arith.constant 0 : i32
    %c0_i32_1 = arith.constant 0 : i32
    return %c0_i32, %c0_i32_0 : i32, i32
  }
  func.func @transform_22(%arg0: i32) -> (i32, i32, i32) {
    %c0_i32 = arith.constant 0 : i32
    %c0_i32_0 = arith.constant 0 : i32
    %c0_i32_1 = arith.constant 0 : i32
    %c0_i32_2 = arith.constant 0 : i32
    return %c0_i32, %c0_i32_0, %c0_i32_1 : i32, i32, i32
  }
  func.func @transform_23(%arg0: i32) -> (i32, i32, i32) {
    %c0_i32 = arith.constant 0 : i32
    %c0_i32_0 = arith.constant 0 : i32
    %c0_i32_1 = arith.constant 0 : i32
    %c0_i32_2 = arith.constant 0 : i32
    return %c0_i32, %c0_i32_0, %c0_i32_1 : i32, i32, i32
  }
  func.func @transform_24(%arg0: i32) -> (i32, i32, i32) {
    %c0_i32 = arith.constant 0 : i32
    %c0_i32_0 = arith.constant 0 : i32
    %c0_i32_1 = arith.constant 0 : i32
    %c0_i32_2 = arith.constant 0 : i32
    return %c0_i32, %c0_i32_0, %c0_i32_1 : i32, i32, i32
  }
  func.func @transform_25(%arg0: i32) -> (i32, i32, i32) {
    %c0_i32 = arith.constant 0 : i32
    %c0_i32_0 = arith.constant 0 : i32
    %c0_i32_1 = arith.constant 0 : i32
    %c0_i32_2 = arith.constant 0 : i32
    return %c0_i32, %c0_i32_0, %c0_i32_1 : i32, i32, i32
  }
  func.func @transform_26(%arg0: i32) -> (i32, i32, i32) {
    %c0_i32 = arith.constant 0 : i32
    %c0_i32_0 = arith.constant 0 : i32
    %c0_i32_1 = arith.constant 0 : i32
    %c0_i32_2 = arith.constant 0 : i32
    return %c0_i32, %c0_i32_0, %c0_i32_1 : i32, i32, i32
  }
  func.func @transform_27(%arg0: i32) -> (i32, i32, i32) {
    %c0_i32 = arith.constant 0 : i32
    %c0_i32_0 = arith.constant 0 : i32
    %c0_i32_1 = arith.constant 0 : i32
    %c0_i32_2 = arith.constant 0 : i32
    return %c0_i32, %c0_i32_0, %c0_i32_1 : i32, i32, i32
  }
  func.func @transform_28(%arg0: i32) -> (i32, i32, i32) {
    %c0_i32 = arith.constant 0 : i32
    %c0_i32_0 = arith.constant 0 : i32
    %c0_i32_1 = arith.constant 0 : i32
    %c0_i32_2 = arith.constant 0 : i32
    return %c0_i32, %c0_i32_0, %c0_i32_1 : i32, i32, i32
  }
  func.func @transform_29(%arg0: i32) -> (i32, i32, i32) {
    %c0_i32 = arith.constant 0 : i32
    %c0_i32_0 = arith.constant 0 : i32
    %c0_i32_1 = arith.constant 0 : i32
    %c0_i32_2 = arith.constant 0 : i32
    return %c0_i32, %c0_i32_0, %c0_i32_1 : i32, i32, i32
  }
  func.func @transform_30(%arg0: i32) -> (i32, i32, i32) {
    %c0_i32 = arith.constant 0 : i32
    %c0_i32_0 = arith.constant 0 : i32
    %c0_i32_1 = arith.constant 0 : i32
    %c0_i32_2 = arith.constant 0 : i32
    return %c0_i32, %c0_i32_0, %c0_i32_1 : i32, i32, i32
  }
  func.func @transform_31(%arg0: i32) -> (i32, i32, i32) {
    %c0_i32 = arith.constant 0 : i32
    %c0_i32_0 = arith.constant 0 : i32
    %c0_i32_1 = arith.constant 0 : i32
    %c0_i32_2 = arith.constant 0 : i32
    return %c0_i32, %c0_i32_0, %c0_i32_1 : i32, i32, i32
  }
  func.func @transform_32(%arg0: i32) -> (i32, i32, i32) {
    %c0_i32 = arith.constant 0 : i32
    %c0_i32_0 = arith.constant 0 : i32
    %c0_i32_1 = arith.constant 0 : i32
    %c0_i32_2 = arith.constant 0 : i32
    return %c0_i32, %c0_i32_0, %c0_i32_1 : i32, i32, i32
  }
  func.func @transform_33(%arg0: i32) -> (i32, i32, i32) {
    %c0_i32 = arith.constant 0 : i32
    %c0_i32_0 = arith.constant 0 : i32
    %c0_i32_1 = arith.constant 0 : i32
    %c0_i32_2 = arith.constant 0 : i32
    return %c0_i32, %c0_i32_0, %c0_i32_1 : i32, i32, i32
  }
  func.func @transform_34(%arg0: i32) -> (i32, i32, i32) {
    %c0_i32 = arith.constant 0 : i32
    %c0_i32_0 = arith.constant 0 : i32
    %c0_i32_1 = arith.constant 0 : i32
    %c0_i32_2 = arith.constant 0 : i32
    return %c0_i32, %c0_i32_0, %c0_i32_1 : i32, i32, i32
  }
  func.func @transform_35(%arg0: i32) -> (i32, i32, i32) {
    %c0_i32 = arith.constant 0 : i32
    %c0_i32_0 = arith.constant 0 : i32
    %c0_i32_1 = arith.constant 0 : i32
    %c0_i32_2 = arith.constant 0 : i32
    return %c0_i32, %c0_i32_0, %c0_i32_1 : i32, i32, i32
  }
  func.func @transform_36(%arg0: i32) -> (i32, i32, i32) {
    %c0_i32 = arith.constant 0 : i32
    %c0_i32_0 = arith.constant 0 : i32
    %c0_i32_1 = arith.constant 0 : i32
    %c0_i32_2 = arith.constant 0 : i32
    return %c0_i32, %c0_i32_0, %c0_i32_1 : i32, i32, i32
  }
  func.func @transform_37(%arg0: i32) -> (i32, i32, i32) {
    %c0_i32 = arith.constant 0 : i32
    %c0_i32_0 = arith.constant 0 : i32
    %c0_i32_1 = arith.constant 0 : i32
    %c0_i32_2 = arith.constant 0 : i32
    return %c0_i32, %c0_i32_0, %c0_i32_1 : i32, i32, i32
  }
  func.func @transform_38(%arg0: i32) -> (i32, i32, i32) {
    %c0_i32 = arith.constant 0 : i32
    %c0_i32_0 = arith.constant 0 : i32
    %c0_i32_1 = arith.constant 0 : i32
    %c0_i32_2 = arith.constant 0 : i32
    return %c0_i32, %c0_i32_0, %c0_i32_1 : i32, i32, i32
  }
  func.func @transform_39(%arg0: i32) -> (i32, i32, i32) {
    %c0_i32 = arith.constant 0 : i32
    %c0_i32_0 = arith.constant 0 : i32
    %c0_i32_1 = arith.constant 0 : i32
    %c0_i32_2 = arith.constant 0 : i32
    return %c0_i32, %c0_i32_0, %c0_i32_1 : i32, i32, i32
  }
  func.func @transform_40(%arg0: i32) -> (i32, i32, i32) {
    %c0_i32 = arith.constant 0 : i32
    %c0_i32_0 = arith.constant 0 : i32
    %c0_i32_1 = arith.constant 0 : i32
    %c0_i32_2 = arith.constant 0 : i32
    return %c0_i32, %c0_i32_0, %c0_i32_1 : i32, i32, i32
  }
  func.func @transform_41(%arg0: i32) -> (i32, i32, i32) {
    %c0_i32 = arith.constant 0 : i32
    %c0_i32_0 = arith.constant 0 : i32
    %c0_i32_1 = arith.constant 0 : i32
    %c0_i32_2 = arith.constant 0 : i32
    return %c0_i32, %c0_i32_0, %c0_i32_1 : i32, i32, i32
  }
  func.func @transform_42(%arg0: i32) -> (i32, i32, i32) {
    %c0_i32 = arith.constant 0 : i32
    %c0_i32_0 = arith.constant 0 : i32
    %c0_i32_1 = arith.constant 0 : i32
    return %arg0, %c0_i32, %c0_i32_0 : i32, i32, i32
  }
}

</mosaic_0001>

<bundles_post_ra>
// kernel: blip2_image_forward.1
= control target key start
LH: loop header
LB: loop body
LE: loop exit
PB: predicated region body
PF: predicated region fallthrough
CT: control target
= control target key end

     0   :  { %s12847_s6 = smov 1   ;;  %s12848_s10 = smov 2   ;;  %s14720_s0 = inlined_call_operand.smem [shape: u32[43], index: -1, kind: input, shape index: {}] }
   0x1   :  { %s12923_s5 = sld [smem:[%s14720_s0]]   ;;  %s12849_s14 = smov 3  }
   0x2   :  { %s12928_s9 = sld [smem:[%s14720_s0 + %s12847_s6]]   ;;  %s12850_s18 = smov 4  }
   0x3   :  { %s12933_s13 = sld [smem:[%s14720_s0 + %s12848_s10]]   ;;  %s12851_s22 = smov 5  }
   0x4   :  { %s12938_s17 = sld [smem:[%s14720_s0 + %s12849_s14]]   ;;  %s12852_s26 = smov 6  }
   0x5   :  { %s12943_s21 = sld [smem:[%s14720_s0 + %s12850_s18]]   ;;  %s12853_s30 = smov 7  }
   0x6   :  { %s12948_s25 = sld [smem:[%s14720_s0 + %s12851_s22]]   ;;  %s12854_s4 = smov 8  }
   0x7   :  { %14778 = sst [smem:[#allocation37_spill]] %s12923_s5  ;;  %s12855_s10 = smov 9  }
   0x8   :  { %14779 = sst [smem:[#allocation38_spill]] %s12928_s9  ;;  %s12856_s15 = smov 10  }
   0x9   :  { %14780 = sst [smem:[#allocation39_spill]] %s12933_s13  ;;  %s12857_s20 = smov 11  }
   0xa   :  { %14781 = sst [smem:[#allocation40_spill]] %s12938_s17  ;;  %s12859_s1 = smov 13  }
   0xb   :  { %s12953_s29 = sld [smem:[%s14720_s0 + %s12852_s26]]   ;;  %s12858_s26 = smov 12  }
   0xc   :  { %14782 = sst [smem:[#allocation41_spill]] %s12948_s25  ;;  %s12860_s7 = smov 14  }
   0xd   :  { %s12958_s3 = sld [smem:[%s14720_s0 + %s12853_s30]]   ;;  %s12862_s22 = smov 16  }
   0xe   :  { %s12963_s8 = sld [smem:[%s14720_s0 + %s12854_s4]]   ;;  %s12863_s28 = smov 17  }
   0xf   :  { %s12968_s14 = sld [smem:[%s14720_s0 + %s12855_s10]]  }
  0x10   :  { %s12973_s19 = sld [smem:[%s14720_s0 + %s12856_s15]]   ;;  %s12861_s15 = smov 15  }
  0x11   :  { %14783 = sst [smem:[#allocation42_spill]] %s12953_s29 }
  0x12   :  { %s12978_s24 = sld [smem:[%s14720_s0 + %s12857_s20]]  }
  0x13   :  { %14784 = sst [smem:[#allocation43_spill]] %s12958_s3 }
  0x14   :  { %14785 = sst [smem:[#allocation44_spill]] %s12963_s8 }
  0x15   :  { %14786 = sst [smem:[#allocation45_spill]] %s12968_s14 }
  0x16   :  { %14787 = sst [smem:[#allocation46_spill]] %s12973_s19 }
  0x17   :  { %s12983_s30 = sld [smem:[%s14720_s0 + %s12858_s26]]  }
  0x18   :  { %14788 = sst [smem:[#allocation47_spill]] %s12978_s24 }
  0x19   :  { %s12988_s6 = sld [smem:[%s14720_s0 + %s12859_s1]]  }
  0x1a   :  { %s12993_s12 = sld [smem:[%s14720_s0 + %s12860_s7]]   ;;  %s12864_s7 = smov 18  }
  0x1b   :  { %s12998_s20 = sld [smem:[%s14720_s0 + %s12861_s15]]   ;;  %s12865_s15 = smov 19  }
  0x1c   :  { %s13003_s27 = sld [smem:[%s14720_s0 + %s12862_s22]]   ;;  %s12866_s22 = smov 20  }
  0x1d   :  { %14789 = sst [smem:[#allocation48_spill]] %s12983_s30 }
  0x1e   :  { %s13008_s4 = sld [smem:[%s14720_s0 + %s12863_s28]]   ;;  %s12867_s28 = smov 21  }
  0x1f   :  { %14790 = sst [smem:[#allocation49_spill]] %s12988_s6 }
  0x20   :  { %14791 = sst [smem:[#allocation50_spill]] %s12993_s12 }
  0x21   :  { %14792 = sst [smem:[#allocation51_spill]] %s12998_s20 }
  0x22   :  { %14793 = sst [smem:[#allocation52_spill]] %s13003_s27 }
  0x23   :  { %s13013_s12 = sld [smem:[%s14720_s0 + %s12864_s7]]   ;;  %s12868_s7 = smov 22  }
  0x24   :  { %14794 = sst [smem:[#allocation53_spill]] %s13008_s4 }
  0x25   :  { %s13018_s20 = sld [smem:[%s14720_s0 + %s12865_s15]]   ;;  %s12869_s15 = smov 23  }
  0x26   :  { %s13023_s27 = sld [smem:[%s14720_s0 + %s12866_s22]]   ;;  %s12870_s22 = smov 24  }
  0x27   :  { %s13028_s30 = sld [smem:[%s14720_s0 + %s12867_s28]]   ;;  %s12871_s28 = smov 25  }
  0x28   :  { %s13033_s24 = sld [smem:[%s14720_s0 + %s12868_s7]]   ;;  %s12872_s7 = smov 26  }
  0x29   :  { %14795 = sst [smem:[#allocation54_spill]] %s13013_s12 }
  0x2b   :  { %14796 = sst [smem:[#allocation55_spill]] %s13018_s20 }
  0x2c   :  { %14797 = sst [smem:[#allocation56_spill]] %s13023_s27 }
  0x2d   :  { %14798 = sst [smem:[#allocation57_spill]] %s13028_s30 }
  0x2e   :  { %14799 = sst [smem:[#allocation58_spill]] %s13033_s24 }
  0x2f   :  { %s13038_s20 = sld [smem:[%s14720_s0 + %s12869_s15]]   ;;  %s12873_s15 = smov 27  }
  0x30   :  { %s13043_s27 = sld [smem:[%s14720_s0 + %s12870_s22]]   ;;  %s12874_s22 = smov 28  }
  0x31   :  { %s13048_s30 = sld [smem:[%s14720_s0 + %s12871_s28]]   ;;  %s12875_s28 = smov 29  }
  0x32   :  { %s13053_s24 = sld [smem:[%s14720_s0 + %s12872_s7]]   ;;  %s12876_s7 = smov 30  }
  0x35   :  { %14800 = sst [smem:[#allocation59_spill]] %s13038_s20 }
  0x36   :  { %14801 = sst [smem:[#allocation60_spill]] %s13043_s27 }
  0x37   :  { %14802 = sst [smem:[#allocation61_spill]] %s13048_s30 }
  0x38   :  { %14803 = sst [smem:[#allocation62_spill]] %s13053_s24 }
  0x39   :  { %s13058_s20 = sld [smem:[%s14720_s0 + %s12873_s15]]   ;;  %s12877_s15 = smov 31  }
  0x3a   :  { %s13063_s27 = sld [smem:[%s14720_s0 + %s12874_s22]]   ;;  %s12878_s22 = smov 32  }
  0x3b   :  { %s13068_s30 = sld [smem:[%s14720_s0 + %s12875_s28]]   ;;  %s12879_s28 = smov 33  }
  0x3c   :  { %s13073_s24 = sld [smem:[%s14720_s0 + %s12876_s7]]   ;;  %s12880_s7 = smov 34  }
  0x3d   :  { %s13083_s6 = sld [smem:[%s14720_s0 + %s12878_s22]]   ;;  %s12882_s22 = smov 36  }
  0x3e   :  { %s13088_s19 = sld [smem:[%s14720_s0 + %s12879_s28]]   ;;  %s12883_s28 = smov 37  }
  0x3f   :  { %14804 = sst [smem:[#allocation63_spill]] %s13058_s20 }
  0x40   :  { %s13078_s20 = sld [smem:[%s14720_s0 + %s12877_s15]]   ;;  %s12881_s15 = smov 35  }
  0x41   :  { %s13098_s14 = sld [smem:[%s14720_s0 + %s12881_s15]]   ;;  %s12885_s15 = smov 39  }
  0x42   :  { %14805 = sst [smem:[#allocation64_spill]] %s13073_s24 }
  0x43   :  { %14806 = sst [smem:[#allocation65_spill]] %s13083_s6 }
  0x44   :  { %s13093_s24 = sld [smem:[%s14720_s0 + %s12880_s7]]   ;;  %s12884_s7 = smov 38  }
  0x45   :  { %s13103_s8 = sld [smem:[%s14720_s0 + %s12882_s22]]   ;;  %s12886_s22 = smov 40  }
  0x46   :  { %s13108_s29 = sld [smem:[%s14720_s0 + %s12883_s28]]   ;;  %s12887_s28 = smov 41  }
  0x47   :  { %s13113_s25 = sld [smem:[%s14720_s0 + %s12884_s7]]   ;;  %s12888_s7 = smov 42  }
  0x48   :  { %s13118_s3 = sld [smem:[%s14720_s0 + %s12885_s15]]  }
  0x49   :  { %s13128_s13 = sld [smem:[%s14720_s0 + %s12887_s28]]  }
  0x4a   :  { %14807 = sst [smem:[#allocation66_spill]] %s13093_s24 }
  0x4b   :  { %14808 = sst [smem:[#allocation67_spill]] %s13103_s8 }
  0x4c   :  { %s13123_s8 = sld [smem:[%s14720_s0 + %s12886_s22]]  }
  0x4d   :  { %14809 = sst [smem:[#allocation68_spill]] %s13113_s25 }
  0x4e   :  { %14810 = sst [smem:[#allocation69_spill]] %s13118_s3 }
  0x4f   :  { %s13133_s25 = sld [smem:[%s14720_s0 + %s12888_s7]]  }
  0x52   :  { %14811 = sst [smem:[#allocation70_spill]] %s13123_s8 }
  0x53   :  { %90 = vsyncpa [#allocation4], 0 }
  0x54   :  { %91 = vsyncpa [#allocation7], 0 }
  0x55   :  { %92 = vsyncpa [#allocation10], 0 }
  0x56   :  { %93 = vsyncpa [#allocation13], 0 }
  0x57   :  { %94 = vsyncpa [#allocation16], 0 }
  0x58   :  { %95 = vsyncpa [#allocation19], 0 }
  0x59   :  { %96 = vsyncpa [#allocation22], 0 }
  0x5a   :  { %97 = vsyncpa [#allocation25], 0 }
  0x5b   :  { %98 = vsyncpa [#allocation5], 0 }
  0x5c   :  { %100 = vsyncpa [#allocation5 + $0x1], 0  ;;  %s13135_s15 = smov 0   ;;  %s13137_s16 = smov 0  }
  0x5d   :  { %s13139_s18 = smov 0   ;;  %s13141_s22 = smov 0  }
  0x5e   :  { %14812 = sst [smem:[#allocation71_spill]] %s13141_s22 }
  0x5f LB: > { %s14814_s9 = sld [smem:[#allocation38_spill]]  ;;  %s14816_s4 = sld [smem:[#allocation53_spill]]  ;;  %s12841_s18 = sphi %s13139_s18, %s14896_s18   ;;  %s12837_s16 = sphi %s13137_s16, %s14898_s16   ;;  %s12833_s15 = sphi %s13135_s15, %s14897_s15  }
  0x60   : > { %s14815_s8 = sld [smem:[#allocation70_spill]]  ;;  %s14817_s3 = sld [smem:[#allocation69_spill]] }
  0x61   : > { %s14818_s24 = sld [smem:[#allocation66_spill]]  ;;  %s14819_s6 = sld [smem:[#allocation65_spill]] }
  0x62   : > { %s14820_s17 = sld [smem:[#allocation40_spill]]  ;;  %s14821_s12 = sld [smem:[#allocation54_spill]] }
  0x63   : > { %s14822_s22 = sld [smem:[#allocation71_spill]]  ;;  %14824 = sst [smem:[#allocation72_spill]] %s12841_s18 }
  0x64   : > { %14823 = sst [smem:[#allocation71_spill]] %s12833_s15  ;;  %s1000_s28 = sadd.s32 1, %s12841_s18 }
  0x65   : > { %p1010_p0 = scmp.ne.s32.totalorder %s12841_s18, %s12837_s16  ;;  %p1016_p3 = scmp.ne.s32.totalorder %s12837_s16, %s12833_s15 }
  0x68   : > { %s12331_s15 = scalar_lea.hbm %s14820_s17, 16 }
  0x69   : > { %14825 = sst [smem:[#allocation73_spill]] %s14822_s22  ;;  %s13156_s0 = sadd.s32 4294967295, %s14822_s22  }
  0x6a   : > { %s9587_s23 = sadd.s32 4294967294, %s14822_s22   ;;  %s13160_s26 = sadd.s32 1, %s14822_s22  }
  0x6b   : > { %14826 = sst [smem:[#allocation74_spill]] %s13160_s26  ;;  %s997_s1 = ssub.s32 %s14822_s22, %s13160_s26 }
  0x6c   : > { %p998_p1 = scmp.eq.s32.totalorder %s997_s1, 0  ;;  %p1011_p2 = scmp.eq.s32.totalorder %s13156_s0, 1 }
  0x6d   : > { %p1017_p4 = scmp.eq.s32.totalorder %s9587_s23, 1  ;;  %p9588_p7 = scmp.ge.s32.totalorder %s14822_s22, 1 }
  0x6e   : > { %s13171_s2 = scalar_select %p998_p1, %s12841_s18, %s1000_s28  }
  0x6f   : > { %p13173_p5 = por %p1011_p2, %p1010_p0  ;;  %p13177_p6 = por %p1017_p4, %p1016_p3 }
  0x70   : > { %14827 = sst [smem:[#allocation75_spill]] %s13171_s2  ;;  %p1024_p8 = scmp.lt.s32.totalorder %s14822_s22, 3 }
  0x71   : > { %s14828_s7 = scalar_select %p13173_p5, 1, 0 }
  0x72   : > { %s14829_s10 = scalar_select %p13177_p6, 1, 0 }
  0x73   : > { %p14747_p9 = scmp.eq.s32.totalorder %s13156_s0, 0  ;;  %p13184_p10 = pnand %p9588_p7, %p1024_p8 }
  0x74   : > { %14830 = sst [smem:[#allocation76_spill]] %s14829_s10  ;;  %s12889_s23 = smov [#allocation6]  }
  0x75   : > { %s14831_s11 = scalar_select %p13184_p10, 1, 0 }
  0x76   : > { %s1053_s28 = sshll.u32 %s12889_s23, 4  ;;  %p11391_p11 = pneg %p13184_p10  ;;  %s1054_s28 = int_to_ptr.vmem [resolvable:$true] %s1053_s28 }
  0x77   : > { %s12890_s1 = smov [#allocation9]   ;;  %s12891_s26 = smov [#allocation12]  }
  0x78   : > { %s1114_s2 = sshll.u32 %s12890_s1, 4  ;;  %p13192_p12 = pnand %p14747_p9, %p11391_p11  ;;  %s13196_s2 = int_to_ptr.vmem [resolvable:$true] %s1114_s2 }
  0x79   : > { %s1164_s10 = sshll.u32 %s12891_s26, 4  ;;  %p12332_p13 = scmp.ne.s32.totalorder %s14820_s17, %s12331_s15  ;;  %s13198_s10 = int_to_ptr.vmem [resolvable:$true] %s1164_s10 }
  0x7a   : > { %p13204_p0 = pneg %p13192_p12  ;;  %p12338_p3 = scmp.lt.u32.totalorder %s12331_s15, %s14820_s17 }
  0x7c   : > { %p12334_p1 = pnand %p13204_p0, %p12332_p13 }
  0x7e   : > { %p12335_p2 = pneg %p12334_p1 }
  0x80   : > { %p12340_p4 = pnand %p12338_p3, %p12335_p2 }
  0x82   : > { %12343 = shalt.err (!%p12340_p4)
}
  0x83   : > { %s12344_s1 = scalar_lea.vmem %s1054_s28, 16  ;;  %s12351_s26 = scalar_lea.vmem %s1054_s28, 32 }
  0x84   : > { %p12345_p7 = scmp.ne.s32.totalorder %s1054_s28, %s12344_s1  ;;  %p12352_p9 = scmp.lt.s32.totalorder %s1054_s28, %s1054_s28 }
  0x85   : > { %p12353_p6 = scmp.lt.s32.totalorder %s12351_s26, %s12344_s1 }
  0x86   : > { %p12347_p8 = pnand %p12345_p7, %p13204_p0 }
  0x87   : > { %p12354_p5 = por %p12353_p6, %p12352_p9 }
  0x88   : > { %p12348_p11 = pneg %p12347_p8 }
  0x8a   : > { %p12355_p10 = pnand %p12354_p5, %p12348_p11 }
  0x8c   : > { %12358 = shalt.err (!%p12355_p10)
}
  0x8d   : > { %11397 = dma.hbm_to_vmem [thread:$0]  (!%p13192_p12), %s14820_s17, 16, %s1054_s28, [#allocation7]  }
  0x8e   : > { %s12359_s15 = scalar_lea.hbm %s14821_s12, 16 }
  0x8f   : > { %p12360_p13 = scmp.ne.s32.totalorder %s14821_s12, %s12359_s15  ;;  %p12366_p3 = scmp.lt.u32.totalorder %s12359_s15, %s14821_s12 }
  0x91   : > { %p12362_p1 = pnand %p12360_p13, %p13204_p0 }
  0x93   : > { %p12363_p2 = pneg %p12362_p1 }
  0x95   : > { %p12368_p4 = pnand %p12366_p3, %p12363_p2 }
  0x97   : > { %12371 = shalt.err (!%p12368_p4)
}
  0x98   : > { %s12372_s1 = scalar_lea.vmem %s13196_s2, 16  ;;  %s12379_s26 = scalar_lea.vmem %s13196_s2, 32 }
  0x99   : > { %p12373_p5 = scmp.ne.s32.totalorder %s13196_s2, %s12372_s1  ;;  %p12380_p10 = scmp.lt.s32.totalorder %s13196_s2, %s13196_s2 }
  0x9a   : > { %p12381_p7 = scmp.lt.s32.totalorder %s12379_s26, %s12372_s1 }
  0x9b   : > { %p12375_p6 = pnand %p12373_p5, %p13204_p0 }
  0x9c   : > { %p12382_p8 = por %p12381_p7, %p12380_p10 }
  0x9d   : > { %p12376_p9 = pneg %p12375_p6 }
  0x9f   : > { %p12383_p11 = pnand %p12382_p8, %p12376_p9 }
  0xa1   : > { %12386 = shalt.err (!%p12383_p11)
}
  0xa2   : > { %11403 = dma.hbm_to_vmem [thread:$0]  (!%p13192_p12), %s14821_s12, 16, %s13196_s2, [#allocation10]  }
  0xa3   : > { %s12387_s28 = scalar_lea.hbm %s13068_s30, 32 }
  0xa4   : > { %p12388_p13 = scmp.ne.s32.totalorder %s13068_s30, %s12387_s28  ;;  %p12394_p3 = scmp.lt.u32.totalorder %s12387_s28, %s13068_s30 }
  0xa6   : > { %p12390_p1 = pnand %p12388_p13, %p13204_p0 }
  0xa8   : > { %p12391_p2 = pneg %p12390_p1 }
  0xaa   : > { %p12396_p4 = pnand %p12394_p3, %p12391_p2 }
  0xac   : > { %12399 = shalt.err (!%p12396_p4)
}
  0xad   : > { %s12400_s15 = scalar_lea.vmem %s13198_s10, 32  ;;  %p12408_p10 = scmp.lt.s32.totalorder %s13198_s10, %s13198_s10 }
  0xae   : > { %p12401_p5 = scmp.ne.s32.totalorder %s13198_s10, %s12400_s15  ;;  %p12409_p7 = scmp.lt.s32.totalorder %s12400_s15, %s12400_s15 }
  0xb0   : > { %p12403_p6 = pnand %p12401_p5, %p13204_p0  ;;  %p12410_p8 = por %p12409_p7, %p12408_p10 }
  0xb2   : > { %p12404_p9 = pneg %p12403_p6 }
  0xb4   : > { %p12411_p11 = pnand %p12410_p8, %p12404_p9 }
  0xb6   : > { %12414 = shalt.err (!%p12411_p11)
}
  0xb7   : > { %s14759_s2 = smov 16   ;;  %s12893_s1 = smov 1  }
  0xb8   : > { %11409 = dma.hbm_to_vmem [thread:$0]  (!%p13192_p12), %s13068_s30, 32, %s13198_s10, [#allocation13], %s14759_s2, %s14759_s2, %s12893_s1  }
  0xb9   : > { %s12894_s26 = smov [#allocation15]   ;;  %s12895_s15 = smov [#allocation18]  }
  0xba   : > { %s1193_s28 = sshll.u32 %s12894_s26, 4  ;;  %s1219_s12 = sshll.u32 %s12895_s15, 4  ;;  %s1194_s28 = int_to_ptr.vmem [resolvable:$true] %s1193_s28  ;;  %s1220_s12 = int_to_ptr.vmem [resolvable:$true] %s1219_s12 }
  0xbb   : > { %s12415_s17 = scalar_lea.hbm %s14819_s6, 2048 }
  0xbc   : > { %p12416_p13 = scmp.ne.s32.totalorder %s14819_s6, %s12415_s17  ;;  %p12422_p3 = scmp.lt.u32.totalorder %s12415_s17, %s14819_s6 }
  0xbe   : > { %p12418_p1 = pnand %p12416_p13, %p13204_p0 }
  0xc0   : > { %p12419_p2 = pneg %p12418_p1 }
  0xc2   : > { %p12424_p4 = pnand %p12422_p3, %p12419_p2 }
  0xc4   : > { %12427 = shalt.err (!%p12424_p4)
}
  0xc5   : > { %s12428_s22 = scalar_lea.vmem %s1194_s28, 2048  ;;  %p12436_p10 = scmp.lt.s32.totalorder %s1194_s28, %s1194_s28 }
  0xc6   : > { %p12429_p5 = scmp.ne.s32.totalorder %s1194_s28, %s12428_s22  ;;  %p12437_p7 = scmp.lt.s32.totalorder %s12428_s22, %s12428_s22 }
  0xc8   : > { %p12431_p6 = pnand %p12429_p5, %p13204_p0  ;;  %p12438_p8 = por %p12437_p7, %p12436_p10 }
  0xca   : > { %p12432_p9 = pneg %p12431_p6 }
  0xcc   : > { %p12439_p11 = pnand %p12438_p8, %p12432_p9 }
  0xce   : > { %12442 = shalt.err (!%p12439_p11)
}
  0xcf   : > { %s14753_s10 = smov 64   ;;  %s14755_s17 = smov 4  }
  0xd0   : > { %11415 = dma.hbm_to_vmem [thread:$0]  (!%p13192_p12), %s14819_s6, 2048, %s1194_s28, [#allocation16], %s14753_s10, %s14753_s10, %s14755_s17  }
  0xd1   : > { %s12443_s26 = scalar_lea.hbm %s14818_s24, 32 }
  0xd2   : > { %p12444_p13 = scmp.ne.s32.totalorder %s14818_s24, %s12443_s26  ;;  %p12450_p3 = scmp.lt.u32.totalorder %s12443_s26, %s14818_s24 }
  0xd4   : > { %p12446_p1 = pnand %p12444_p13, %p13204_p0 }
  0xd6   : > { %p12447_p2 = pneg %p12446_p1 }
  0xd8   : > { %p12452_p4 = pnand %p12450_p3, %p12447_p2 }
  0xda   : > { %12455 = shalt.err (!%p12452_p4)
}
  0xdb   : > { %s12456_s22 = scalar_lea.vmem %s1220_s12, 32  ;;  %p12464_p10 = scmp.lt.s32.totalorder %s1220_s12, %s1220_s12 }
  0xdc   : > { %p12457_p5 = scmp.ne.s32.totalorder %s1220_s12, %s12456_s22  ;;  %p12465_p7 = scmp.lt.s32.totalorder %s12456_s22, %s12456_s22 }
  0xde   : > { %p12459_p6 = pnand %p12457_p5, %p13204_p0  ;;  %p12466_p8 = por %p12465_p7, %p12464_p10 }
  0xe0   : > { %p12460_p9 = pneg %p12459_p6 }
  0xe2   : > { %p12467_p11 = pnand %p12466_p8, %p12460_p9 }
  0xe4   : > { %12470 = shalt.err (!%p12467_p11)
}
  0xe5   : > { %11421 = dma.hbm_to_vmem [thread:$0]  (!%p13192_p12), %s14818_s24, 32, %s1220_s12, [#allocation19], %s14759_s2, %s14759_s2, %s12893_s1  }
  0xe6   : > { %s12898_s28 = smov [#allocation21]   ;;  %s12899_s26 = smov [#allocation24]  }
  0xe7   : > { %s1248_s15 = sshll.u32 %s12898_s28, 4  ;;  %s1277_s10 = sshll.u32 %s12899_s26, 4  ;;  %s1249_s15 = int_to_ptr.vmem [resolvable:$true] %s1248_s15  ;;  %s1278_s10 = int_to_ptr.vmem [resolvable:$true] %s1277_s10 }
  0xe8   : > { %s12471_s22 = scalar_lea.hbm %s13108_s29, 128 }
  0xe9   : > { %p12472_p13 = scmp.ne.s32.totalorder %s13108_s29, %s12471_s22  ;;  %p12478_p3 = scmp.lt.u32.totalorder %s12471_s22, %s13108_s29 }
  0xeb   : > { %p12474_p1 = pnand %p12472_p13, %p13204_p0 }
  0xed   : > { %p12475_p2 = pneg %p12474_p1 }
  0xef   : > { %p12480_p4 = pnand %p12478_p3, %p12475_p2 }
  0xf1   : > { %12483 = shalt.err (!%p12480_p4)
}
  0xf2   : > { %s12484_s17 = scalar_lea.vmem %s1249_s15, 128  ;;  %p12492_p10 = scmp.lt.s32.totalorder %s1249_s15, %s1249_s15 }
  0xf3   : > { %p12485_p5 = scmp.ne.s32.totalorder %s1249_s15, %s12484_s17  ;;  %p12493_p7 = scmp.lt.s32.totalorder %s12484_s17, %s12484_s17 }
  0xf5   : > { %p12487_p6 = pnand %p12485_p5, %p13204_p0  ;;  %p12494_p8 = por %p12493_p7, %p12492_p10 }
  0xf7   : > { %p12488_p9 = pneg %p12487_p6 }
  0xf9   : > { %p12495_p11 = pnand %p12494_p8, %p12488_p9 }
  0xfb   : > { %12498 = shalt.err (!%p12495_p11)
}
  0xfc   : > { %s14834_s12 = smov 4   ;;  %s14835_s28 = smov 64  }
  0xfd   : > { %11427 = dma.hbm_to_vmem [thread:$0]  (!%p13192_p12), %s13108_s29, 128, %s1249_s15, [#allocation22], %s14835_s28, %s14835_s28, %s14834_s12  }
  0xfe   : > { %s12499_s26 = scalar_lea.hbm %s14815_s8, 32 }
  0xff   : > { %p12500_p13 = scmp.ne.s32.totalorder %s14815_s8, %s12499_s26  ;;  %p12506_p3 = scmp.lt.u32.totalorder %s12499_s26, %s14815_s8 }
 0x101   : > { %p12502_p1 = pnand %p12500_p13, %p13204_p0 }
 0x103   : > { %p12503_p2 = pneg %p12502_p1 }
 0x105   : > { %p12508_p4 = pnand %p12506_p3, %p12503_p2 }
 0x107   : > { %12511 = shalt.err (!%p12508_p4)
}
 0x108   : > { %s12512_s17 = scalar_lea.vmem %s1278_s10, 32  ;;  %p12520_p10 = scmp.lt.s32.totalorder %s1278_s10, %s1278_s10 }
 0x109   : > { %p12513_p5 = scmp.ne.s32.totalorder %s1278_s10, %s12512_s17  ;;  %p12521_p7 = scmp.lt.s32.totalorder %s12512_s17, %s12512_s17 }
 0x10b   : > { %p12515_p6 = pnand %p12513_p5, %p13204_p0  ;;  %p12522_p8 = por %p12521_p7, %p12520_p10 }
 0x10d   : > { %p12516_p9 = pneg %p12515_p6 }
 0x10f   : > { %p12523_p11 = pnand %p12522_p8, %p12516_p9 }
 0x111   : > { %12526 = shalt.err (!%p12523_p11)
}
 0x112   : > { %11433 = dma.hbm_to_vmem [thread:$0]  (!%p13192_p12), %s14815_s8, 32, %s1278_s10, [#allocation25], %s14759_s2, %s14759_s2, %s12893_s1  }
 0x113   : > { %s12900_s15 = smov [#allocation3]   ;;  %s12901_s26 = smov [#allocation8]  }
 0x114   : > { %s1036_s22 = sshll.u32 %s12900_s15, 4  ;;  %s1103_s6 = sshll.u32 %s12901_s26, 4  ;;  %s1037_s22 = int_to_ptr.vmem [resolvable:$true] %s1036_s22  ;;  %s1104_s6 = int_to_ptr.vmem [resolvable:$true] %s1103_s6 }
 0x115   : > { %s12527_s17 = scalar_lea.hbm %s14814_s9, 1536 }
 0x116   : > { %p12528_p13 = scmp.ne.s32.totalorder %s14814_s9, %s12527_s17  ;;  %p12534_p3 = scmp.lt.u32.totalorder %s12527_s17, %s14814_s9 }
 0x118   : > { %p12530_p1 = pnand %p12528_p13, %p13204_p0 }
 0x11a   : > { %p12531_p2 = pneg %p12530_p1 }
 0x11c   : > { %p12536_p4 = pnand %p12534_p3, %p12531_p2 }
 0x11e   : > { %12539 = shalt.err (!%p12536_p4)
}
 0x11f   : > { %s12540_s24 = scalar_lea.vmem %s1037_s22, 1536  ;;  %p12548_p10 = scmp.lt.s32.totalorder %s1037_s22, %s1037_s22 }
 0x120   : > { %p12541_p5 = scmp.ne.s32.totalorder %s1037_s22, %s12540_s24  ;;  %p12549_p7 = scmp.lt.s32.totalorder %s12540_s24, %s12540_s24 }
 0x122   : > { %p12543_p6 = pnand %p12541_p5, %p13204_p0  ;;  %p12550_p8 = por %p12549_p7, %p12548_p10 }
 0x124   : > { %p12544_p9 = pneg %p12543_p6 }
 0x126   : > { %p12551_p11 = pnand %p12550_p8, %p12544_p9 }
 0x128   : > { %12554 = shalt.err (!%p12551_p11)
}
 0x129   : > { %11394 = dma.hbm_to_vmem [thread:$0]  (!%p13192_p12), %s14814_s9, 1536, %s1037_s22, [#allocation4], %s14835_s28, %s14835_s28, %s14834_s12  }
 0x12a   : > { %s12555_s10 = scalar_lea.hbm %s14816_s4, 16 }
 0x12b   : > { %p12556_p13 = scmp.ne.s32.totalorder %s14816_s4, %s12555_s10  ;;  %p12562_p3 = scmp.lt.u32.totalorder %s12555_s10, %s14816_s4 }
 0x12d   : > { %p12558_p1 = pnand %p12556_p13, %p13204_p0 }
 0x12f   : > { %p12559_p2 = pneg %p12558_p1 }
 0x131   : > { %p12564_p4 = pnand %p12562_p3, %p12559_p2 }
 0x133   : > { %12567 = shalt.err (!%p12564_p4)
}
 0x134   : > { %s12568_s24 = scalar_lea.vmem %s1104_s6, 16  ;;  %s12575_s15 = scalar_lea.vmem %s1104_s6, 32 }
 0x135   : > { %p12569_p5 = scmp.ne.s32.totalorder %s1104_s6, %s12568_s24  ;;  %p12576_p10 = scmp.lt.s32.totalorder %s1104_s6, %s1104_s6 }
 0x136   : > { %p12577_p7 = scmp.lt.s32.totalorder %s12575_s15, %s12568_s24 }
 0x137   : > { %p12571_p6 = pnand %p12569_p5, %p13204_p0 }
 0x138   : > { %p12578_p8 = por %p12577_p7, %p12576_p10 }
 0x139   : > { %p12572_p9 = pneg %p12571_p6 }
 0x13b   : > { %p12579_p11 = pnand %p12578_p8, %p12572_p9 }
 0x13d   : > { %12582 = shalt.err (!%p12579_p11)
}
 0x13e   : > { %11400 = dma.hbm_to_vmem [thread:$0]  (!%p13192_p12), %s14816_s4, 16, %s1104_s6, [#allocation7]  }
 0x13f   : > { %s12902_s22 = smov [#allocation11]   ;;  %s12903_s17 = smov [#allocation14]  }
 0x140   : > { %s1151_s26 = sshll.u32 %s12902_s22, 4  ;;  %s1180_s10 = sshll.u32 %s12903_s17, 4  ;;  %s1152_s26 = int_to_ptr.vmem [resolvable:$true] %s1151_s26  ;;  %s1181_s10 = int_to_ptr.vmem [resolvable:$true] %s1180_s10 }
 0x141   : > { %s12583_s2 = scalar_lea.hbm %s13063_s27, 2048 }
 0x142   : > { %p12584_p13 = scmp.ne.s32.totalorder %s13063_s27, %s12583_s2  ;;  %p12590_p3 = scmp.lt.u32.totalorder %s12583_s2, %s13063_s27 }
 0x144   : > { %p12586_p1 = pnand %p12584_p13, %p13204_p0 }
 0x146   : > { %p12587_p2 = pneg %p12586_p1 }
 0x148   : > { %p12592_p4 = pnand %p12590_p3, %p12587_p2 }
 0x14a   : > { %12595 = shalt.err (!%p12592_p4)
}
 0x14b   : > { %s12596_s24 = scalar_lea.vmem %s1152_s26, 2048  ;;  %p12604_p10 = scmp.lt.s32.totalorder %s1152_s26, %s1152_s26 }
 0x14c   : > { %p12597_p5 = scmp.ne.s32.totalorder %s1152_s26, %s12596_s24  ;;  %p12605_p7 = scmp.lt.s32.totalorder %s12596_s24, %s12596_s24 }
 0x14e   : > { %p12599_p6 = pnand %p12597_p5, %p13204_p0  ;;  %p12606_p8 = por %p12605_p7, %p12604_p10 }
 0x150   : > { %p12600_p9 = pneg %p12599_p6 }
 0x152   : > { %p12607_p11 = pnand %p12606_p8, %p12600_p9 }
 0x154   : > { %12610 = shalt.err (!%p12607_p11)
}
 0x155   : > { %11406 = dma.hbm_to_vmem [thread:$0]  (!%p13192_p12), %s13063_s27, 2048, %s1152_s26, [#allocation10], %s14835_s28, %s14835_s28, %s14834_s12  }
 0x156   : > { %s12611_s6 = scalar_lea.hbm %s13078_s20, 64 }
 0x157   : > { %p12612_p13 = scmp.ne.s32.totalorder %s13078_s20, %s12611_s6  ;;  %p12618_p3 = scmp.lt.u32.totalorder %s12611_s6, %s13078_s20 }
 0x159   : > { %p12614_p1 = pnand %p12612_p13, %p13204_p0 }
 0x15b   : > { %p12615_p2 = pneg %p12614_p1 }
 0x15d   : > { %p12620_p4 = pnand %p12618_p3, %p12615_p2 }
 0x15f   : > { %12623 = shalt.err (!%p12620_p4)
}
 0x160   : > { %s12624_s2 = scalar_lea.vmem %s1181_s10, 64  ;;  %p12632_p10 = scmp.lt.s32.totalorder %s1181_s10, %s1181_s10 }
 0x161   : > { %p12625_p5 = scmp.ne.s32.totalorder %s1181_s10, %s12624_s2  ;;  %p12633_p7 = scmp.lt.s32.totalorder %s12624_s2, %s12624_s2 }
 0x163   : > { %p12627_p6 = pnand %p12625_p5, %p13204_p0  ;;  %p12634_p8 = por %p12633_p7, %p12632_p10 }
 0x165   : > { %p12628_p9 = pneg %p12627_p6 }
 0x167   : > { %p12635_p11 = pnand %p12634_p8, %p12628_p9 }
 0x169   : > { %12638 = shalt.err (!%p12635_p11)
}
 0x16a   : > { %s12904_s12 = smov 32   ;;  %s12905_s28 = smov 2  }
 0x16b   : > { %11412 = dma.hbm_to_vmem [thread:$0]  (!%p13192_p12), %s13078_s20, 64, %s1181_s10, [#allocation13], %s12904_s12, %s12904_s12, %s12905_s28  }
 0x16c   : > { %s12906_s15 = smov [#allocation17]   ;;  %s12907_s26 = smov [#allocation20]  }
 0x16d   : > { %s1206_s22 = sshll.u32 %s12906_s15, 4  ;;  %s1232_s17 = sshll.u32 %s12907_s26, 4  ;;  %s1207_s22 = int_to_ptr.vmem [resolvable:$true] %s1206_s22  ;;  %s1233_s17 = int_to_ptr.vmem [resolvable:$true] %s1232_s17 }
 0x16e   : > { %s12639_s24 = scalar_lea.hbm %s13088_s19, 32 }
 0x16f   : > { %p12640_p13 = scmp.ne.s32.totalorder %s13088_s19, %s12639_s24  ;;  %p12646_p3 = scmp.lt.u32.totalorder %s12639_s24, %s13088_s19 }
 0x171   : > { %p12642_p1 = pnand %p12640_p13, %p13204_p0 }
 0x173   : > { %p12643_p2 = pneg %p12642_p1 }
 0x175   : > { %p12648_p4 = pnand %p12646_p3, %p12643_p2 }
 0x177   : > { %12651 = shalt.err (!%p12648_p4)
}
 0x178   : > { %s12652_s6 = scalar_lea.vmem %s1207_s22, 32  ;;  %p12660_p10 = scmp.lt.s32.totalorder %s1207_s22, %s1207_s22 }
 0x179   : > { %p12653_p5 = scmp.ne.s32.totalorder %s1207_s22, %s12652_s6  ;;  %p12661_p7 = scmp.lt.s32.totalorder %s12652_s6, %s12652_s6 }
 0x17b   : > { %p12655_p6 = pnand %p12653_p5, %p13204_p0  ;;  %p12662_p8 = por %p12661_p7, %p12660_p10 }
 0x17d   : > { %p12656_p9 = pneg %p12655_p6 }
 0x17f   : > { %p12663_p11 = pnand %p12662_p8, %p12656_p9 }
 0x181   : > { %12666 = shalt.err (!%p12663_p11)
}
 0x182   : > { %s14836_s10 = smov 16   ;;  %s12667_s2 = scalar_lea.hbm %s13098_s14, 32 }
 0x183   : > { %11418 = dma.hbm_to_vmem [thread:$0]  (!%p13192_p12), %s13088_s19, 32, %s1207_s22, [#allocation16], %s14836_s10, %s14836_s10, %s12893_s1  }
 0x184   : > { %p12668_p13 = scmp.ne.s32.totalorder %s13098_s14, %s12667_s2  ;;  %p12674_p3 = scmp.lt.u32.totalorder %s12667_s2, %s13098_s14 }
 0x186   : > { %p12670_p1 = pnand %p12668_p13, %p13204_p0 }
 0x188   : > { %p12671_p2 = pneg %p12670_p1 }
 0x18a   : > { %p12676_p4 = pnand %p12674_p3, %p12671_p2 }
 0x18c   : > { %12679 = shalt.err (!%p12676_p4)
}
 0x18d   : > { %s12680_s12 = scalar_lea.vmem %s1233_s17, 32  ;;  %p12688_p10 = scmp.lt.s32.totalorder %s1233_s17, %s1233_s17 }
 0x18e   : > { %p12681_p5 = scmp.ne.s32.totalorder %s1233_s17, %s12680_s12  ;;  %p12689_p7 = scmp.lt.s32.totalorder %s12680_s12, %s12680_s12 }
 0x190   : > { %p12683_p6 = pnand %p12681_p5, %p13204_p0  ;;  %p12690_p8 = por %p12689_p7, %p12688_p10 }
 0x192   : > { %p12684_p9 = pneg %p12683_p6 }
 0x194   : > { %p12691_p11 = pnand %p12690_p8, %p12684_p9 }
 0x196   : > { %12694 = shalt.err (!%p12691_p11)
}
 0x197   : > { %11424 = dma.hbm_to_vmem [thread:$0]  (!%p13192_p12), %s13098_s14, 32, %s1233_s17, [#allocation19], %s14836_s10, %s14836_s10, %s12893_s1  }
 0x198   : > { %s12908_s28 = smov [#allocation23]   ;;  %s12909_s22 = smov [#allocation26]  }
 0x199   : > { %s1264_s15 = sshll.u32 %s12908_s28, 4  ;;  %s1290_s26 = sshll.u32 %s12909_s22, 4  ;;  %s1265_s15 = int_to_ptr.vmem [resolvable:$true] %s1264_s15  ;;  %s1291_s26 = int_to_ptr.vmem [resolvable:$true] %s1290_s26 }
 0x19a   : > { %s12695_s24 = scalar_lea.hbm %s14817_s3, 32 }
 0x19b   : > { %p12696_p13 = scmp.ne.s32.totalorder %s14817_s3, %s12695_s24  ;;  %p12702_p3 = scmp.lt.u32.totalorder %s12695_s24, %s14817_s3 }
 0x19d   : > { %p12698_p1 = pnand %p12696_p13, %p13204_p0 }
 0x19f   : > { %p12699_p2 = pneg %p12698_p1 }
 0x1a1   : > { %p12704_p4 = pnand %p12702_p3, %p12699_p2 }
 0x1a3   : > { %12707 = shalt.err (!%p12704_p4)
}
 0x1a4   : > { %s12708_s6 = scalar_lea.vmem %s1265_s15, 32  ;;  %p12716_p10 = scmp.lt.s32.totalorder %s1265_s15, %s1265_s15 }
 0x1a5   : > { %p12709_p5 = scmp.ne.s32.totalorder %s1265_s15, %s12708_s6  ;;  %p12717_p7 = scmp.lt.s32.totalorder %s12708_s6, %s12708_s6 }
 0x1a7   : > { %p12711_p6 = pnand %p12709_p5, %p13204_p0  ;;  %p12718_p8 = por %p12717_p7, %p12716_p10 }
 0x1a9   : > { %p12712_p9 = pneg %p12711_p6 }
 0x1ab   : > { %p12719_p11 = pnand %p12718_p8, %p12712_p9 }
 0x1ad   : > { %12722 = shalt.err (!%p12719_p11)
}
 0x1ae   : > { %11430 = dma.hbm_to_vmem [thread:$0]  (!%p13192_p12), %s14817_s3, 32, %s1265_s15, [#allocation22], %s14836_s10, %s14836_s10, %s12893_s1  }
 0x1af   : > { %s12723_s17 = scalar_lea.hbm %s13128_s13, 32 }
 0x1b0   : > { %p12724_p13 = scmp.ne.s32.totalorder %s13128_s13, %s12723_s17  ;;  %p12730_p3 = scmp.lt.u32.totalorder %s12723_s17, %s13128_s13 }
 0x1b2   : > { %p12726_p1 = pnand %p12724_p13, %p13204_p0 }
 0x1b4   : > { %p12727_p2 = pneg %p12726_p1 }
 0x1b6   : > { %p12732_p4 = pnand %p12730_p3, %p12727_p2 }
 0x1b8   : > { %12735 = shalt.err (!%p12732_p4)
}
 0x1b9   : > { %s12736_s2 = scalar_lea.vmem %s1291_s26, 32  ;;  %p12744_p10 = scmp.lt.s32.totalorder %s1291_s26, %s1291_s26 }
 0x1ba   : > { %p12737_p5 = scmp.ne.s32.totalorder %s1291_s26, %s12736_s2  ;;  %p12745_p7 = scmp.lt.s32.totalorder %s12736_s2, %s12736_s2 }
 0x1bc   : > { %p12739_p6 = pnand %p12737_p5, %p13204_p0  ;;  %p12746_p8 = por %p12745_p7, %p12744_p10 }
 0x1be   : > { %p12740_p9 = pneg %p12739_p6 }
 0x1c0   : > { %p12747_p11 = pnand %p12746_p8, %p12740_p9 }
 0x1c2   : > { %12750 = shalt.err (!%p12747_p11)
}
 0x1c3   : > { %11436 = dma.hbm_to_vmem [thread:$0]  (!%p13192_p12), %s13128_s13, 32, %s1291_s26, [#allocation25], %s14836_s10, %s14836_s10, %s12893_s1  }
 0x1c4   : > { %p14837_p13 = scmp.ne.s32.totalorder %s14831_s11, 0 }
 0x1c5   : > { %p14838_p1 = scmp.eq.s32.totalorder (!%p14837_p13), %s13156_s0, 0 }
 0x1c6   : > { %1314 = sbr.rel (%p14837_p13) target bundleno = 13859 (0x3623), region = 188 }
 0x1cd   : > { %12796 = dma.done.wait (%p14838_p1), [#allocation4], 1536   ;;  %p14839_p0 = pmov %p14838_p1 }
 0x1cf   : > { %12798 = vsyncadd (%p14839_p0), [#allocation4], 4294965760  ;;  %p14840_p2 = pmov %p14839_p0 }
 0x1d0   : > { %p14841_p3 = pmov %p14839_p0 }
 0x1d1   : > { %12800 = dma.done.wait (%p14840_p2), [#allocation7], 32  }
 0x1d2   : > { %12802 = vsyncadd (%p14841_p3), [#allocation7], 4294967264  ;;  %p14842_p4 = pmov %p14839_p0 }
 0x1d3   : > { %p14843_p12 = pmov %p14839_p0 }
 0x1d4   : > { %12804 = dma.done.wait (%p14842_p4), [#allocation10], 2064  }
 0x1d5   : > { %12806 = vsyncadd (%p14843_p12), [#allocation10], 4294965232  ;;  %p14844_p5 = pmov %p14839_p0 }
 0x1d6   : > { %p14845_p6 = pmov %p14839_p0 }
 0x1d7   : > { %12808 = dma.done.wait (%p14844_p5), [#allocation13], 96  }
 0x1d8   : > { %12810 = vsyncadd (%p14845_p6), [#allocation13], 4294967200  ;;  %p14846_p9 = pmov %p14839_p0 }
 0x1d9   : > { %p14847_p10 = pmov %p14839_p0 }
 0x1da   : > { %12812 = dma.done.wait (%p14846_p9), [#allocation16], 2080  }
 0x1db   : > { %12814 = vsyncadd (%p14847_p10), [#allocation16], 4294965216  ;;  %p14848_p7 = pmov %p14839_p0 }
 0x1dc   : > { %p14849_p8 = pmov %p14839_p0 }
 0x1dd   : > { %12816 = dma.done.wait (%p14848_p7), [#allocation19], 64  }
 0x1de   : > { %12818 = vsyncadd (%p14849_p8), [#allocation19], 4294967232  ;;  %p14850_p11 = pmov %p14839_p0 }
 0x1df   : > { %p14851_p13 = pmov %p14839_p0 }
 0x1e0   : > { %12820 = dma.done.wait (%p14850_p11), [#allocation22], 160  }
 0x1e1   : > { %12822 = vsyncadd (%p14851_p13), [#allocation22], 4294967136  ;;  %p14852_p1 = pmov %p14839_p0 }
 0x1e3   : > { %12824 = dma.done.wait (%p14852_p1), [#allocation25], 64  }
 0x1e4   : > { %12826 = vsyncadd (%p14839_p0), [#allocation25], 4294967232  ;;  %s14853_s5 = sld [smem:[#allocation37_spill]]  ;;  %v12910_v0 = vmov 0   ;;  %p1471_p2 = scmp.lt.s32.totalorder %s13156_s0, 1  ;;  %v11571_v1 = vld [vmem:[#allocation3] sm:$0xff]  }
 0x1e5   : > { %1590 = vmatprep.subr.bf16.mxu0 %v12910_v0  ;;  %1912 = vmatprep.mubr.bf16.mxu1 %v12910_v0  ;;  %v11572_v2 = vld [vmem:[#allocation3 + $0x8] sm:$0xff]   ;;  %v11573_v3 = vld [vmem:[#allocation3 + $0x10] sm:$0xff]   ;;  %v11574_v4 = vld [vmem:[#allocation3 + $0x18] sm:$0xff]   ;;  %vm1586_vm0 = vcmask 523264   ;;  %s14854_s1 = sld [smem:[#allocation39_spill]]  ;;  %s14855_s10 = sld [smem:[#allocation43_spill]] }
 0x1e6   : > { %1591 = vmatpush1.bf16.msra.mxu0 %v11571_v1  ;;  %s1472_s18 = scalar_select %p1471_p2, %s13156_s0, 1  ;;  %v11575_v7 = vld [vmem:[#allocation3 + $0x20] sm:$0xff]   ;;  %v11576_v9 = vld [vmem:[#allocation3 + $0x28] sm:$0xff]   ;;  %v11577_v10 = vld [vmem:[#allocation3 + $0x30] sm:$0xff]   ;;  %vm1650_vm1 = vcmask 1040384   ;;  %vm2065_vm2 = vcmask 138240  }
 0x1e7   : > { %1592 = vmatprep.subr.bf16.mxu0 %v12910_v0  ;;  %v11578_v11 = vld [vmem:[#allocation3 + $0x38] sm:$0xff]   ;;  %v11579_v12 = vld [vmem:[#allocation3 + $0x40] sm:$0xff]   ;;  %v11580_v13 = vld [vmem:[#allocation3 + $0x48] sm:$0xff]   ;;  %s14856_s12 = sld [smem:[#allocation41_spill]]  ;;  %s14857_s28 = sld [smem:[#allocation42_spill]]  ;;  %vm2072_vm3 = vcmask 131072  }
 0x1e8   : > { %s10488_s11 = sshll.u32 %s1472_s18, 5  ;;  %v11581_v14 = vld [vmem:[#allocation3 + $0x50] sm:$0xff]   ;;  %v11582_v15 = vld [vmem:[#allocation3 + $0x58] sm:$0xff]   ;;  %v1631_v19 = vld [vmem:[#allocation6] sm:$0x1]  ;;  %s14858_s15 = sld [smem:[#allocation44_spill]] }
 0x1e9   : > { %v1632_v20 = vld [vmem:[%s12943_s21] sm:$0x1]  ;;  %v1635_v24 = vld [vmem:[%s12943_s21 + $0x1] sm:$0xff]  ;;  %v1636_v28 = vld [vmem:[%s12943_s21 + $0x9] sm:$0xff]  ;;  %s14761_s22 = smov 64   ;;  %s14860_s24 = sld [smem:[#allocation45_spill]] }
 0x1ea   : > { %1593 = vmatpush1.bf16.msra.mxu0 %v11572_v2  ;;  %s13441_s23 = scalar_lea.vmem %s14853_s5, %s10488_s11  ;;  %v1633_v21 = vadd.f32 %v1632_v20, %v1631_v19  ;;  %s14861_s6 = sld [smem:[#allocation46_spill]]  ;;  %vm12913_vm4 = vmmov 0   ;;  %vm5503_vm5 = vcmask 1043456   ;;  %vm5487_vm6 = vcmask 64512  }
 0x1eb   : > { %1594 = vmatprep.subr.bf16.mxu0 %v12910_v0  ;;  %v1478_v5 = vld [vmem:[%s13441_s23 + $0x8] sm:$0xff]  ;;  %v1480_v6 = vld [vmem:[%s13441_s23 + $0x18] sm:$0xff]  ;;  %v1477_v16 = vld [vmem:[%s13441_s23] sm:$0xff]  ;;  %s14862_s17 = sld [smem:[#allocation49_spill]]  ;;  %s14863_s2 = sld [smem:[#allocation47_spill]] }
 0x1ec   : > { %v1507_v8 = vpack.c.bf16 %v1480_v6, %v1478_v5  ;;  %v1479_v17 = vld [vmem:[%s13441_s23 + $0x10] sm:$0xff]  ;;  %1634 = vst [vmem:[#allocation2] sm:$0x1] %v1633_v21  ;;  %v9623_v22 = vld [vmem:[%s14854_s1] ss:$0 sm:$0xff]  ;;  %s14864_s18 = sld [smem:[#allocation48_spill]] }
 0x1ed   : > { %v1506_v18 = vpack.c.bf16 %v1479_v17, %v1477_v16  ;;  %v11583_v37 = vld [vmem:[%s14855_s10 + $0x4] ss:$12 sps:$4 sm:$0xff]   ;;  %v11585_v38 = vld [vmem:[%s14855_s10] ss:$12 sps:$4 sm:$0xff]   ;;  %v11586_v39 = vld [vmem:[%s14855_s10 + $0x1c] ss:$12 sps:$4 sm:$0xff]  }
 0x1ee   : > { %1595 = vmatpush1.bf16.msra.mxu0 %v11573_v3  ;;  %9636 = vmatprep.mubr.msk.bf16.mxu0 %vm1586_vm0, %v1507_v8  ;;  %v11588_v40 = vld [vmem:[%s14855_s10 + $0x18] ss:$12 sps:$4 sm:$0xff]   ;;  %v11589_v54 = vld [vmem:[%s14855_s10 + $0x34] ss:$12 sps:$4 sm:$0xff]   ;;  %v11591_v55 = vld [vmem:[%s14855_s10 + $0x30] ss:$12 sps:$4 sm:$0xff]   ;;  %s14859_s26 = smov %s14858_s15 }
 0x1ef   : > { %1596 = vmatprep.subr.bf16.mxu0 %v12910_v0  ;;  %1880 = vmatprep.subr.bf16.mxu1 %v11583_v37  ;;  %v11592_v56 = vld [vmem:[%s14855_s10 + $0x4c] ss:$12 sps:$4 sm:$0xff]   ;;  %v11594_v57 = vld [vmem:[%s14855_s10 + $0x48] ss:$12 sps:$4 sm:$0xff]   ;;  %v11595_v58 = vld [vmem:[%s14855_s10 + $0x64] ss:$12 sps:$4 sm:$0xff]  }
 0x1f0   : > { %1881 = vmatpush1.bf16.msra.mxu1 %v11585_v38  ;;  %v11597_v59 = vld [vmem:[%s14855_s10 + $0x60] ss:$12 sps:$4 sm:$0xff]   ;;  %v11598_v60 = vld [vmem:[%s14855_s10 + $0x7c] ss:$12 sps:$4 sm:$0xff]   ;;  %v11600_v61 = vld [vmem:[%s14855_s10 + $0x78] ss:$12 sps:$4 sm:$0xff]  }
 0x1f1   : > { %1882 = vmatprep.subr.bf16.mxu1 %v11586_v39  ;;  %v11601_v62 = vld [vmem:[%s14855_s10 + $0x94] ss:$12 sps:$4 sm:$0xff]   ;;  %v11603_v63 = vld [vmem:[%s14855_s10 + $0x90] ss:$12 sps:$4 sm:$0xff]   ;;  %v11604_v1 = vld [vmem:[%s14855_s10 + $0xac] ss:$12 sps:$4 sm:$0xff]   ;;  %v1737_v39 = vlaneseq }
 0x1f2   : > { %1597 = vmatpush1.bf16.msra.mxu0 %v11574_v4  ;;  %v11606_v2 = vld [vmem:[%s14855_s10 + $0xa8] ss:$12 sps:$4 sm:$0xff]   ;;  %v9638_v20 = vld [vmem:[%s14857_s28] ss:$0 sm:$0xff]  ;;  %v11613_v37 = vld [vmem:[%s14855_s10 + $0x98] ss:$12 sps:$4 sm:$0xff]   ;;  %s14865_s11 = smov %s14864_s18 }
 0x1f3   : > { %1598 = vmatprep.subr.bf16.mxu0 %v12910_v0  ;;  %v11607_v3 = vld [vmem:[%s14855_s10 + $0x8] ss:$12 sps:$4 sm:$0xff]   ;;  %v11614_v38 = vld [vmem:[%s14855_s10 + $0xb0] ss:$12 sps:$4 sm:$0xff]   ;;  %s14866_s23 = sld [smem:[#allocation51_spill]]  ;;  %s14867_s1 = sld [smem:[#allocation50_spill]] }
 0x1f4   : > { %1883 = vmatpush1.bf16.msra.mxu1 %v11588_v40  ;;  %v13502_v40 = vshrl.u32 %v1737_v39, 7  ;;  %s14881_s5 = sld [smem:[#allocation61_spill]]  ;;  %s14884_s8 = sld [smem:[#allocation63_spill]] }
 0x1f5   : > { %1884 = vmatprep.subr.bf16.mxu1 %v11589_v54  ;;  %p14889_p4 = scmp.ne.s32.totalorder %s14828_s7, 0 }
 0x1f6   : > { %1599 = vmatpush1.bf16.msra.mxu0 %v11575_v7 }
 0x1f7   : > { %1600 = vmatprep.subr.bf16.mxu0 %v12910_v0 }
 0x1f8   : > { %1885 = vmatpush1.bf16.msra.mxu1 %v11591_v55 }
 0x1f9   : > { %1886 = vmatprep.subr.bf16.mxu1 %v11592_v56 }
 0x1fa   : > { %1601 = vmatpush1.bf16.msra.mxu0 %v11576_v9 }
 0x1fb   : > { %1602 = vmatprep.subr.bf16.mxu0 %v12910_v0 }
 0x1fc   : > { %1887 = vmatpush1.bf16.msra.mxu1 %v11594_v57 }
 0x1fd   : > { %1888 = vmatprep.subr.bf16.mxu1 %v11595_v58 }
 0x1fe   : > { %1603 = vmatpush1.bf16.msra.mxu0 %v11577_v10 }
 0x1ff   : > { %1604 = vmatprep.subr.bf16.mxu0 %v12910_v0 }
 0x200   : > { %1889 = vmatpush1.bf16.msra.mxu1 %v11597_v59 }
 0x201   : > { %1890 = vmatprep.subr.bf16.mxu1 %v11598_v60 }
 0x202   : > { %1605 = vmatpush1.bf16.msra.mxu0 %v11578_v11 }
 0x203   : > { %1606 = vmatprep.subr.bf16.mxu0 %v12910_v0 }
 0x204   : > { %1891 = vmatpush1.bf16.msra.mxu1 %v11600_v61 }
 0x205   : > { %1892 = vmatprep.subr.bf16.mxu1 %v11601_v62 }
 0x206   : > { %1607 = vmatpush1.bf16.msra.mxu0 %v11579_v12 }
 0x207   : > { %1608 = vmatprep.subr.bf16.mxu0 %v12910_v0 }
 0x208   : > { %1893 = vmatpush1.bf16.msra.mxu1 %v11603_v63 }
 0x209   : > { %1894 = vmatprep.subr.bf16.mxu1 %v11604_v1 }
 0x20a   : > { %1609 = vmatpush1.bf16.msra.mxu0 %v11580_v13 }
 0x20b   : > { %1610 = vmatprep.subr.bf16.mxu0 %v12910_v0 }
 0x20c   : > { %1895 = vmatpush1.bf16.msra.mxu1 %v11606_v2 }
 0x20d   : > { %10881 = vmatprep.subr.bf16.mxu1 %v11607_v3 }
 0x20e   : > { %1611 = vmatpush1.bf16.msra.mxu0 %v11581_v14 }
 0x20f   : > { %1612 = vmatprep.subr.bf16.mxu0 %v12910_v0 }
 0x212   : > { %1613 = vmatpush1.bf16.msra.mxu0 %v11582_v15  ;;  %v9637_v15 = vld [vmem:[%s14856_s12] ss:$0 sm:$0xff] }
 0x215   : > { %1623 = vmatmul.mubr.bf16.vlgmr.msra.gmra.mrb[0].mxu0 %v1506_v18 }
 0x2e8   : > { %v1624_v23 = vpop.f32.mrb[0].mxu0 }
 0x2e9   : > { %v1625_v25 = vadd.f32 %v9623_v22, %v1624_v23  ;;  %v1626_v26 = vpop.f32.mrb[1].mxu0 }
 0x2ea   : > { %v1627_v27 = vpop.f32.mrb[2].mxu0  ;;  %v11608_v26 = vld [vmem:[%s14855_s10 + $0x20] ss:$12 sps:$4 sm:$0xff]  }
 0x2eb   : > { %v1637_v29 = vadd.f32 %v1635_v24, %v1625_v25  ;;  %v1628_v30 = vadd.f32 %v9623_v22, %v1627_v27  ;;  %v1629_v31 = vpop.f32.mrb[3].mxu0 }
 0x2ec   : > { %v11610_v31 = vld [vmem:[%s14855_s10 + $0x50] ss:$12 sps:$4 sm:$0xff]  }
 0x2ed   : > { %1639 = vst [vmem:[#allocation2 + $0x1] sm:$0xff] %v1637_v29  ;;  %v1638_v32 = vadd.f32 %v1636_v28, %v1628_v30  ;;  %v11609_v28 = vld [vmem:[%s14855_s10 + $0x38] ss:$12 sps:$4 sm:$0xff]  }
 0x2ef   : > { %1640 = vst [vmem:[#allocation2 + $0x9] sm:$0xff] %v1638_v32  ;;  %v11611_v32 = vld [vmem:[%s14855_s10 + $0x68] ss:$12 sps:$4 sm:$0xff]  }
 0x2f4   : > { %v13461_v33 = vld [vmem:[#allocation2] sm:$0xff] }
 0x2f5   : > { %1646 = vadd.xlane.f32.xlu0 %v13461_v33 }
 0x2f6   : > { %v13464_v34 = vld [vmem:[#allocation2 + $0x10] sm:$0x1]  ;;  %v13468_v36 = vld [vmem:[#allocation2 + $0x8] sm:$0xff] }
 0x2f7   : > { %v1651_v35 = vsel %vm1650_vm1, %v13464_v34, 0.0 }
 0x2f8   : > { %1652 = vadd.xlane.f32.xlu1 %v1651_v35  ;;  %v11612_v35 = vld [vmem:[%s14855_s10 + $0x80] ss:$12 sps:$4 sm:$0xff]  }
 0x2f9   : > { %1648 = vadd.xlane.f32.xlu0 %v13468_v36 }
 0x382   : > { %v1647_v41 = vpop.xlane.xlu0 %1646 }
 0x383   : > { %v1655_v42 = vmul.f32 0.0078125, %v1647_v41  ;;  %v13505_v41 = vsub.s32 0, %v13502_v40 }
 0x385   : > { %v1653_v43 = vpop.xlane.xlu1 %1652  ;;  %v1658_v44 = vsub.f32 %v13461_v33, %v1655_v42  ;;  %v1733_v42 = vld [vmem:[%s14858_s15] sm:$0x7]  ;;  %s14868_s15 = sld [smem:[#allocation52_spill]] }
 0x386   : > { %v1657_v45 = vmul.f32 0.0078125, %v1653_v43  ;;  %v1649_v46 = vpop.xlane.xlu0 %1648  ;;  %v13509_v43 = vsub.s32 1, %v13502_v40 }
 0x387   : > { %v1656_v47 = vmul.f32 0.0078125, %v1649_v46  ;;  %v1661_v48 = vmul.f32 %v1658_v44, %v1658_v44 }
 0x388   : > { %v1660_v49 = vsub.f32 %v13464_v34, %v1657_v45  ;;  %v1744_v46 = vrot.slane %v1733_v42, %v13509_v43 }
 0x389   : > { %1664 = vadd.xlane.f32.xlu1 %v1661_v48  ;;  %v1659_v50 = vsub.f32 %v13468_v36, %v1656_v47 }
 0x38a   : > { %v1663_v51 = vmul.f32 %v1660_v49, %v1660_v49 }
 0x38b   : > { %v1662_v52 = vmul.f32 %v1659_v50, %v1659_v50 }
 0x38c   : > { %v1668_v53 = vsel %vm1650_vm1, %v1663_v51, 0.0 }
 0x38d   : > { %1669 = vadd.xlane.f32.xlu1 %v1668_v53  ;;  %1666 = vadd.xlane.f32.xlu0 %v1662_v52 }
 0x416   : > { %v1665_v4 = vpop.xlane.xlu1 %1664 }
 0x417   : > { %v1671_v5 = vmul.f32 0.0078125, %v1665_v4 }
 0x419   : > { %v1674_v6 = vadd.f32 1e-06, %v1671_v5 }
 0x41a   : > { %v1670_v7 = vpop.xlane.xlu1 %1669  ;;  %v1667_v8 = vpop.xlane.xlu0 %1666 }
 0x41b   : > { %12143 = vrsqrt.f32 %v1674_v6  ;;  %v1673_v9 = vmul.f32 0.0078125, %v1670_v7  ;;  %v1672_v10 = vmul.f32 0.0078125, %v1667_v8 }
 0x41d   : > { %v1676_v11 = vadd.f32 1e-06, %v1673_v9  ;;  %v1675_v12 = vadd.f32 1e-06, %v1672_v10 }
 0x41f   : > { %12145 = vrsqrt.f32 %v1676_v11 }
 0x420   : > { %12147 = vrsqrt.f32 %v1675_v12 }
 0x425   : > { %v12144_v13 = vpop.eup %12143 }
 0x426   : > { %v1680_v14 = vmul.f32 %v12144_v13, %v1658_v44  ;;  %v1740_v44 = vrot.slane %v1733_v42, %v13505_v41  ;;  %v13531_v13 = vsel %vm1650_vm1, 65535, %v12910_v0 }
 0x428   : > { %v1689_v19 = vmul.f32 %v9637_v15, %v1680_v14 }
 0x429   : > { %v12146_v16 = vpop.eup %12145 }
 0x42a   : > { %v12148_v17 = vpop.eup %12147  ;;  %v1682_v22 = vmul.f32 %v12146_v16, %v1660_v49  ;;  %v1698_v23 = vadd.f32 %v9638_v20, %v1689_v19 }
 0x42b   : > { %v1681_v18 = vmul.f32 %v12148_v17, %v1659_v50 }
 0x42c   : > { %v1691_v27 = vmul.f32 %v9637_v15, %v1682_v22 }
 0x42d   : > { %v1690_v21 = vmul.f32 %v9637_v15, %v1681_v18 }
 0x42e   : > { %v1700_v29 = vadd.f32 %v9638_v20, %v1691_v27 }
 0x42f   : > { %v1699_v24 = vadd.f32 %v9638_v20, %v1690_v21 }
 0x430   : > { %v1735_v30 = vpack.c.bf16 %v1700_v29, %v1700_v29 }
 0x431   : > { %v1734_v25 = vpack.c.bf16 %v1699_v24, %v1698_v23 }
 0x433   : > { %1913 = vmatmul.mubr.bf16.vlgmr.msra.gmra.mrb[0].mxu1 %v1734_v25 }
 0x434   : > { %10882 = vmatpush3.bf16.msra.mxu1 %v11607_v3  ;;  %1922 = vmatprep.mubr.bf16.mxu1 %v12910_v0  ;;  %v13524_v3 = vsub.s32 2, %v13502_v40 }
 0x435   : > { %10883 = vmatprep.subr.bf16.mxu1 %v11608_v26 }
 0x436   : > { %v1748_v4 = vrot.slane %v1733_v42, %v13524_v3 }
 0x438   : > { %10884 = vmatpush3.bf16.msra.mxu1 %v11608_v26 }
 0x439   : > { %10885 = vmatprep.subr.bf16.mxu1 %v11609_v28 }
 0x43b   : > { %1923 = vmatmul.mubr.bf16.gmra.mrb[4].mxu1 %v1735_v30 }
 0x43c   : > { %10886 = vmatpush3.bf16.msra.mxu1 %v11609_v28  ;;  %10897 = vmatprep.mubr.bf16.mxu1 %v1734_v25 }
 0x43d   : > { %10887 = vmatprep.subr.bf16.mxu1 %v11610_v31 }
 0x440   : > { %10888 = vmatpush3.bf16.msra.mxu1 %v11610_v31 }
 0x441   : > { %10889 = vmatprep.subr.bf16.mxu1 %v11611_v32 }
 0x444   : > { %10890 = vmatpush3.bf16.msra.mxu1 %v11611_v32 }
 0x445   : > { %10891 = vmatprep.subr.bf16.mxu1 %v11612_v35 }
 0x448   : > { %10892 = vmatpush3.bf16.msra.mxu1 %v11612_v35 }
 0x449   : > { %10893 = vmatprep.subr.bf16.mxu1 %v11613_v37 }
 0x44c   : > { %10894 = vmatpush3.bf16.msra.mxu1 %v11613_v37 }
 0x44d   : > { %10895 = vmatprep.subr.bf16.mxu1 %v11614_v38 }
 0x450   : > { %10896 = vmatpush3.bf16.msra.mxu1 %v11614_v38 }
 0x453   : > { %10898 = vmatmul.mubr.bf16.vlgmr.msra.gmra.mrb[8].mxu1 %v1735_v30 }
 0x506   : > { %v1914_v45 = vpop.f32.mrb[0].mxu1 }
 0x507   : > { %v1916_v47 = vpop.f32.mrb[1].mxu1  ;;  %v1915_v49 = vadd.f32 %v1914_v45, %v1740_v44 }
 0x508   : > { %v1918_v48 = vpop.f32.mrb[2].mxu1  ;;  %v1917_v52 = vadd.f32 %v1916_v47, %v1744_v46 }
 0x509   : > { %v1919_v50 = vadd.f32 %v1918_v48, %v1740_v44  ;;  %v1920_v51 = vpop.f32.mrb[3].mxu1 }
 0x50a   : > { %v1921_v53 = vadd.f32 %v1920_v51, %v1744_v46 }
 0x50b   : > { %v1996_v54 = vpack.c.bf16 %v1919_v50, %v1915_v49 }
 0x50c   : > { %v1998_v55 = vpack.c.bf16 %v1921_v53, %v1917_v52 }
 0x50d   : > { %10905 = vmatprep.mubr.msk.bf16.mxu0 %vm1586_vm0, %v1996_v54 }
 0x50e   : > { %v1924_v56 = vpop.f32.mrb[4].mxu1  ;;  %2171 = vrot.lane.b32.xlu0 %v1998_v55, %s14761_s22  ;;  %11321 = vmatprep.subr.msk.bf16.mxu0 %vm1586_vm0, %v1998_v55  ;;  %v2009_v57 = vsel %vm1586_vm0, %v1998_v55, 0 }
 0x50f   : > { %v1926_v58 = vpop.f32.mrb[5].mxu1  ;;  %10902 = vmatpush3.bf16.xpose.msra.mxu0 %v2009_v57  ;;  %v1925_v63 = vadd.f32 %v1924_v56, %v1740_v44 }
 0x510   : > { %v1927_v59 = vadd.f32 %v1926_v58, %v1744_v46  ;;  %v1928_v60 = vpop.f32.mrb[6].mxu1 }
 0x511   : > { %v1929_v61 = vpop.f32.mrb[7].mxu1  ;;  %v1997_v2 = vpack.c.bf16 %v1925_v63, %v1925_v63 }
 0x512   : > { %v1999_v62 = vpack.c.bf16 %v1927_v59, %v1927_v59 }
 0x514   : > { %2173 = vrot.lane.b32.xlu1 %v1999_v62, %s14761_s22  ;;  %11322 = vmatprep.subr.msk.bf16.mxu0 %vm1586_vm0, %v1999_v62  ;;  %v2012_v1 = vsel %vm1586_vm0, %v1999_v62, 0 }
 0x517   : > { %10904 = vmatpush3.bf16.xpose.msra.mxu0 %v2012_v1 }
 0x518   : > { %2165 = vrot.lane.b32.xlu1 %v1996_v54, %s14761_s22 }
 0x51c   : > { %2167 = vrot.lane.b32.xlu1 %v1997_v2, %s14761_s22 }
 0x51e   : > { %10906 = vmatmul.mubr.msk.bf16.vlgmr.msra.gmra.mrb[4].mxu0 %vm1586_vm0, %v1997_v2 }
 0x526   : > { %v10899_v5 = vpop.f32.mrb[8].mxu1 }
 0x527   : > { %v1974_v6 = vadd.f32 %v10899_v5, %v1748_v4  ;;  %v1965_v7 = vpop.f32.mrb[9].mxu1 }
 0x528   : > { %v10900_v8 = vpop.f32.mrb[10].mxu1  ;;  %v1966_v11 = vadd.f32 %v1965_v7, %v1748_v4 }
 0x529   : > { %v1968_v9 = vpop.f32.mrb[11].mxu1  ;;  %v13527_v10 = vpack.c.bf16 %v1974_v6, %v1974_v6 }
 0x52a   : > { %v1969_v12 = vadd.f32 %v1968_v9, %v1748_v4 }
 0x52b   : > { %v2111_v15 = vand.u32 %v13531_v13, %v13527_v10 }
 0x52c   : > { %v13533_v14 = vpack.c.bf16 %v1969_v12, %v1966_v11 }
 0x52e   : > { %10909 = vmatprep.subr.bf16.mxu0 %v13533_v14 }
 0x52f   : > { %10910 = vmatpush3.bf16.msra.mxu0 %v13533_v14 }
 0x530   : > { %10911 = vmatprep.subr.bf16.mxu0 %v2111_v15 }
 0x533   : > { %10912 = vmatpush3.bf16.msra.mxu0 %v2111_v15 }
 0x580   : > { %v2172_v16 = vpop.permute.xlu0 %2171 }
 0x581   : > { %11323 = vmatprep.subr.msk.bf16.mxu1 %vm1586_vm0, %v2172_v16  ;;  %v2182_v17 = vsel %vm1586_vm0, %v2172_v16, 0 }
 0x582   : > { %10918 = vmatpush3.bf16.xpose.msra.mxu1 %v2182_v17 }
 0x586   : > { %v2174_v18 = vpop.permute.xlu1 %2173 }
 0x587   : > { %11324 = vmatprep.subr.msk.bf16.mxu1 %vm1586_vm0, %v2174_v18  ;;  %v2185_v19 = vsel %vm1586_vm0, %v2174_v18, 0 }
 0x58a   : > { %10920 = vmatpush3.bf16.xpose.msra.mxu1 %v2185_v19  ;;  %v2166_v20 = vpop.permute.xlu1 %2165 }
 0x58b   : > { %10921 = vmatprep.mubr.msk.bf16.mxu1 %vm1586_vm0, %v2166_v20 }
 0x58e   : > { %v2168_v21 = vpop.permute.xlu1 %2167 }
 0x591   : > { %10922 = vmatmul.mubr.msk.bf16.vlgmr.msra.gmra.mrb[12].mxu1 %vm1586_vm0, %v2168_v21 }
 0x5f1   : > { %v10907_v22 = vpop.f32.mrb[4].mxu0 }
 0x5f2   : > { %v2048_v23 = vpop.f32.mrb[5].mxu0  ;;  %v2064_v27 = vmul.f32 0.125, %v10907_v22  ;;  %v11615_v22 = vld [vmem:[%s14860_s24] sm:$0xff]  }
 0x5f3   : > { %v2062_v24 = vmul.f32 0.125, %v2048_v23  ;;  %v10908_v25 = vpop.f32.mrb[6].mxu0  ;;  %v11616_v23 = vld [vmem:[%s14860_s24 + $0x8] sm:$0xff]   ;;  %10945 = vmatprep.subr.bf16.mxu1 %v11615_v22 }
 0x5f4   : > { %v2051_v26 = vpop.f32.mrb[7].mxu0  ;;  %v2073_v31 = vsel %vm2072_vm3, %v2064_v27, -inf  ;;  %10946 = vmatpush3.bf16.msra.mxu1 %v11615_v22 }
 0x5f5   : > { %v2063_v28 = vmul.f32 0.125, %v2051_v26  ;;  %v2066_v29 = vsel %vm2065_vm2, %v2062_v24, -inf  ;;  %10947 = vmatprep.subr.bf16.mxu1 %v11616_v23 }
 0x5f6   : > { %2067 = vmax.xlane.f32.xlu0 %v2066_v29 }
 0x5f7   : > { %v2069_v30 = vsel %vm2065_vm2, %v2063_v28, -inf }
 0x5f8   : > { %2070 = vmax.xlane.f32.xlu1 %v2069_v30  ;;  %10948 = vmatpush3.bf16.msra.mxu1 %v11616_v23 }
 0x5fa   : > { %2074 = vmax.xlane.f32.xlu0 %v2073_v31  ;;  %v11618_v31 = vld [vmem:[%s14860_s24 + $0x18] sm:$0xff]  }
 0x664   : > { %v10923_v32 = vpop.f32.mrb[12].mxu1 }
 0x665   : > { %v2237_v35 = vmul.f32 0.125, %v10923_v32  ;;  %v2221_v37 = vpop.f32.mrb[13].mxu1 }
 0x666   : > { %v2235_v38 = vmul.f32 0.125, %v2221_v37  ;;  %v10924_v39 = vpop.f32.mrb[14].mxu1 }
 0x667   : > { %v2224_v42 = vpop.f32.mrb[15].mxu1  ;;  %v2244_v44 = vsel %vm2072_vm3, %v2237_v35, -inf }
 0x668   : > { %v2236_v45 = vmul.f32 0.125, %v2224_v42  ;;  %2245 = vmax.xlane.f32.xlu1 %v2244_v44  ;;  %v2238_v46 = vsel %vm2065_vm2, %v2235_v38, -inf  ;;  %v11619_v44 = vld [vmem:[%s14860_s24 + $0x20] sm:$0xff]  }
 0x669   : > { %2239 = vmax.xlane.f32.xlu0 %v2238_v46 }
 0x66a   : > { %v2241_v47 = vsel %vm2065_vm2, %v2236_v45, -inf }
 0x66d   : > { %2242 = vmax.xlane.f32.xlu0 %v2241_v47 }
 0x683   : > { %v2068_v48 = vpop.xlane.xlu0 %2067 }
 0x684   : > { %v2076_v50 = vsub.f32 %v2062_v24, %v2068_v48  ;;  %v11617_v24 = vld [vmem:[%s14860_s24 + $0x10] sm:$0xff]  }
 0x685   : > { %v2071_v49 = vpop.xlane.xlu1 %2070  ;;  %10949 = vmatprep.subr.bf16.mxu1 %v11617_v24 }
 0x686   : > { %v2077_v51 = vsub.f32 %v2063_v28, %v2071_v49  ;;  %v2079_v55 = vmul.f32 1.442695, %v2076_v50  ;;  %10950 = vmatpush3.bf16.msra.mxu1 %v11617_v24 }
 0x687   : > { %v2075_v52 = vpop.xlane.xlu0 %2074  ;;  %10951 = vmatprep.subr.bf16.mxu1 %v11618_v31 }
 0x688   : > { %v2081_v53 = vmul.f32 1.442695, %v2077_v51  ;;  %v2078_v54 = vsub.f32 %v2064_v27, %v2075_v52 }
 0x68a   : > { %12149 = vpow2.f32 %v2081_v53  ;;  %v2083_v56 = vmul.f32 1.442695, %v2078_v54  ;;  %10952 = vmatpush3.bf16.msra.mxu1 %v11618_v31  ;;  %v11620_v53 = vld [vmem:[%s14860_s24 + $0x28] sm:$0xff]   ;;  %v11621_v54 = vld [vmem:[%s14860_s24 + $0x30] sm:$0xff]  }
 0x68c   : > { %12151 = vpow2.f32 %v2083_v56 }
 0x68d   : > { %12153 = vpow2.f32 %v2079_v55  ;;  %v11622_v55 = vld [vmem:[%s14860_s24 + $0x38] sm:$0xff]  }
 0x694   : > { %v12150_v57 = vpop.eup %12149 }
 0x695   : > { %v2088_v58 = vsel %vm2065_vm2, %v12150_v57, 0.0 }
 0x696   : > { %v12152_v59 = vpop.eup %12151  ;;  %2089 = vadd.xlane.f32.xlu1 %v2088_v58 }
 0x697   : > { %v2091_v60 = vsel %vm2072_vm3, %v12152_v59, 0.0  ;;  %v12154_v61 = vpop.eup %12153 }
 0x698   : > { %2092 = vadd.xlane.f32.xlu0 %v2091_v60  ;;  %v2085_v62 = vsel %vm2065_vm2, %v12154_v61, 0.0 }
 0x69c   : > { %2086 = vadd.xlane.f32.xlu0 %v2085_v62 }
 0x6f5   : > { %v2246_v63 = vpop.xlane.xlu1 %2245 }
 0x6f6   : > { %v2249_v1 = vsub.f32 %v2237_v35, %v2246_v63  ;;  %v2240_v2 = vpop.xlane.xlu0 %2239 }
 0x6f7   : > { %v2247_v4 = vsub.f32 %v2235_v38, %v2240_v2 }
 0x6f8   : > { %v2254_v5 = vmul.f32 1.442695, %v2249_v1 }
 0x6f9   : > { %v2250_v6 = vmul.f32 1.442695, %v2247_v4 }
 0x6fa   : > { %12155 = vpow2.f32 %v2254_v5  ;;  %v2243_v7 = vpop.xlane.xlu0 %2242 }
 0x6fb   : > { %v2248_v8 = vsub.f32 %v2236_v45, %v2243_v7  ;;  %12157 = vpow2.f32 %v2250_v6 }
 0x6fd   : > { %v2252_v9 = vmul.f32 1.442695, %v2248_v8 }
 0x6ff   : > { %12159 = vpow2.f32 %v2252_v9 }
 0x704   : > { %v12156_v11 = vpop.eup %12155 }
 0x705   : > { %v2262_v12 = vsel %vm2072_vm3, %v12156_v11, 0.0  ;;  %v12158_v15 = vpop.eup %12157 }
 0x706   : > { %2263 = vadd.xlane.f32.xlu1 %v2262_v12  ;;  %v2256_v17 = vsel %vm2065_vm2, %v12158_v15, 0.0  ;;  %v9683_v12 = vld [vmem:[%s14861_s6] ss:$0 sm:$0xff] }
 0x709   : > { %v12160_v16 = vpop.eup %12159 }
 0x70a   : > { %2257 = vadd.xlane.f32.xlu1 %v2256_v17  ;;  %v2259_v18 = vsel %vm2065_vm2, %v12160_v16, 0.0 }
 0x70b   : > { %2260 = vadd.xlane.f32.xlu0 %v2259_v18 }
 0x71b   : > { %2277 = vrot.lane.b32.xlu1 %v13527_v10, %s14761_s22 }
 0x721   : > { %2275 = vrot.lane.b32.xlu0 %v13533_v14, %s14761_s22  ;;  %s14869_s22 = smov %s14868_s15 }
 0x723   : > { %v2090_v19 = vpop.xlane.xlu1 %2089 }
 0x725   : > { %v2093_v20 = vpop.xlane.xlu0 %2092 }
 0x726   : > { %12161 = vrcp.f32 %v2093_v20 }
 0x727   : > { %12163 = vrcp.f32 %v2090_v19 }
 0x729   : > { %v2087_v21 = vpop.xlane.xlu0 %2086 }
 0x72a   : > { %12165 = vrcp.f32 %v2087_v21 }
 0x730   : > { %v12162_v25 = vpop.eup %12161 }
 0x731   : > { %v12164_v10 = vpop.eup %12163  ;;  %v2099_v27 = vmul.f32 %v12162_v25, %v12152_v59 }
 0x732   : > { %v2098_v28 = vmul.f32 %v12164_v10, %v12150_v57 }
 0x733   : > { %v2101_v30 = vpack.c.bf16 %v2099_v27, %v2099_v27  ;;  %v11623_v27 = vld [vmem:[%s14862_s17] ss:$16 sps:$4 sm:$0xff]  }
 0x734   : > { %v12166_v26 = vpop.eup %12165 }
 0x735   : > { %v2097_v14 = vmul.f32 %v12166_v26, %v12154_v61 }
 0x737   : > { %v2100_v29 = vpack.c.bf16 %v2098_v28, %v2097_v14  ;;  %v11625_v14 = vld [vmem:[%s14862_s17 + $0x4] ss:$16 sps:$4 sm:$0xff]   ;;  %v11628_v28 = vld [vmem:[%s14862_s17 + $0xc] ss:$16 sps:$4 sm:$0xff]  }
 0x738   : > { %2829 = vmatprep.subr.bf16.mxu1 %v11628_v28 }
 0x739   : > { %10913 = vmatprep.mubr.msk.bf16.mxu0 %vm2065_vm2, %v2100_v29  ;;  %v11631_v29 = vld [vmem:[%s14862_s17 + $0x24] ss:$16 sps:$4 sm:$0xff]  }
 0x73a   : > { %10914 = vmatmul.mubr.msk.bf16.vlgmr.msra.gmra.mrb[8].mxu0 %vm2065_vm2, %v2101_v30  ;;  %v11634_v30 = vld [vmem:[%s14862_s17 + $0x2c] ss:$16 sps:$4 sm:$0xff]  }
 0x793   : > { %v2264_v32 = vpop.xlane.xlu1 %2263 }
 0x794   : > { %12167 = vrcp.f32 %v2264_v32 }
 0x797   : > { %v2258_v35 = vpop.xlane.xlu1 %2257 }
 0x798   : > { %12169 = vrcp.f32 %v2258_v35  ;;  %v2261_v37 = vpop.xlane.xlu0 %2260 }
 0x799   : > { %12171 = vrcp.f32 %v2261_v37 }
 0x79b   : > { %v2278_v38 = vpop.permute.xlu1 %2277 }
 0x79c   : > { %v2287_v39 = vand.u32 %v2278_v38, %v13531_v13  ;;  %v2276_v42 = vpop.permute.xlu0 %2275 }
 0x79d   : > { %10925 = vmatprep.subr.bf16.mxu0 %v2276_v42 }
 0x79e   : > { %10926 = vmatpush3.bf16.msra.mxu0 %v2276_v42  ;;  %v12168_v45 = vpop.eup %12167 }
 0x79f   : > { %10927 = vmatprep.subr.bf16.mxu0 %v2287_v39  ;;  %v2270_v49 = vmul.f32 %v12168_v45, %v12156_v11 }
 0x7a1   : > { %v2272_v52 = vpack.c.bf16 %v2270_v49, %v2270_v49 }
 0x7a2   : > { %v12170_v46 = vpop.eup %12169  ;;  %10928 = vmatpush3.bf16.msra.mxu0 %v2287_v39 }
 0x7a3   : > { %v12172_v47 = vpop.eup %12171  ;;  %v2268_v48 = vmul.f32 %v12170_v46, %v12158_v15  ;;  %10933 = vmatprep.subr.bf16.mxu0 %v11619_v44 }
 0x7a4   : > { %v2269_v50 = vmul.f32 %v12172_v47, %v12160_v16 }
 0x7a6   : > { %v2271_v51 = vpack.c.bf16 %v2269_v50, %v2268_v48  ;;  %v11637_v50 = vld [vmem:[%s14862_s17 + $0x44] ss:$16 sps:$4 sm:$0xff]  }
 0x7a8   : > { %10929 = vmatprep.mubr.msk.bf16.mxu0 %vm2065_vm2, %v2271_v51  ;;  %v11640_v51 = vld [vmem:[%s14862_s17 + $0x4c] ss:$16 sps:$4 sm:$0xff]  }
 0x7a9   : > { %10930 = vmatmul.mubr.msk.bf16.vlgmr.msra.gmra.mrb[12].mxu0 %vm2065_vm2, %v2272_v52  ;;  %v11635_v52 = vld [vmem:[%s14862_s17 + $0x40] ss:$16 sps:$4 sm:$0xff]  }
 0x7aa   : > { %10934 = vmatpush3.bf16.msra.mxu0 %v11619_v44 }
 0x7ab   : > { %10935 = vmatprep.subr.bf16.mxu0 %v11620_v53 }
 0x7ae   : > { %10936 = vmatpush3.bf16.msra.mxu0 %v11620_v53  ;;  %v11638_v53 = vld [vmem:[%s14862_s17 + $0x48] ss:$16 sps:$4 sm:$0xff]  }
 0x7af   : > { %10937 = vmatprep.subr.bf16.mxu0 %v11621_v54 }
 0x7b2   : > { %10938 = vmatpush3.bf16.msra.mxu0 %v11621_v54  ;;  %v11643_v54 = vld [vmem:[%s14862_s17 + $0x64] ss:$16 sps:$4 sm:$0xff]  }
 0x7b3   : > { %10939 = vmatprep.subr.bf16.mxu0 %v11622_v55 }
 0x7b6   : > { %10940 = vmatpush3.bf16.msra.mxu0 %v11622_v55  ;;  %v11646_v55 = vld [vmem:[%s14862_s17 + $0x6c] ss:$16 sps:$4 sm:$0xff]  }
 0x7b7   : > { %2778 = vmatprep.subr.bf16.mxu0 %v11625_v14 }
 0x80d   : > { %v10915_v56 = vpop.f32.mrb[8].mxu0 }
 0x80e   : > { %v2147_v57 = vpop.f32.mrb[9].mxu0  ;;  %v2162_v61 = vpack.c.bf16 %v10915_v56, %v10915_v56  ;;  %v11641_v56 = vld [vmem:[%s14862_s17 + $0x60] ss:$16 sps:$4 sm:$0xff]  }
 0x80f   : > { %v10916_v58 = vpop.f32.mrb[10].mxu0 }
 0x810   : > { %v2150_v59 = vpop.f32.mrb[11].mxu0  ;;  %v11649_v58 = vld [vmem:[%s14862_s17 + $0x84] ss:$16 sps:$4 sm:$0xff]  }
 0x811   : > { %v2161_v60 = vpack.c.bf16 %v2150_v59, %v2147_v57  ;;  %v11644_v57 = vld [vmem:[%s14862_s17 + $0x68] ss:$16 sps:$4 sm:$0xff]   ;;  %v11652_v59 = vld [vmem:[%s14862_s17 + $0x8c] ss:$16 sps:$4 sm:$0xff]  }
 0x813   : > { %10953 = vmatprep.mubr.msk.bf16.mxu1 %vm1586_vm0, %v2161_v60  ;;  %v11647_v60 = vld [vmem:[%s14862_s17 + $0x80] ss:$16 sps:$4 sm:$0xff]  }
 0x814   : > { %10954 = vmatmul.mubr.msk.bf16.vlgmr.msra.gmra.mrb[16].mxu1 %vm1586_vm0, %v2162_v61  ;;  %v11650_v61 = vld [vmem:[%s14862_s17 + $0x88] ss:$16 sps:$4 sm:$0xff]  }
 0x815   : > { %2861 = vmatprep.mubr.bf16.mxu1 %v12910_v0 }
 0x87c   : > { %v10931_v62 = vpop.f32.mrb[12].mxu0 }
 0x87d   : > { %v2323_v63 = vpop.f32.mrb[13].mxu0  ;;  %v2338_v5 = vpack.c.bf16 %v10931_v62, %v10931_v62  ;;  %v11655_v62 = vld [vmem:[%s14862_s17 + $0xa4] ss:$16 sps:$4 sm:$0xff]  }
 0x87e   : > { %v10932_v1 = vpop.f32.mrb[14].mxu0 }
 0x87f   : > { %v2326_v2 = vpop.f32.mrb[15].mxu0  ;;  %v11653_v1 = vld [vmem:[%s14862_s17 + $0xa0] ss:$16 sps:$4 sm:$0xff]  }
 0x880   : > { %v2337_v4 = vpack.c.bf16 %v2326_v2, %v2323_v63  ;;  %v11658_v63 = vld [vmem:[%s14862_s17 + $0xac] ss:$16 sps:$4 sm:$0xff]   ;;  %v11656_v2 = vld [vmem:[%s14862_s17 + $0xa8] ss:$16 sps:$4 sm:$0xff]  }
 0x882   : > { %10941 = vmatprep.mubr.msk.bf16.mxu0 %vm1586_vm0, %v2337_v4  ;;  %v11661_v4 = vld [vmem:[%s14862_s17 + $0xc4] ss:$16 sps:$4 sm:$0xff]  }
 0x883   : > { %10942 = vmatmul.mubr.msk.bf16.vlgmr.msra.gmra.mrb[16].mxu0 %vm1586_vm0, %v2338_v5  ;;  %v11664_v5 = vld [vmem:[%s14862_s17 + $0xcc] ss:$16 sps:$4 sm:$0xff]  }
 0x884   : > { %2810 = vmatprep.mubr.bf16.mxu0 %v12910_v0  ;;  %2779 = vmatpush1.bf16.msra.mxu0 %v11623_v27  ;;  %v9684_v27 = vld [vmem:[%s14863_s2] ss:$0 sm:$0xff] }
 0x885   : > { %2780 = vmatprep.subr.bf16.mxu0 %v11631_v29 }
 0x8e7   : > { %v10955_v6 = vpop.f32.mrb[16].mxu1 }
 0x8e8   : > { %v2481_v7 = vpop.f32.mrb[17].mxu1 }
 0x8e9   : > { %v10956_v8 = vpop.f32.mrb[18].mxu1 }
 0x8ea   : > { %v2484_v9 = vpop.f32.mrb[19].mxu1  ;;  %v11667_v8 = vld [vmem:[%s14862_s17 + $0xe4] ss:$16 sps:$4 sm:$0xff]  }
 0x956   : > { %v10943_v11 = vpop.f32.mrb[16].mxu0 }
 0x957   : > { %v2490_v15 = vadd.f32 %v10955_v6, %v10943_v11  ;;  %v2403_v16 = vpop.f32.mrb[17].mxu0  ;;  %v11659_v6 = vld [vmem:[%s14862_s17 + $0xc0] ss:$16 sps:$4 sm:$0xff]  }
 0x958   : > { %v2482_v17 = vadd.f32 %v2481_v7, %v2403_v16  ;;  %v10944_v18 = vpop.f32.mrb[18].mxu0  ;;  %v11662_v7 = vld [vmem:[%s14862_s17 + $0xc8] ss:$16 sps:$4 sm:$0xff]   ;;  %v11665_v11 = vld [vmem:[%s14862_s17 + $0xe0] ss:$16 sps:$4 sm:$0xff]  }
 0x959   : > { %v2406_v19 = vpop.f32.mrb[19].mxu0  ;;  %v2503_v22 = vadd.f32 %v9683_v12, %v2490_v15 }
 0x95a   : > { %v2501_v20 = vadd.f32 %v9683_v12, %v2482_v17  ;;  %v2485_v21 = vadd.f32 %v2484_v9, %v2406_v19  ;;  %v11670_v9 = vld [vmem:[%s14862_s17 + $0xec] ss:$16 sps:$4 sm:$0xff]  }
 0x95b   : > { %v13589_v10 = vadd.f32 %v2503_v22, %v13464_v34  ;;  %v11632_v34 = vld [vmem:[%s14862_s17 + $0x28] ss:$16 sps:$4 sm:$0xff]  }
 0x95c   : > { %v2502_v23 = vadd.f32 %v9683_v12, %v2485_v21  ;;  %v13582_v24 = vadd.f32 %v2501_v20, %v13461_v33  ;;  %v11626_v33 = vld [vmem:[%s14862_s17 + $0x8] ss:$16 sps:$4 sm:$0xff]  }
 0x95d   : > { %v2513_v26 = vsel %vm1650_vm1, %v13589_v10, 0.0  ;;  %2830 = vmatpush1.bf16.msra.mxu1 %v11626_v33  ;;  %v11668_v12 = vld [vmem:[%s14862_s17 + $0xe8] ss:$16 sps:$4 sm:$0xff]  }
 0x95e   : > { %2509 = vadd.xlane.f32.xlu1 %v13582_v24  ;;  %v13586_v25 = vadd.f32 %v2502_v23, %v13468_v36  ;;  %v11629_v36 = vld [vmem:[%s14862_s17 + $0x20] ss:$16 sps:$4 sm:$0xff]   ;;  %2831 = vmatprep.subr.bf16.mxu1 %v11634_v30 }
 0x95f   : > { %2781 = vmatpush1.bf16.msra.mxu0 %v11629_v36  ;;  %v9685_v30 = vld [vmem:[%s14864_s18] ss:$0 sm:$0xff]  ;;  %s14870_s18 = smov 64  }
 0x960   : > { %2511 = vadd.xlane.f32.xlu0 %v13586_v25  ;;  %2782 = vmatprep.subr.bf16.mxu0 %v11637_v50  ;;  %v11677_v50 = vld [vmem:[%s14866_s23 + $0x8] sm:$0xff]  }
 0x961   : > { %2832 = vmatpush1.bf16.msra.mxu1 %v11632_v34 }
 0x962   : > { %2833 = vmatprep.subr.bf16.mxu1 %v11640_v51  ;;  %v11678_v51 = vld [vmem:[%s14866_s23 + $0x88] sm:$0xff]  }
 0x963   : > { %2783 = vmatpush1.bf16.msra.mxu0 %v11635_v52  ;;  %v11679_v52 = vld [vmem:[%s14866_s23 + $0x50] sm:$0xff]  }
 0x964   : > { %2514 = vadd.xlane.f32.xlu0 %v2513_v26  ;;  %2784 = vmatprep.subr.bf16.mxu0 %v11643_v54  ;;  %v11681_v54 = vld [vmem:[%s14866_s23 + $0x10] sm:$0xff]  }
 0x965   : > { %2834 = vmatpush1.bf16.msra.mxu1 %v11638_v53  ;;  %v11680_v53 = vld [vmem:[%s14866_s23 + $0xd0] sm:$0xff]  }
 0x966   : > { %2835 = vmatprep.subr.bf16.mxu1 %v11646_v55  ;;  %v11682_v55 = vld [vmem:[%s14866_s23 + $0x90] sm:$0xff]  }
 0x967   : > { %2785 = vmatpush1.bf16.msra.mxu0 %v11641_v56  ;;  %v11683_v56 = vld [vmem:[%s14866_s23 + $0x58] sm:$0xff]  }
 0x968   : > { %2786 = vmatprep.subr.bf16.mxu0 %v11649_v58  ;;  %v11685_v58 = vld [vmem:[%s14866_s23 + $0x18] sm:$0xff]  }
 0x969   : > { %2836 = vmatpush1.bf16.msra.mxu1 %v11644_v57  ;;  %v11684_v57 = vld [vmem:[%s14866_s23 + $0xd8] sm:$0xff]  }
 0x96a   : > { %2837 = vmatprep.subr.bf16.mxu1 %v11652_v59  ;;  %v11686_v59 = vld [vmem:[%s14866_s23 + $0x98] sm:$0xff]  }
 0x96b   : > { %2787 = vmatpush1.bf16.msra.mxu0 %v11647_v60  ;;  %v11687_v60 = vld [vmem:[%s14866_s23 + $0x60] sm:$0xff]  }
 0x96c   : > { %2788 = vmatprep.subr.bf16.mxu0 %v11655_v62  ;;  %v11689_v62 = vld [vmem:[%s14866_s23 + $0x20] sm:$0xff]  }
 0x96d   : > { %2838 = vmatpush1.bf16.msra.mxu1 %v11650_v61  ;;  %v11688_v61 = vld [vmem:[%s14866_s23 + $0xe0] sm:$0xff]  }
 0x96e   : > { %2839 = vmatprep.subr.bf16.mxu1 %v11658_v63  ;;  %v11690_v63 = vld [vmem:[%s14866_s23 + $0xa0] sm:$0xff]  }
 0x96f   : > { %2789 = vmatpush1.bf16.msra.mxu0 %v11653_v1  ;;  %v11691_v1 = vld [vmem:[%s14866_s23 + $0x68] sm:$0xff]  }
 0x970   : > { %2790 = vmatprep.subr.bf16.mxu0 %v11661_v4  ;;  %v11693_v4 = vld [vmem:[%s14866_s23 + $0x28] sm:$0xff]  }
 0x971   : > { %2840 = vmatpush1.bf16.msra.mxu1 %v11656_v2  ;;  %v11692_v2 = vld [vmem:[%s14866_s23 + $0xe8] sm:$0xff]  }
 0x972   : > { %2841 = vmatprep.subr.bf16.mxu1 %v11664_v5  ;;  %v11694_v5 = vld [vmem:[%s14866_s23 + $0xa8] sm:$0xff]  }
 0x973   : > { %2791 = vmatpush1.bf16.msra.mxu0 %v11659_v6  ;;  %v11695_v6 = vld [vmem:[%s14866_s23 + $0x70] sm:$0xff]  }
 0x974   : > { %2792 = vmatprep.subr.bf16.mxu0 %v11667_v8  ;;  %v11697_v8 = vld [vmem:[%s14866_s23 + $0x30] sm:$0xff]  }
 0x975   : > { %2842 = vmatpush1.bf16.msra.mxu1 %v11662_v7  ;;  %v11696_v7 = vld [vmem:[%s14866_s23 + $0xf0] sm:$0xff]  }
 0x976   : > { %2843 = vmatprep.subr.bf16.mxu1 %v11670_v9  ;;  %v11698_v9 = vld [vmem:[%s14866_s23 + $0xb0] sm:$0xff]  }
 0x977   : > { %2793 = vmatpush1.bf16.msra.mxu0 %v11665_v11  ;;  %v11699_v11 = vld [vmem:[%s14866_s23 + $0x78] sm:$0xff]  }
 0x979   : > { %2844 = vmatpush1.bf16.msra.mxu1 %v11668_v12  ;;  %v11700_v12 = vld [vmem:[%s14866_s23 + $0xf8] sm:$0xff]  }
 0x9eb   : > { %v2510_v31 = vpop.xlane.xlu1 %2509 }
 0x9ec   : > { %v2516_v32 = vmul.f32 0.0078125, %v2510_v31 }
 0x9ed   : > { %v2512_v35 = vpop.xlane.xlu0 %2511 }
 0x9ee   : > { %v13603_v37 = vsub.f32 %v13582_v24, %v2516_v32  ;;  %v2517_v38 = vmul.f32 0.0078125, %v2512_v35 }
 0x9f0   : > { %v13606_v39 = vsub.f32 %v13586_v25, %v2517_v38  ;;  %v2522_v42 = vmul.f32 %v13603_v37, %v13603_v37 }
 0x9f1   : > { %v2515_v44 = vpop.xlane.xlu0 %2514 }
 0x9f2   : > { %v2518_v45 = vmul.f32 0.0078125, %v2515_v44  ;;  %2525 = vadd.xlane.f32.xlu1 %v2522_v42  ;;  %v2523_v46 = vmul.f32 %v13606_v39, %v13606_v39  ;;  %v11671_v44 = vld [vmem:[%s14866_s23 + $0x40] sm:$0xff]  }
 0x9f3   : > { %10527 = vmatprep.subr.bf16.mxu0 %v11671_v44 }
 0x9f4   : > { %v13613_v47 = vsub.f32 %v13589_v10, %v2518_v45  ;;  %2527 = vadd.xlane.f32.xlu0 %v2523_v46  ;;  %v11672_v45 = vld [vmem:[%s14866_s23 + $0xc0] sm:$0xff]  }
 0x9f5   : > { %10555 = vmatprep.subr.bf16.mxu1 %v11672_v45  ;;  %v11673_v46 = vld [vmem:[%s14866_s23] sm:$0xff]  }
 0x9f6   : > { %v2524_v48 = vmul.f32 %v13613_v47, %v13613_v47 }
 0x9f8   : > { %v2529_v49 = vsel %vm1650_vm1, %v2524_v48, 0.0  ;;  %v11675_v48 = vld [vmem:[%s14866_s23 + $0x48] sm:$0xff]  }
 0x9f9   : > { %2530 = vadd.xlane.f32.xlu1 %v2529_v49  ;;  %v11676_v49 = vld [vmem:[%s14866_s23 + $0xc8] sm:$0xff]  }
 0xa7f   : > { %v2526_v15 = vpop.xlane.xlu1 %2525 }
 0xa80   : > { %v2532_v16 = vmul.f32 0.0078125, %v2526_v15  ;;  %v11701_v15 = vld [vmem:[%s14866_s23 + $0x38] sm:$0xff]  }
 0xa81   : > { %v2528_v17 = vpop.xlane.xlu0 %2527 }
 0xa82   : > { %v2535_v18 = vadd.f32 1e-06, %v2532_v16  ;;  %v2533_v19 = vmul.f32 0.0078125, %v2528_v17  ;;  %v11702_v16 = vld [vmem:[%s14866_s23 + $0xb8] sm:$0xff]   ;;  %v2594_v17 = vld [vmem:[%s14867_s1] sm:$0xf] }
 0xa84   : > { %12173 = vrsqrt.f32 %v2535_v18  ;;  %v2536_v20 = vadd.f32 1e-06, %v2533_v19  ;;  %v13683_v18 = vsub.s32 3, %v13502_v40  ;;  %v2601_v19 = vrot.slane %v2594_v17, %v13505_v41 }
 0xa86   : > { %12175 = vrsqrt.f32 %v2536_v20  ;;  %v2531_v21 = vpop.xlane.xlu1 %2530  ;;  %v2609_v20 = vrot.slane %v2594_v17, %v13524_v3 }
 0xa87   : > { %v2534_v22 = vmul.f32 0.0078125, %v2531_v21  ;;  %v2605_v21 = vrot.slane %v2594_v17, %v13509_v43 }
 0xa89   : > { %v2537_v23 = vadd.f32 1e-06, %v2534_v22  ;;  %v13689_v22 = vrot.slane %v2594_v17, %v13683_v18 }
 0xa8b   : > { %12177 = vrsqrt.f32 %v2537_v23 }
 0xa8e   : > { %v12174_v26 = vpop.eup %12173 }
 0xa8f   : > { %v2541_v14 = vmul.f32 %v12174_v26, %v13603_v37 }
 0xa90   : > { %v12176_v33 = vpop.eup %12175 }
 0xa91   : > { %v2542_v28 = vmul.f32 %v12176_v33, %v13606_v39  ;;  %v2550_v29 = vmul.f32 %v9684_v27, %v2541_v14 }
 0xa93   : > { %v2551_v36 = vmul.f32 %v9684_v27, %v2542_v28  ;;  %v2559_v31 = vadd.f32 %v9685_v30, %v2550_v29 }
 0xa95   : > { %v12178_v34 = vpop.eup %12177  ;;  %v2560_v32 = vadd.f32 %v9685_v30, %v2551_v36 }
 0xa96   : > { %v2543_v35 = vmul.f32 %v12178_v34, %v13613_v47  ;;  %v11674_v47 = vld [vmem:[%s14866_s23 + $0x80] sm:$0xff]  }
 0xa97   : > { %v2595_v38 = vpack.c.bf16 %v2560_v32, %v2559_v31 }
 0xa98   : > { %v2552_v42 = vmul.f32 %v9684_v27, %v2543_v35 }
 0xa99   : > { %2811 = vmatmul.mubr.bf16.vlgmr.msra.gmra.mrb[20].mxu0 %v2595_v38  ;;  %2862 = vmatmul.mubr.bf16.vlgmr.msra.gmra.mrb[20].mxu1 %v2595_v38 }
 0xa9a   : > { %2820 = vmatprep.mubr.bf16.mxu0 %v12910_v0  ;;  %2871 = vmatprep.mubr.bf16.mxu1 %v12910_v0  ;;  %v2561_v37 = vadd.f32 %v9685_v30, %v2552_v42 }
 0xa9b   : > { %10528 = vmatpush3.bf16.msra.mxu0 %v11673_v46  ;;  %10556 = vmatpush3.bf16.msra.mxu1 %v11674_v47 }
 0xa9c   : > { %v2596_v39 = vpack.c.bf16 %v2561_v37, %v2561_v37  ;;  %10529 = vmatprep.subr.bf16.mxu0 %v11675_v48  ;;  %10557 = vmatprep.subr.bf16.mxu1 %v11676_v49 }
 0xa9f   : > { %10530 = vmatpush3.bf16.msra.mxu0 %v11677_v50  ;;  %10558 = vmatpush3.bf16.msra.mxu1 %v11678_v51 }
 0xaa0   : > { %10531 = vmatprep.subr.bf16.mxu0 %v11679_v52  ;;  %10559 = vmatprep.subr.bf16.mxu1 %v11680_v53 }
 0xaa1   : > { %2821 = vmatmul.mubr.bf16.gmra.mrb[24].mxu0 %v2596_v39  ;;  %2872 = vmatmul.mubr.bf16.gmra.mrb[24].mxu1 %v2596_v39 }
 0xaa3   : > { %10532 = vmatpush3.bf16.msra.mxu0 %v11681_v54  ;;  %10560 = vmatpush3.bf16.msra.mxu1 %v11682_v55 }
 0xaa4   : > { %10533 = vmatprep.subr.bf16.mxu0 %v11683_v56  ;;  %10561 = vmatprep.subr.bf16.mxu1 %v11684_v57 }
 0xaa7   : > { %10534 = vmatpush3.bf16.msra.mxu0 %v11685_v58  ;;  %10562 = vmatpush3.bf16.msra.mxu1 %v11686_v59 }
 0xaa8   : > { %10535 = vmatprep.subr.bf16.mxu0 %v11687_v60  ;;  %10563 = vmatprep.subr.bf16.mxu1 %v11688_v61 }
 0xaab   : > { %10536 = vmatpush3.bf16.msra.mxu0 %v11689_v62  ;;  %10564 = vmatpush3.bf16.msra.mxu1 %v11690_v63 }
 0xaac   : > { %10537 = vmatprep.subr.bf16.mxu0 %v11691_v1  ;;  %10565 = vmatprep.subr.bf16.mxu1 %v11692_v2 }
 0xaaf   : > { %10538 = vmatpush3.bf16.msra.mxu0 %v11693_v4  ;;  %10566 = vmatpush3.bf16.msra.mxu1 %v11694_v5 }
 0xab0   : > { %10539 = vmatprep.subr.bf16.mxu0 %v11695_v6  ;;  %10567 = vmatprep.subr.bf16.mxu1 %v11696_v7 }
 0xab3   : > { %10540 = vmatpush3.bf16.msra.mxu0 %v11697_v8  ;;  %10568 = vmatpush3.bf16.msra.mxu1 %v11698_v9 }
 0xab4   : > { %10541 = vmatprep.subr.bf16.mxu0 %v11699_v11  ;;  %10569 = vmatprep.subr.bf16.mxu1 %v11700_v12 }
 0xab7   : > { %10542 = vmatpush3.bf16.msra.mxu0 %v11701_v15  ;;  %10570 = vmatpush3.bf16.msra.mxu1 %v11702_v16 }
 0xb6c   : > { %v2812_v23 = vpop.f32.mrb[20].mxu0  ;;  %v2863_v26 = vpop.f32.mrb[20].mxu1 }
 0xb6d   : > { %v13691_v27 = vadd.f32 %v2812_v23, %v2601_v19  ;;  %v13693_v14 = vadd.f32 %v2863_v26, %v2609_v20  ;;  %v2814_v33 = vpop.f32.mrb[21].mxu0  ;;  %v2865_v28 = vpop.f32.mrb[21].mxu1 }
 0xb6e   : > { %v13695_v29 = vadd.f32 %v2814_v33, %v2605_v21  ;;  %v13698_v40 = vadd.f32 %v2865_v28, %v13689_v22  ;;  %v2816_v30 = vpop.f32.mrb[22].mxu0  ;;  %v2867_v36 = vpop.f32.mrb[22].mxu1 }
 0xb6f   : > { %v2892_v34 = vmul.f32 0.044715, %v13691_v27  ;;  %v2894_v31 = vmul.f32 0.044715, %v13693_v14  ;;  %v13704_v38 = vadd.f32 %v2816_v30, %v2601_v19  ;;  %v13706_v42 = vadd.f32 %v2867_v36, %v2609_v20  ;;  %v2818_v37 = vpop.f32.mrb[23].mxu0  ;;  %v2869_v39 = vpop.f32.mrb[23].mxu1 }
 0xb70   : > { %v2893_v32 = vmul.f32 0.044715, %v13695_v29  ;;  %v2895_v35 = vmul.f32 0.044715, %v13698_v40  ;;  %v13710_v46 = vadd.f32 %v2818_v37, %v2605_v21  ;;  %v13713_v47 = vadd.f32 %v2869_v39, %v13689_v22 }
 0xb71   : > { %v2904_v44 = vmul.f32 %v2892_v34, %v13691_v27  ;;  %v2906_v45 = vmul.f32 %v2894_v31, %v13693_v14  ;;  %v2896_v48 = vmul.f32 0.044715, %v13704_v38  ;;  %v2898_v51 = vmul.f32 0.044715, %v13706_v42 }
 0xb72   : > { %v2905_v52 = vmul.f32 %v2893_v32, %v13695_v29  ;;  %v2907_v53 = vmul.f32 %v2895_v35, %v13698_v40  ;;  %v2897_v55 = vmul.f32 0.044715, %v13710_v46  ;;  %v2899_v61 = vmul.f32 0.044715, %v13713_v47 }
 0xb73   : > { %v2916_v49 = vmul.f32 %v2904_v44, %v13691_v27  ;;  %v2918_v50 = vmul.f32 %v2906_v45, %v13693_v14  ;;  %v2908_v54 = vmul.f32 %v2896_v48, %v13704_v38  ;;  %v2910_v60 = vmul.f32 %v2898_v51, %v13706_v42 }
 0xb74   : > { %v2822_v56 = vpop.f32.mrb[24].mxu0  ;;  %v2873_v57 = vpop.f32.mrb[24].mxu1  ;;  %v2909_v2 = vmul.f32 %v2897_v55, %v13710_v46  ;;  %v2911_v12 = vmul.f32 %v2899_v61, %v13713_v47  ;;  %v2917_v17 = vmul.f32 %v2905_v52, %v13695_v29  ;;  %v2919_v28 = vmul.f32 %v2907_v53, %v13698_v40 }
 0xb75   : > { %v2928_v58 = vadd.f32 %v2916_v49, %v13691_v27  ;;  %v2930_v59 = vadd.f32 %v2918_v50, %v13693_v14  ;;  %v2824_v62 = vpop.f32.mrb[25].mxu0  ;;  %v2875_v63 = vpop.f32.mrb[25].mxu1  ;;  %v2920_v1 = vmul.f32 %v2908_v54, %v13704_v38  ;;  %v13729_v4 = vadd.f32 %v2822_v56, %v2601_v19 }
 0xb76   : > { %v13731_v5 = vadd.f32 %v2873_v57, %v2609_v20  ;;  %v2826_v6 = vpop.f32.mrb[26].mxu0  ;;  %v2877_v7 = vpop.f32.mrb[26].mxu1  ;;  %v2922_v11 = vmul.f32 %v2910_v60, %v13706_v42  ;;  %v2921_v26 = vmul.f32 %v2909_v2, %v13710_v46  ;;  %v13740_v33 = vadd.f32 %v2824_v62, %v2605_v21 }
 0xb77   : > { %v2940_v8 = vmul.f32 0.7978846, %v2928_v58  ;;  %v2942_v9 = vmul.f32 0.7978846, %v2930_v59  ;;  %v2827_v15 = vpop.f32.mrb[27].mxu0  ;;  %v2878_v16 = vpop.f32.mrb[27].mxu1  ;;  %v2932_v23 = vadd.f32 %v2920_v1, %v13704_v38  ;;  %v2923_v31 = vmul.f32 %v2911_v12, %v13713_v47 }
 0xb78   : > { %v2934_v19 = vadd.f32 %v2922_v11, %v13706_v42  ;;  %v2900_v20 = vmul.f32 0.044715, %v13729_v4  ;;  %v2902_v36 = vmul.f32 0.044715, %v13731_v5  ;;  %v2901_v32 = vmul.f32 0.044715, %v13740_v33 }
 0xb79   : > { %12179 = vtanh.f32 %v2940_v8  ;;  %v2944_v30 = vmul.f32 0.7978846, %v2932_v23  ;;  %v13747_v35 = vadd.f32 %v2875_v63, %v13689_v22  ;;  %v2929_v37 = vadd.f32 %v2917_v17, %v13695_v29 }
 0xb7a   : > { %12181 = vtanh.f32 %v2942_v9  ;;  %v2946_v34 = vmul.f32 0.7978846, %v2934_v19  ;;  %v2933_v21 = vadd.f32 %v2921_v26, %v13710_v46  ;;  %v2912_v39 = vmul.f32 %v2900_v20, %v13729_v4 }
 0xb7b   : > { %12183 = vtanh.f32 %v2944_v30  ;;  %v2913_v44 = vmul.f32 %v2901_v32, %v13740_v33  ;;  %v2903_v45 = vmul.f32 0.044715, %v13747_v35  ;;  %v2914_v48 = vmul.f32 %v2902_v36, %v13731_v5 }
 0xb7c   : > { %12185 = vtanh.f32 %v2946_v34  ;;  %v2941_v49 = vmul.f32 0.7978846, %v2929_v37  ;;  %v2945_v50 = vmul.f32 0.7978846, %v2933_v21  ;;  %v2931_v51 = vadd.f32 %v2919_v28, %v13698_v40 }
 0xb7d   : > { %v2915_v22 = vmul.f32 %v2903_v45, %v13747_v35  ;;  %v2935_v52 = vadd.f32 %v2923_v31, %v13713_v47  ;;  %v2925_v53 = vmul.f32 %v2913_v44, %v13740_v33  ;;  %v2924_v58 = vmul.f32 %v2912_v39, %v13729_v4 }
 0xb7e   : > { %12187 = vtanh.f32 %v2941_v49  ;;  %v2943_v54 = vmul.f32 0.7978846, %v2931_v51  ;;  %v2926_v59 = vmul.f32 %v2914_v48, %v13731_v5  ;;  %v2880_v16 = vmul.f32 0.5, %v13691_v27 }
 0xb7f   : > { %12189 = vtanh.f32 %v2945_v50  ;;  %v2947_v55 = vmul.f32 0.7978846, %v2935_v52  ;;  %v2937_v56 = vadd.f32 %v2925_v53, %v13740_v33  ;;  %v2927_v57 = vmul.f32 %v2915_v22, %v13747_v35 }
 0xb80   : > { %12191 = vtanh.f32 %v2943_v54  ;;  %v2936_v1 = vadd.f32 %v2924_v58, %v13729_v4  ;;  %v2938_v2 = vadd.f32 %v2926_v59, %v13731_v5  ;;  %v2884_v17 = vmul.f32 0.5, %v13704_v38 }
 0xb81   : > { %12193 = vtanh.f32 %v2947_v55  ;;  %v2949_v61 = vmul.f32 0.7978846, %v2937_v56  ;;  %v2939_v62 = vadd.f32 %v2927_v57, %v13747_v35  ;;  %v2882_v26 = vmul.f32 0.5, %v13693_v14 }
 0xb82   : > { %v2948_v11 = vmul.f32 0.7978846, %v2936_v1  ;;  %v2950_v12 = vmul.f32 0.7978846, %v2938_v2  ;;  %v2886_v19 = vmul.f32 0.5, %v13706_v42  ;;  %v2881_v38 = vmul.f32 0.5, %v13695_v29 }
 0xb83   : > { %v12180_v60 = vpop.eup %12179  ;;  %12195 = vtanh.f32 %v2949_v61  ;;  %v2951_v7 = vmul.f32 0.7978846, %v2939_v62  ;;  %v2885_v39 = vmul.f32 0.5, %v13710_v46  ;;  %v2883_v42 = vmul.f32 0.5, %v13698_v40 }
 0xb84   : > { %v12182_v63 = vpop.eup %12181  ;;  %v2964_v6 = vadd.f32 1.0, %v12180_v60  ;;  %v2887_v51 = vmul.f32 0.5, %v13713_v47  ;;  %v2889_v53 = vmul.f32 0.5, %v13740_v33  ;;  %v2891_v40 = vmul.f32 0.5, %v13747_v35 }
 0xb85   : > { %v12184_v8 = vpop.eup %12183  ;;  %v2966_v9 = vadd.f32 1.0, %v12182_v63  ;;  %12197 = vtanh.f32 %v2951_v7  ;;  %v2888_v47 = vmul.f32 0.5, %v13729_v4 }
 0xb86   : > { %v12186_v15 = vpop.eup %12185  ;;  %v2968_v23 = vadd.f32 1.0, %v12184_v8  ;;  %12199 = vtanh.f32 %v2948_v11  ;;  %v2976_v28 = vmul.f32 %v2964_v6, %v2880_v16  ;;  %v2890_v6 = vmul.f32 0.5, %v13731_v5  ;;  %v9718_v11 = vld [vmem:[%s14868_s15] ss:$0 sm:$0xff]  ;;  %s14871_s15 = sld [smem:[#allocation55_spill]] }
 0xb87   : > { %v2970_v20 = vadd.f32 1.0, %v12186_v15  ;;  %12201 = vtanh.f32 %v2950_v12  ;;  %v2978_v34 = vmul.f32 %v2966_v9, %v2882_v26 }
 0xb88   : > { %v2980_v30 = vmul.f32 %v2968_v23, %v2884_v17  ;;  %v12188_v36 = vpop.eup %12187 }
 0xb89   : > { %v2982_v31 = vmul.f32 %v2970_v20, %v2886_v19  ;;  %v12190_v32 = vpop.eup %12189  ;;  %v2965_v37 = vadd.f32 1.0, %v12188_v36 }
 0xb8a   : > { %v3053_v21 = vpack.c.bf16 %v2980_v30, %v2976_v28  ;;  %v12192_v27 = vpop.eup %12191  ;;  %v2969_v44 = vadd.f32 1.0, %v12190_v32 }
 0xb8b   : > { %v3055_v14 = vpack.c.bf16 %v2982_v31, %v2978_v34  ;;  %v12194_v45 = vpop.eup %12193  ;;  %v2967_v48 = vadd.f32 1.0, %v12192_v27  ;;  %v2977_v49 = vmul.f32 %v2965_v37, %v2881_v38 }
 0xb8c   : > { %v2981_v50 = vmul.f32 %v2969_v44, %v2885_v39  ;;  %v2971_v22 = vadd.f32 1.0, %v12194_v45 }
 0xb8d   : > { %v12196_v52 = vpop.eup %12195  ;;  %v2979_v55 = vmul.f32 %v2967_v48, %v2883_v42 }
 0xb8e   : > { %v3054_v54 = vpack.c.bf16 %v2981_v50, %v2977_v49  ;;  %v2983_v56 = vmul.f32 %v2971_v22, %v2887_v51  ;;  %v2973_v29 = vadd.f32 1.0, %v12196_v52 }
 0xb8f   : > { %v12198_v57 = vpop.eup %12197 }
 0xb90   : > { %v12200_v46 = vpop.eup %12199  ;;  %3291 = vmatprep.mubr.bf16.mxu0 %v3054_v54  ;;  %v3056_v58 = vpack.c.bf16 %v2983_v56, %v2979_v55  ;;  %v2985_v59 = vmul.f32 %v2973_v29, %v2889_v53  ;;  %v2975_v60 = vadd.f32 1.0, %v12198_v57  ;;  %v11703_v53 = vld [vmem:[%s14855_s10 + $0xc0] ss:$12 sps:$4 sm:$0xff]   ;;  %v11708_v54 = vld [vmem:[%s14855_s10 + $0xdc] ss:$12 sps:$4 sm:$0xff]  }
 0xb91   : > { %v12202_v61 = vpop.eup %12201  ;;  %3292 = vmatmul.mubr.bf16.vlgmr.msra.gmra.mrb[28].mxu0 %v3053_v21  ;;  %v2972_v62 = vadd.f32 1.0, %v12200_v46  ;;  %v11706_v55 = vld [vmem:[%s14855_s10 + $0xd8] ss:$12 sps:$4 sm:$0xff]  }
 0xb92   : > { %3339 = vmatprep.mubr.bf16.mxu1 %v3056_v58  ;;  %v3058_v63 = vpack.c.bf16 %v2985_v59, %v2985_v59  ;;  %v2987_v33 = vmul.f32 %v2975_v60, %v2891_v40  ;;  %v2974_v1 = vadd.f32 1.0, %v12202_v61 }
 0xb93   : > { %3340 = vmatmul.mubr.bf16.vlgmr.msra.gmra.mrb[28].mxu1 %v3055_v14  ;;  %v2984_v2 = vmul.f32 %v2972_v62, %v2888_v47 }
 0xb94   : > { %3299 = vmatprep.mubr.bf16.mxu0 %v3058_v63  ;;  %v3060_v7 = vpack.c.bf16 %v2987_v33, %v2987_v33  ;;  %v2986_v8 = vmul.f32 %v2974_v1, %v2890_v6  ;;  %v11711_v33 = vld [vmem:[%s14855_s10 + $0xf4] ss:$12 sps:$4 sm:$0xff]   ;;  %v11715_v6 = vld [vmem:[%s14855_s10 + $0x10c] ss:$12 sps:$4 sm:$0xff]  }
 0xb95   : > { %v3057_v35 = vpack.c.bf16 %v2984_v2, %v2984_v2  ;;  %v11712_v1 = vld [vmem:[%s14855_s10 + $0xc8] ss:$12 sps:$4 sm:$0xff]   ;;  %v11709_v2 = vld [vmem:[%s14855_s10 + $0xf0] ss:$12 sps:$4 sm:$0xff]  }
 0xb96   : > { %3347 = vmatprep.mubr.bf16.mxu1 %v3060_v7  ;;  %v3059_v9 = vpack.c.bf16 %v2986_v8, %v2986_v8  ;;  %10957 = vmatprep.subr.bf16.mxu1 %v11712_v1  ;;  %v11716_v7 = vld [vmem:[%s14855_s10 + $0xe0] ss:$12 sps:$4 sm:$0xff]   ;;  %v11713_v8 = vld [vmem:[%s14855_s10 + $0x108] ss:$12 sps:$4 sm:$0xff]  }
 0xb97   : > { %10958 = vmatpush3.bf16.msra.mxu1 %v11712_v1 }
 0xb98   : > { %10959 = vmatprep.subr.bf16.mxu1 %v11716_v7 }
 0xb99   : > { %3300 = vmatmul.mubr.bf16.gmra.mrb[32].mxu0 %v3057_v35  ;;  %v11719_v35 = vld [vmem:[%s14855_s10 + $0x124] ss:$12 sps:$4 sm:$0xff]  }
 0xb9a   : > { %3628 = vmatprep.mubr.bf16.mxu0 %v12910_v0 }
 0xb9b   : > { %3348 = vmatmul.mubr.bf16.gmra.mrb[32].mxu1 %v3059_v9  ;;  %v11720_v9 = vld [vmem:[%s14855_s10 + $0xf8] ss:$12 sps:$4 sm:$0xff]  }
 0xb9c   : > { %10960 = vmatpush3.bf16.msra.mxu1 %v11716_v7 }
 0xb9d   : > { %10961 = vmatprep.subr.bf16.mxu1 %v11720_v9 }
 0xba0   : > { %10962 = vmatpush3.bf16.msra.mxu1 %v11720_v9 }
 0xc64   : > { %v10543_v4 = vpop.f32.mrb[28].mxu0 }
 0xc65   : > { %v10544_v12 = vpop.f32.mrb[29].mxu0 }
 0xc66   : > { %v10571_v15 = vpop.f32.mrb[28].mxu1  ;;  %v10545_v16 = vadd.f32 %v10544_v12, %v10543_v4  ;;  %v10546_v17 = vpop.f32.mrb[30].mxu0  ;;  %v11717_v4 = vld [vmem:[%s14855_s10 + $0x120] ss:$12 sps:$4 sm:$0xff]   ;;  %v11723_v12 = vld [vmem:[%s14855_s10 + $0x13c] ss:$12 sps:$4 sm:$0xff]  }
 0xc67   : > { %v10572_v23 = vpop.f32.mrb[29].mxu1  ;;  %v10547_v26 = vpop.f32.mrb[31].mxu0 }
 0xc68   : > { %v3294_v19 = vadd.f32 %v10545_v16, %v9718_v11  ;;  %v10573_v5 = vadd.f32 %v10572_v23, %v10571_v15  ;;  %v10574_v20 = vpop.f32.mrb[30].mxu1  ;;  %v10548_v28 = vadd.f32 %v10547_v26, %v10546_v17  ;;  %v11724_v15 = vld [vmem:[%s14855_s10 + $0x110] ss:$12 sps:$4 sm:$0xff]   ;;  %v11727_v16 = vld [vmem:[%s14855_s10 + $0x154] ss:$12 sps:$4 sm:$0xff]  }
 0xc69   : > { %v10575_v30 = vpop.f32.mrb[31].mxu1  ;;  %v11728_v17 = vld [vmem:[%s14855_s10 + $0x128] ss:$12 sps:$4 sm:$0xff]   ;;  %10963 = vmatprep.subr.bf16.mxu1 %v11724_v15  ;;  %v11725_v23 = vld [vmem:[%s14855_s10 + $0x150] ss:$12 sps:$4 sm:$0xff]  }
 0xc6a   : > { %v3342_v36 = vadd.f32 %v10573_v5, %v3294_v19  ;;  %v3297_v34 = vadd.f32 %v10548_v28, %v9718_v11  ;;  %v10576_v31 = vadd.f32 %v10575_v30, %v10574_v20  ;;  %10964 = vmatpush3.bf16.msra.mxu1 %v11724_v15  ;;  %v11731_v26 = vld [vmem:[%s14855_s10 + $0x16c] ss:$12 sps:$4 sm:$0xff]   ;;  %v11729_v5 = vld [vmem:[%s14855_s10 + $0x168] ss:$12 sps:$4 sm:$0xff]   ;;  %v11734_v28 = vld [vmem:[%s14855_s10 + $0x170] ss:$12 sps:$4 sm:$0xff]  }
 0xc6b   : > { %10965 = vmatprep.subr.bf16.mxu1 %v11728_v17  ;;  %v11732_v19 = vld [vmem:[%s14855_s10 + $0x140] ss:$12 sps:$4 sm:$0xff]   ;;  %v11733_v20 = vld [vmem:[%s14855_s10 + $0x158] ss:$12 sps:$4 sm:$0xff]  }
 0xc6c   : > { %v3345_v32 = vadd.f32 %v10576_v31, %v3297_v34  ;;  %v10549_v37 = vpop.f32.mrb[32].mxu0  ;;  %v13781_v21 = vadd.f32 %v3342_v36, %v13582_v24 }
 0xc6d   : > { %v10550_v27 = vpop.f32.mrb[33].mxu0 }
 0xc6e   : > { %v10577_v38 = vpop.f32.mrb[32].mxu1  ;;  %v10551_v39 = vadd.f32 %v10550_v27, %v10549_v37  ;;  %v10552_v44 = vpop.f32.mrb[34].mxu0  ;;  %3362 = vadd.xlane.f32.xlu0 %v13781_v21  ;;  %v13785_v14 = vadd.f32 %v3345_v32, %v13586_v25  ;;  %v11705_v25 = vld [vmem:[%s14855_s10 + $0xc4] ss:$12 sps:$4 sm:$0xff]   ;;  %10966 = vmatpush3.bf16.msra.mxu1 %v11728_v17 }
 0xc6f   : > { %v10578_v45 = vpop.f32.mrb[33].mxu1  ;;  %v10553_v42 = vpop.f32.mrb[35].mxu0  ;;  %3596 = vmatprep.subr.bf16.mxu0 %v11705_v25  ;;  %10967 = vmatprep.subr.bf16.mxu1 %v11732_v19 }
 0xc70   : > { %v3302_v48 = vadd.f32 %v10551_v39, %v9718_v11  ;;  %v10579_v49 = vadd.f32 %v10578_v45, %v10577_v38  ;;  %v10580_v50 = vpop.f32.mrb[34].mxu1  ;;  %3364 = vadd.xlane.f32.xlu1 %v13785_v14  ;;  %3597 = vmatpush1.bf16.msra.mxu0 %v11703_v53  ;;  %v11721_v11 = vld [vmem:[%s14855_s10 + $0x138] ss:$12 sps:$4 sm:$0xff]   ;;  %v9753_v45 = vld [vmem:[%s14856_s12 + $0x1] ss:$0 sm:$0xff] }
 0xc71   : > { %v10581_v24 = vpop.f32.mrb[35].mxu1  ;;  %3598 = vmatprep.subr.bf16.mxu0 %v11708_v54 }
 0xc72   : > { %v3350_v51 = vadd.f32 %v10579_v49, %v3302_v48  ;;  %10968 = vmatpush3.bf16.msra.mxu1 %v11732_v19  ;;  %v9754_v24 = vld [vmem:[%s14857_s28 + $0x1] ss:$0 sm:$0xff] }
 0xc73   : > { %10969 = vmatprep.subr.bf16.mxu1 %v11733_v20 }
 0xc74   : > { %v13789_v22 = vadd.f32 %v3350_v51, %v13589_v10  ;;  %3599 = vmatpush1.bf16.msra.mxu0 %v11706_v55 }
 0xc75   : > { %3600 = vmatprep.subr.bf16.mxu0 %v11711_v33 }
 0xc76   : > { %v3366_v52 = vsel %vm1650_vm1, %v13789_v22, 0.0  ;;  %10970 = vmatpush3.bf16.msra.mxu1 %v11733_v20 }
 0xc77   : > { %3367 = vadd.xlane.f32.xlu0 %v3366_v52  ;;  %10971 = vmatprep.subr.bf16.mxu1 %v11734_v28 }
 0xc78   : > { %3601 = vmatpush1.bf16.msra.mxu0 %v11709_v2 }
 0xc79   : > { %3602 = vmatprep.subr.bf16.mxu0 %v11715_v6 }
 0xc7a   : > { %10972 = vmatpush3.bf16.msra.mxu1 %v11734_v28 }
 0xc7c   : > { %3603 = vmatpush1.bf16.msra.mxu0 %v11713_v8 }
 0xc7d   : > { %3604 = vmatprep.subr.bf16.mxu0 %v11719_v35 }
 0xc80   : > { %3605 = vmatpush1.bf16.msra.mxu0 %v11717_v4 }
 0xc81   : > { %3606 = vmatprep.subr.bf16.mxu0 %v11723_v12 }
 0xc84   : > { %3607 = vmatpush1.bf16.msra.mxu0 %v11721_v11 }
 0xc85   : > { %3608 = vmatprep.subr.bf16.mxu0 %v11727_v16 }
 0xc88   : > { %3609 = vmatpush1.bf16.msra.mxu0 %v11725_v23 }
 0xc89   : > { %3610 = vmatprep.subr.bf16.mxu0 %v11731_v26 }
 0xc8c   : > { %3611 = vmatpush1.bf16.msra.mxu0 %v11729_v5 }
 0xcfb   : > { %v3363_v56 = vpop.xlane.xlu0 %3362 }
 0xcfc   : > { %v3369_v29 = vmul.f32 0.0078125, %v3363_v56 }
 0xcfd   : > { %v3365_v57 = vpop.xlane.xlu1 %3364 }
 0xcfe   : > { %v13798_v10 = vsub.f32 %v13781_v21, %v3369_v29  ;;  %v3370_v46 = vmul.f32 0.0078125, %v3365_v57 }
 0xd00   : > { %v13801_v58 = vsub.f32 %v13785_v14, %v3370_v46  ;;  %v3375_v59 = vmul.f32 %v13798_v10, %v13798_v10 }
 0xd02   : > { %3378 = vadd.xlane.f32.xlu1 %v3375_v59  ;;  %v3376_v40 = vmul.f32 %v13801_v58, %v13801_v58 }
 0xd04   : > { %3380 = vadd.xlane.f32.xlu0 %v3376_v40  ;;  %v3368_v60 = vpop.xlane.xlu0 %3367 }
 0xd05   : > { %v3371_v61 = vmul.f32 0.0078125, %v3368_v60 }
 0xd07   : > { %v13808_v47 = vsub.f32 %v13789_v22, %v3371_v61 }
 0xd09   : > { %v3377_v62 = vmul.f32 %v13808_v47, %v13808_v47 }
 0xd0b   : > { %v3382_v63 = vsel %vm1650_vm1, %v3377_v62, 0.0 }
 0xd0c   : > { %3383 = vadd.xlane.f32.xlu1 %v3382_v63 }
 0xd8f   : > { %v3379_v30 = vpop.xlane.xlu1 %3378 }
 0xd90   : > { %v3385_v36 = vmul.f32 0.0078125, %v3379_v30 }
 0xd91   : > { %v3381_v34 = vpop.xlane.xlu0 %3380 }
 0xd92   : > { %v3388_v31 = vadd.f32 1e-06, %v3385_v36  ;;  %v3386_v32 = vmul.f32 0.0078125, %v3381_v34 }
 0xd94   : > { %12203 = vrsqrt.f32 %v3388_v31  ;;  %v3389_v37 = vadd.f32 1e-06, %v3386_v32 }
 0xd96   : > { %12205 = vrsqrt.f32 %v3389_v37 }
 0xd99   : > { %v3384_v27 = vpop.xlane.xlu1 %3383 }
 0xd9a   : > { %v3387_v38 = vmul.f32 0.0078125, %v3384_v27 }
 0xd9c   : > { %v3390_v39 = vadd.f32 1e-06, %v3387_v38 }
 0xd9e   : > { %v12204_v44 = vpop.eup %12203  ;;  %12207 = vrsqrt.f32 %v3390_v39 }
 0xd9f   : > { %v3394_v42 = vmul.f32 %v12204_v44, %v13798_v10  ;;  %v9787_v10 = vld [vmem:[%s14859_s26 + $0x3] sm:$0x7] }
 0xda0   : > { %v12206_v48 = vpop.eup %12205  ;;  %v3456_v46 = vrot.slane %v9787_v10, %v13505_v41  ;;  %v3460_v59 = vrot.slane %v9787_v10, %v13509_v43  ;;  %v3464_v2 = vrot.slane %v9787_v10, %v13524_v3 }
 0xda1   : > { %v3403_v49 = vmul.f32 %v9753_v45, %v3394_v42  ;;  %v3395_v50 = vmul.f32 %v12206_v48, %v13801_v58 }
 0xda3   : > { %v3404_v51 = vmul.f32 %v9753_v45, %v3395_v50  ;;  %v3412_v52 = vadd.f32 %v9754_v24, %v3403_v49 }
 0xda5   : > { %v3413_v53 = vadd.f32 %v9754_v24, %v3404_v51 }
 0xda7   : > { %v3450_v25 = vpack.c.bf16 %v3413_v53, %v3412_v52 }
 0xda8   : > { %v12208_v54 = vpop.eup %12207 }
 0xda9   : > { %3629 = vmatmul.mubr.bf16.vlgmr.msra.gmra.mrb[36].mxu0 %v3450_v25  ;;  %10973 = vmatprep.mubr.bf16.mxu1 %v3450_v25  ;;  %v3396_v55 = vmul.f32 %v12208_v54, %v13808_v47 }
 0xdaa   : > { %3638 = vmatprep.mubr.bf16.mxu0 %v12910_v0 }
 0xdab   : > { %v3405_v56 = vmul.f32 %v9753_v45, %v3396_v55 }
 0xdad   : > { %v3414_v29 = vadd.f32 %v9754_v24, %v3405_v56 }
 0xdaf   : > { %v3451_v57 = vpack.c.bf16 %v3414_v29, %v3414_v29 }
 0xdb1   : > { %3639 = vmatmul.mubr.bf16.gmra.mrb[40].mxu0 %v3451_v57  ;;  %10974 = vmatmul.mubr.bf16.vlgmr.msra.gmra.mrb[36].mxu1 %v3451_v57 }
 0xe7c   : > { %v3630_v58 = vpop.f32.mrb[36].mxu0 }
 0xe7d   : > { %v3632_v40 = vpop.f32.mrb[37].mxu0  ;;  %v3631_v61 = vadd.f32 %v3630_v58, %v3456_v46 }
 0xe7e   : > { %v3634_v60 = vpop.f32.mrb[38].mxu0  ;;  %v3633_v33 = vadd.f32 %v3632_v40, %v3460_v59 }
 0xe7f   : > { %v3635_v62 = vadd.f32 %v3634_v60, %v3456_v46  ;;  %v3636_v63 = vpop.f32.mrb[39].mxu0 }
 0xe80   : > { %v3637_v47 = vadd.f32 %v3636_v63, %v3460_v59 }
 0xe81   : > { %v13842_v1 = vpack.c.bf16 %v3635_v62, %v3631_v61 }
 0xe82   : > { %v13845_v6 = vpack.c.bf16 %v3637_v47, %v3633_v33 }
 0xe83   : > { %10981 = vmatprep.mubr.msk.bf16.mxu0 %vm1586_vm0, %v13842_v1 }
 0xe84   : > { %v3640_v7 = vpop.f32.mrb[40].mxu0  ;;  %v10975_v8 = vpop.f32.mrb[36].mxu1  ;;  %11325 = vmatprep.subr.msk.bf16.mxu0 %vm1586_vm0, %v13845_v6  ;;  %v3727_v35 = vsel %vm1586_vm0, %v13845_v6, 0 }
 0xe85   : > { %v3690_v9 = vadd.f32 %v10975_v8, %v3464_v2  ;;  %v3642_v4 = vpop.f32.mrb[41].mxu0  ;;  %v3681_v11 = vpop.f32.mrb[37].mxu1  ;;  %10978 = vmatpush3.bf16.xpose.msra.mxu0 %v3727_v35  ;;  %v3641_v34 = vadd.f32 %v3640_v7, %v3456_v46 }
 0xe86   : > { %v3643_v12 = vadd.f32 %v3642_v4, %v3460_v59  ;;  %v3644_v15 = vpop.f32.mrb[42].mxu0  ;;  %v10976_v16 = vpop.f32.mrb[38].mxu1  ;;  %v3682_v5 = vadd.f32 %v3681_v11, %v3464_v2  ;;  %v11735_v11 = vld [vmem:[%s14860_s24 + $0x40] sm:$0xff]  }
 0xe87   : > { %v3645_v17 = vpop.f32.mrb[43].mxu0  ;;  %v3684_v23 = vpop.f32.mrb[39].mxu1  ;;  %v13853_v26 = vpack.c.bf16 %v3690_v9, %v3690_v9  ;;  %v3715_v31 = vpack.c.bf16 %v3641_v34, %v3641_v34  ;;  %v11736_v15 = vld [vmem:[%s14860_s24 + $0x48] sm:$0xff]  }
 0xe88   : > { %v3717_v19 = vpack.c.bf16 %v3643_v12, %v3643_v12  ;;  %v3685_v20 = vadd.f32 %v3684_v23, %v3464_v2  ;;  %v11737_v17 = vld [vmem:[%s14860_s24 + $0x50] sm:$0xff]   ;;  %v11738_v23 = vld [vmem:[%s14860_s24 + $0x58] sm:$0xff]  }
 0xe89   : > { %v3825_v30 = vand.u32 %v13853_v26, %v13531_v13 }
 0xe8a   : > { %v13855_v28 = vpack.c.bf16 %v3685_v20, %v3682_v5  ;;  %11326 = vmatprep.subr.msk.bf16.mxu0 %vm1586_vm0, %v3717_v19  ;;  %v3730_v36 = vsel %vm1586_vm0, %v3717_v19, 0 }
 0xe8c   : > { %10985 = vmatprep.subr.bf16.mxu1 %v13855_v28 }
 0xe8d   : > { %10980 = vmatpush3.bf16.xpose.msra.mxu0 %v3730_v36  ;;  %10986 = vmatpush3.bf16.msra.mxu1 %v13855_v28 }
 0xe8e   : > { %10987 = vmatprep.subr.bf16.mxu1 %v3825_v30 }
 0xe91   : > { %10988 = vmatpush3.bf16.msra.mxu1 %v3825_v30 }
 0xe94   : > { %10982 = vmatmul.mubr.msk.bf16.vlgmr.msra.gmra.mrb[44].mxu0 %vm1586_vm0, %v3715_v31 }
 0xf67   : > { %v10983_v32 = vpop.f32.mrb[44].mxu0 }
 0xf68   : > { %v3766_v37 = vpop.f32.mrb[45].mxu0  ;;  %v3782_v44 = vmul.f32 0.125, %v10983_v32 }
 0xf69   : > { %v3780_v27 = vmul.f32 0.125, %v3766_v37  ;;  %v10984_v38 = vpop.f32.mrb[46].mxu0 }
 0xf6a   : > { %v3769_v39 = vpop.f32.mrb[47].mxu0  ;;  %v3789_v49 = vsel %vm2072_vm3, %v3782_v44, -inf }
 0xf6b   : > { %v3781_v45 = vmul.f32 0.125, %v3769_v39  ;;  %v3783_v42 = vsel %vm2065_vm2, %v3780_v27, -inf }
 0xf6c   : > { %3784 = vmax.xlane.f32.xlu0 %v3783_v42 }
 0xf6d   : > { %v3786_v48 = vsel %vm2065_vm2, %v3781_v45, -inf }
 0xf6e   : > { %3787 = vmax.xlane.f32.xlu1 %v3786_v48 }
 0xf70   : > { %3790 = vmax.xlane.f32.xlu0 %v3789_v49 }
 0xff9   : > { %v3785_v50 = vpop.xlane.xlu0 %3784 }
 0xffa   : > { %v3792_v24 = vsub.f32 %v3780_v27, %v3785_v50 }
 0xffb   : > { %v3788_v51 = vpop.xlane.xlu1 %3787 }
 0xffc   : > { %v3795_v52 = vmul.f32 1.442695, %v3792_v24  ;;  %v3793_v53 = vsub.f32 %v3781_v45, %v3788_v51 }
 0xffd   : > { %v3791_v25 = vpop.xlane.xlu0 %3790 }
 0xffe   : > { %12209 = vpow2.f32 %v3795_v52  ;;  %v3797_v54 = vmul.f32 1.442695, %v3793_v53  ;;  %v3794_v55 = vsub.f32 %v3782_v44, %v3791_v25 }
0x1000   : > { %12211 = vpow2.f32 %v3797_v54  ;;  %v3799_v56 = vmul.f32 1.442695, %v3794_v55 }
0x1002   : > { %12213 = vpow2.f32 %v3799_v56 }
0x1008   : > { %v12210_v29 = vpop.eup %12209 }
0x1009   : > { %v3801_v57 = vsel %vm2065_vm2, %v12210_v29, 0.0 }
0x100a   : > { %v12212_v10 = vpop.eup %12211  ;;  %3802 = vadd.xlane.f32.xlu1 %v3801_v57 }
0x100b   : > { %v3804_v46 = vsel %vm2065_vm2, %v12212_v10, 0.0 }
0x100c   : > { %v12214_v58 = vpop.eup %12213  ;;  %3805 = vadd.xlane.f32.xlu0 %v3804_v46 }
0x100d   : > { %v3807_v59 = vsel %vm2072_vm3, %v12214_v58, 0.0 }
0x100e   : > { %3808 = vadd.xlane.f32.xlu1 %v3807_v59 }
0x101f   : > { %3887 = vrot.lane.b32.xlu1 %v3717_v19, %s14870_s18 }
0x1022   : > { %3885 = vrot.lane.b32.xlu0 %v13845_v6, %s14870_s18 }
0x1023   : > { %3879 = vrot.lane.b32.xlu1 %v13842_v1, %s14870_s18 }
0x1027   : > { %3881 = vrot.lane.b32.xlu1 %v3715_v31, %s14870_s18 }
0x1097   : > { %v3803_v40 = vpop.xlane.xlu1 %3802 }
0x1098   : > { %12215 = vrcp.f32 %v3803_v40 }
0x1099   : > { %v3806_v60 = vpop.xlane.xlu0 %3805 }
0x109a   : > { %12217 = vrcp.f32 %v3806_v60 }
0x109b   : > { %v3809_v61 = vpop.xlane.xlu1 %3808 }
0x109c   : > { %12219 = vrcp.f32 %v3809_v61 }
0x109d   : > { %v3886_v62 = vpop.permute.xlu0 %3885 }
0x109e   : > { %11327 = vmatprep.subr.msk.bf16.mxu1 %vm1586_vm0, %v3886_v62  ;;  %v3896_v9 = vsel %vm1586_vm0, %v3886_v62, 0 }
0x109f   : > { %v3888_v47 = vpop.permute.xlu1 %3887 }
0x10a0   : > { %v3899_v12 = vsel %vm1586_vm0, %v3888_v47, 0 }
0x10a2   : > { %v12216_v63 = vpop.eup %12215 }
0x10a3   : > { %v3813_v2 = vmul.f32 %v12216_v63, %v12210_v29  ;;  %v3880_v4 = vpop.permute.xlu1 %3879 }
0x10a4   : > { %v12218_v33 = vpop.eup %12217 }
0x10a5   : > { %v3814_v6 = vmul.f32 %v12218_v33, %v12212_v10 }
0x10a6   : > { %v12220_v7 = vpop.eup %12219 }
0x10a7   : > { %v3815_v1 = vmul.f32 %v12220_v7, %v12214_v58  ;;  %v3816_v8 = vpack.c.bf16 %v3814_v6, %v3813_v2  ;;  %v3882_v16 = vpop.permute.xlu1 %3881 }
0x10a9   : > { %10989 = vmatprep.mubr.msk.bf16.mxu1 %vm2065_vm2, %v3816_v8  ;;  %v3817_v35 = vpack.c.bf16 %v3815_v1, %v3815_v1 }
0x10ab   : > { %10990 = vmatmul.mubr.msk.bf16.vlgmr.msra.gmra.mrb[40].mxu1 %vm2065_vm2, %v3817_v35 }
0x10ac   : > { %10994 = vmatpush3.bf16.xpose.msra.mxu1 %v3896_v9  ;;  %10997 = vmatprep.mubr.msk.bf16.mxu1 %vm1586_vm0, %v3880_v4 }
0x10ad   : > { %11328 = vmatprep.subr.msk.bf16.mxu1 %vm1586_vm0, %v3888_v47 }
0x10b4   : > { %10996 = vmatpush3.bf16.xpose.msra.mxu1 %v3899_v12  ;;  %v11740_v12 = vld [vmem:[%s14860_s24 + $0x68] sm:$0xff]  }
0x10b5   : > { %11021 = vmatprep.subr.bf16.mxu1 %v11735_v11 }
0x10bb   : > { %10998 = vmatmul.mubr.msk.bf16.vlgmr.msra.gmra.mrb[44].mxu1 %vm1586_vm0, %v3882_v16  ;;  %v11742_v16 = vld [vmem:[%s14860_s24 + $0x78] sm:$0xff]  }
0x10bc   : > { %11022 = vmatpush3.bf16.msra.mxu1 %v11735_v11 }
0x10bd   : > { %11023 = vmatprep.subr.bf16.mxu1 %v11736_v15 }
0x10c0   : > { %11024 = vmatpush3.bf16.msra.mxu1 %v11736_v15  ;;  %v11741_v15 = vld [vmem:[%s14860_s24 + $0x70] sm:$0xff]  }
0x10c1   : > { %11025 = vmatprep.subr.bf16.mxu1 %v11737_v17 }
0x10c4   : > { %11026 = vmatpush3.bf16.msra.mxu1 %v11737_v17 }
0x10c5   : > { %11027 = vmatprep.subr.bf16.mxu1 %v11738_v23 }
0x10c8   : > { %11028 = vmatpush3.bf16.msra.mxu1 %v11738_v23 }
0x117e   : > { %v10991_v19 = vpop.f32.mrb[40].mxu1 }
0x117f   : > { %v3861_v5 = vpop.f32.mrb[41].mxu1  ;;  %v3876_v34 = vpack.c.bf16 %v10991_v19, %v10991_v19 }
0x1180   : > { %v10992_v20 = vpop.f32.mrb[42].mxu1 }
0x1181   : > { %v3864_v30 = vpop.f32.mrb[43].mxu1 }
0x1182   : > { %v3875_v36 = vpack.c.bf16 %v3864_v30, %v3861_v5 }
0x1184   : > { %11029 = vmatprep.mubr.msk.bf16.mxu1 %vm1586_vm0, %v3875_v36 }
0x1185   : > { %11030 = vmatmul.mubr.msk.bf16.vlgmr.msra.gmra.mrb[48].mxu1 %vm1586_vm0, %v3876_v34  ;;  %v9849_v34 = vld [vmem:[%s14861_s6 + $0x1] ss:$0 sm:$0xff] }
0x1186   : > { %4579 = vmatprep.mubr.bf16.mxu1 %v12910_v0 }
0x118e   : > { %v10999_v31 = vpop.f32.mrb[44].mxu1 }
0x118f   : > { %v3935_v32 = vpop.f32.mrb[45].mxu1  ;;  %v3951_v39 = vmul.f32 0.125, %v10999_v31 }
0x1190   : > { %v3949_v37 = vmul.f32 0.125, %v3935_v32  ;;  %v11000_v27 = vpop.f32.mrb[46].mxu1 }
0x1191   : > { %v3938_v38 = vpop.f32.mrb[47].mxu1  ;;  %v3958_v48 = vsel %vm2072_vm3, %v3951_v39, -inf }
0x1192   : > { %v3950_v44 = vmul.f32 0.125, %v3938_v38  ;;  %v3952_v45 = vsel %vm2065_vm2, %v3949_v37, -inf }
0x1193   : > { %3953 = vmax.xlane.f32.xlu0 %v3952_v45 }
0x1194   : > { %v3955_v42 = vsel %vm2065_vm2, %v3950_v44, -inf }
0x1195   : > { %3956 = vmax.xlane.f32.xlu1 %v3955_v42 }
0x1197   : > { %3959 = vmax.xlane.f32.xlu0 %v3958_v48 }
0x1220   : > { %v3954_v49 = vpop.xlane.xlu0 %3953 }
0x1221   : > { %v3961_v50 = vsub.f32 %v3949_v37, %v3954_v49 }
0x1222   : > { %v3957_v24 = vpop.xlane.xlu1 %3956 }
0x1223   : > { %v3964_v51 = vmul.f32 1.442695, %v3961_v50  ;;  %v3962_v52 = vsub.f32 %v3950_v44, %v3957_v24 }
0x1224   : > { %v3960_v53 = vpop.xlane.xlu0 %3959 }
0x1225   : > { %12221 = vpow2.f32 %v3964_v51  ;;  %v3966_v25 = vmul.f32 1.442695, %v3962_v52  ;;  %v3963_v54 = vsub.f32 %v3951_v39, %v3960_v53  ;;  %v11743_v51 = vld [vmem:[%s14862_s17 + $0x100] ss:$16 sps:$4 sm:$0xff]   ;;  %v11745_v52 = vld [vmem:[%s14862_s17 + $0x104] ss:$16 sps:$4 sm:$0xff]  }
0x1226   : > { %v11748_v53 = vld [vmem:[%s14862_s17 + $0x10c] ss:$16 sps:$4 sm:$0xff]  }
0x1227   : > { %12223 = vpow2.f32 %v3966_v25  ;;  %v3968_v55 = vmul.f32 1.442695, %v3963_v54  ;;  %v11751_v25 = vld [vmem:[%s14862_s17 + $0x124] ss:$16 sps:$4 sm:$0xff]   ;;  %v11754_v54 = vld [vmem:[%s14862_s17 + $0x12c] ss:$16 sps:$4 sm:$0xff]   ;;  %4547 = vmatprep.subr.bf16.mxu1 %v11748_v53 }
0x1229   : > { %12225 = vpow2.f32 %v3968_v55 }
0x122f   : > { %v12222_v56 = vpop.eup %12221 }
0x1230   : > { %v3970_v29 = vsel %vm2065_vm2, %v12222_v56, 0.0 }
0x1231   : > { %v12224_v57 = vpop.eup %12223  ;;  %3971 = vadd.xlane.f32.xlu0 %v3970_v29 }
0x1232   : > { %v3973_v58 = vsel %vm2065_vm2, %v12224_v57, 0.0 }
0x1233   : > { %v12226_v10 = vpop.eup %12225 }
0x1234   : > { %v3976_v46 = vsel %vm2072_vm3, %v12226_v10, 0.0 }
0x1235   : > { %3977 = vadd.xlane.f32.xlu1 %v3976_v46  ;;  %3974 = vadd.xlane.f32.xlu0 %v3973_v58 }
0x1246   : > { %3991 = vrot.lane.b32.xlu1 %v13853_v26, %s14870_s18  ;;  %v11739_v26 = vld [vmem:[%s14860_s24 + $0x60] sm:$0xff]  }
0x124b   : > { %3989 = vrot.lane.b32.xlu0 %v13855_v28, %s14870_s18 }
0x1258   : > { %v11031_v59 = vpop.f32.mrb[48].mxu1 }
0x1259   : > { %v4195_v40 = vpop.f32.mrb[49].mxu1 }
0x125a   : > { %v11032_v60 = vpop.f32.mrb[50].mxu1 }
0x125b   : > { %v4198_v61 = vpop.f32.mrb[51].mxu1 }
0x12be   : > { %v3972_v62 = vpop.xlane.xlu0 %3971 }
0x12bf   : > { %12227 = vrcp.f32 %v3972_v62  ;;  %v13947_v62 = vld [vmem:[%s14871_s15] sm:$0xff]  ;;  %s14872_s15 = sld [smem:[#allocation58_spill]] }
0x12c2   : > { %v3975_v63 = vpop.xlane.xlu0 %3974  ;;  %v3978_v33 = vpop.xlane.xlu1 %3977 }
0x12c3   : > { %12229 = vrcp.f32 %v3975_v63 }
0x12c4   : > { %12231 = vrcp.f32 %v3978_v33 }
0x12c6   : > { %v3990_v47 = vpop.permute.xlu0 %3989  ;;  %v3992_v2 = vpop.permute.xlu1 %3991 }
0x12c7   : > { %v4001_v6 = vand.u32 %v3992_v2, %v13531_v13  ;;  %11001 = vmatprep.subr.bf16.mxu0 %v3990_v47  ;;  %v11760_v2 = vld [vmem:[%s14862_s17 + $0x14c] ss:$16 sps:$4 sm:$0xff]  }
0x12c8   : > { %11002 = vmatpush3.bf16.msra.mxu0 %v3990_v47  ;;  %v11757_v47 = vld [vmem:[%s14862_s17 + $0x144] ss:$16 sps:$4 sm:$0xff]  }
0x12c9   : > { %11003 = vmatprep.subr.bf16.mxu0 %v4001_v6  ;;  %v12228_v28 = vpop.eup %12227 }
0x12ca   : > { %v3982_v8 = vmul.f32 %v12228_v28, %v12222_v56  ;;  %v11763_v28 = vld [vmem:[%s14862_s17 + $0x164] ss:$16 sps:$4 sm:$0xff]  }
0x12cc   : > { %11004 = vmatpush3.bf16.msra.mxu0 %v4001_v6  ;;  %v11755_v6 = vld [vmem:[%s14862_s17 + $0x140] ss:$16 sps:$4 sm:$0xff]  }
0x12cd   : > { %v12230_v7 = vpop.eup %12229  ;;  %11009 = vmatprep.subr.bf16.mxu0 %v11739_v26 }
0x12ce   : > { %v12232_v1 = vpop.eup %12231  ;;  %v3983_v35 = vmul.f32 %v12230_v7, %v12224_v57  ;;  %v11766_v7 = vld [vmem:[%s14862_s17 + $0x16c] ss:$16 sps:$4 sm:$0xff]  }
0x12cf   : > { %v3984_v9 = vmul.f32 %v12232_v1, %v12226_v10  ;;  %v11761_v1 = vld [vmem:[%s14862_s17 + $0x160] ss:$16 sps:$4 sm:$0xff]  }
0x12d0   : > { %v3985_v4 = vpack.c.bf16 %v3983_v35, %v3982_v8  ;;  %v11764_v8 = vld [vmem:[%s14862_s17 + $0x168] ss:$16 sps:$4 sm:$0xff]   ;;  %v11769_v35 = vld [vmem:[%s14862_s17 + $0x184] ss:$16 sps:$4 sm:$0xff]  }
0x12d1   : > { %v3986_v11 = vpack.c.bf16 %v3984_v9, %v3984_v9  ;;  %v11772_v9 = vld [vmem:[%s14862_s17 + $0x18c] ss:$16 sps:$4 sm:$0xff]  }
0x12d2   : > { %11005 = vmatprep.mubr.msk.bf16.mxu0 %vm2065_vm2, %v3985_v4  ;;  %v11767_v4 = vld [vmem:[%s14862_s17 + $0x180] ss:$16 sps:$4 sm:$0xff]  }
0x12d3   : > { %11006 = vmatmul.mubr.msk.bf16.vlgmr.msra.gmra.mrb[48].mxu0 %vm2065_vm2, %v3986_v11  ;;  %v11770_v11 = vld [vmem:[%s14862_s17 + $0x188] ss:$16 sps:$4 sm:$0xff]  }
0x12d4   : > { %11010 = vmatpush3.bf16.msra.mxu0 %v11739_v26  ;;  %v11758_v26 = vld [vmem:[%s14862_s17 + $0x148] ss:$16 sps:$4 sm:$0xff]  }
0x12d5   : > { %11011 = vmatprep.subr.bf16.mxu0 %v11740_v12 }
0x12d8   : > { %11012 = vmatpush3.bf16.msra.mxu0 %v11740_v12  ;;  %v11773_v12 = vld [vmem:[%s14862_s17 + $0x1a0] ss:$16 sps:$4 sm:$0xff]  }
0x12d9   : > { %11013 = vmatprep.subr.bf16.mxu0 %v11741_v15 }
0x12dc   : > { %11014 = vmatpush3.bf16.msra.mxu0 %v11741_v15  ;;  %v11775_v15 = vld [vmem:[%s14862_s17 + $0x1a4] ss:$16 sps:$4 sm:$0xff]  }
0x12dd   : > { %11015 = vmatprep.subr.bf16.mxu0 %v11742_v16 }
0x12e0   : > { %11016 = vmatpush3.bf16.msra.mxu0 %v11742_v16  ;;  %v11776_v16 = vld [vmem:[%s14862_s17 + $0x1a8] ss:$16 sps:$4 sm:$0xff]  }
0x12e1   : > { %4496 = vmatprep.subr.bf16.mxu0 %v11745_v52 }
0x13a6   : > { %v11007_v17 = vpop.f32.mrb[48].mxu0 }
0x13a7   : > { %v4037_v23 = vpop.f32.mrb[49].mxu0  ;;  %v4052_v30 = vpack.c.bf16 %v11007_v17, %v11007_v17  ;;  %v11778_v17 = vld [vmem:[%s14862_s17 + $0x1ac] ss:$16 sps:$4 sm:$0xff]  }
0x13a8   : > { %v11008_v19 = vpop.f32.mrb[50].mxu0 }
0x13a9   : > { %v4040_v5 = vpop.f32.mrb[51].mxu0  ;;  %v11784_v19 = vld [vmem:[%s14862_s17 + $0x1cc] ss:$16 sps:$4 sm:$0xff]  }
0x13aa   : > { %v4051_v20 = vpack.c.bf16 %v4040_v5, %v4037_v23  ;;  %v11781_v23 = vld [vmem:[%s14862_s17 + $0x1c4] ss:$16 sps:$4 sm:$0xff]   ;;  %v11779_v5 = vld [vmem:[%s14862_s17 + $0x1c0] ss:$16 sps:$4 sm:$0xff]  }
0x13ac   : > { %11017 = vmatprep.mubr.msk.bf16.mxu0 %vm1586_vm0, %v4051_v20  ;;  %v11782_v20 = vld [vmem:[%s14862_s17 + $0x1c8] ss:$16 sps:$4 sm:$0xff]  }
0x13ad   : > { %11018 = vmatmul.mubr.msk.bf16.vlgmr.msra.gmra.mrb[52].mxu0 %vm1586_vm0, %v4052_v30  ;;  %v11787_v30 = vld [vmem:[%s14862_s17 + $0x1e4] ss:$16 sps:$4 sm:$0xff]  }
0x13ae   : > { %4528 = vmatprep.mubr.bf16.mxu0 %v12910_v0  ;;  %4497 = vmatpush1.bf16.msra.mxu0 %v11743_v51 }
0x13af   : > { %4498 = vmatprep.subr.bf16.mxu0 %v11751_v25 }
0x1480   : > { %v11019_v36 = vpop.f32.mrb[52].mxu0 }
0x1481   : > { %v4204_v31 = vadd.f32 %v11031_v59, %v11019_v36  ;;  %v4117_v32 = vpop.f32.mrb[53].mxu0  ;;  %v11790_v36 = vld [vmem:[%s14862_s17 + $0x1ec] ss:$16 sps:$4 sm:$0xff]  }
0x1482   : > { %v4196_v37 = vadd.f32 %v4195_v40, %v4117_v32  ;;  %v11020_v27 = vpop.f32.mrb[54].mxu0 }
0x1483   : > { %v4120_v38 = vpop.f32.mrb[55].mxu0  ;;  %v4217_v45 = vadd.f32 %v9849_v34, %v4204_v31  ;;  %v11788_v31 = vld [vmem:[%s14862_s17 + $0x1e8] ss:$16 sps:$4 sm:$0xff]  }
0x1484   : > { %v4215_v39 = vadd.f32 %v9849_v34, %v4196_v37  ;;  %v4199_v44 = vadd.f32 %v4198_v61, %v4120_v38 }
0x1485   : > { %v13920_v50 = vadd.f32 %v4217_v45, %v13789_v22  ;;  %v11752_v22 = vld [vmem:[%s14862_s17 + $0x128] ss:$16 sps:$4 sm:$0xff]  }
0x1486   : > { %v4216_v42 = vadd.f32 %v9849_v34, %v4199_v44  ;;  %v13913_v48 = vadd.f32 %v4215_v39, %v13781_v21  ;;  %v11746_v21 = vld [vmem:[%s14862_s17 + $0x108] ss:$16 sps:$4 sm:$0xff]   ;;  %v11785_v34 = vld [vmem:[%s14862_s17 + $0x1e0] ss:$16 sps:$4 sm:$0xff]  }
0x1487   : > { %v4229_v24 = vsel %vm1650_vm1, %v13920_v50, 0.0  ;;  %4548 = vmatpush1.bf16.msra.mxu1 %v11746_v21 }
0x1488   : > { %4225 = vadd.xlane.f32.xlu1 %v13913_v48  ;;  %v13917_v49 = vadd.f32 %v4216_v42, %v13785_v14  ;;  %v11749_v14 = vld [vmem:[%s14862_s17 + $0x120] ss:$16 sps:$4 sm:$0xff]   ;;  %4549 = vmatprep.subr.bf16.mxu1 %v11754_v54 }
0x1489   : > { %4499 = vmatpush1.bf16.msra.mxu0 %v11749_v14  ;;  %v9852_v54 = vld [vmem:[%s14863_s2 + $0x1] ss:$0 sm:$0xff]  ;;  %s14873_s2 = smov %s14872_s15 }
0x148a   : > { %4227 = vadd.xlane.f32.xlu0 %v13917_v49  ;;  %4500 = vmatprep.subr.bf16.mxu0 %v11757_v47  ;;  %v11792_v47 = vld [vmem:[%s14866_s23 + $0x1c0] sm:$0xff]  }
0x148b   : > { %4550 = vmatpush1.bf16.msra.mxu1 %v11752_v22 }
0x148c   : > { %4551 = vmatprep.subr.bf16.mxu1 %v11760_v2  ;;  %v11794_v2 = vld [vmem:[%s14866_s23 + $0x180] sm:$0xff]  }
0x148d   : > { %4501 = vmatpush1.bf16.msra.mxu0 %v11755_v6  ;;  %v11795_v6 = vld [vmem:[%s14866_s23 + $0x148] sm:$0xff]  }
0x148e   : > { %4230 = vadd.xlane.f32.xlu0 %v4229_v24  ;;  %4502 = vmatprep.subr.bf16.mxu0 %v11763_v28  ;;  %v11797_v28 = vld [vmem:[%s14866_s23 + $0x108] sm:$0xff]  }
0x148f   : > { %4552 = vmatpush1.bf16.msra.mxu1 %v11758_v26  ;;  %v11796_v26 = vld [vmem:[%s14866_s23 + $0x1c8] sm:$0xff]  }
0x1490   : > { %4553 = vmatprep.subr.bf16.mxu1 %v11766_v7  ;;  %v11798_v7 = vld [vmem:[%s14866_s23 + $0x188] sm:$0xff]  }
0x1491   : > { %4503 = vmatpush1.bf16.msra.mxu0 %v11761_v1  ;;  %v11799_v1 = vld [vmem:[%s14866_s23 + $0x150] sm:$0xff]  }
0x1492   : > { %4504 = vmatprep.subr.bf16.mxu0 %v11769_v35  ;;  %v11801_v35 = vld [vmem:[%s14866_s23 + $0x110] sm:$0xff]  }
0x1493   : > { %4554 = vmatpush1.bf16.msra.mxu1 %v11764_v8  ;;  %v11800_v8 = vld [vmem:[%s14866_s23 + $0x1d0] sm:$0xff]  }
0x1494   : > { %4555 = vmatprep.subr.bf16.mxu1 %v11772_v9  ;;  %v11802_v9 = vld [vmem:[%s14866_s23 + $0x190] sm:$0xff]  }
0x1495   : > { %4505 = vmatpush1.bf16.msra.mxu0 %v11767_v4  ;;  %v11803_v4 = vld [vmem:[%s14866_s23 + $0x158] sm:$0xff]  }
0x1496   : > { %4506 = vmatprep.subr.bf16.mxu0 %v11775_v15  ;;  %v11806_v15 = vld [vmem:[%s14866_s23 + $0x198] sm:$0xff]  }
0x1497   : > { %4556 = vmatpush1.bf16.msra.mxu1 %v11770_v11  ;;  %v11804_v11 = vld [vmem:[%s14866_s23 + $0x1d8] sm:$0xff]  }
0x1498   : > { %4557 = vmatprep.subr.bf16.mxu1 %v11778_v17  ;;  %v11808_v17 = vld [vmem:[%s14866_s23 + $0x1e0] sm:$0xff]  }
0x1499   : > { %4507 = vmatpush1.bf16.msra.mxu0 %v11773_v12  ;;  %v11805_v12 = vld [vmem:[%s14866_s23 + $0x118] sm:$0xff]  }
0x149a   : > { %4508 = vmatprep.subr.bf16.mxu0 %v11781_v23  ;;  %v11809_v23 = vld [vmem:[%s14866_s23 + $0x120] sm:$0xff]  }
0x149b   : > { %4558 = vmatpush1.bf16.msra.mxu1 %v11776_v16  ;;  %v11807_v16 = vld [vmem:[%s14866_s23 + $0x160] sm:$0xff]  }
0x149c   : > { %4559 = vmatprep.subr.bf16.mxu1 %v11784_v19  ;;  %v11810_v19 = vld [vmem:[%s14866_s23 + $0x1a0] sm:$0xff]  }
0x149d   : > { %4509 = vmatpush1.bf16.msra.mxu0 %v11779_v5  ;;  %v11811_v5 = vld [vmem:[%s14866_s23 + $0x168] sm:$0xff]  }
0x149e   : > { %4510 = vmatprep.subr.bf16.mxu0 %v11787_v30  ;;  %v11813_v30 = vld [vmem:[%s14866_s23 + $0x128] sm:$0xff]  }
0x149f   : > { %4560 = vmatpush1.bf16.msra.mxu1 %v11782_v20  ;;  %v11812_v20 = vld [vmem:[%s14866_s23 + $0x1e8] sm:$0xff]  }
0x14a0   : > { %4561 = vmatprep.subr.bf16.mxu1 %v11790_v36  ;;  %v11814_v36 = vld [vmem:[%s14866_s23 + $0x1a8] sm:$0xff]  }
0x14a1   : > { %4511 = vmatpush1.bf16.msra.mxu0 %v11785_v34  ;;  %v11815_v34 = vld [vmem:[%s14866_s23 + $0x170] sm:$0xff]  }
0x14a3   : > { %4562 = vmatpush1.bf16.msra.mxu1 %v11788_v31  ;;  %v11816_v31 = vld [vmem:[%s14866_s23 + $0x1f0] sm:$0xff]  }
0x14a4   : > { %10649 = vmatprep.subr.bf16.mxu1 %v11792_v47 }
0x1515   : > { %v4226_v55 = vpop.xlane.xlu1 %4225 }
0x1516   : > { %v4232_v56 = vmul.f32 0.0078125, %v4226_v55 }
0x1517   : > { %v4228_v29 = vpop.xlane.xlu0 %4227 }
0x1518   : > { %v13934_v57 = vsub.f32 %v13913_v48, %v4232_v56  ;;  %v4233_v10 = vmul.f32 0.0078125, %v4228_v29  ;;  %v9853_v29 = vld [vmem:[%s14865_s11 + $0x1] ss:$0 sm:$0xff] }
0x151a   : > { %v13937_v46 = vsub.f32 %v13917_v49, %v4233_v10  ;;  %v4238_v58 = vmul.f32 %v13934_v57, %v13934_v57 }
0x151b   : > { %v4231_v59 = vpop.xlane.xlu0 %4230 }
0x151c   : > { %v4234_v40 = vmul.f32 0.0078125, %v4231_v59  ;;  %4241 = vadd.xlane.f32.xlu1 %v4238_v58  ;;  %v4239_v60 = vmul.f32 %v13937_v46, %v13937_v46 }
0x151e   : > { %v13944_v61 = vsub.f32 %v13920_v50, %v4234_v40  ;;  %4243 = vadd.xlane.f32.xlu0 %v4239_v60 }
0x1520   : > { %v4240_v63 = vmul.f32 %v13944_v61, %v13944_v61 }
0x1522   : > { %5136 = vadd.xlane.f32.xlu0 %v13947_v62  ;;  %v4245_v33 = vsel %vm1650_vm1, %v4240_v63, 0.0 }
0x1523   : > { %4246 = vadd.xlane.f32.xlu1 %v4245_v33  ;;  %v11791_v33 = vld [vmem:[%s14866_s23 + $0x140] sm:$0xff]  }
0x1524   : > { %10621 = vmatprep.subr.bf16.mxu0 %v11791_v33 }
0x15a9   : > { %v4242_v32 = vpop.xlane.xlu1 %4241 }
0x15aa   : > { %v4248_v37 = vmul.f32 0.0078125, %v4242_v32  ;;  %v11817_v32 = vld [vmem:[%s14866_s23 + $0x130] sm:$0xff]  }
0x15ab   : > { %v4244_v27 = vpop.xlane.xlu0 %4243 }
0x15ac   : > { %v4251_v38 = vadd.f32 1e-06, %v4248_v37  ;;  %v4249_v39 = vmul.f32 0.0078125, %v4244_v27  ;;  %v11818_v37 = vld [vmem:[%s14866_s23 + $0x1b0] sm:$0xff]   ;;  %v11819_v27 = vld [vmem:[%s14866_s23 + $0x178] sm:$0xff]  }
0x15ae   : > { %12233 = vrsqrt.f32 %v4251_v38  ;;  %v4252_v44 = vadd.f32 1e-06, %v4249_v39  ;;  %v11820_v38 = vld [vmem:[%s14866_s23 + $0x1f8] sm:$0xff]  }
0x15af   : > { %v5137_v45 = vpop.xlane.xlu0 %5136  ;;  %v11821_v39 = vld [vmem:[%s14866_s23 + $0x138] sm:$0xff]  }
0x15b0   : > { %12235 = vrsqrt.f32 %v4252_v44  ;;  %v5138_v42 = vmul.f32 0.0078125, %v5137_v45  ;;  %v4247_v24 = vpop.xlane.xlu1 %4246  ;;  %v11822_v44 = vld [vmem:[%s14866_s23 + $0x1b8] sm:$0xff]   ;;  %v11825_v45 = vld [vmem:[%s14872_s15 + $0x4] ss:$12 sps:$4 sm:$0xff]   ;;  %s14874_s15 = sld [smem:[#allocation56_spill]] }
0x15b1   : > { %v4250_v51 = vmul.f32 0.0078125, %v4247_v24  ;;  %v9886_v24 = vld [vmem:[%s14867_s1 + $0x4] sm:$0xf]  ;;  %s14875_s1 = sld [smem:[#allocation57_spill]] }
0x15b2   : > { %v13978_v52 = vsub.f32 %v13947_v62, %v5138_v42  ;;  %v12912_v42 = vmov 0.0  }
0x15b3   : > { %v4253_v21 = vadd.f32 1e-06, %v4250_v51  ;;  %v4319_v51 = vrot.slane %v9886_v24, %v13505_v41 }
0x15b4   : > { %v5140_v53 = vmul.f32 %v13978_v52, %v13978_v52 }
0x15b5   : > { %12237 = vrsqrt.f32 %v4253_v21  ;;  %v4327_v21 = vrot.slane %v9886_v24, %v13524_v3 }
0x15b6   : > { %5141 = vadd.xlane.f32.xlu1 %v5140_v53  ;;  %v4323_v53 = vrot.slane %v9886_v24, %v13509_v43 }
0x15b8   : > { %v12234_v25 = vpop.eup %12233 }
0x15b9   : > { %v4257_v14 = vmul.f32 %v12234_v25, %v13934_v57  ;;  %v14028_v25 = vrot.slane %v9886_v24, %v13683_v18 }
0x15ba   : > { %v12236_v22 = vpop.eup %12235 }
0x15bb   : > { %v4258_v55 = vmul.f32 %v12236_v22, %v13937_v46  ;;  %v4266_v56 = vmul.f32 %v9852_v54, %v4257_v14 }
0x15bd   : > { %v4267_v10 = vmul.f32 %v9852_v54, %v4258_v55  ;;  %v4275_v59 = vadd.f32 %v9853_v29, %v4266_v56 }
0x15bf   : > { %v12238_v58 = vpop.eup %12237  ;;  %v4276_v40 = vadd.f32 %v9853_v29, %v4267_v10 }
0x15c0   : > { %v4259_v60 = vmul.f32 %v12238_v58, %v13944_v61  ;;  %v11793_v61 = vld [vmem:[%s14866_s23 + $0x100] sm:$0xff]  }
0x15c1   : > { %v4313_v62 = vpack.c.bf16 %v4276_v40, %v4275_v59 }
0x15c2   : > { %v4268_v63 = vmul.f32 %v9852_v54, %v4259_v60 }
0x15c3   : > { %4529 = vmatmul.mubr.bf16.vlgmr.msra.gmra.mrb[56].mxu0 %v4313_v62  ;;  %4580 = vmatmul.mubr.bf16.vlgmr.msra.gmra.mrb[52].mxu1 %v4313_v62 }
0x15c4   : > { %4538 = vmatprep.mubr.bf16.mxu0 %v12910_v0  ;;  %4589 = vmatprep.mubr.bf16.mxu1 %v12910_v0  ;;  %v4277_v57 = vadd.f32 %v9853_v29, %v4268_v63 }
0x15c5   : > { %10622 = vmatpush3.bf16.msra.mxu0 %v11793_v61  ;;  %10650 = vmatpush3.bf16.msra.mxu1 %v11794_v2 }
0x15c6   : > { %v4314_v46 = vpack.c.bf16 %v4277_v57, %v4277_v57  ;;  %10623 = vmatprep.subr.bf16.mxu0 %v11795_v6  ;;  %10651 = vmatprep.subr.bf16.mxu1 %v11796_v26 }
0x15c9   : > { %10624 = vmatpush3.bf16.msra.mxu0 %v11797_v28  ;;  %10652 = vmatpush3.bf16.msra.mxu1 %v11798_v7 }
0x15ca   : > { %10625 = vmatprep.subr.bf16.mxu0 %v11799_v1  ;;  %10653 = vmatprep.subr.bf16.mxu1 %v11800_v8 }
0x15cb   : > { %4539 = vmatmul.mubr.bf16.gmra.mrb[60].mxu0 %v4314_v46  ;;  %4590 = vmatmul.mubr.bf16.gmra.mrb[56].mxu1 %v4314_v46 }
0x15cd   : > { %10626 = vmatpush3.bf16.msra.mxu0 %v11801_v35  ;;  %10654 = vmatpush3.bf16.msra.mxu1 %v11802_v9 }
0x15ce   : > { %10627 = vmatprep.subr.bf16.mxu0 %v11803_v4  ;;  %10655 = vmatprep.subr.bf16.mxu1 %v11804_v11 }
0x15d1   : > { %10628 = vmatpush3.bf16.msra.mxu0 %v11805_v12  ;;  %10656 = vmatpush3.bf16.msra.mxu1 %v11806_v15 }
0x15d2   : > { %10629 = vmatprep.subr.bf16.mxu0 %v11807_v16  ;;  %10657 = vmatprep.subr.bf16.mxu1 %v11808_v17 }
0x15d5   : > { %10630 = vmatpush3.bf16.msra.mxu0 %v11809_v23  ;;  %10658 = vmatpush3.bf16.msra.mxu1 %v11810_v19 }
0x15d6   : > { %10631 = vmatprep.subr.bf16.mxu0 %v11811_v5  ;;  %10659 = vmatprep.subr.bf16.mxu1 %v11812_v20 }
0x15d9   : > { %10632 = vmatpush3.bf16.msra.mxu0 %v11813_v30  ;;  %10660 = vmatpush3.bf16.msra.mxu1 %v11814_v36 }
0x15da   : > { %10633 = vmatprep.subr.bf16.mxu0 %v11815_v34  ;;  %10661 = vmatprep.subr.bf16.mxu1 %v11816_v31 }
0x15dd   : > { %10634 = vmatpush3.bf16.msra.mxu0 %v11817_v32  ;;  %10662 = vmatpush3.bf16.msra.mxu1 %v11818_v37 }
0x15de   : > { %10635 = vmatprep.subr.bf16.mxu0 %v11819_v27  ;;  %10663 = vmatprep.subr.bf16.mxu1 %v11820_v38 }
0x15e1   : > { %10636 = vmatpush3.bf16.msra.mxu0 %v11821_v39  ;;  %10664 = vmatpush3.bf16.msra.mxu1 %v11822_v44 }
0x15e2   : > { %11033 = vmatprep.subr.bf16.mxu1 %v12912_v42  ;;  %5339 = vmatprep.subr.bf16.mxu0 %v11825_v45 }
0x1696   : > { %v4530_v54 = vpop.f32.mrb[56].mxu0  ;;  %v4581_v14 = vpop.f32.mrb[52].mxu1 }
0x1697   : > { %v14030_v22 = vadd.f32 %v4530_v54, %v4319_v51  ;;  %v14032_v55 = vadd.f32 %v4581_v14, %v4327_v21  ;;  %v4532_v56 = vpop.f32.mrb[57].mxu0  ;;  %v4583_v29 = vpop.f32.mrb[53].mxu1 }
0x1698   : > { %v14034_v10 = vadd.f32 %v4532_v56, %v4323_v53  ;;  %v14037_v58 = vadd.f32 %v4583_v29, %v14028_v25  ;;  %v4534_v59 = vpop.f32.mrb[58].mxu0  ;;  %v4585_v40 = vpop.f32.mrb[54].mxu1 }
0x1699   : > { %v4610_v60 = vmul.f32 0.044715, %v14030_v22  ;;  %v4612_v62 = vmul.f32 0.044715, %v14032_v55  ;;  %v14043_v46 = vadd.f32 %v4534_v59, %v4319_v51  ;;  %v14045_v33 = vadd.f32 %v4585_v40, %v4327_v21  ;;  %v4536_v47 = vpop.f32.mrb[59].mxu0  ;;  %v4587_v61 = vpop.f32.mrb[55].mxu1 }
0x169a   : > { %v4611_v63 = vmul.f32 0.044715, %v14034_v10  ;;  %v4613_v57 = vmul.f32 0.044715, %v14037_v58  ;;  %v14049_v26 = vadd.f32 %v4536_v47, %v4323_v53  ;;  %v14052_v28 = vadd.f32 %v4587_v61, %v14028_v25 }
0x169b   : > { %v4622_v2 = vmul.f32 %v4610_v60, %v14030_v22  ;;  %v4624_v6 = vmul.f32 %v4612_v62, %v14032_v55  ;;  %v4614_v7 = vmul.f32 0.044715, %v14043_v46  ;;  %v4616_v35 = vmul.f32 0.044715, %v14045_v33 }
0x169c   : > { %v4623_v9 = vmul.f32 %v4611_v63, %v14034_v10  ;;  %v4625_v4 = vmul.f32 %v4613_v57, %v14037_v58  ;;  %v4615_v12 = vmul.f32 0.044715, %v14049_v26  ;;  %v4617_v5 = vmul.f32 0.044715, %v14052_v28 }
0x169d   : > { %v4634_v1 = vmul.f32 %v4622_v2, %v14030_v22  ;;  %v4636_v8 = vmul.f32 %v4624_v6, %v14032_v55  ;;  %v4626_v11 = vmul.f32 %v4614_v7, %v14043_v46  ;;  %v4628_v19 = vmul.f32 %v4616_v35, %v14045_v33 }
0x169e   : > { %v4540_v15 = vpop.f32.mrb[60].mxu0  ;;  %v4591_v16 = vpop.f32.mrb[56].mxu1  ;;  %v4627_v34 = vmul.f32 %v4615_v12, %v14049_v26  ;;  %v4629_v45 = vmul.f32 %v4617_v5, %v14052_v28  ;;  %v4635_v14 = vmul.f32 %v4623_v9, %v14034_v10  ;;  %v4637_v40 = vmul.f32 %v4625_v4, %v14037_v58 }
0x169f   : > { %v4646_v17 = vadd.f32 %v4634_v1, %v14030_v22  ;;  %v4648_v23 = vadd.f32 %v4636_v8, %v14032_v55  ;;  %v4542_v20 = vpop.f32.mrb[61].mxu0  ;;  %v4593_v30 = vpop.f32.mrb[57].mxu1  ;;  %v4638_v36 = vmul.f32 %v4626_v11, %v14043_v46  ;;  %v14068_v31 = vadd.f32 %v4540_v15, %v4319_v51 }
0x16a0   : > { %v14070_v32 = vadd.f32 %v4591_v16, %v4327_v21  ;;  %v4544_v37 = vpop.f32.mrb[62].mxu0  ;;  %v4595_v27 = vpop.f32.mrb[58].mxu1  ;;  %v4640_v44 = vmul.f32 %v4628_v19, %v14045_v33  ;;  %v4639_v29 = vmul.f32 %v4627_v34, %v14049_v26  ;;  %v14079_v59 = vadd.f32 %v4542_v20, %v4323_v53 }
0x16a1   : > { %v4658_v38 = vmul.f32 0.7978846, %v4646_v17  ;;  %v4660_v39 = vmul.f32 0.7978846, %v4648_v23  ;;  %v4545_v24 = vpop.f32.mrb[63].mxu0  ;;  %v4596_v54 = vpop.f32.mrb[59].mxu1  ;;  %v4650_v56 = vadd.f32 %v4638_v36, %v14043_v46  ;;  %v4641_v57 = vmul.f32 %v4629_v45, %v14052_v28 }
0x16a2   : > { %v4652_v51 = vadd.f32 %v4640_v44, %v14045_v33  ;;  %v4618_v21 = vmul.f32 0.044715, %v14068_v31  ;;  %v4620_v62 = vmul.f32 0.044715, %v14070_v32  ;;  %v4619_v47 = vmul.f32 0.044715, %v14079_v59 }
0x16a3   : > { %12239 = vtanh.f32 %v4658_v38  ;;  %v4662_v60 = vmul.f32 0.7978846, %v4650_v56  ;;  %v14086_v61 = vadd.f32 %v4593_v30, %v14028_v25  ;;  %v4647_v2 = vadd.f32 %v4635_v14, %v14034_v10 }
0x16a4   : > { %12241 = vtanh.f32 %v4660_v39  ;;  %v4664_v63 = vmul.f32 0.7978846, %v4652_v51  ;;  %v4651_v53 = vadd.f32 %v4639_v29, %v14049_v26  ;;  %v4630_v6 = vmul.f32 %v4618_v21, %v14068_v31 }
0x16a5   : > { %12243 = vtanh.f32 %v4662_v60  ;;  %v4631_v7 = vmul.f32 %v4619_v47, %v14079_v59  ;;  %v4621_v1 = vmul.f32 0.044715, %v14086_v61  ;;  %v4632_v8 = vmul.f32 %v4620_v62, %v14070_v32 }
0x16a6   : > { %12245 = vtanh.f32 %v4664_v63  ;;  %v4659_v35 = vmul.f32 0.7978846, %v4647_v2  ;;  %v4663_v9 = vmul.f32 0.7978846, %v4651_v53  ;;  %v4649_v4 = vadd.f32 %v4637_v40, %v14037_v58 }
0x16a7   : > { %v4633_v25 = vmul.f32 %v4621_v1, %v14086_v61  ;;  %v4653_v11 = vadd.f32 %v4641_v57, %v14052_v28  ;;  %v4643_v12 = vmul.f32 %v4631_v7, %v14079_v59  ;;  %v4642_v19 = vmul.f32 %v4630_v6, %v14068_v31  ;;  %v5142_v1 = vpop.xlane.xlu1 %5141 }
0x16a8   : > { %12247 = vtanh.f32 %v4659_v35  ;;  %v4661_v15 = vmul.f32 0.7978846, %v4649_v4  ;;  %v4644_v5 = vmul.f32 %v4632_v8, %v14070_v32  ;;  %v4598_v56 = vmul.f32 0.5, %v14030_v22 }
0x16a9   : > { %12249 = vtanh.f32 %v4663_v9  ;;  %v4665_v16 = vmul.f32 0.7978846, %v4653_v11  ;;  %v4655_v17 = vadd.f32 %v4643_v12, %v14079_v59  ;;  %v4645_v23 = vmul.f32 %v4633_v25, %v14086_v61 }
0x16aa   : > { %12251 = vtanh.f32 %v4661_v15  ;;  %v4654_v37 = vadd.f32 %v4642_v19, %v14068_v31  ;;  %v4656_v27 = vadd.f32 %v4644_v5, %v14070_v32  ;;  %v4602_v29 = vmul.f32 0.5, %v14043_v46  ;;  %v11823_v5 = vld [vmem:[%s14873_s2] ss:$12 sps:$4 sm:$0xff]  }
0x16ab   : > { %12253 = vtanh.f32 %v4665_v16  ;;  %v4667_v30 = vmul.f32 0.7978846, %v4655_v17  ;;  %v4657_v36 = vadd.f32 %v4645_v23, %v14086_v61  ;;  %v4600_v21 = vmul.f32 0.5, %v14032_v55 }
0x16ac   : > { %v4666_v24 = vmul.f32 0.7978846, %v4654_v37  ;;  %v4668_v54 = vmul.f32 0.7978846, %v4656_v27  ;;  %v4604_v40 = vmul.f32 0.5, %v14045_v33  ;;  %v4599_v46 = vmul.f32 0.5, %v14034_v10 }
0x16ad   : > { %v12240_v20 = vpop.eup %12239  ;;  %12255 = vtanh.f32 %v4667_v30  ;;  %v4669_v39 = vmul.f32 0.7978846, %v4657_v36  ;;  %v4603_v8 = vmul.f32 0.5, %v14049_v26  ;;  %v4601_v9 = vmul.f32 0.5, %v14037_v58  ;;  %v11829_v36 = vld [vmem:[%s14873_s2 + $0x1c] ss:$12 sps:$4 sm:$0xff]  }
0x16ae   : > { %v12242_v34 = vpop.eup %12241  ;;  %v4682_v38 = vadd.f32 1.0, %v12240_v20  ;;  %v4605_v12 = vmul.f32 0.5, %v14052_v28  ;;  %v5143_v17 = vmul.f32 0.0078125, %v5142_v1  ;;  %v4607_v10 = vmul.f32 0.5, %v14079_v59  ;;  %v11826_v37 = vld [vmem:[%s14873_s2 + $0x8] ss:$12 sps:$4 sm:$0xff]  }
0x16af   : > { %v12244_v44 = vpop.eup %12243  ;;  %v4684_v45 = vadd.f32 1.0, %v12242_v34  ;;  %12257 = vtanh.f32 %v4669_v39  ;;  %v4609_v28 = vmul.f32 0.5, %v14086_v61  ;;  %v4606_v59 = vmul.f32 0.5, %v14068_v31  ;;  %v11842_v1 = vld [vmem:[%s14873_s2 + $0x68] ss:$12 sps:$4 sm:$0xff]  }
0x16b0   : > { %v12246_v14 = vpop.eup %12245  ;;  %v4686_v51 = vadd.f32 1.0, %v12244_v44  ;;  %12259 = vtanh.f32 %v4666_v24  ;;  %v4694_v62 = vmul.f32 %v4682_v38, %v4598_v56  ;;  %v11827_v24 = vld [vmem:[%s14873_s2 + $0x18] ss:$12 sps:$4 sm:$0xff]  }
0x16b1   : > { %v4688_v60 = vadd.f32 1.0, %v12246_v14  ;;  %12261 = vtanh.f32 %v4668_v54  ;;  %v4696_v47 = vmul.f32 %v4684_v45, %v4600_v21  ;;  %v5144_v45 = vadd.f32 1e-12, %v5143_v17  ;;  %v11830_v21 = vld [vmem:[%s14873_s2 + $0x20] ss:$12 sps:$4 sm:$0xff]  }
0x16b2   : > { %v4698_v63 = vmul.f32 %v4686_v51, %v4602_v29  ;;  %v12248_v57 = vpop.eup %12247  ;;  %v11833_v29 = vld [vmem:[%s14873_s2 + $0x34] ss:$12 sps:$4 sm:$0xff]   ;;  %v4608_v51 = vmul.f32 0.5, %v14070_v32 }
0x16b3   : > { %v4700_v2 = vmul.f32 %v4688_v60, %v4604_v40  ;;  %v12250_v53 = vpop.eup %12249  ;;  %v4683_v6 = vadd.f32 1.0, %v12248_v57  ;;  %12263 = vrsqrt.f32 %v5144_v45  ;;  %v11831_v60 = vld [vmem:[%s14873_s2 + $0x30] ss:$12 sps:$4 sm:$0xff]   ;;  %v11834_v57 = vld [vmem:[%s14873_s2 + $0x38] ss:$12 sps:$4 sm:$0xff]  }
0x16b4   : > { %v4773_v7 = vpack.c.bf16 %v4698_v63, %v4694_v62  ;;  %v12252_v22 = vpop.eup %12251  ;;  %v4687_v55 = vadd.f32 1.0, %v12250_v53  ;;  %v11837_v63 = vld [vmem:[%s14873_s2 + $0x4c] ss:$12 sps:$4 sm:$0xff]   ;;  %v11838_v53 = vld [vmem:[%s14873_s2 + $0x50] ss:$12 sps:$4 sm:$0xff]  }
0x16b5   : > { %v4775_v33 = vpack.c.bf16 %v4700_v2, %v4696_v47  ;;  %v12254_v35 = vpop.eup %12253  ;;  %v4685_v4 = vadd.f32 1.0, %v12252_v22  ;;  %v4695_v25 = vmul.f32 %v4683_v6, %v4599_v46  ;;  %v11835_v47 = vld [vmem:[%s14873_s2 + $0x48] ss:$12 sps:$4 sm:$0xff]   ;;  %v11841_v2 = vld [vmem:[%s14873_s2 + $0x64] ss:$12 sps:$4 sm:$0xff]  }
0x16b6   : > { %v4699_v11 = vmul.f32 %v4687_v55, %v4603_v8  ;;  %v4689_v15 = vadd.f32 1.0, %v12254_v35  ;;  %v11839_v6 = vld [vmem:[%s14873_s2 + $0x60] ss:$12 sps:$4 sm:$0xff]   ;;  %v11843_v46 = vld [vmem:[%s14873_s2 + $0x78] ss:$12 sps:$4 sm:$0xff]  }
0x16b7   : > { %v12256_v16 = vpop.eup %12255  ;;  %v4697_v26 = vmul.f32 %v4685_v4, %v4601_v9  ;;  %v11849_v55 = vld [vmem:[%s14873_s2 + $0x94] ss:$12 sps:$4 sm:$0xff]   ;;  %v11847_v9 = vld [vmem:[%s14873_s2 + $0x90] ss:$12 sps:$4 sm:$0xff]  }
0x16b8   : > { %v4774_v23 = vpack.c.bf16 %v4699_v11, %v4695_v25  ;;  %v4701_v19 = vmul.f32 %v4689_v15, %v4605_v12  ;;  %v4691_v20 = vadd.f32 1.0, %v12256_v16  ;;  %v11846_v35 = vld [vmem:[%s14873_s2 + $0x80] ss:$12 sps:$4 sm:$0xff]   ;;  %v11850_v11 = vld [vmem:[%s14873_s2 + $0x98] ss:$12 sps:$4 sm:$0xff]  }
0x16b9   : > { %v12258_v30 = vpop.eup %12257  ;;  %v11853_v25 = vld [vmem:[%s14873_s2 + $0xac] ss:$12 sps:$4 sm:$0xff]   ;;  %v10020_v12 = vld [vmem:[%s14875_s1] ss:$0 sm:$0xff]  ;;  %v11854_v16 = vld [vmem:[%s14873_s2 + $0xb0] ss:$12 sps:$4 sm:$0xff]  }
0x16ba   : > { %v12260_v58 = vpop.eup %12259  ;;  %5011 = vmatprep.mubr.bf16.mxu0 %v4774_v23  ;;  %v4776_v34 = vpack.c.bf16 %v4701_v19, %v4697_v26  ;;  %v4703_v27 = vmul.f32 %v4691_v20, %v4607_v10  ;;  %v4693_v38 = vadd.f32 1.0, %v12258_v30  ;;  %v9984_v23 = vld [vmem:[%s14869_s22 + $0x1] ss:$0 sm:$0xff]  ;;  %s14876_s1 = sld [smem:[#allocation59_spill]] }
0x16bb   : > { %v12262_v39 = vpop.eup %12261  ;;  %5012 = vmatmul.mubr.bf16.vlgmr.msra.gmra.mrb[64].mxu0 %v4773_v7  ;;  %v4690_v44 = vadd.f32 1.0, %v12260_v58  ;;  %v11845_v7 = vld [vmem:[%s14873_s2 + $0x7c] ss:$12 sps:$4 sm:$0xff]  }
0x16bc   : > { %5059 = vmatprep.mubr.bf16.mxu1 %v4776_v34  ;;  %5340 = vmatpush1.bf16.msra.mxu0 %v11823_v5  ;;  %v4778_v54 = vpack.c.bf16 %v4703_v27, %v4703_v27  ;;  %v4705_v14 = vmul.f32 %v4693_v38, %v4609_v28  ;;  %v4692_v56 = vadd.f32 1.0, %v12262_v39 }
0x16bd   : > { %5060 = vmatmul.mubr.bf16.vlgmr.msra.gmra.mrb[60].mxu1 %v4775_v33  ;;  %5341 = vmatprep.subr.bf16.mxu0 %v11829_v36  ;;  %v4702_v61 = vmul.f32 %v4690_v44, %v4606_v59  ;;  %v12264_v22 = vpop.eup %12263  ;;  %v10019_v33 = vld [vmem:[%s14874_s15] ss:$0 sm:$0xff]  ;;  %s14877_s15 = sld [smem:[#allocation60_spill]] }
0x16be   : > { %11034 = vmatpush3.bf16.msra.mxu1 %v11826_v37  ;;  %5019 = vmatprep.mubr.bf16.mxu0 %v4778_v54  ;;  %v4780_v31 = vpack.c.bf16 %v4705_v14, %v4705_v14  ;;  %v4704_v40 = vmul.f32 %v4692_v56, %v4608_v51  ;;  %v5146_v8 = vmul.f32 %v12264_v22, %v13978_v52  ;;  %v11851_v52 = vld [vmem:[%s14873_s2 + $0xa8] ss:$12 sps:$4 sm:$0xff]  }
0x16bf   : > { %11035 = vmatprep.subr.bf16.mxu1 %v12912_v42  ;;  %v4777_v62 = vpack.c.bf16 %v4702_v61, %v4702_v61 }
0x16c0   : > { %5342 = vmatpush1.bf16.msra.mxu0 %v11827_v24  ;;  %5067 = vmatprep.mubr.bf16.mxu1 %v4780_v31  ;;  %v4779_v32 = vpack.c.bf16 %v4704_v40, %v4704_v40  ;;  %v5153_v4 = vmul.f32 %v10019_v33, %v5146_v8 }
0x16c1   : > { %5343 = vmatprep.subr.bf16.mxu0 %v11833_v29 }
0x16c2   : > { %11036 = vmatpush3.bf16.msra.mxu1 %v11830_v21  ;;  %v14151_v15 = vadd.f32 %v10020_v12, %v5153_v4 }
0x16c3   : > { %11037 = vmatprep.subr.bf16.mxu1 %v12912_v42  ;;  %5020 = vmatmul.mubr.bf16.gmra.mrb[68].mxu0 %v4777_v62  ;;  %v5193_v62 = vld [vmem:[%s14876_s1] sm:$0x7]  ;;  %s14878_s3 = smov %s14877_s15 }
0x16c4   : > { %5344 = vmatpush1.bf16.msra.mxu0 %v11831_v60  ;;  %5371 = vmatprep.mubr.bf16.mxu0 %v12910_v0  ;;  %v5194_v17 = vpack.c.bf16 %v14151_v15, %v14151_v15 }
0x16c5   : > { %5068 = vmatmul.mubr.bf16.gmra.mrb[64].mxu1 %v4779_v32  ;;  %5345 = vmatprep.subr.bf16.mxu0 %v11837_v63  ;;  %v5199_v63 = vrot.slane %v5193_v62, %v13505_v41  ;;  %v5207_v32 = vrot.slane %v5193_v62, %v13524_v3 }
0x16c6   : > { %11038 = vmatpush3.bf16.msra.mxu1 %v11834_v57  ;;  %11049 = vmatprep.mubr.msk.bf16.mxu1 %vm12913_vm4, %v12912_v42  ;;  %v5203_v57 = vrot.slane %v5193_v62, %v13509_v43 }
0x16c7   : > { %11039 = vmatprep.subr.bf16.mxu1 %v12912_v42 }
0x16c8   : > { %5346 = vmatpush1.bf16.msra.mxu0 %v11835_v47 }
0x16c9   : > { %5347 = vmatprep.subr.bf16.mxu0 %v11841_v2 }
0x16ca   : > { %11040 = vmatpush3.bf16.msra.mxu1 %v11838_v53 }
0x16cb   : > { %11041 = vmatprep.subr.bf16.mxu1 %v12912_v42 }
0x16cc   : > { %5348 = vmatpush1.bf16.msra.mxu0 %v11839_v6 }
0x16cd   : > { %5349 = vmatprep.subr.bf16.mxu0 %v11845_v7 }
0x16ce   : > { %11042 = vmatpush3.bf16.msra.mxu1 %v11842_v1 }
0x16cf   : > { %11043 = vmatprep.subr.bf16.mxu1 %v12912_v42 }
0x16d0   : > { %5350 = vmatpush1.bf16.msra.mxu0 %v11843_v46 }
0x16d1   : > { %5351 = vmatprep.subr.bf16.mxu0 %v11849_v55 }
0x16d2   : > { %11044 = vmatpush3.bf16.msra.mxu1 %v11846_v35 }
0x16d3   : > { %11045 = vmatprep.subr.bf16.mxu1 %v12912_v42 }
0x16d4   : > { %5352 = vmatpush1.bf16.msra.mxu0 %v11847_v9 }
0x16d5   : > { %5353 = vmatprep.subr.bf16.mxu0 %v11853_v25 }
0x16d6   : > { %11046 = vmatpush3.bf16.msra.mxu1 %v11850_v11 }
0x16d7   : > { %11047 = vmatprep.subr.bf16.mxu1 %v12912_v42 }
0x16d8   : > { %5354 = vmatpush1.bf16.msra.mxu0 %v11851_v52 }
0x16d9   : > { %11053 = vmatprep.subr.bf16.mxu0 %v12912_v42 }
0x16da   : > { %11048 = vmatpush3.bf16.msra.mxu1 %v11854_v16 }
0x16db   : > { %5372 = vmatmul.mubr.bf16.vlgmr.msra.gmra.mrb[72].mxu0 %v5194_v17  ;;  %11059 = vmatprep.subr.bf16.mxu1 %v12912_v42 }
0x16dc   : > { %11055 = vmatprep.mubr.msk.bf16.mxu0 %vm12913_vm4, %v12912_v42 }
0x16dd   : > { %11050 = vmatmul.mubr.bf16.vlgmr.msra.gmra.mrb[68].mxu1 %v5194_v17 }
0x16de   : > { %11061 = vmatprep.mubr.msk.bf16.mxu1 %vm12913_vm4, %v12912_v42 }
0x178e   : > { %v10637_v10 = vpop.f32.mrb[64].mxu0 }
0x178f   : > { %v10638_v26 = vpop.f32.mrb[65].mxu0 }
0x1790   : > { %v10665_v19 = vpop.f32.mrb[60].mxu1  ;;  %v10639_v5 = vadd.f32 %v10638_v26, %v10637_v10  ;;  %v10640_v20 = vpop.f32.mrb[66].mxu0 }
0x1791   : > { %v10666_v30 = vpop.f32.mrb[61].mxu1  ;;  %v10641_v36 = vpop.f32.mrb[67].mxu0 }
0x1792   : > { %v5014_v58 = vadd.f32 %v10639_v5, %v9984_v23  ;;  %v10667_v34 = vadd.f32 %v10666_v30, %v10665_v19  ;;  %v10668_v37 = vpop.f32.mrb[62].mxu1  ;;  %v10642_v27 = vadd.f32 %v10641_v36, %v10640_v20 }
0x1793   : > { %v10669_v28 = vpop.f32.mrb[63].mxu1 }
0x1794   : > { %v14164_v38 = vadd.f32 %v10667_v34, %v5014_v58  ;;  %v5017_v39 = vadd.f32 %v10642_v27, %v9984_v23  ;;  %v10670_v59 = vadd.f32 %v10669_v28, %v10668_v37 }
0x1796   : > { %v14166_v44 = vadd.f32 %v10670_v59, %v5017_v39  ;;  %v10643_v45 = vpop.f32.mrb[68].mxu0 }
0x1797   : > { %v10644_v24 = vpop.f32.mrb[69].mxu0 }
0x1798   : > { %v10671_v54 = vpop.f32.mrb[64].mxu1  ;;  %v10645_v14 = vadd.f32 %v10644_v24, %v10643_v45  ;;  %v10646_v56 = vpop.f32.mrb[70].mxu0 }
0x1799   : > { %v10672_v29 = vpop.f32.mrb[65].mxu1  ;;  %v10647_v61 = vpop.f32.mrb[71].mxu0 }
0x179a   : > { %v5022_v51 = vadd.f32 %v10645_v14, %v9984_v23  ;;  %v10673_v21 = vadd.f32 %v10672_v29, %v10671_v54  ;;  %v10674_v31 = vpop.f32.mrb[66].mxu1  ;;  %v14195_v61 = vadd.f32 %v14164_v38, %v13913_v48 }
0x179b   : > { %v10675_v40 = vpop.f32.mrb[67].mxu1 }
0x179c   : > { %v14168_v60 = vadd.f32 %v10673_v21, %v5022_v51  ;;  %v14200_v51 = vadd.f32 %v14166_v44, %v13917_v49 }
0x179e   : > { %v5077_v21 = vadd.f32 %v14168_v60, %v13920_v50 }
0x17a0   : > { %v5084_v31 = vsel %vm1650_vm1, %v5077_v21, 0.0 }
0x17ae   : > { %v5373_v47 = vpop.f32.mrb[72].mxu0 }
0x17af   : > { %v5374_v2 = vadd.f32 %v5373_v47, %v5199_v63  ;;  %v5375_v53 = vpop.f32.mrb[73].mxu0 }
0x17b0   : > { %v5414_v6 = vpop.f32.mrb[68].mxu1  ;;  %v5376_v7 = vadd.f32 %v5375_v53, %v5203_v57  ;;  %v5377_v22 = vpop.f32.mrb[74].mxu0  ;;  %v11855_v53 = vld [vmem:[%s14877_s15] sm:$0xff]   ;;  %s14879_s15 = sld [smem:[#allocation64_spill]] }
0x17b1   : > { %v5437_v1 = vpack.c.bf16 %v5374_v2, %v5374_v2  ;;  %v5415_v46 = vadd.f32 %v5414_v6, %v5207_v32  ;;  %v11051_v8 = vpop.f32.mrb[69].mxu1  ;;  %v5378_v55 = vpop.f32.mrb[75].mxu0 }
0x17b2   : > { %v5438_v33 = vpack.c.bf16 %v5376_v7, %v5376_v7  ;;  %v5417_v35 = vpop.f32.mrb[70].mxu1  ;;  %v11857_v8 = vld [vmem:[%s14878_s3 + $0x10] sm:$0xff]   ;;  %v11858_v55 = vld [vmem:[%s14878_s3 + $0x18] sm:$0xff]  }
0x17b3   : > { %v5439_v9 = vpack.c.bf16 %v5415_v46, %v5415_v46  ;;  %v11052_v4 = vpop.f32.mrb[71].mxu1  ;;  %5549 = vrot.lane.b32.xlu1 %v5437_v1, %s14870_s18  ;;  %v11860_v35 = vld [vmem:[%s14878_s3 + $0x28] sm:$0xff]  }
0x17b4   : > { %v5444_v25 = vsel %vm1586_vm0, %v5438_v33, 0  ;;  %5552 = vrot.lane.b32.xlu0 %v5438_v33, %s14870_s18  ;;  %v11859_v33 = vld [vmem:[%s14878_s3 + $0x20] sm:$0xff]   ;;  %v11862_v4 = vld [vmem:[%s14878_s3 + $0x38] sm:$0xff]  }
0x17b5   : > { %v5505_v11 = vsel %vm5503_vm5, %v5439_v9, 0  ;;  %11054 = vmatpush3.bf16.xpose.msra.mxu0 %v5444_v25 }
0x17b6   : > { %11060 = vmatpush3.bf16.msra.mxu1 %v5505_v11  ;;  %11065 = vmatprep.subr.bf16.mxu0 %v12912_v42  ;;  %s14880_s4 = smov %s14879_s15 }
0x17b7   : > { %11071 = vmatprep.subr.bf16.mxu1 %v12912_v42 }
0x17bc   : > { %11056 = vmatmul.mubr.msk.bf16.vlgmr.msra.gmra.mrb[76].mxu0 %vm1586_vm0, %v5437_v1  ;;  %v11856_v1 = vld [vmem:[%s14878_s3 + $0x8] sm:$0xff]  }
0x17bd   : > { %11067 = vmatprep.mubr.msk.bf16.mxu0 %vm12913_vm4, %v12912_v42 }
0x1825   : > { %v5550_v16 = vpop.permute.xlu1 %5549 }
0x1826   : > { %v5553_v12 = vpop.permute.xlu0 %5552 }
0x1827   : > { %v5558_v52 = vsel %vm1586_vm0, %v5553_v12, 0 }
0x1828   : > { %11066 = vmatpush3.bf16.xpose.msra.mxu0 %v5558_v52 }
0x1829   : > { %11077 = vmatprep.subr.bf16.mxu0 %v12912_v42 }
0x182f   : > { %11068 = vmatmul.mubr.msk.bf16.vlgmr.msra.gmra.mrb[80].mxu0 %vm1586_vm0, %v5550_v16 }
0x1830   : > { %11085 = vmatprep.mubr.msk.bf16.mxu0 %vm12913_vm4, %v12912_v42  ;;  %11078 = vmatpush3.bf16.msra.mxu0 %v11859_v33 }
0x1831   : > { %11079 = vmatprep.subr.bf16.mxu0 %v12912_v42 }
0x1834   : > { %11080 = vmatpush3.bf16.msra.mxu0 %v11860_v35 }
0x1835   : > { %11081 = vmatprep.subr.bf16.mxu0 %v12912_v42 }
0x188f   : > { %v5480_v17 = vpop.f32.mrb[76].mxu0 }
0x1890   : > { %v5486_v10 = vmul.f32 0.125, %v5480_v17  ;;  %v11057_v23 = vpop.f32.mrb[77].mxu0 }
0x1891   : > { %v5483_v26 = vpop.f32.mrb[78].mxu0 }
0x1892   : > { %v11058_v19 = vpop.f32.mrb[79].mxu0  ;;  %v5488_v5 = vsel %vm5487_vm6, %v5486_v10, -inf }
0x1893   : > { %5489 = vmax.xlane.f32.xlu1 %v5488_v5 }
0x1902   : > { %v5594_v20 = vpop.f32.mrb[80].mxu0 }
0x1903   : > { %v5600_v30 = vmul.f32 0.125, %v5594_v20  ;;  %v11069_v36 = vpop.f32.mrb[81].mxu0 }
0x1904   : > { %v5597_v58 = vpop.f32.mrb[82].mxu0  ;;  %v11863_v36 = vld [vmem:[%s14879_s15] ss:$8 sps:$4 sm:$0xff]   ;;  %s14882_s15 = sld [smem:[#allocation62_spill]] }
0x1905   : > { %v11070_v34 = vpop.f32.mrb[83].mxu0  ;;  %v5601_v37 = vsel %vm5487_vm6, %v5600_v30, -inf  ;;  %v11865_v58 = vld [vmem:[%s14880_s4 + $0x4] ss:$8 sps:$4 sm:$0xff]  }
0x1906   : > { %5602 = vmax.xlane.f32.xlu0 %v5601_v37  ;;  %v10059_v37 = vld [vmem:[%s14881_s5] ss:$0 sm:$0xff] }
0x190a   : > { %s14883_s6 = smov %s14882_s15 }
0x1920   : > { %v5490_v27 = vpop.xlane.xlu1 %5489 }
0x1921   : > { %v5491_v28 = vsub.f32 %v5486_v10, %v5490_v27 }
0x1923   : > { %v5492_v39 = vmul.f32 1.442695, %v5491_v28 }
0x1925   : > { %12265 = vpow2.f32 %v5492_v39 }
0x192f   : > { %v12266_v59 = vpop.eup %12265 }
0x1930   : > { %v5494_v45 = vsel %vm5487_vm6, %v12266_v59, 0.0 }
0x1931   : > { %5495 = vadd.xlane.f32.xlu0 %v5494_v45 }
0x1947   : > { %5614 = vrot.lane.b32.xlu0 %v5439_v9, %s14870_s18  ;;  %v11861_v9 = vld [vmem:[%s14878_s3 + $0x30] sm:$0xff]  }
0x1948   : > { %11082 = vmatpush3.bf16.msra.mxu0 %v11861_v9 }
0x1949   : > { %11083 = vmatprep.subr.bf16.mxu0 %v12912_v42 }
0x194c   : > { %11084 = vmatpush3.bf16.msra.mxu0 %v11862_v4 }
0x194d   : > { %11101 = vmatprep.subr.bf16.mxu0 %v12912_v42 }
0x1993   : > { %v5603_v24 = vpop.xlane.xlu0 %5602 }
0x1994   : > { %v5604_v54 = vsub.f32 %v5600_v30, %v5603_v24 }
0x1996   : > { %v5605_v14 = vmul.f32 1.442695, %v5604_v54 }
0x1998   : > { %12267 = vpow2.f32 %v5605_v14 }
0x19a2   : > { %v12268_v56 = vpop.eup %12267 }
0x19a3   : > { %v5607_v29 = vsel %vm5487_vm6, %v12268_v56, 0.0 }
0x19a4   : > { %5608 = vadd.xlane.f32.xlu1 %v5607_v29 }
0x19a8   : > { %5080 = vadd.xlane.f32.xlu1 %v14195_v61 }
0x19ac   : > { %5082 = vadd.xlane.f32.xlu1 %v14200_v51 }
0x19b0   : > { %5085 = vadd.xlane.f32.xlu1 %v5084_v31 }
0x19be   : > { %v5496_v40 = vpop.xlane.xlu0 %5495 }
0x19bf   : > { %12269 = vrcp.f32 %v5496_v40 }
0x19c2   : > { %v5615_v48 = vpop.permute.xlu0 %5614 }
0x19c3   : > { %v5620_v57 = vsel %vm5503_vm5, %v5615_v48, 0  ;;  %v11869_v48 = vld [vmem:[%s14880_s4 + $0x20] ss:$8 sps:$4 sm:$0xff]  }
0x19c9   : > { %v12270_v62 = vpop.eup %12269 }
0x19ca   : > { %v5498_v63 = vmul.f32 %v12270_v62, %v12266_v59  ;;  %v11866_v62 = vld [vmem:[%s14880_s4 + $0x10] ss:$8 sps:$4 sm:$0xff]  }
0x19cc   : > { %v5499_v38 = vpack.c.bf16 %v5498_v63, %v5498_v63  ;;  %v11868_v63 = vld [vmem:[%s14880_s4 + $0x14] ss:$8 sps:$4 sm:$0xff]  }
0x19ce   : > { %11062 = vmatmul.mubr.msk.bf16.vlgmr.msra.gmra.mrb[72].mxu1 %vm5487_vm6, %v5499_v38  ;;  %v11877_v38 = vld [vmem:[%s14880_s4 + $0x44] ss:$8 sps:$4 sm:$0xff]  }
0x19cf   : > { %11072 = vmatpush3.bf16.msra.mxu1 %v5620_v57  ;;  %11073 = vmatprep.mubr.msk.bf16.mxu1 %vm12913_vm4, %v12912_v42  ;;  %v11875_v57 = vld [vmem:[%s14880_s4 + $0x40] ss:$8 sps:$4 sm:$0xff]  }
0x19d0   : > { %11089 = vmatprep.subr.bf16.mxu1 %v12912_v42 }
0x1a31   : > { %v5609_v49 = vpop.xlane.xlu1 %5608 }
0x1a32   : > { %12271 = vrcp.f32 %v5609_v49  ;;  %v11878_v49 = vld [vmem:[%s14880_s4 + $0x50] ss:$8 sps:$4 sm:$0xff]  }
0x1a35   : > { %v5081_v50 = vpop.xlane.xlu1 %5080 }
0x1a36   : > { %v5087_v28 = vmul.f32 0.0078125, %v5081_v50  ;;  %v11880_v50 = vld [vmem:[%s14880_s4 + $0x54] ss:$8 sps:$4 sm:$0xff]  }
0x1a38   : > { %v5090_v14 = vsub.f32 %v14195_v61, %v5087_v28  ;;  %v11871_v61 = vld [vmem:[%s14880_s4 + $0x24] ss:$8 sps:$4 sm:$0xff]   ;;  %v11890_v28 = vld [vmem:[#allocation11 + $0x18] sm:$0xff]  }
0x1a39   : > { %v14211_v44 = vpop.xlane.xlu1 %5082 }
0x1a3a   : > { %v5093_v31 = vmul.f32 %v5090_v14, %v5090_v14 }
0x1a3c   : > { %v12272_v60 = vpop.eup %12271 }
0x1a3d   : > { %v5611_v32 = vmul.f32 %v12272_v60, %v12268_v56  ;;  %v5086_v47 = vpop.xlane.xlu1 %5085  ;;  %v5088_v56 = vmul.f32 0.0078125, %v14211_v44  ;;  %v11883_v44 = vld [vmem:[%s14880_s4 + $0x64] ss:$8 sps:$4 sm:$0xff]   ;;  %v11881_v60 = vld [vmem:[%s14880_s4 + $0x60] ss:$8 sps:$4 sm:$0xff]  }
0x1a3e   : > { %v5089_v2 = vmul.f32 0.0078125, %v5086_v47  ;;  %v11884_v47 = vld [vmem:[%s14880_s4 + $0x70] ss:$8 sps:$4 sm:$0xff]  }
0x1a3f   : > { %v5612_v6 = vpack.c.bf16 %v5611_v32, %v5611_v32  ;;  %v11886_v32 = vld [vmem:[%s14880_s4 + $0x74] ss:$8 sps:$4 sm:$0xff]  }
0x1a40   : > { %v14214_v7 = vsub.f32 %v5077_v21, %v5089_v2  ;;  %v5091_v21 = vsub.f32 %v14200_v51, %v5088_v56  ;;  %v11872_v51 = vld [vmem:[%s14880_s4 + $0x30] ss:$8 sps:$4 sm:$0xff]   ;;  %v11887_v2 = vld [vmem:[#allocation11] sm:$0xff]  }
0x1a41   : > { %11074 = vmatmul.mubr.msk.bf16.vlgmr.msra.gmra.mrb[76].mxu1 %vm5487_vm6, %v5612_v6 }
0x1a42   : > { %v5095_v22 = vmul.f32 %v14214_v7, %v14214_v7  ;;  %11090 = vmatpush3.bf16.msra.mxu1 %v11855_v53  ;;  %11097 = vmatprep.mubr.msk.bf16.mxu1 %vm12913_vm4, %v12912_v42  ;;  %v5094_v40 = vmul.f32 %v5091_v21, %v5091_v21  ;;  %v11888_v53 = vld [vmem:[#allocation11 + $0x8] sm:$0xff]  }
0x1a43   : > { %11091 = vmatprep.subr.bf16.mxu1 %v12912_v42 }
0x1a44   : > { %v5100_v46 = vsel %vm1650_vm1, %v5095_v22, 0.0 }
0x1a45   : > { %5101 = vadd.xlane.f32.xlu0 %v5100_v46 }
0x1a46   : > { %11092 = vmatpush3.bf16.msra.mxu1 %v11856_v1 }
0x1a47   : > { %11093 = vmatprep.subr.bf16.mxu1 %v12912_v42 }
0x1a4a   : > { %11094 = vmatpush3.bf16.msra.mxu1 %v11857_v8 }
0x1a4b   : > { %11095 = vmatprep.subr.bf16.mxu1 %v12912_v42 }
0x1a4e   : > { %11096 = vmatpush3.bf16.msra.mxu1 %v11858_v55 }
0x1a4f   : > { %6054 = vmatprep.subr.bf16.mxu1 %v11865_v58 }
0x1aa1   : > { %v5541_v25 = vpop.f32.mrb[72].mxu1 }
0x1aa2   : > { %v5547_v11 = vpack.c.bf16 %v5541_v25, %v5541_v25  ;;  %v11063_v12 = vpop.f32.mrb[73].mxu1 }
0x1aa3   : > { %v5544_v52 = vpop.f32.mrb[74].mxu1 }
0x1aa4   : > { %v11064_v16 = vpop.f32.mrb[75].mxu1  ;;  %11098 = vmatmul.mubr.msk.bf16.vlgmr.msra.gmra.mrb[80].mxu1 %vm1586_vm0, %v5547_v11 }
0x1aa5   : > { %6086 = vmatprep.mubr.bf16.mxu1 %v12910_v0  ;;  %6055 = vmatpush1.bf16.msra.mxu1 %v11863_v36  ;;  %v10018_v36 = vld [vmem:[#allocation9] ss:$0 sm:$0xff] }
0x1aa6   : > { %6056 = vmatprep.subr.bf16.mxu1 %v11868_v63 }
0x1aa9   : > { %6057 = vmatpush1.bf16.msra.mxu1 %v11866_v62  ;;  %v10061_v62 = vld [vmem:[%s14884_s8] ss:$0 sm:$0xff] }
0x1aaa   : > { %6058 = vmatprep.subr.bf16.mxu1 %v11871_v61 }
0x1aad   : > { %6059 = vmatpush1.bf16.msra.mxu1 %v11869_v48 }
0x1ad2   : > { %v5102_v22 = vpop.xlane.xlu0 %5101 }
0x1ad3   : > { %v5105_v8 = vmul.f32 0.0078125, %v5102_v22 }
0x1ad5   : > { %v5108_v4 = vadd.f32 1e-06, %v5105_v8 }
0x1b14   : > { %v5656_v17 = vpop.f32.mrb[76].mxu1 }
0x1b15   : > { %v5662_v10 = vpack.c.bf16 %v5656_v17, %v5656_v17  ;;  %v11075_v23 = vpop.f32.mrb[77].mxu1 }
0x1b16   : > { %v5659_v26 = vpop.f32.mrb[78].mxu1  ;;  %v10017_v23 = vld [vmem:[#allocation8] ss:$0 sm:$0xff] }
0x1b17   : > { %v11076_v19 = vpop.f32.mrb[79].mxu1  ;;  %11086 = vmatmul.mubr.msk.bf16.vlgmr.msra.gmra.mrb[84].mxu0 %vm1586_vm0, %v5662_v10 }
0x1b18   : > { %11117 = vmatprep.mubr.msk.bf16.mxu0 %vm12913_vm4, %v12912_v42  ;;  %11102 = vmatpush3.bf16.msra.mxu0 %v11887_v2 }
0x1b19   : > { %11103 = vmatprep.subr.bf16.mxu0 %v12912_v42 }
0x1b1c   : > { %11104 = vmatpush3.bf16.msra.mxu0 %v11888_v53 }
0x1b1d   : > { %11105 = vmatprep.subr.bf16.mxu0 %v12912_v42 }
0x1b77   : > { %v5791_v5 = vpop.f32.mrb[80].mxu1 }
0x1b78   : > { %v11099_v20 = vpop.f32.mrb[81].mxu1 }
0x1b79   : > { %v5794_v30 = vpop.f32.mrb[82].mxu1 }
0x1b7a   : > { %v11100_v34 = vpop.f32.mrb[83].mxu1  ;;  %v11889_v30 = vld [vmem:[#allocation11 + $0x10] sm:$0xff]  }
0x1b7b   : > { %11106 = vmatpush3.bf16.msra.mxu0 %v11889_v30 }
0x1b7c   : > { %11107 = vmatprep.subr.bf16.mxu0 %v12912_v42 }
0x1b7f   : > { %11108 = vmatpush3.bf16.msra.mxu0 %v11890_v28 }
0x1b80   : > { %11109 = vmatprep.subr.bf16.mxu0 %v12912_v42 }
0x1bea   : > { %v5724_v27 = vpop.f32.mrb[84].mxu0 }
0x1beb   : > { %v5792_v39 = vadd.f32 %v5791_v5, %v5724_v27  ;;  %v11087_v59 = vpop.f32.mrb[85].mxu0 }
0x1bec   : > { %v5727_v45 = vpop.f32.mrb[86].mxu0  ;;  %v11892_v59 = vld [vmem:[#allocation11 + $0x28] sm:$0xff]  }
0x1bed   : > { %v5803_v24 = vadd.f32 %v10059_v37, %v5792_v39  ;;  %v11088_v54 = vpop.f32.mrb[87].mxu0 }
0x1bee   : > { %v11894_v54 = vld [vmem:[#allocation11 + $0x38] sm:$0xff]  }
0x1bef   : > { %v5804_v29 = vadd.f32 %v5803_v24, %v14151_v15  ;;  %v11874_v15 = vld [vmem:[%s14880_s4 + $0x34] ss:$8 sps:$4 sm:$0xff]  }
0x1bf0   : > { %6060 = vmatprep.subr.bf16.mxu1 %v11874_v15  ;;  %v11893_v24 = vld [vmem:[#allocation11 + $0x30] sm:$0xff]   ;;  %v5960_v15 = vld [vmem:[#allocation14] sm:$0x3] }
0x1bf1   : > { %5807 = vadd.xlane.f32.xlu1 %v5804_v29  ;;  %6061 = vmatpush1.bf16.msra.mxu1 %v11872_v51  ;;  %v5967_v51 = vrot.slane %v5960_v15, %v13505_v41 }
0x1bf2   : > { %6062 = vmatprep.subr.bf16.mxu1 %v11877_v38 }
0x1bf5   : > { %5096 = vadd.xlane.f32.xlu1 %v5093_v31  ;;  %6063 = vmatpush1.bf16.msra.mxu1 %v11875_v57  ;;  %v10060_v31 = vld [vmem:[%s14882_s15] ss:$0 sm:$0xff]  ;;  %v5971_v57 = vrot.slane %v5960_v15, %v13509_v43  ;;  %s14885_s15 = sld [smem:[#allocation67_spill]] }
0x1bf6   : > { %6064 = vmatprep.subr.bf16.mxu1 %v11880_v50 }
0x1bf9   : > { %5098 = vadd.xlane.f32.xlu1 %v5094_v40  ;;  %6065 = vmatpush1.bf16.msra.mxu1 %v11878_v49 }
0x1bfa   : > { %6066 = vmatprep.subr.bf16.mxu1 %v11883_v44 }
0x1bfb   : > { %s14886_s9 = smov %s14885_s15 }
0x1bfd   : > { %6067 = vmatpush1.bf16.msra.mxu1 %v11881_v60 }
0x1bfe   : > { %6068 = vmatprep.subr.bf16.mxu1 %v11886_v32 }
0x1c01   : > { %6069 = vmatpush1.bf16.msra.mxu1 %v11884_v47 }
0x1c02   : > { %11129 = vmatprep.subr.bf16.mxu1 %v12912_v42 }
0x1c7e   : > { %v5808_v6 = vpop.xlane.xlu1 %5807 }
0x1c7f   : > { %v5809_v1 = vmul.f32 0.0078125, %v5808_v6 }
0x1c81   : > { %v5810_v46 = vsub.f32 %v5804_v29, %v5809_v1 }
0x1c82   : > { %v5097_v55 = vpop.xlane.xlu1 %5096 }
0x1c83   : > { %v5103_v33 = vmul.f32 0.0078125, %v5097_v55  ;;  %v5811_v35 = vmul.f32 %v5810_v46, %v5810_v46 }
0x1c85   : > { %v5106_v9 = vadd.f32 1e-06, %v5103_v33  ;;  %5812 = vadd.xlane.f32.xlu1 %v5811_v35 }
0x1c86   : > { %v5099_v25 = vpop.xlane.xlu1 %5098 }
0x1c87   : > { %12273 = vrsqrt.f32 %v5106_v9  ;;  %v5104_v11 = vmul.f32 0.0078125, %v5099_v25 }
0x1c88   : > { %12275 = vrsqrt.f32 %v5108_v4 }
0x1c89   : > { %v5107_v12 = vadd.f32 1e-06, %v5104_v11 }
0x1c8b   : > { %12277 = vrsqrt.f32 %v5107_v12  ;;  %v10062_v12 = vld [vmem:[#allocation12] ss:$0 sm:$0xff] }
0x1c91   : > { %v12274_v52 = vpop.eup %12273 }
0x1c92   : > { %v5112_v16 = vmul.f32 %v12274_v52, %v5090_v14  ;;  %v12276_v17 = vpop.eup %12275 }
0x1c93   : > { %v5114_v20 = vmul.f32 %v12276_v17, %v14214_v7  ;;  %v11891_v7 = vld [vmem:[#allocation11 + $0x20] sm:$0xff]  }
0x1c94   : > { %v5121_v19 = vmul.f32 %v10017_v23, %v5112_v16  ;;  %11110 = vmatpush3.bf16.msra.mxu0 %v11891_v7 }
0x1c95   : > { %v12278_v10 = vpop.eup %12277  ;;  %v5123_v27 = vmul.f32 %v10017_v23, %v5114_v20  ;;  %11111 = vmatprep.subr.bf16.mxu0 %v12912_v42 }
0x1c96   : > { %v5113_v26 = vmul.f32 %v12278_v10, %v5091_v21  ;;  %v5130_v58 = vadd.f32 %v10018_v36, %v5121_v19 }
0x1c97   : > { %v5132_v39 = vadd.f32 %v10018_v36, %v5123_v27 }
0x1c98   : > { %v5122_v5 = vmul.f32 %v10017_v23, %v5113_v26  ;;  %11112 = vmatpush3.bf16.msra.mxu0 %v11892_v59 }
0x1c99   : > { %v14273_v45 = vpack.c.bf16 %v5132_v39, %v5132_v39  ;;  %11113 = vmatprep.subr.bf16.mxu0 %v12912_v42 }
0x1c9a   : > { %v5131_v34 = vadd.f32 %v10018_v36, %v5122_v5 }
0x1c9c   : > { %v14267_v37 = vpack.c.bf16 %v5131_v34, %v5130_v58  ;;  %11114 = vmatpush3.bf16.msra.mxu0 %v11893_v24 }
0x1c9d   : > { %11115 = vmatprep.subr.bf16.mxu0 %v12912_v42 }
0x1c9e   : > { %6087 = vmatmul.mubr.bf16.vlgmr.msra.gmra.mrb[84].mxu1 %v14267_v37 }
0x1c9f   : > { %6096 = vmatprep.mubr.bf16.mxu1 %v12910_v0 }
0x1ca0   : > { %11116 = vmatpush3.bf16.msra.mxu0 %v11894_v54 }
0x1ca1   : > { %11121 = vmatprep.subr.bf16.mxu0 %v12912_v42 }
0x1ca6   : > { %6097 = vmatmul.mubr.bf16.gmra.mrb[88].mxu1 %v14273_v45 }
0x1ca7   : > { %11133 = vmatprep.mubr.msk.bf16.mxu1 %vm12913_vm4, %v12912_v42 }
0x1d12   : > { %v5813_v14 = vpop.xlane.xlu1 %5812 }
0x1d13   : > { %v5814_v56 = vmul.f32 0.0078125, %v5813_v14 }
0x1d15   : > { %v5815_v29 = vadd.f32 1e-12, %v5814_v56 }
0x1d17   : > { %12279 = vrsqrt.f32 %v5815_v29 }
0x1d21   : > { %v12280_v21 = vpop.eup %12279 }
0x1d22   : > { %v5817_v40 = vmul.f32 %v12280_v21, %v5810_v46 }
0x1d24   : > { %v5824_v63 = vmul.f32 %v10060_v31, %v5817_v40 }
0x1d26   : > { %v14283_v61 = vadd.f32 %v10061_v62, %v5824_v63 }
0x1d28   : > { %v5849_v48 = vpack.c.bf16 %v14283_v61, %v14283_v61 }
0x1d2a   : > { %11118 = vmatmul.mubr.bf16.vlgmr.msra.gmra.mrb[88].mxu0 %v5849_v48 }
0x1d2b   : > { %11125 = vmatprep.mubr.msk.bf16.mxu0 %vm12913_vm4, %v12912_v42 }
0x1d71   : > { %v6088_v38 = vpop.f32.mrb[84].mxu1 }
0x1d72   : > { %v6090_v49 = vpop.f32.mrb[85].mxu1  ;;  %v6089_v44 = vadd.f32 %v6088_v38, %v5967_v51 }
0x1d73   : > { %v6092_v50 = vpop.f32.mrb[86].mxu1  ;;  %v6091_v47 = vadd.f32 %v6090_v49, %v5971_v57 }
0x1d74   : > { %v6093_v60 = vadd.f32 %v6092_v50, %v5967_v51  ;;  %v6094_v32 = vpop.f32.mrb[87].mxu1 }
0x1d75   : > { %v6095_v2 = vadd.f32 %v6094_v32, %v5971_v57  ;;  %v11897_v32 = vld [vmem:[#allocation15 + $0x10] sm:$0xff]  }
0x1d76   : > { %v6123_v53 = vpack.c.bf16 %v6093_v60, %v6089_v44  ;;  %v11895_v44 = vld [vmem:[#allocation15] sm:$0xff]   ;;  %v11896_v60 = vld [vmem:[#allocation15 + $0x8] sm:$0xff]  }
0x1d77   : > { %v6125_v6 = vpack.c.bf16 %v6095_v2, %v6091_v47 }
0x1d78   : > { %6241 = vrot.lane.b32.xlu1 %v6123_v53, %s14870_s18  ;;  %v6131_v22 = vsel %vm1586_vm0, %v6123_v53, 0 }
0x1d79   : > { %v6098_v1 = vpop.f32.mrb[88].mxu1  ;;  %11122 = vmatpush3.bf16.xpose.msra.mxu0 %v6131_v22  ;;  %11130 = vmatpush3.bf16.msra.mxu1 %v6125_v6 }
0x1d7a   : > { %v6099_v46 = vadd.f32 %v6098_v1, %v5967_v51  ;;  %v6100_v8 = vpop.f32.mrb[89].mxu1  ;;  %11123 = vmatprep.subr.bf16.mxu0 %v12912_v42  ;;  %11131 = vmatprep.subr.bf16.mxu1 %v12912_v42 }
0x1d7b   : > { %v6101_v55 = vadd.f32 %v6100_v8, %v5971_v57  ;;  %v6102_v33 = vpop.f32.mrb[90].mxu1 }
0x1d7c   : > { %v6124_v35 = vpack.c.bf16 %v6099_v46, %v6099_v46  ;;  %v6103_v9 = vpop.f32.mrb[91].mxu1  ;;  %v11899_v33 = vld [vmem:[#allocation15 + $0x20] sm:$0xff]  }
0x1d7d   : > { %v6126_v4 = vpack.c.bf16 %v6101_v55, %v6101_v55  ;;  %v11900_v9 = vld [vmem:[#allocation15 + $0x28] sm:$0xff]  }
0x1d7e   : > { %6243 = vrot.lane.b32.xlu1 %v6124_v35, %s14870_s18  ;;  %v6134_v11 = vsel %vm1586_vm0, %v6124_v35, 0 }
0x1d7f   : > { %v6193_v25 = vand.u32 %v6126_v4, %v13531_v13 }
0x1d81   : > { %11124 = vmatpush3.bf16.xpose.msra.mxu0 %v6134_v11  ;;  %11132 = vmatpush3.bf16.msra.mxu1 %v6193_v25  ;;  %v11902_v25 = vld [vmem:[#allocation15 + $0x38] sm:$0xff]  }
0x1d82   : > { %11137 = vmatprep.subr.bf16.mxu0 %v12912_v42  ;;  %11145 = vmatprep.subr.bf16.mxu1 %v12912_v42 }
0x1dea   : > { %v6242_v10 = vpop.permute.xlu1 %6241 }
0x1deb   : > { %v6249_v5 = vsel %vm1586_vm0, %v6242_v10, 0 }
0x1df0   : > { %v6244_v20 = vpop.permute.xlu1 %6243 }
0x1df1   : > { %v6252_v30 = vsel %vm1586_vm0, %v6244_v20, 0 }
0x1dfd   : > { %v5938_v52 = vpop.f32.mrb[88].mxu0 }
0x1dfe   : > { %v5939_v16 = vadd.f32 %v10062_v12, %v5938_v52  ;;  %v11119_v17 = vpop.f32.mrb[89].mxu0 }
0x1dff   : > { %v5941_v23 = vpop.f32.mrb[90].mxu0 }
0x1e00   : > { %v6122_v26 = vpack.c.bf16 %v5939_v16, %v5939_v16  ;;  %v11120_v19 = vpop.f32.mrb[91].mxu0 }
0x1e02   : > { %6237 = vrot.lane.b32.xlu1 %v6122_v26, %s14870_s18  ;;  %11126 = vmatmul.mubr.msk.bf16.vlgmr.msra.gmra.mrb[92].mxu0 %vm1586_vm0, %v6122_v26 }
0x1e03   : > { %11138 = vmatpush3.bf16.xpose.msra.mxu0 %v6249_v5  ;;  %11141 = vmatprep.mubr.msk.bf16.mxu0 %vm12913_vm4, %v12912_v42 }
0x1e04   : > { %11139 = vmatprep.subr.bf16.mxu0 %v12912_v42 }
0x1e0b   : > { %11140 = vmatpush3.bf16.xpose.msra.mxu0 %v6252_v30 }
0x1e0c   : > { %11165 = vmatprep.subr.bf16.mxu0 %v12912_v42 }
0x1e74   : > { %v6238_v36 = vpop.permute.xlu1 %6237 }
0x1e75   : > { %11142 = vmatmul.mubr.msk.bf16.vlgmr.msra.gmra.mrb[96].mxu0 %vm1586_vm0, %v6238_v36 }
0x1e76   : > { %11173 = vmatprep.mubr.msk.bf16.mxu0 %vm12913_vm4, %v12912_v42  ;;  %11166 = vmatpush3.bf16.msra.mxu0 %v11895_v44  ;;  %v11923_v44 = vld [vmem:[%s14886_s9 + $0x64] ss:$16 sps:$4 sm:$0xff]  }
0x1e77   : > { %11167 = vmatprep.subr.bf16.mxu0 %v12912_v42 }
0x1e7a   : > { %11168 = vmatpush3.bf16.msra.mxu0 %v11896_v60  ;;  %v11926_v60 = vld [vmem:[%s14886_s9 + $0x6c] ss:$16 sps:$4 sm:$0xff]  }
0x1e7b   : > { %11169 = vmatprep.subr.bf16.mxu0 %v12912_v42 }
0x1e7e   : > { %11170 = vmatpush3.bf16.msra.mxu0 %v11897_v32  ;;  %v11921_v32 = vld [vmem:[%s14886_s9 + $0x60] ss:$16 sps:$4 sm:$0xff]  }
0x1e7f   : > { %11171 = vmatprep.subr.bf16.mxu0 %v12912_v42 }
0x1ed5   : > { %v6170_v58 = vpop.f32.mrb[92].mxu0 }
0x1ed6   : > { %v6176_v34 = vmul.f32 0.125, %v6170_v58  ;;  %v11127_v27 = vpop.f32.mrb[93].mxu0 }
0x1ed7   : > { %v6173_v28 = vpop.f32.mrb[94].mxu0 }
0x1ed8   : > { %v11128_v39 = vpop.f32.mrb[95].mxu0  ;;  %v6177_v7 = vsel %vm2065_vm2, %v6176_v34, -inf }
0x1ed9   : > { %6178 = vmax.xlane.f32.xlu0 %v6177_v7 }
0x1eef   : > { %6309 = vrot.lane.b32.xlu0 %v6125_v6, %s14870_s18  ;;  %v11898_v6 = vld [vmem:[#allocation15 + $0x18] sm:$0xff]  }
0x1ef0   : > { %11172 = vmatpush3.bf16.msra.mxu0 %v11898_v6  ;;  %v11927_v6 = vld [vmem:[%s14886_s9 + $0x80] ss:$16 sps:$4 sm:$0xff]  }
0x1f48   : > { %v6288_v59 = vpop.f32.mrb[96].mxu0 }
0x1f49   : > { %v6294_v24 = vmul.f32 0.125, %v6288_v59  ;;  %v11143_v54 = vpop.f32.mrb[97].mxu0 }
0x1f4a   : > { %v6291_v14 = vpop.f32.mrb[98].mxu0 }
0x1f4b   : > { %v11144_v56 = vpop.f32.mrb[99].mxu0  ;;  %v6295_v29 = vsel %vm2065_vm2, %v6294_v24, -inf  ;;  %v11903_v14 = vld [vmem:[%s14885_s15] ss:$16 sps:$4 sm:$0xff]   ;;  %s14887_s15 = sld [smem:[#allocation68_spill]] }
0x1f4c   : > { %6296 = vmax.xlane.f32.xlu1 %v6295_v29  ;;  %v11905_v56 = vld [vmem:[%s14886_s9 + $0x4] ss:$16 sps:$4 sm:$0xff]   ;;  %v11906_v29 = vld [vmem:[%s14886_s9 + $0x8] ss:$16 sps:$4 sm:$0xff]  }
0x1f51   : > { %s14888_s10 = smov %s14887_s15 }
0x1f66   : > { %v6179_v21 = vpop.xlane.xlu0 %6178 }
0x1f67   : > { %v6180_v31 = vsub.f32 %v6176_v34, %v6179_v21  ;;  %v10101_v34 = vld [vmem:[#allocation17] ss:$0 sm:$0xff]  ;;  %v11908_v21 = vld [vmem:[%s14886_s9 + $0xc] ss:$16 sps:$4 sm:$0xff]  }
0x1f68   : > { %6786 = vmatprep.subr.bf16.mxu0 %v11908_v21  ;;  %v11963_v21 = vld [vmem:[%s14888_s10 + $0x58] sm:$0xff]  }
0x1f69   : > { %v6181_v40 = vmul.f32 1.442695, %v6180_v31  ;;  %v11911_v31 = vld [vmem:[%s14886_s9 + $0x24] ss:$16 sps:$4 sm:$0xff]  }
0x1f6a   : > { %v6310_v49 = vpop.permute.xlu0 %6309 }
0x1f6b   : > { %12281 = vpow2.f32 %v6181_v40  ;;  %v11914_v40 = vld [vmem:[%s14886_s9 + $0x2c] ss:$16 sps:$4 sm:$0xff]  }
0x1f75   : > { %v12282_v62 = vpop.eup %12281 }
0x1f76   : > { %v6183_v63 = vsel %vm2065_vm2, %v12282_v62, 0.0 }
0x1f77   : > { %6184 = vadd.xlane.f32.xlu0 %v6183_v63  ;;  %v11912_v63 = vld [vmem:[%s14886_s9 + $0x28] ss:$16 sps:$4 sm:$0xff]  }
0x1fd9   : > { %v6297_v48 = vpop.xlane.xlu1 %6296 }
0x1fda   : > { %v6298_v15 = vsub.f32 %v6294_v24, %v6297_v48  ;;  %v11917_v48 = vld [vmem:[%s14886_s9 + $0x44] ss:$16 sps:$4 sm:$0xff]  }
0x1fdc   : > { %v6299_v51 = vmul.f32 1.442695, %v6298_v15  ;;  %v11915_v15 = vld [vmem:[%s14886_s9 + $0x40] ss:$16 sps:$4 sm:$0xff]  }
0x1fde   : > { %12283 = vpow2.f32 %v6299_v51  ;;  %v11918_v51 = vld [vmem:[%s14886_s9 + $0x48] ss:$16 sps:$4 sm:$0xff]  }
0x1fe8   : > { %v12284_v38 = vpop.eup %12283 }
0x1fe9   : > { %v6301_v57 = vsel %vm2065_vm2, %v12284_v38, 0.0 }
0x1fea   : > { %6302 = vadd.xlane.f32.xlu0 %v6301_v57 }
0x2000   : > { %6311 = vrot.lane.b32.xlu0 %v6126_v4, %s14870_s18  ;;  %v11901_v4 = vld [vmem:[#allocation15 + $0x30] sm:$0xff]  }
0x2004   : > { %v6185_v50 = vpop.xlane.xlu0 %6184 }
0x2005   : > { %12285 = vrcp.f32 %v6185_v50 }
0x200f   : > { %v12286_v47 = vpop.eup %12285 }
0x2010   : > { %v6187_v2 = vmul.f32 %v12286_v47, %v12282_v62  ;;  %v11909_v62 = vld [vmem:[%s14886_s9 + $0x20] ss:$16 sps:$4 sm:$0xff]   ;;  %v11924_v47 = vld [vmem:[%s14886_s9 + $0x68] ss:$16 sps:$4 sm:$0xff]  }
0x2012   : > { %v6188_v53 = vpack.c.bf16 %v6187_v2, %v6187_v2  ;;  %v11929_v2 = vld [vmem:[%s14886_s9 + $0x84] ss:$16 sps:$4 sm:$0xff]  }
0x2014   : > { %11134 = vmatmul.mubr.msk.bf16.vlgmr.msra.gmra.mrb[92].mxu1 %vm2065_vm2, %v6188_v53  ;;  %v11932_v53 = vld [vmem:[%s14886_s9 + $0x8c] ss:$16 sps:$4 sm:$0xff]  }
0x2015   : > { %11146 = vmatpush3.bf16.msra.mxu1 %v6310_v49  ;;  %11149 = vmatprep.mubr.msk.bf16.mxu1 %vm12913_vm4, %v12912_v42 }
0x2016   : > { %11147 = vmatprep.subr.bf16.mxu1 %v12912_v42 }
0x2077   : > { %v6303_v22 = vpop.xlane.xlu0 %6302 }
0x2078   : > { %12287 = vrcp.f32 %v6303_v22  ;;  %v11930_v22 = vld [vmem:[%s14886_s9 + $0x88] ss:$16 sps:$4 sm:$0xff]  }
0x207b   : > { %v6312_v1 = vpop.permute.xlu0 %6311 }
0x207c   : > { %v6318_v46 = vand.u32 %v6312_v1, %v13531_v13  ;;  %v11933_v1 = vld [vmem:[%s14886_s9 + $0xa0] ss:$16 sps:$4 sm:$0xff]  }
0x207e   : > { %11148 = vmatpush3.bf16.msra.mxu1 %v6318_v46  ;;  %v11935_v46 = vld [vmem:[%s14886_s9 + $0xa4] ss:$16 sps:$4 sm:$0xff]  }
0x207f   : > { %11153 = vmatprep.subr.bf16.mxu1 %v12912_v42 }
0x2082   : > { %v12288_v8 = vpop.eup %12287 }
0x2083   : > { %v6305_v55 = vmul.f32 %v12288_v8, %v12284_v38  ;;  %v11936_v8 = vld [vmem:[%s14886_s9 + $0xa8] ss:$16 sps:$4 sm:$0xff]  }
0x2085   : > { %v6306_v35 = vpack.c.bf16 %v6305_v55, %v6305_v55  ;;  %v11938_v55 = vld [vmem:[%s14886_s9 + $0xac] ss:$16 sps:$4 sm:$0xff]  }
0x2087   : > { %11150 = vmatmul.mubr.msk.bf16.vlgmr.msra.gmra.mrb[96].mxu1 %vm2065_vm2, %v6306_v35  ;;  %v11944_v35 = vld [vmem:[%s14886_s9 + $0xcc] ss:$16 sps:$4 sm:$0xff]  }
0x2088   : > { %11154 = vmatpush3.bf16.msra.mxu1 %v11899_v33  ;;  %11161 = vmatprep.mubr.msk.bf16.mxu1 %vm12913_vm4, %v12912_v42  ;;  %v11941_v33 = vld [vmem:[%s14886_s9 + $0xc4] ss:$16 sps:$4 sm:$0xff]  }
0x2089   : > { %11155 = vmatprep.subr.bf16.mxu1 %v12912_v42 }
0x208c   : > { %11156 = vmatpush3.bf16.msra.mxu1 %v11900_v9  ;;  %v11939_v9 = vld [vmem:[%s14886_s9 + $0xc0] ss:$16 sps:$4 sm:$0xff]  }
0x208d   : > { %11157 = vmatprep.subr.bf16.mxu1 %v12912_v42 }
0x2090   : > { %11158 = vmatpush3.bf16.msra.mxu1 %v11901_v4  ;;  %v11942_v4 = vld [vmem:[%s14886_s9 + $0xc8] ss:$16 sps:$4 sm:$0xff]  }
0x2091   : > { %11159 = vmatprep.subr.bf16.mxu1 %v12912_v42 }
0x2094   : > { %11160 = vmatpush3.bf16.msra.mxu1 %v11902_v25  ;;  %v11947_v25 = vld [vmem:[%s14886_s9 + $0xe4] ss:$16 sps:$4 sm:$0xff]  }
0x2095   : > { %6745 = vmatprep.subr.bf16.mxu1 %v11905_v56  ;;  %v11961_v56 = vld [vmem:[%s14888_s10 + $0x10] sm:$0xff]  }
0x20e7   : > { %v6229_v11 = vpop.f32.mrb[92].mxu1 }
0x20e8   : > { %v6235_v12 = vpack.c.bf16 %v6229_v11, %v6229_v11  ;;  %v11135_v52 = vpop.f32.mrb[93].mxu1  ;;  %v11950_v11 = vld [vmem:[%s14886_s9 + $0xec] ss:$16 sps:$4 sm:$0xff]  }
0x20e9   : > { %v6232_v16 = vpop.f32.mrb[94].mxu1  ;;  %v11948_v52 = vld [vmem:[%s14886_s9 + $0xe8] ss:$16 sps:$4 sm:$0xff]  }
0x20ea   : > { %v11136_v17 = vpop.f32.mrb[95].mxu1  ;;  %11174 = vmatmul.mubr.msk.bf16.vlgmr.msra.gmra.mrb[100].mxu0 %vm1586_vm0, %v6235_v12  ;;  %v11945_v12 = vld [vmem:[%s14886_s9 + $0xe0] ss:$16 sps:$4 sm:$0xff]  }
0x20eb   : > { %6818 = vmatprep.mubr.bf16.mxu0 %v12910_v0  ;;  %6787 = vmatpush1.bf16.msra.mxu0 %v11906_v29  ;;  %v11962_v29 = vld [vmem:[%s14888_s10 + $0x90] sm:$0xff]  }
0x20ec   : > { %6788 = vmatprep.subr.bf16.mxu0 %v11914_v40  ;;  %v11965_v40 = vld [vmem:[%s14888_s10 + $0x18] sm:$0xff]  }
0x20ef   : > { %6789 = vmatpush1.bf16.msra.mxu0 %v11912_v63  ;;  %v11967_v63 = vld [vmem:[%s14888_s10 + $0x60] sm:$0xff]  }
0x215a   : > { %v6354_v10 = vpop.f32.mrb[96].mxu1 }
0x215b   : > { %v6360_v23 = vpack.c.bf16 %v6354_v10, %v6354_v10  ;;  %v11151_v26 = vpop.f32.mrb[97].mxu1 }
0x215c   : > { %v6357_v19 = vpop.f32.mrb[98].mxu1  ;;  %v10102_v26 = vld [vmem:[#allocation18] ss:$0 sm:$0xff] }
0x215d   : > { %v11152_v5 = vpop.f32.mrb[99].mxu1  ;;  %11162 = vmatmul.mubr.msk.bf16.vlgmr.msra.gmra.mrb[100].mxu1 %vm1586_vm0, %v6360_v23 }
0x215e   : > { %6777 = vmatprep.mubr.bf16.mxu1 %v12910_v0  ;;  %6746 = vmatpush1.bf16.msra.mxu1 %v11903_v14  ;;  %v10103_v5 = vld [vmem:[#allocation20] ss:$0 sm:$0xff]  ;;  %v11960_v14 = vld [vmem:[%s14888_s10 + $0xd0] sm:$0xff]  }
0x215f   : > { %6747 = vmatprep.subr.bf16.mxu1 %v11911_v31  ;;  %v11964_v31 = vld [vmem:[%s14888_s10 + $0xd8] sm:$0xff]  }
0x2162   : > { %6748 = vmatpush1.bf16.msra.mxu1 %v11909_v62  ;;  %v11966_v62 = vld [vmem:[%s14888_s10 + $0x98] sm:$0xff]  }
0x2163   : > { %6749 = vmatprep.subr.bf16.mxu1 %v11917_v48  ;;  %v11968_v48 = vld [vmem:[%s14888_s10 + $0xe0] sm:$0xff]  }
0x2166   : > { %6750 = vmatpush1.bf16.msra.mxu1 %v11915_v15  ;;  %v11970_v15 = vld [vmem:[%s14888_s10 + $0xa0] sm:$0xff]  }
0x2167   : > { %6751 = vmatprep.subr.bf16.mxu1 %v11923_v44  ;;  %v11976_v44 = vld [vmem:[%s14888_s10 + $0xf0] sm:$0xff]  }
0x216a   : > { %6752 = vmatpush1.bf16.msra.mxu1 %v11921_v32  ;;  %v11978_v32 = vld [vmem:[%s14888_s10 + $0xb0] sm:$0xff]  }
0x216b   : > { %6753 = vmatprep.subr.bf16.mxu1 %v11929_v2  ;;  %v11980_v2 = vld [vmem:[%s14888_s10 + $0xf8] sm:$0xff]  }
0x216e   : > { %6754 = vmatpush1.bf16.msra.mxu1 %v11927_v6  ;;  %v11982_v6 = vld [vmem:[%s14888_s10 + $0xb8] sm:$0xff]  }
0x216f   : > { %6755 = vmatprep.subr.bf16.mxu1 %v11935_v46 }
0x2172   : > { %6756 = vmatpush1.bf16.msra.mxu1 %v11933_v1 }
0x2173   : > { %6757 = vmatprep.subr.bf16.mxu1 %v11941_v33 }
0x2176   : > { %6758 = vmatpush1.bf16.msra.mxu1 %v11939_v9 }
0x2177   : > { %6759 = vmatprep.subr.bf16.mxu1 %v11947_v25 }
0x217a   : > { %6760 = vmatpush1.bf16.msra.mxu1 %v11945_v12 }
0x21bd   : > { %v6489_v20 = vpop.f32.mrb[100].mxu0 }
0x21be   : > { %v11175_v30 = vpop.f32.mrb[101].mxu0 }
0x21bf   : > { %v6492_v36 = vpop.f32.mrb[102].mxu0 }
0x21c0   : > { %v11176_v58 = vpop.f32.mrb[103].mxu0 }
0x21c1   : > { %v11951_v58 = vld [vmem:[%s14887_s15 + $0x40] sm:$0xff]   ;;  %s10485_s15 = sshll.u32 %s13156_s0, 4 }
0x21c2   : > { %10735 = vmatprep.subr.bf16.mxu1 %v11951_v58 }
0x2230   : > { %v6422_v27 = vpop.f32.mrb[100].mxu1 }
0x2231   : > { %v6490_v28 = vadd.f32 %v6489_v20, %v6422_v27  ;;  %v11163_v39 = vpop.f32.mrb[101].mxu1  ;;  %v11953_v27 = vld [vmem:[%s14888_s10] sm:$0xff]  }
0x2232   : > { %v6425_v7 = vpop.f32.mrb[102].mxu1  ;;  %v11955_v39 = vld [vmem:[%s14888_s10 + $0x48] sm:$0xff]  }
0x2233   : > { %v6501_v59 = vadd.f32 %v10101_v34, %v6490_v28  ;;  %v11164_v24 = vpop.f32.mrb[103].mxu1  ;;  %v11952_v34 = vld [vmem:[%s14888_s10 + $0xc0] sm:$0xff]   ;;  %v11956_v7 = vld [vmem:[%s14888_s10 + $0xc8] sm:$0xff]  }
0x2234   : > { %v11954_v28 = vld [vmem:[%s14888_s10 + $0x80] sm:$0xff]   ;;  %v11958_v24 = vld [vmem:[%s14888_s10 + $0x88] sm:$0xff]  }
0x2235   : > { %v6502_v54 = vadd.f32 %v6501_v59, %v14283_v61  ;;  %v11920_v61 = vld [vmem:[%s14886_s9 + $0x4c] ss:$16 sps:$4 sm:$0xff]  }
0x2236   : > { %6790 = vmatprep.subr.bf16.mxu0 %v11920_v61  ;;  %v11957_v59 = vld [vmem:[%s14888_s10 + $0x8] sm:$0xff]   ;;  %v11969_v61 = vld [vmem:[%s14888_s10 + $0x20] sm:$0xff]  }
0x2237   : > { %6505 = vadd.xlane.f32.xlu1 %v6502_v54  ;;  %6791 = vmatpush1.bf16.msra.mxu0 %v11918_v51  ;;  %v11971_v51 = vld [vmem:[%s14888_s10 + $0x68] sm:$0xff]  }
0x2238   : > { %6792 = vmatprep.subr.bf16.mxu0 %v11926_v60  ;;  %v11977_v60 = vld [vmem:[%s14888_s10 + $0x30] sm:$0xff]  }
0x223b   : > { %6793 = vmatpush1.bf16.msra.mxu0 %v11924_v47  ;;  %v11979_v47 = vld [vmem:[%s14888_s10 + $0x78] sm:$0xff]  }
0x223c   : > { %6794 = vmatprep.subr.bf16.mxu0 %v11932_v53  ;;  %v11981_v53 = vld [vmem:[%s14888_s10 + $0x38] sm:$0xff]  }
0x223f   : > { %6795 = vmatpush1.bf16.msra.mxu0 %v11930_v22  ;;  %v6562_v22 = vld [vmem:[#allocation21] sm:$0xf] }
0x2240   : > { %6796 = vmatprep.subr.bf16.mxu0 %v11938_v55  ;;  %v6568_v1 = vrot.slane %v6562_v22, %v13505_v41  ;;  %v6576_v46 = vrot.slane %v6562_v22, %v13524_v3  ;;  %v6580_v55 = vrot.slane %v6562_v22, %v13683_v18 }
0x2243   : > { %6797 = vmatpush1.bf16.msra.mxu0 %v11936_v8  ;;  %v6572_v8 = vrot.slane %v6562_v22, %v13509_v43 }
0x2244   : > { %6798 = vmatprep.subr.bf16.mxu0 %v11944_v35 }
0x2247   : > { %6799 = vmatpush1.bf16.msra.mxu0 %v11942_v4 }
0x2248   : > { %6800 = vmatprep.subr.bf16.mxu0 %v11950_v11 }
0x224b   : > { %6801 = vmatpush1.bf16.msra.mxu0 %v11948_v52 }
0x224c   : > { %10757 = vmatprep.subr.bf16.mxu0 %v11952_v34 }
0x22c4   : > { %v6506_v38 = vpop.xlane.xlu1 %6505 }
0x22c5   : > { %v6507_v57 = vmul.f32 0.0078125, %v6506_v38  ;;  %v11972_v38 = vld [vmem:[%s14888_s10 + $0xe8] sm:$0xff]  }
0x22c7   : > { %v6508_v49 = vsub.f32 %v6502_v54, %v6507_v57  ;;  %v11959_v54 = vld [vmem:[%s14888_s10 + $0x50] sm:$0xff]   ;;  %v11973_v57 = vld [vmem:[%s14888_s10 + $0x28] sm:$0xff]  }
0x22c9   : > { %v6509_v50 = vmul.f32 %v6508_v49, %v6508_v49 }
0x22cb   : > { %6510 = vadd.xlane.f32.xlu0 %v6509_v50  ;;  %v11975_v50 = vld [vmem:[%s14888_s10 + $0x70] sm:$0xff]  }
0x2358   : > { %v6511_v16 = vpop.xlane.xlu0 %6510 }
0x2359   : > { %v6512_v17 = vmul.f32 0.0078125, %v6511_v16 }
0x235b   : > { %v6513_v10 = vadd.f32 1e-12, %v6512_v17 }
0x235d   : > { %12289 = vrsqrt.f32 %v6513_v10 }
0x2367   : > { %v12290_v23 = vpop.eup %12289 }
0x2368   : > { %v6515_v19 = vmul.f32 %v12290_v23, %v6508_v49  ;;  %v11974_v49 = vld [vmem:[%s14888_s10 + $0xa8] sm:$0xff]  }
0x236a   : > { %v6522_v20 = vmul.f32 %v10102_v26, %v6515_v19 }
0x236c   : > { %v14369_v30 = vadd.f32 %v10103_v5, %v6522_v20 }
0x236e   : > { %v6563_v36 = vpack.c.bf16 %v14369_v30, %v14369_v30 }
0x2370   : > { %6778 = vmatmul.mubr.bf16.vlgmr.msra.gmra.mrb[104].mxu1 %v6563_v36  ;;  %6819 = vmatmul.mubr.bf16.vlgmr.msra.gmra.mrb[104].mxu0 %v6563_v36 }
0x2371   : > { %10736 = vmatpush3.bf16.msra.mxu1 %v11953_v27  ;;  %10758 = vmatpush3.bf16.msra.mxu0 %v11954_v28 }
0x2372   : > { %10737 = vmatprep.subr.bf16.mxu1 %v11955_v39  ;;  %10759 = vmatprep.subr.bf16.mxu0 %v11956_v7 }
0x2375   : > { %10738 = vmatpush3.bf16.msra.mxu1 %v11957_v59  ;;  %10760 = vmatpush3.bf16.msra.mxu0 %v11958_v24 }
0x2376   : > { %10739 = vmatprep.subr.bf16.mxu1 %v11959_v54  ;;  %10761 = vmatprep.subr.bf16.mxu0 %v11960_v14 }
0x2379   : > { %10740 = vmatpush3.bf16.msra.mxu1 %v11961_v56  ;;  %10762 = vmatpush3.bf16.msra.mxu0 %v11962_v29 }
0x237a   : > { %10741 = vmatprep.subr.bf16.mxu1 %v11963_v21  ;;  %10763 = vmatprep.subr.bf16.mxu0 %v11964_v31 }
0x237d   : > { %10742 = vmatpush3.bf16.msra.mxu1 %v11965_v40  ;;  %10764 = vmatpush3.bf16.msra.mxu0 %v11966_v62 }
0x237e   : > { %10743 = vmatprep.subr.bf16.mxu1 %v11967_v63  ;;  %10765 = vmatprep.subr.bf16.mxu0 %v11968_v48 }
0x2381   : > { %10744 = vmatpush3.bf16.msra.mxu1 %v11969_v61  ;;  %10766 = vmatpush3.bf16.msra.mxu0 %v11970_v15 }
0x2382   : > { %10745 = vmatprep.subr.bf16.mxu1 %v11971_v51  ;;  %10767 = vmatprep.subr.bf16.mxu0 %v11972_v38 }
0x2385   : > { %10746 = vmatpush3.bf16.msra.mxu1 %v11973_v57  ;;  %10768 = vmatpush3.bf16.msra.mxu0 %v11974_v49 }
0x2386   : > { %10747 = vmatprep.subr.bf16.mxu1 %v11975_v50  ;;  %10769 = vmatprep.subr.bf16.mxu0 %v11976_v44 }
0x2389   : > { %10748 = vmatpush3.bf16.msra.mxu1 %v11977_v60  ;;  %10770 = vmatpush3.bf16.msra.mxu0 %v11978_v32 }
0x238a   : > { %10749 = vmatprep.subr.bf16.mxu1 %v11979_v47  ;;  %10771 = vmatprep.subr.bf16.mxu0 %v11980_v2 }
0x238d   : > { %10750 = vmatpush3.bf16.msra.mxu1 %v11981_v53  ;;  %10772 = vmatpush3.bf16.msra.mxu0 %v11982_v6 }
0x238e   : > { %11177 = vmatprep.subr.bf16.mxu0 %v12912_v42 }
0x2443   : > { %v6779_v33 = vpop.f32.mrb[104].mxu1  ;;  %v6820_v35 = vpop.f32.mrb[104].mxu0 }
0x2444   : > { %v6780_v9 = vadd.f32 %v6779_v33, %v6568_v1  ;;  %v6821_v4 = vadd.f32 %v6820_v35, %v6576_v46  ;;  %v6781_v25 = vpop.f32.mrb[105].mxu1  ;;  %v6822_v11 = vpop.f32.mrb[105].mxu0  ;;  %v10136_v33 = vld [vmem:[#allocation23] ss:$0 sm:$0xff] }
0x2445   : > { %v6782_v12 = vadd.f32 %v6781_v25, %v6572_v8  ;;  %v6823_v52 = vadd.f32 %v6822_v11, %v6580_v55  ;;  %v6783_v16 = vpop.f32.mrb[106].mxu1  ;;  %v6824_v17 = vpop.f32.mrb[106].mxu0 }
0x2446   : > { %v6831_v10 = vmul.f32 0.044715, %v6780_v9  ;;  %v6833_v23 = vmul.f32 0.044715, %v6821_v4  ;;  %v6784_v26 = vpop.f32.mrb[107].mxu1  ;;  %v6825_v19 = vpop.f32.mrb[107].mxu0 }
0x2447   : > { %v6832_v5 = vmul.f32 0.044715, %v6782_v12  ;;  %v6834_v20 = vmul.f32 0.044715, %v6823_v52  ;;  %v6827_v48 = vmul.f32 0.5, %v6780_v9  ;;  %v6828_v51 = vmul.f32 0.5, %v6782_v12 }
0x2448   : > { %v6835_v36 = vmul.f32 %v6831_v10, %v6780_v9  ;;  %v6837_v58 = vmul.f32 %v6833_v23, %v6821_v4  ;;  %v6830_v49 = vmul.f32 0.5, %v6823_v52  ;;  %v6829_v32 = vmul.f32 0.5, %v6821_v4  ;;  %v11983_v26 = vld [vmem:[%s14873_s2 + $0xc0] ss:$12 sps:$4 sm:$0xff]   ;;  %v11985_v19 = vld [vmem:[%s14873_s2 + $0xc4] ss:$12 sps:$4 sm:$0xff]  }
0x2449   : > { %v6836_v34 = vmul.f32 %v6832_v5, %v6782_v12  ;;  %v6838_v27 = vmul.f32 %v6834_v20, %v6823_v52  ;;  %v11986_v5 = vld [vmem:[%s14873_s2 + $0xc8] ss:$12 sps:$4 sm:$0xff]   ;;  %7418 = vmatprep.subr.bf16.mxu1 %v11985_v19 }
0x244a   : > { %v6839_v28 = vmul.f32 %v6835_v36, %v6780_v9  ;;  %v6841_v39 = vmul.f32 %v6837_v58, %v6821_v4  ;;  %v11989_v20 = vld [vmem:[%s14873_s2 + $0xdc] ss:$12 sps:$4 sm:$0xff]   ;;  %v11990_v36 = vld [vmem:[%s14873_s2 + $0xe0] ss:$12 sps:$4 sm:$0xff]   ;;  %v11987_v58 = vld [vmem:[%s14873_s2 + $0xd8] ss:$12 sps:$4 sm:$0xff]  }
0x244b   : > { %v6840_v7 = vmul.f32 %v6836_v34, %v6782_v12  ;;  %v6842_v59 = vmul.f32 %v6838_v27, %v6823_v52  ;;  %v11993_v34 = vld [vmem:[%s14873_s2 + $0xf4] ss:$12 sps:$4 sm:$0xff]  }
0x244c   : > { %v6843_v24 = vadd.f32 %v6839_v28, %v6780_v9  ;;  %v6845_v54 = vadd.f32 %v6841_v39, %v6821_v4 }
0x244d   : > { %v6844_v14 = vadd.f32 %v6840_v7, %v6782_v12  ;;  %v6846_v56 = vadd.f32 %v6842_v59, %v6823_v52  ;;  %v11994_v59 = vld [vmem:[%s14873_s2 + $0xf8] ss:$12 sps:$4 sm:$0xff]  }
0x244e   : > { %v6847_v29 = vmul.f32 0.7978846, %v6843_v24  ;;  %v6849_v40 = vmul.f32 0.7978846, %v6845_v54  ;;  %v11997_v24 = vld [vmem:[%s14873_s2 + $0x10c] ss:$12 sps:$4 sm:$0xff]  }
0x244f   : > { %v6848_v21 = vmul.f32 0.7978846, %v6844_v14  ;;  %v6850_v31 = vmul.f32 0.7978846, %v6846_v56  ;;  %v11995_v54 = vld [vmem:[%s14873_s2 + $0x108] ss:$12 sps:$4 sm:$0xff]  }
0x2450   : > { %12291 = vtanh.f32 %v6847_v29  ;;  %v11998_v14 = vld [vmem:[%s14873_s2 + $0x110] ss:$12 sps:$4 sm:$0xff]   ;;  %v11999_v29 = vld [vmem:[%s14873_s2 + $0x120] ss:$12 sps:$4 sm:$0xff]  }
0x2451   : > { %12293 = vtanh.f32 %v6848_v21  ;;  %v12001_v56 = vld [vmem:[%s14873_s2 + $0x124] ss:$12 sps:$4 sm:$0xff]   ;;  %v12002_v21 = vld [vmem:[%s14873_s2 + $0x128] ss:$12 sps:$4 sm:$0xff]  }
0x2452   : > { %12295 = vtanh.f32 %v6850_v31  ;;  %v12003_v31 = vld [vmem:[%s14873_s2 + $0x138] ss:$12 sps:$4 sm:$0xff]  }
0x2453   : > { %12297 = vtanh.f32 %v6849_v40  ;;  %v12005_v40 = vld [vmem:[%s14873_s2 + $0x13c] ss:$12 sps:$4 sm:$0xff]  }
0x245a   : > { %v12292_v62 = vpop.eup %12291 }
0x245b   : > { %v12294_v63 = vpop.eup %12293  ;;  %v6855_v61 = vadd.f32 1.0, %v12292_v62  ;;  %v12006_v62 = vld [vmem:[%s14873_s2 + $0x140] ss:$12 sps:$4 sm:$0xff]  }
0x245c   : > { %v12296_v15 = vpop.eup %12295  ;;  %v6856_v38 = vadd.f32 1.0, %v12294_v63  ;;  %v12009_v63 = vld [vmem:[%s14873_s2 + $0x154] ss:$12 sps:$4 sm:$0xff]  }
0x245d   : > { %v12298_v57 = vpop.eup %12297  ;;  %v6858_v50 = vadd.f32 1.0, %v12296_v15  ;;  %v6859_v44 = vmul.f32 %v6855_v61, %v6827_v48  ;;  %v12007_v48 = vld [vmem:[%s14873_s2 + $0x150] ss:$12 sps:$4 sm:$0xff]   ;;  %v12010_v61 = vld [vmem:[%s14873_s2 + $0x158] ss:$12 sps:$4 sm:$0xff]  }
0x245e   : > { %v6860_v60 = vmul.f32 %v6856_v38, %v6828_v51  ;;  %v6857_v47 = vadd.f32 1.0, %v12298_v57  ;;  %v12013_v15 = vld [vmem:[%s14873_s2 + $0x16c] ss:$12 sps:$4 sm:$0xff]   ;;  %v12011_v51 = vld [vmem:[%s14873_s2 + $0x168] ss:$12 sps:$4 sm:$0xff]  }
0x245f   : > { %v6862_v2 = vmul.f32 %v6858_v50, %v6830_v49  ;;  %v6928_v1 = vpack.c.bf16 %v6859_v44, %v6859_v44  ;;  %v12014_v38 = vld [vmem:[%s14873_s2 + $0x170] ss:$12 sps:$4 sm:$0xff]  }
0x2460   : > { %v6929_v53 = vpack.c.bf16 %v6860_v60, %v6860_v60  ;;  %v6861_v6 = vmul.f32 %v6857_v47, %v6829_v32  ;;  %v10169_v60 = vld [vmem:[#allocation24] ss:$0 sm:$0xff]  ;;  %v10170_v47 = vld [vmem:[#allocation26] ss:$0 sm:$0xff] }
0x2461   : > { %v6931_v22 = vpack.c.bf16 %v6862_v2, %v6862_v2 }
0x2462   : > { %7162 = vmatprep.mubr.bf16.mxu1 %v6929_v53  ;;  %v6930_v46 = vpack.c.bf16 %v6861_v6, %v6861_v6 }
0x2463   : > { %7202 = vmatprep.mubr.bf16.mxu0 %v6931_v22  ;;  %7163 = vmatmul.mubr.bf16.vlgmr.msra.gmra.mrb[108].mxu1 %v6928_v1  ;;  %v10203_v22 = vld [vmem:[%s14876_s1 + $0x3] sm:$0x7] }
0x2464   : > { %7203 = vmatmul.mubr.bf16.vlgmr.msra.gmra.mrb[108].mxu0 %v6930_v46  ;;  %7450 = vmatprep.mubr.bf16.mxu1 %v12910_v0  ;;  %v7286_v1 = vrot.slane %v10203_v22, %v13524_v3  ;;  %v7282_v46 = vrot.slane %v10203_v22, %v13509_v43 }
0x2465   : > { %11193 = vmatprep.mubr.msk.bf16.mxu0 %vm12913_vm4, %v12912_v42  ;;  %11178 = vmatpush3.bf16.msra.mxu0 %v11986_v5 }
0x2466   : > { %7419 = vmatpush1.bf16.msra.mxu1 %v11983_v26  ;;  %11179 = vmatprep.subr.bf16.mxu0 %v12912_v42 }
0x2467   : > { %7420 = vmatprep.subr.bf16.mxu1 %v11989_v20 }
0x2469   : > { %11180 = vmatpush3.bf16.msra.mxu0 %v11990_v36 }
0x246a   : > { %7421 = vmatpush1.bf16.msra.mxu1 %v11987_v58  ;;  %11181 = vmatprep.subr.bf16.mxu0 %v12912_v42 }
0x246b   : > { %7422 = vmatprep.subr.bf16.mxu1 %v11993_v34 }
0x246d   : > { %11182 = vmatpush3.bf16.msra.mxu0 %v11994_v59 }
0x246e   : > { %11183 = vmatprep.subr.bf16.mxu0 %v12912_v42 }
0x2471   : > { %11184 = vmatpush3.bf16.msra.mxu0 %v11998_v14 }
0x2472   : > { %11185 = vmatprep.subr.bf16.mxu0 %v12912_v42 }
0x2475   : > { %11186 = vmatpush3.bf16.msra.mxu0 %v12002_v21 }
0x2476   : > { %11187 = vmatprep.subr.bf16.mxu0 %v12912_v42 }
0x2479   : > { %11188 = vmatpush3.bf16.msra.mxu0 %v12006_v62 }
0x247a   : > { %11189 = vmatprep.subr.bf16.mxu0 %v12912_v42 }
0x247d   : > { %11190 = vmatpush3.bf16.msra.mxu0 %v12010_v61 }
0x247e   : > { %11191 = vmatprep.subr.bf16.mxu0 %v12912_v42 }
0x2481   : > { %11192 = vmatpush3.bf16.msra.mxu0 %v12014_v38 }
0x2482   : > { %11203 = vmatprep.subr.bf16.mxu0 %v12912_v42 }
0x2536   : > { %v10751_v8 = vpop.f32.mrb[108].mxu1 }
0x2537   : > { %v10773_v55 = vpop.f32.mrb[108].mxu0  ;;  %v10752_v35 = vpop.f32.mrb[109].mxu1 }
0x2538   : > { %v10753_v9 = vadd.f32 %v10752_v35, %v10751_v8  ;;  %v10774_v4 = vpop.f32.mrb[109].mxu0  ;;  %v10754_v25 = vpop.f32.mrb[110].mxu1  ;;  %v7278_v8 = vrot.slane %v10203_v22, %v13505_v41  ;;  %v12015_v22 = vld [vmem:[%s14878_s3 + $0x40] sm:$0xff]  }
0x2539   : > { %v10775_v11 = vadd.f32 %v10774_v4, %v10773_v55  ;;  %v10776_v12 = vpop.f32.mrb[110].mxu0  ;;  %v10755_v52 = vpop.f32.mrb[111].mxu1 }
0x253a   : > { %v7165_v16 = vadd.f32 %v10753_v9, %v10136_v33  ;;  %v10777_v17 = vpop.f32.mrb[111].mxu0 }
0x253c   : > { %v7205_v10 = vadd.f32 %v10775_v11, %v7165_v16 }
0x253e   : > { %v7210_v23 = vadd.f32 %v7205_v10, %v14369_v30  ;;  %v11991_v30 = vld [vmem:[%s14873_s2 + $0xf0] ss:$12 sps:$4 sm:$0xff]  }
0x253f   : > { %7423 = vmatpush1.bf16.msra.mxu1 %v11991_v30 }
0x2540   : > { %7213 = vadd.xlane.f32.xlu1 %v7210_v23  ;;  %7424 = vmatprep.subr.bf16.mxu1 %v11997_v24 }
0x2543   : > { %7425 = vmatpush1.bf16.msra.mxu1 %v11995_v54 }
0x2544   : > { %7426 = vmatprep.subr.bf16.mxu1 %v12001_v56 }
0x2547   : > { %7427 = vmatpush1.bf16.msra.mxu1 %v11999_v29 }
0x2548   : > { %7428 = vmatprep.subr.bf16.mxu1 %v12005_v40 }
0x254b   : > { %7429 = vmatpush1.bf16.msra.mxu1 %v12003_v31 }
0x254c   : > { %7430 = vmatprep.subr.bf16.mxu1 %v12009_v63 }
0x254f   : > { %7431 = vmatpush1.bf16.msra.mxu1 %v12007_v48 }
0x2550   : > { %7432 = vmatprep.subr.bf16.mxu1 %v12013_v15 }
0x2553   : > { %7433 = vmatpush1.bf16.msra.mxu1 %v12011_v51 }
0x2554   : > { %11197 = vmatprep.subr.bf16.mxu1 %v12912_v42 }
0x25cd   : > { %v7214_v27 = vpop.xlane.xlu1 %7213 }
0x25ce   : > { %v7215_v28 = vmul.f32 0.0078125, %v7214_v27 }
0x25d0   : > { %v7216_v39 = vsub.f32 %v7210_v23, %v7215_v28 }
0x25d2   : > { %v7217_v7 = vmul.f32 %v7216_v39, %v7216_v39 }
0x25d4   : > { %7218 = vadd.xlane.f32.xlu1 %v7217_v7 }
0x2661   : > { %v7219_v57 = vpop.xlane.xlu1 %7218 }
0x2662   : > { %v7220_v49 = vmul.f32 0.0078125, %v7219_v57 }
0x2664   : > { %v7221_v50 = vadd.f32 1e-12, %v7220_v49 }
0x2666   : > { %12299 = vrsqrt.f32 %v7221_v50 }
0x2670   : > { %v12300_v44 = vpop.eup %12299 }
0x2671   : > { %v7223_v32 = vmul.f32 %v12300_v44, %v7216_v39 }
0x2673   : > { %v7230_v2 = vmul.f32 %v10169_v60, %v7223_v32 }
0x2675   : > { %v14447_v53 = vadd.f32 %v10170_v47, %v7230_v2 }
0x2677   : > { %v7273_v6 = vpack.c.bf16 %v14447_v53, %v14447_v53 }
0x2679   : > { %7451 = vmatmul.mubr.bf16.vlgmr.msra.gmra.mrb[112].mxu1 %v7273_v6  ;;  %11194 = vmatmul.mubr.bf16.vlgmr.msra.gmra.mrb[112].mxu0 %v7273_v6 }
0x267a   : > { %11199 = vmatprep.mubr.msk.bf16.mxu1 %vm12913_vm4, %v12912_v42  ;;  %11205 = vmatprep.mubr.msk.bf16.mxu0 %vm12913_vm4, %v12912_v42 }
0x274c   : > { %v7452_v55 = vpop.f32.mrb[112].mxu1  ;;  %v7493_v33 = vpop.f32.mrb[112].mxu0 }
0x274d   : > { %v7494_v35 = vadd.f32 %v7493_v33, %v7286_v1  ;;  %v7454_v9 = vpop.f32.mrb[113].mxu1  ;;  %v11195_v4 = vpop.f32.mrb[113].mxu0  ;;  %v7453_v10 = vadd.f32 %v7452_v55, %v7278_v8  ;;  %v12017_v8 = vld [vmem:[%s14878_s3 + $0x50] sm:$0xff]   ;;  %v12018_v55 = vld [vmem:[%s14878_s3 + $0x58] sm:$0xff]   ;;  %v12021_v33 = vld [vmem:[%s14880_s4 + $0x84] ss:$8 sps:$4 sm:$0xff]  }
0x274e   : > { %v7455_v25 = vadd.f32 %v7454_v9, %v7282_v46  ;;  %v7456_v11 = vpop.f32.mrb[114].mxu1  ;;  %v7496_v12 = vpop.f32.mrb[114].mxu0  ;;  %v12016_v46 = vld [vmem:[%s14878_s3 + $0x48] sm:$0xff]   ;;  %v12045_v4 = vld [vmem:[%s14878_s3 + $0x70] sm:$0xff]  }
0x274f   : > { %v7520_v52 = vpack.c.bf16 %v7494_v35, %v7494_v35  ;;  %v7457_v16 = vpop.f32.mrb[115].mxu1  ;;  %v11196_v17 = vpop.f32.mrb[115].mxu0  ;;  %v7518_v5 = vpack.c.bf16 %v7453_v10, %v7453_v10  ;;  %v12043_v35 = vld [vmem:[%s14878_s3 + $0x60] sm:$0xff]   ;;  %v12044_v9 = vld [vmem:[%s14878_s3 + $0x68] sm:$0xff]  }
0x2750   : > { %v7519_v23 = vpack.c.bf16 %v7455_v25, %v7455_v25  ;;  %v12046_v25 = vld [vmem:[%s14878_s3 + $0x78] sm:$0xff]   ;;  %v12019_v12 = vld [vmem:[%s14880_s4 + $0x80] ss:$8 sps:$4 sm:$0xff]   ;;  %s14682_s3 = scalar_lea.hbm %s13133_s25, %s10485_s15 }
0x2751   : > { %v7584_v26 = vsel %vm5503_vm5, %v7520_v52, 0  ;;  %v12024_v17 = vld [vmem:[%s14880_s4 + $0x94] ss:$8 sps:$4 sm:$0xff]  }
0x2752   : > { %v7525_v19 = vsel %vm1586_vm0, %v7519_v23, 0  ;;  %11204 = vmatpush3.bf16.msra.mxu0 %v7584_v26  ;;  %7631 = vrot.lane.b32.xlu1 %v7519_v23, %s14870_s18  ;;  %v12022_v26 = vld [vmem:[%s14880_s4 + $0x90] ss:$8 sps:$4 sm:$0xff]  }
0x2753   : > { %11198 = vmatpush3.bf16.xpose.msra.mxu1 %v7525_v19  ;;  %11215 = vmatprep.subr.bf16.mxu0 %v12912_v42  ;;  %v12027_v19 = vld [vmem:[%s14880_s4 + $0xa4] ss:$8 sps:$4 sm:$0xff]  }
0x2754   : > { %11209 = vmatprep.subr.bf16.mxu1 %v12912_v42 }
0x2756   : > { %7628 = vrot.lane.b32.xlu1 %v7518_v5, %s14870_s18 }
0x275a   : > { %11200 = vmatmul.mubr.msk.bf16.vlgmr.msra.gmra.mrb[116].mxu1 %vm1586_vm0, %v7518_v5  ;;  %v12025_v5 = vld [vmem:[%s14880_s4 + $0xa0] ss:$8 sps:$4 sm:$0xff]  }
0x275b   : > { %11211 = vmatprep.mubr.msk.bf16.mxu1 %vm12913_vm4, %v12912_v42 }
0x27c4   : > { %v7632_v20 = vpop.permute.xlu1 %7631 }
0x27c5   : > { %v7637_v36 = vsel %vm1586_vm0, %v7632_v20, 0  ;;  %v12030_v20 = vld [vmem:[%s14880_s4 + $0xb4] ss:$8 sps:$4 sm:$0xff]  }
0x27c6   : > { %11210 = vmatpush3.bf16.xpose.msra.mxu1 %v7637_v36  ;;  %v12028_v36 = vld [vmem:[%s14880_s4 + $0xb0] ss:$8 sps:$4 sm:$0xff]  }
0x27c7   : > { %11221 = vmatprep.subr.bf16.mxu1 %v12912_v42 }
0x27c8   : > { %v7629_v58 = vpop.permute.xlu1 %7628 }
0x27cd   : > { %11212 = vmatmul.mubr.msk.bf16.vlgmr.msra.gmra.mrb[120].mxu1 %vm1586_vm0, %v7629_v58  ;;  %v12033_v58 = vld [vmem:[%s14880_s4 + $0xc4] ss:$8 sps:$4 sm:$0xff]  }
0x27ce   : > { %11229 = vmatprep.mubr.msk.bf16.mxu1 %vm12913_vm4, %v12912_v42  ;;  %11222 = vmatpush3.bf16.msra.mxu1 %v12043_v35 }
0x27cf   : > { %11223 = vmatprep.subr.bf16.mxu1 %v12912_v42 }
0x27d2   : > { %11224 = vmatpush3.bf16.msra.mxu1 %v12044_v9 }
0x27d3   : > { %11225 = vmatprep.subr.bf16.mxu1 %v12912_v42 }
0x27d6   : > { %11226 = vmatpush3.bf16.msra.mxu1 %v12045_v4 }
0x27d7   : > { %11227 = vmatprep.subr.bf16.mxu1 %v12912_v42 }
0x27da   : > { %11228 = vmatpush3.bf16.msra.mxu1 %v12046_v25 }
0x27db   : > { %11245 = vmatprep.subr.bf16.mxu1 %v12912_v42 }
0x282d   : > { %v7561_v34 = vpop.f32.mrb[116].mxu1 }
0x282e   : > { %v7567_v30 = vmul.f32 0.125, %v7561_v34  ;;  %v11201_v27 = vpop.f32.mrb[117].mxu1  ;;  %v12031_v34 = vld [vmem:[%s14880_s4 + $0xc0] ss:$8 sps:$4 sm:$0xff]  }
0x282f   : > { %v7564_v28 = vpop.f32.mrb[118].mxu1  ;;  %v12034_v27 = vld [vmem:[%s14880_s4 + $0xd0] ss:$8 sps:$4 sm:$0xff]  }
0x2830   : > { %v11202_v39 = vpop.f32.mrb[119].mxu1  ;;  %v7568_v7 = vsel %vm5487_vm6, %v7567_v30, -inf  ;;  %v12039_v28 = vld [vmem:[%s14880_s4 + $0xe4] ss:$8 sps:$4 sm:$0xff]  }
0x2831   : > { %7569 = vmax.xlane.f32.xlu0 %v7568_v7  ;;  %v12037_v39 = vld [vmem:[%s14880_s4 + $0xe0] ss:$8 sps:$4 sm:$0xff]   ;;  %v12042_v7 = vld [vmem:[%s14880_s4 + $0xf4] ss:$8 sps:$4 sm:$0xff]  }
0x28a0   : > { %v7673_v59 = vpop.f32.mrb[120].mxu1 }
0x28a1   : > { %v7679_v24 = vmul.f32 0.125, %v7673_v59  ;;  %v11213_v54 = vpop.f32.mrb[121].mxu1  ;;  %v12040_v59 = vld [vmem:[%s14880_s4 + $0xf0] ss:$8 sps:$4 sm:$0xff]  }
0x28a2   : > { %v7676_v14 = vpop.f32.mrb[122].mxu1 }
0x28a3   : > { %v11214_v56 = vpop.f32.mrb[123].mxu1  ;;  %v7680_v29 = vsel %vm5487_vm6, %v7679_v24, -inf }
0x28a4   : > { %7681 = vmax.xlane.f32.xlu1 %v7680_v29 }
0x28be   : > { %v7570_v21 = vpop.xlane.xlu0 %7569 }
0x28bf   : > { %v7571_v31 = vsub.f32 %v7567_v30, %v7570_v21  ;;  %v12036_v30 = vld [vmem:[%s14880_s4 + $0xd4] ss:$8 sps:$4 sm:$0xff]  }
0x28c1   : > { %v7572_v40 = vmul.f32 1.442695, %v7571_v31 }
0x28c3   : > { %12301 = vpow2.f32 %v7572_v40 }
0x28cd   : > { %v12302_v62 = vpop.eup %12301 }
0x28ce   : > { %v7574_v63 = vsel %vm5487_vm6, %v12302_v62, 0.0 }
0x28cf   : > { %7575 = vadd.xlane.f32.xlu0 %v7574_v63 }
0x2931   : > { %v7682_v48 = vpop.xlane.xlu1 %7681 }
0x2932   : > { %v7683_v61 = vsub.f32 %v7679_v24, %v7682_v48 }
0x2934   : > { %v7684_v15 = vmul.f32 1.442695, %v7683_v61 }
0x2936   : > { %12303 = vpow2.f32 %v7684_v15 }
0x2940   : > { %v12304_v51 = vpop.eup %12303 }
0x2941   : > { %v7686_v38 = vsel %vm5487_vm6, %v12304_v51, 0.0 }
0x2942   : > { %7687 = vadd.xlane.f32.xlu0 %v7686_v38 }
0x2958   : > { %7693 = vrot.lane.b32.xlu0 %v7520_v52, %s14870_s18 }
0x295c   : > { %v7576_v57 = vpop.xlane.xlu0 %7575 }
0x295d   : > { %12305 = vrcp.f32 %v7576_v57 }
0x2967   : > { %v12306_v49 = vpop.eup %12305 }
0x2968   : > { %v7578_v50 = vmul.f32 %v12306_v49, %v12302_v62  ;;  %v8045_v62 = vld [vmem:[#allocation14 + $0x2] sm:$0x3] }
0x2969   : > { %v8054_v48 = vrot.slane %v8045_v62, %v13509_v43 }
0x296a   : > { %v7579_v44 = vpack.c.bf16 %v7578_v50, %v7578_v50 }
0x296c   : > { %11206 = vmatmul.mubr.msk.bf16.vlgmr.msra.gmra.mrb[116].mxu0 %vm5487_vm6, %v7579_v44 }
0x296d   : > { %11217 = vmatprep.mubr.msk.bf16.mxu0 %vm12913_vm4, %v12912_v42 }
0x29cf   : > { %v7688_v60 = vpop.xlane.xlu0 %7687 }
0x29d0   : > { %12307 = vrcp.f32 %v7688_v60 }
0x29d3   : > { %v7694_v32 = vpop.permute.xlu0 %7693 }
0x29d4   : > { %v7699_v47 = vsel %vm5503_vm5, %v7694_v32, 0 }
0x29d5   : > { %11216 = vmatpush3.bf16.msra.mxu0 %v7699_v47 }
0x29d6   : > { %11233 = vmatprep.subr.bf16.mxu0 %v12912_v42 }
0x29da   : > { %v12308_v2 = vpop.eup %12307 }
0x29db   : > { %v7690_v6 = vmul.f32 %v12308_v2, %v12304_v51 }
0x29dd   : > { %v7691_v1 = vpack.c.bf16 %v7690_v6, %v7690_v6 }
0x29df   : > { %11218 = vmatmul.mubr.msk.bf16.vlgmr.msra.gmra.mrb[120].mxu0 %vm5487_vm6, %v7691_v1 }
0x29e0   : > { %11234 = vmatpush3.bf16.msra.mxu0 %v12015_v22  ;;  %11241 = vmatprep.mubr.msk.bf16.mxu0 %vm12913_vm4, %v12912_v42 }
0x29e1   : > { %11235 = vmatprep.subr.bf16.mxu0 %v12912_v42 }
0x29e4   : > { %11236 = vmatpush3.bf16.msra.mxu0 %v12016_v46 }
0x29e5   : > { %11237 = vmatprep.subr.bf16.mxu0 %v12912_v42 }
0x29e8   : > { %11238 = vmatpush3.bf16.msra.mxu0 %v12017_v8 }
0x29e9   : > { %11239 = vmatprep.subr.bf16.mxu0 %v12912_v42 }
0x29ec   : > { %11240 = vmatpush3.bf16.msra.mxu0 %v12018_v55  ;;  %v10259_v55 = vld [vmem:[%s14881_s5 + $0x1] ss:$0 sm:$0xff] }
0x29ed   : > { %8137 = vmatprep.subr.bf16.mxu0 %v12021_v33 }
0x2a3f   : > { %v7620_v11 = vpop.f32.mrb[116].mxu0 }
0x2a40   : > { %v7626_v52 = vpack.c.bf16 %v7620_v11, %v7620_v11  ;;  %v11207_v16 = vpop.f32.mrb[117].mxu0 }
0x2a41   : > { %v7623_v10 = vpop.f32.mrb[118].mxu0  ;;  %v12048_v16 = vld [vmem:[#allocation11 + $0x48] sm:$0xff]  }
0x2a42   : > { %v11208_v23 = vpop.f32.mrb[119].mxu0  ;;  %11242 = vmatmul.mubr.msk.bf16.vlgmr.msra.gmra.mrb[124].mxu0 %vm1586_vm0, %v7626_v52  ;;  %v12047_v52 = vld [vmem:[#allocation11 + $0x40] sm:$0xff]   ;;  %v12050_v10 = vld [vmem:[#allocation11 + $0x58] sm:$0xff]  }
0x2a43   : > { %8138 = vmatpush1.bf16.msra.mxu0 %v12019_v12  ;;  %8169 = vmatprep.mubr.bf16.mxu0 %v12910_v0 }
0x2a44   : > { %8139 = vmatprep.subr.bf16.mxu0 %v12024_v17  ;;  %v12049_v17 = vld [vmem:[#allocation11 + $0x50] sm:$0xff]  }
0x2a47   : > { %8140 = vmatpush1.bf16.msra.mxu0 %v12022_v26 }
0x2a48   : > { %8141 = vmatprep.subr.bf16.mxu0 %v12027_v19 }
0x2a4b   : > { %8142 = vmatpush1.bf16.msra.mxu0 %v12025_v5 }
0x2a4c   : > { %8143 = vmatprep.subr.bf16.mxu0 %v12030_v20  ;;  %v12051_v20 = vld [vmem:[#allocation11 + $0x60] sm:$0xff]  }
0x2a4f   : > { %8144 = vmatpush1.bf16.msra.mxu0 %v12028_v36  ;;  %v12052_v36 = vld [vmem:[#allocation11 + $0x68] sm:$0xff]  }
0x2a50   : > { %8145 = vmatprep.subr.bf16.mxu0 %v12033_v58  ;;  %v12053_v58 = vld [vmem:[#allocation11 + $0x70] sm:$0xff]  }
0x2a53   : > { %8146 = vmatpush1.bf16.msra.mxu0 %v12031_v34  ;;  %v12054_v34 = vld [vmem:[#allocation11 + $0x78] sm:$0xff]  }
0x2a54   : > { %8147 = vmatprep.subr.bf16.mxu0 %v12036_v30 }
0x2a57   : > { %8148 = vmatpush1.bf16.msra.mxu0 %v12034_v27 }
0x2a58   : > { %8149 = vmatprep.subr.bf16.mxu0 %v12039_v28 }
0x2a5b   : > { %8150 = vmatpush1.bf16.msra.mxu0 %v12037_v39 }
0x2a5c   : > { %8151 = vmatprep.subr.bf16.mxu0 %v12042_v7  ;;  %v10262_v7 = vld [vmem:[%s14883_s6 + $0x1] ss:$0 sm:$0xff]  ;;  %s12914_s6 = smov [#allocation27]  }
0x2a5d   : > { %s12755_s0 = sshll.u32 %s12914_s6, 4  ;;  %s12756_s0 = int_to_ptr.vmem [resolvable:$false] %s12755_s0 }
0x2a5f   : > { %8152 = vmatpush1.bf16.msra.mxu0 %v12040_v59 }
0x2a60   : > { %11273 = vmatprep.subr.bf16.mxu0 %v12912_v42 }
0x2a62   : > { %8170 = vmatmul.mubr.bf16.vlgmr.msra.gmra.mrb[128].mxu0 %v14267_v37 }
0x2a63   : > { %8179 = vmatprep.mubr.bf16.mxu0 %v12910_v0 }
0x2a6a   : > { %8180 = vmatmul.mubr.bf16.gmra.mrb[132].mxu0 %v14273_v45  ;;  %v8050_v45 = vrot.slane %v8045_v62, %v13505_v41 }
0x2a6b   : > { %11277 = vmatprep.mubr.msk.bf16.mxu0 %vm12913_vm4, %v12912_v42 }
0x2ab2   : > { %v7735_v24 = vpop.f32.mrb[120].mxu0 }
0x2ab3   : > { %v7741_v54 = vpack.c.bf16 %v7735_v24, %v7735_v24  ;;  %v11219_v14 = vpop.f32.mrb[121].mxu0  ;;  %v10263_v24 = vld [vmem:[%s14884_s8 + $0x1] ss:$0 sm:$0xff]  ;;  %s12757_s8 = scalar_lea.vmem %s12756_s0, 32 }
0x2ab4   : > { %v7738_v56 = vpop.f32.mrb[122].mxu0 }
0x2ab5   : > { %v11220_v29 = vpop.f32.mrb[123].mxu0  ;;  %11230 = vmatmul.mubr.msk.bf16.vlgmr.msra.gmra.mrb[124].mxu1 %vm1586_vm0, %v7741_v54 }
0x2ab6   : > { %11261 = vmatprep.mubr.msk.bf16.mxu1 %vm12913_vm4, %v12912_v42  ;;  %11246 = vmatpush3.bf16.msra.mxu1 %v12047_v52 }
0x2ab7   : > { %11247 = vmatprep.subr.bf16.mxu1 %v12912_v42 }
0x2aba   : > { %11248 = vmatpush3.bf16.msra.mxu1 %v12048_v16 }
0x2abb   : > { %11249 = vmatprep.subr.bf16.mxu1 %v12912_v42 }
0x2abe   : > { %11250 = vmatpush3.bf16.msra.mxu1 %v12049_v17 }
0x2abf   : > { %11251 = vmatprep.subr.bf16.mxu1 %v12912_v42 }
0x2ac2   : > { %11252 = vmatpush3.bf16.msra.mxu1 %v12050_v10 }
0x2ac3   : > { %11253 = vmatprep.subr.bf16.mxu1 %v12912_v42 }
0x2ac6   : > { %11254 = vmatpush3.bf16.msra.mxu1 %v12051_v20 }
0x2ac7   : > { %11255 = vmatprep.subr.bf16.mxu1 %v12912_v42 }
0x2aca   : > { %11256 = vmatpush3.bf16.msra.mxu1 %v12052_v36 }
0x2acb   : > { %11257 = vmatprep.subr.bf16.mxu1 %v12912_v42 }
0x2ace   : > { %11258 = vmatpush3.bf16.msra.mxu1 %v12053_v58 }
0x2acf   : > { %11259 = vmatprep.subr.bf16.mxu1 %v12912_v42 }
0x2ad2   : > { %11260 = vmatpush3.bf16.msra.mxu1 %v12054_v34 }
0x2ad3   : > { %11265 = vmatprep.subr.bf16.mxu1 %v12912_v42 }
0x2b15   : > { %v7870_v21 = vpop.f32.mrb[124].mxu0 }
0x2b16   : > { %v11243_v31 = vpop.f32.mrb[125].mxu0 }
0x2b17   : > { %v7873_v37 = vpop.f32.mrb[126].mxu0  ;;  %v10264_v31 = vld [vmem:[#allocation12 + $0x1] ss:$0 sm:$0xff] }
0x2b18   : > { %v11244_v40 = vpop.f32.mrb[127].mxu0 }
0x2b35   : > { %v8171_v63 = vpop.f32.mrb[128].mxu0 }
0x2b36   : > { %v8172_v61 = vadd.f32 %v8171_v63, %v8050_v45  ;;  %v8173_v15 = vpop.f32.mrb[129].mxu0 }
0x2b37   : > { %v8175_v51 = vpop.f32.mrb[130].mxu0  ;;  %v8174_v49 = vadd.f32 %v8173_v15, %v8054_v48 }
0x2b38   : > { %v8176_v38 = vadd.f32 %v8175_v51, %v8050_v45  ;;  %v8177_v57 = vpop.f32.mrb[131].mxu0 }
0x2b39   : > { %v8178_v50 = vadd.f32 %v8177_v57, %v8054_v48 }
0x2b3a   : > { %v14530_v44 = vpack.c.bf16 %v8176_v38, %v8172_v61 }
0x2b3b   : > { %v14532_v60 = vpack.c.bf16 %v8178_v50, %v8174_v49 }
0x2b3c   : > { %v8216_v29 = vsel %vm1586_vm0, %v14530_v44, 0 }
0x2b3d   : > { %v8181_v32 = vpop.f32.mrb[132].mxu0  ;;  %11274 = vmatpush3.bf16.msra.mxu0 %v14532_v60 }
0x2b3e   : > { %v8182_v47 = vadd.f32 %v8181_v32, %v8050_v45  ;;  %v8183_v2 = vpop.f32.mrb[133].mxu0  ;;  %11275 = vmatprep.subr.bf16.mxu0 %v12912_v42 }
0x2b3f   : > { %v8184_v6 = vadd.f32 %v8183_v2, %v8054_v48  ;;  %v8185_v22 = vpop.f32.mrb[134].mxu0 }
0x2b40   : > { %v8186_v1 = vpop.f32.mrb[135].mxu0  ;;  %v8209_v5 = vpack.c.bf16 %v8182_v47, %v8182_v47 }
0x2b41   : > { %v14536_v46 = vpack.c.bf16 %v8184_v6, %v8184_v6 }
0x2b43   : > { %v8278_v8 = vand.u32 %v14536_v46, %v13531_v13 }
0x2b45   : > { %11276 = vmatpush3.bf16.msra.mxu0 %v8278_v8 }
0x2b46   : > { %11289 = vmatprep.subr.bf16.mxu0 %v12912_v42 }
0x2b88   : > { %v7803_v33 = vpop.f32.mrb[124].mxu1 }
0x2b89   : > { %v7871_v35 = vadd.f32 %v7870_v21, %v7803_v33  ;;  %v11231_v9 = vpop.f32.mrb[125].mxu1  ;;  %v8219_v21 = vsel %vm1586_vm0, %v8209_v5, 0 }
0x2b8a   : > { %v7806_v4 = vpop.f32.mrb[126].mxu1 }
0x2b8b   : > { %v7882_v25 = vadd.f32 %v10259_v55, %v7871_v35  ;;  %v11232_v11 = vpop.f32.mrb[127].mxu1 }
0x2b8d   : > { %v7883_v12 = vadd.f32 %v7882_v25, %v14447_v53 }
0x2b8f   : > { %7888 = vadd.xlane.f32.xlu0 %v7883_v12 }
0x2c1c   : > { %v7889_v23 = vpop.xlane.xlu0 %7888 }
0x2c1d   : > { %v7890_v26 = vmul.f32 0.0078125, %v7889_v23 }
0x2c1f   : > { %v7891_v53 = vsub.f32 %v7883_v12, %v7890_v26  ;;  %v12055_v26 = vld [vmem:[#allocation15 + $0x40] sm:$0xff]  }
0x2c21   : > { %v7892_v19 = vmul.f32 %v7891_v53, %v7891_v53 }
0x2c23   : > { %7893 = vadd.xlane.f32.xlu1 %v7892_v19  ;;  %v12057_v19 = vld [vmem:[#allocation15 + $0x50] sm:$0xff]  }
0x2c34   : > { %8326 = vrot.lane.b32.xlu1 %v14530_v44, %s14870_s18 }
0x2c38   : > { %8328 = vrot.lane.b32.xlu1 %v8209_v5, %s14870_s18 }
0x2cb0   : > { %v7894_v30 = vpop.xlane.xlu1 %7893 }
0x2cb1   : > { %v7895_v27 = vmul.f32 0.0078125, %v7894_v30 }
0x2cb3   : > { %v7896_v28 = vadd.f32 1e-12, %v7895_v27 }
0x2cb4   : > { %v8327_v45 = vpop.permute.xlu1 %8326 }
0x2cb5   : > { %12309 = vrsqrt.f32 %v7896_v28  ;;  %v8334_v15 = vsel %vm1586_vm0, %v8327_v45, 0 }
0x2cb8   : > { %v8329_v51 = vpop.permute.xlu1 %8328 }
0x2cb9   : > { %v8337_v38 = vsel %vm1586_vm0, %v8329_v51, 0  ;;  %v10319_v51 = vld [vmem:[#allocation17 + $0x1] ss:$0 sm:$0xff] }
0x2cbf   : > { %v12310_v39 = vpop.eup %12309 }
0x2cc0   : > { %v7898_v59 = vmul.f32 %v12310_v39, %v7891_v53  ;;  %v12056_v53 = vld [vmem:[#allocation15 + $0x48] sm:$0xff]   ;;  %v12059_v39 = vld [vmem:[#allocation15 + $0x60] sm:$0xff]  }
0x2cc2   : > { %v7905_v54 = vmul.f32 %v10262_v7, %v7898_v59  ;;  %v12060_v59 = vld [vmem:[#allocation15 + $0x68] sm:$0xff]  }
0x2cc4   : > { %v14556_v14 = vadd.f32 %v10263_v24, %v7905_v54  ;;  %v12061_v24 = vld [vmem:[#allocation15 + $0x70] sm:$0xff]  }
0x2cc6   : > { %v7932_v56 = vpack.c.bf16 %v14556_v14, %v14556_v14 }
0x2cc8   : > { %11262 = vmatmul.mubr.bf16.vlgmr.msra.gmra.mrb[128].mxu1 %v7932_v56 }
0x2cc9   : > { %11266 = vmatpush3.bf16.xpose.msra.mxu1 %v8216_v29  ;;  %11269 = vmatprep.mubr.msk.bf16.mxu1 %vm12913_vm4, %v12912_v42 }
0x2cca   : > { %11267 = vmatprep.subr.bf16.mxu1 %v12912_v42 }
0x2cd1   : > { %11268 = vmatpush3.bf16.xpose.msra.mxu1 %v8219_v21 }
0x2cd2   : > { %11281 = vmatprep.subr.bf16.mxu1 %v12912_v42 }
0x2d9b   : > { %v8021_v37 = vpop.f32.mrb[128].mxu1 }
0x2d9c   : > { %v8022_v40 = vadd.f32 %v10264_v31, %v8021_v37  ;;  %v11263_v62 = vpop.f32.mrb[129].mxu1 }
0x2d9d   : > { %v8024_v63 = vpop.f32.mrb[130].mxu1 }
0x2d9e   : > { %v8207_v48 = vpack.c.bf16 %v8022_v40, %v8022_v40  ;;  %v11264_v61 = vpop.f32.mrb[131].mxu1 }
0x2da0   : > { %8322 = vrot.lane.b32.xlu1 %v8207_v48, %s14870_s18  ;;  %11270 = vmatmul.mubr.msk.bf16.vlgmr.msra.gmra.mrb[132].mxu1 %vm1586_vm0, %v8207_v48 }
0x2da1   : > { %11282 = vmatpush3.bf16.xpose.msra.mxu1 %v8334_v15  ;;  %11285 = vmatprep.mubr.msk.bf16.mxu1 %vm12913_vm4, %v12912_v42 }
0x2da2   : > { %11283 = vmatprep.subr.bf16.mxu1 %v12912_v42 }
0x2da9   : > { %11284 = vmatpush3.bf16.xpose.msra.mxu1 %v8337_v38 }
0x2daa   : > { %11309 = vmatprep.subr.bf16.mxu1 %v12912_v42 }
0x2e12   : > { %v8323_v57 = vpop.permute.xlu1 %8322 }
0x2e13   : > { %11286 = vmatmul.mubr.msk.bf16.vlgmr.msra.gmra.mrb[136].mxu1 %vm1586_vm0, %v8323_v57 }
0x2e14   : > { %11317 = vmatprep.mubr.msk.bf16.mxu1 %vm12913_vm4, %v12912_v42  ;;  %11310 = vmatpush3.bf16.msra.mxu1 %v12055_v26  ;;  %v12092_v26 = vld [vmem:[%s14886_s9 + $0x18c] ss:$16 sps:$4 sm:$0xff]  }
0x2e15   : > { %11311 = vmatprep.subr.bf16.mxu1 %v12912_v42 }
0x2e18   : > { %11312 = vmatpush3.bf16.msra.mxu1 %v12056_v53  ;;  %v12087_v53 = vld [vmem:[%s14886_s9 + $0x180] ss:$16 sps:$4 sm:$0xff]  }
0x2e19   : > { %11313 = vmatprep.subr.bf16.mxu1 %v12912_v42 }
0x2e1c   : > { %11314 = vmatpush3.bf16.msra.mxu1 %v12057_v19  ;;  %v12090_v19 = vld [vmem:[%s14886_s9 + $0x188] ss:$16 sps:$4 sm:$0xff]  }
0x2e1d   : > { %11315 = vmatprep.subr.bf16.mxu1 %v12912_v42 }
0x2e73   : > { %v8255_v49 = vpop.f32.mrb[132].mxu1 }
0x2e74   : > { %v8261_v50 = vmul.f32 0.125, %v8255_v49  ;;  %v11271_v44 = vpop.f32.mrb[133].mxu1 }
0x2e75   : > { %v8258_v32 = vpop.f32.mrb[134].mxu1 }
0x2e76   : > { %v11272_v47 = vpop.f32.mrb[135].mxu1  ;;  %v8262_v2 = vsel %vm2065_vm2, %v8261_v50, -inf }
0x2e77   : > { %8263 = vmax.xlane.f32.xlu0 %v8262_v2  ;;  %v12063_v47 = vld [vmem:[%s14886_s9 + $0x100] ss:$16 sps:$4 sm:$0xff]   ;;  %v12065_v2 = vld [vmem:[%s14886_s9 + $0x104] ss:$16 sps:$4 sm:$0xff]  }
0x2e8d   : > { %8394 = vrot.lane.b32.xlu0 %v14532_v60, %s14870_s18 }
0x2ee6   : > { %v8373_v6 = vpop.f32.mrb[136].mxu1 }
0x2ee7   : > { %v8379_v22 = vmul.f32 0.125, %v8373_v6  ;;  %v11287_v1 = vpop.f32.mrb[137].mxu1  ;;  %v12066_v6 = vld [vmem:[%s14886_s9 + $0x108] ss:$16 sps:$4 sm:$0xff]  }
0x2ee8   : > { %v8376_v8 = vpop.f32.mrb[138].mxu1  ;;  %v12071_v1 = vld [vmem:[%s14886_s9 + $0x124] ss:$16 sps:$4 sm:$0xff]  }
0x2ee9   : > { %v11288_v55 = vpop.f32.mrb[139].mxu1  ;;  %v8380_v33 = vsel %vm2065_vm2, %v8379_v22, -inf  ;;  %v12074_v8 = vld [vmem:[%s14886_s9 + $0x12c] ss:$16 sps:$4 sm:$0xff]  }
0x2eea   : > { %8381 = vmax.xlane.f32.xlu1 %v8380_v33  ;;  %v12069_v55 = vld [vmem:[%s14886_s9 + $0x120] ss:$16 sps:$4 sm:$0xff]   ;;  %v12072_v33 = vld [vmem:[%s14886_s9 + $0x128] ss:$16 sps:$4 sm:$0xff]  }
0x2f04   : > { %v8264_v35 = vpop.xlane.xlu0 %8263 }
0x2f05   : > { %v8265_v9 = vsub.f32 %v8261_v50, %v8264_v35  ;;  %v12077_v35 = vld [vmem:[%s14886_s9 + $0x144] ss:$16 sps:$4 sm:$0xff]  }
0x2f07   : > { %v8266_v4 = vmul.f32 1.442695, %v8265_v9  ;;  %v12075_v9 = vld [vmem:[%s14886_s9 + $0x140] ss:$16 sps:$4 sm:$0xff]  }
0x2f08   : > { %v8395_v10 = vpop.permute.xlu0 %8394 }
0x2f09   : > { %12311 = vpow2.f32 %v8266_v4  ;;  %v12078_v4 = vld [vmem:[%s14886_s9 + $0x148] ss:$16 sps:$4 sm:$0xff]  }
0x2f13   : > { %v12312_v25 = vpop.eup %12311 }
0x2f14   : > { %v8268_v11 = vsel %vm2065_vm2, %v12312_v25, 0.0 }
0x2f15   : > { %8269 = vadd.xlane.f32.xlu0 %v8268_v11 }
0x2f77   : > { %v8382_v12 = vpop.xlane.xlu1 %8381 }
0x2f78   : > { %v8383_v52 = vsub.f32 %v8379_v22, %v8382_v12  ;;  %v12068_v22 = vld [vmem:[%s14886_s9 + $0x10c] ss:$16 sps:$4 sm:$0xff]  }
0x2f7a   : > { %v8384_v16 = vmul.f32 1.442695, %v8383_v52 }
0x2f7c   : > { %12313 = vpow2.f32 %v8384_v16  ;;  %v12083_v16 = vld [vmem:[%s14886_s9 + $0x164] ss:$16 sps:$4 sm:$0xff]  }
0x2f86   : > { %v12314_v60 = vpop.eup %12313 }
0x2f87   : > { %v8386_v17 = vsel %vm2065_vm2, %v12314_v60, 0.0 }
0x2f88   : > { %8387 = vadd.xlane.f32.xlu0 %v8386_v17  ;;  %v12081_v17 = vld [vmem:[%s14886_s9 + $0x160] ss:$16 sps:$4 sm:$0xff]  }
0x2f9e   : > { %8396 = vrot.lane.b32.xlu0 %v14536_v46, %s14870_s18  ;;  %v12058_v46 = vld [vmem:[#allocation15 + $0x58] sm:$0xff]   ;;  %s1469_s18 = sand.u32 1, %s12837_s16  }
0x2f9f   : > { %11316 = vmatpush3.bf16.msra.mxu1 %v12058_v46  ;;  %v12098_v46 = vld [vmem:[%s14886_s9 + $0x1ac] ss:$16 sps:$4 sm:$0xff]   ;;  %s1470_s1 = scalar_lea.vmem [#allocation27], %s1469_s18  ;;  %s9333_s4 = scalar_lea.sflag [#allocation5], %s1469_s18 }
0x2fa0   : > { %8875 = vmatprep.subr.bf16.mxu1 %v12068_v22  ;;  %v12128_v22 = vld [vmem:[%s14888_s10 + $0x1e0] sm:$0xff]   ;;  %s9345_s2 = sshll.u32 %s1470_s1, 4  ;;  %s14684_s2 = int_to_ptr.vmem [resolvable:$true] %s9345_s2 }
0x2fa1   : > { %s12751_s5 = scalar_lea.vmem %s14684_s2, 16  ;;  %p12758_p6 = scmp.lt.s32.totalorder %s14684_s2, %s12756_s0 }
0x2fa2   : > { %v8270_v23 = vpop.xlane.xlu0 %8269  ;;  %p12752_p3 = scmp.ne.s32.totalorder %s14684_s2, %s12751_s5  ;;  %p12759_p9 = scmp.lt.s32.totalorder %s12757_s8, %s12751_s5 }
0x2fa3   : > { %12315 = vrcp.f32 %v8270_v23  ;;  %v12089_v23 = vld [vmem:[%s14886_s9 + $0x184] ss:$16 sps:$4 sm:$0xff]  }
0x2fa4   : > { %p12753_p12 = pnand %p12752_p3, %p14889_p4  ;;  %p12760_p10 = por %p12759_p9, %p12758_p6 }
0x2fa6   : > { %p12754_p5 = pneg %p12753_p12 }
0x2fa8   : > { %p12761_p7 = pnand %p12760_p10, %p12754_p5 }
0x2fad   : > { %v12316_v5 = vpop.eup %12315 }
0x2fae   : > { %v8272_v20 = vmul.f32 %v12316_v5, %v12312_v25  ;;  %v12093_v5 = vld [vmem:[%s14886_s9 + $0x1a0] ss:$16 sps:$4 sm:$0xff]  }
0x2fb0   : > { %v8273_v36 = vpack.c.bf16 %v8272_v20, %v8272_v20  ;;  %v12095_v20 = vld [vmem:[%s14886_s9 + $0x1a4] ss:$16 sps:$4 sm:$0xff]  }
0x2fb2   : > { %11278 = vmatmul.mubr.msk.bf16.vlgmr.msra.gmra.mrb[136].mxu0 %vm2065_vm2, %v8273_v36  ;;  %v12096_v36 = vld [vmem:[%s14886_s9 + $0x1a8] ss:$16 sps:$4 sm:$0xff]  }
0x2fb3   : > { %11290 = vmatpush3.bf16.msra.mxu0 %v8395_v10  ;;  %11293 = vmatprep.mubr.msk.bf16.mxu0 %vm12913_vm4, %v12912_v42  ;;  %v12084_v10 = vld [vmem:[%s14886_s9 + $0x168] ss:$16 sps:$4 sm:$0xff]  }
0x2fb4   : > { %11291 = vmatprep.subr.bf16.mxu0 %v12912_v42 }
0x3015   : > { %v8388_v58 = vpop.xlane.xlu0 %8387 }
0x3016   : > { %12317 = vrcp.f32 %v8388_v58  ;;  %v12101_v58 = vld [vmem:[%s14886_s9 + $0x1c4] ss:$16 sps:$4 sm:$0xff]  }
0x3019   : > { %v8397_v34 = vpop.permute.xlu0 %8396 }
0x301a   : > { %v8403_v30 = vand.u32 %v8397_v34, %v13531_v13  ;;  %v12062_v13 = vld [vmem:[#allocation15 + $0x78] sm:$0xff]  }
0x301b   : > { %v12104_v34 = vld [vmem:[%s14886_s9 + $0x1cc] ss:$16 sps:$4 sm:$0xff]  }
0x301c   : > { %11292 = vmatpush3.bf16.msra.mxu0 %v8403_v30  ;;  %v12099_v30 = vld [vmem:[%s14886_s9 + $0x1c0] ss:$16 sps:$4 sm:$0xff]  }
0x301d   : > { %11297 = vmatprep.subr.bf16.mxu0 %v12912_v42 }
0x3020   : > { %v12318_v27 = vpop.eup %12317 }
0x3021   : > { %v8390_v28 = vmul.f32 %v12318_v27, %v12314_v60  ;;  %v12086_v60 = vld [vmem:[%s14886_s9 + $0x16c] ss:$16 sps:$4 sm:$0xff]   ;;  %v12102_v27 = vld [vmem:[%s14886_s9 + $0x1c8] ss:$16 sps:$4 sm:$0xff]  }
0x3023   : > { %v8391_v7 = vpack.c.bf16 %v8390_v28, %v8390_v28  ;;  %v12107_v28 = vld [vmem:[%s14886_s9 + $0x1e4] ss:$16 sps:$4 sm:$0xff]  }
0x3025   : > { %11294 = vmatmul.mubr.msk.bf16.vlgmr.msra.gmra.mrb[140].mxu0 %vm2065_vm2, %v8391_v7  ;;  %v12105_v7 = vld [vmem:[%s14886_s9 + $0x1e0] ss:$16 sps:$4 sm:$0xff]  }
0x3026   : > { %11298 = vmatpush3.bf16.msra.mxu0 %v12059_v39  ;;  %11305 = vmatprep.mubr.msk.bf16.mxu0 %vm12913_vm4, %v12912_v42  ;;  %v12110_v39 = vld [vmem:[%s14886_s9 + $0x1ec] ss:$16 sps:$4 sm:$0xff]  }
0x3027   : > { %11299 = vmatprep.subr.bf16.mxu0 %v12912_v42 }
0x302a   : > { %11300 = vmatpush3.bf16.msra.mxu0 %v12060_v59  ;;  %v12108_v59 = vld [vmem:[%s14886_s9 + $0x1e8] ss:$16 sps:$4 sm:$0xff]  }
0x302b   : > { %11301 = vmatprep.subr.bf16.mxu0 %v12912_v42 }
0x302e   : > { %11302 = vmatpush3.bf16.msra.mxu0 %v12061_v24 }
0x302f   : > { %11303 = vmatprep.subr.bf16.mxu0 %v12912_v42 }
0x3032   : > { %11304 = vmatpush3.bf16.msra.mxu0 %v12062_v13 }
0x3033   : > { %8834 = vmatprep.subr.bf16.mxu0 %v12065_v2  ;;  %v12126_v2 = vld [vmem:[%s14888_s10 + $0x198] sm:$0xff]  }
0x3085   : > { %v8314_v54 = vpop.f32.mrb[136].mxu0 }
0x3086   : > { %v8320_v56 = vpack.c.bf16 %v8314_v54, %v8314_v54  ;;  %v11279_v29 = vpop.f32.mrb[137].mxu0 }
0x3087   : > { %v8317_v21 = vpop.f32.mrb[138].mxu0  ;;  %v10320_v29 = vld [vmem:[#allocation18 + $0x1] ss:$0 sm:$0xff] }
0x3088   : > { %v11280_v31 = vpop.f32.mrb[139].mxu0  ;;  %11318 = vmatmul.mubr.msk.bf16.vlgmr.msra.gmra.mrb[140].mxu1 %vm1586_vm0, %v8320_v56 }
0x3089   : > { %8907 = vmatprep.mubr.bf16.mxu1 %v12910_v0  ;;  %8876 = vmatpush1.bf16.msra.mxu1 %v12066_v6  ;;  %v10321_v31 = vld [vmem:[#allocation20 + $0x1] ss:$0 sm:$0xff]  ;;  %v12127_v6 = vld [vmem:[%s14888_s10 + $0x160] sm:$0xff]  }
0x308a   : > { %8877 = vmatprep.subr.bf16.mxu1 %v12074_v8  ;;  %v12130_v8 = vld [vmem:[%s14888_s10 + $0x1a0] sm:$0xff]  }
0x308d   : > { %8878 = vmatpush1.bf16.msra.mxu1 %v12072_v33  ;;  %v12132_v33 = vld [vmem:[%s14888_s10 + $0x1e8] sm:$0xff]  }
0x30f8   : > { %v8439_v37 = vpop.f32.mrb[140].mxu0 }
0x30f9   : > { %v8445_v40 = vpack.c.bf16 %v8439_v37, %v8439_v37  ;;  %v11295_v62 = vpop.f32.mrb[141].mxu0 }
0x30fa   : > { %v8442_v45 = vpop.f32.mrb[142].mxu0 }
0x30fb   : > { %v11296_v63 = vpop.f32.mrb[143].mxu0  ;;  %11306 = vmatmul.mubr.msk.bf16.vlgmr.msra.gmra.mrb[144].mxu0 %vm1586_vm0, %v8445_v40  ;;  %v12111_v45 = vld [vmem:[%s14888_s10 + $0x140] sm:$0xff]  }
0x30fc   : > { %8866 = vmatprep.mubr.bf16.mxu0 %v12910_v0  ;;  %8835 = vmatpush1.bf16.msra.mxu0 %v12063_v47  ;;  %v12112_v63 = vld [vmem:[%s14888_s10 + $0x1c0] sm:$0xff]   ;;  %v12125_v47 = vld [vmem:[%s14888_s10 + $0x118] sm:$0xff]  }
0x30fd   : > { %8836 = vmatprep.subr.bf16.mxu0 %v12071_v1  ;;  %v12129_v1 = vld [vmem:[%s14888_s10 + $0x120] sm:$0xff]  }
0x3100   : > { %8837 = vmatpush1.bf16.msra.mxu0 %v12069_v55  ;;  %v12131_v55 = vld [vmem:[%s14888_s10 + $0x168] sm:$0xff]  }
0x3101   : > { %8838 = vmatprep.subr.bf16.mxu0 %v12077_v35  ;;  %v12133_v35 = vld [vmem:[%s14888_s10 + $0x128] sm:$0xff]  }
0x3104   : > { %8839 = vmatpush1.bf16.msra.mxu0 %v12075_v9  ;;  %v12135_v9 = vld [vmem:[%s14888_s10 + $0x170] sm:$0xff]  }
0x3105   : > { %8840 = vmatprep.subr.bf16.mxu0 %v12083_v16  ;;  %v12141_v16 = vld [vmem:[%s14888_s10 + $0x138] sm:$0xff]  }
0x3108   : > { %8841 = vmatpush1.bf16.msra.mxu0 %v12081_v17  ;;  %v8651_v17 = vld [vmem:[#allocation21 + $0x4] sm:$0xf] }
0x3109   : > { %8842 = vmatprep.subr.bf16.mxu0 %v12089_v23  ;;  %v8665_v23 = vrot.slane %v8651_v17, %v13524_v3 }
0x310c   : > { %8843 = vmatpush1.bf16.msra.mxu0 %v12087_v53  ;;  %v8669_v53 = vrot.slane %v8651_v17, %v13683_v18 }
0x310d   : > { %8844 = vmatprep.subr.bf16.mxu0 %v12095_v20 }
0x3110   : > { %8845 = vmatpush1.bf16.msra.mxu0 %v12093_v5 }
0x3111   : > { %8846 = vmatprep.subr.bf16.mxu0 %v12101_v58 }
0x3114   : > { %8847 = vmatpush1.bf16.msra.mxu0 %v12099_v30 }
0x3115   : > { %8848 = vmatprep.subr.bf16.mxu0 %v12107_v28 }
0x3118   : > { %8849 = vmatpush1.bf16.msra.mxu0 %v12105_v7 }
0x3119   : > { %10837 = vmatprep.subr.bf16.mxu0 %v12111_v45 }
0x315b   : > { %v8574_v42 = vpop.f32.mrb[140].mxu1 }
0x315c   : > { %v11319_v48 = vpop.f32.mrb[141].mxu1 }
0x315d   : > { %v8577_v61 = vpop.f32.mrb[142].mxu1  ;;  %v12114_v48 = vld [vmem:[%s14888_s10 + $0x180] sm:$0xff]  }
0x315e   : > { %v11320_v15 = vpop.f32.mrb[143].mxu1  ;;  %v12115_v61 = vld [vmem:[%s14888_s10 + $0x148] sm:$0xff]  }
0x315f   : > { %v12116_v15 = vld [vmem:[%s14888_s10 + $0x1c8] sm:$0xff]  }
0x31ce   : > { %v8507_v38 = vpop.f32.mrb[144].mxu0 }
0x31cf   : > { %v8575_v57 = vadd.f32 %v8574_v42, %v8507_v38  ;;  %v11307_v49 = vpop.f32.mrb[145].mxu0  ;;  %v12113_v42 = vld [vmem:[%s14888_s10 + $0x100] sm:$0xff]   ;;  %v12118_v38 = vld [vmem:[%s14888_s10 + $0x188] sm:$0xff]  }
0x31d0   : > { %v8510_v50 = vpop.f32.mrb[146].mxu0  ;;  %v12120_v49 = vld [vmem:[%s14888_s10 + $0x1d0] sm:$0xff]  }
0x31d1   : > { %v8586_v44 = vadd.f32 %v10319_v51, %v8575_v57  ;;  %v11308_v32 = vpop.f32.mrb[147].mxu0  ;;  %v12117_v51 = vld [vmem:[%s14888_s10 + $0x108] sm:$0xff]   ;;  %v12119_v57 = vld [vmem:[%s14888_s10 + $0x150] sm:$0xff]  }
0x31d2   : > { %v12121_v50 = vld [vmem:[%s14888_s10 + $0x110] sm:$0xff]   ;;  %v12123_v32 = vld [vmem:[%s14888_s10 + $0x158] sm:$0xff]  }
0x31d3   : > { %v8587_v0 = vadd.f32 %v8586_v44, %v14556_v14  ;;  %v12080_v14 = vld [vmem:[%s14886_s9 + $0x14c] ss:$16 sps:$4 sm:$0xff]   ;;  %v12122_v44 = vld [vmem:[%s14888_s10 + $0x190] sm:$0xff]  }
0x31d4   : > { %8879 = vmatprep.subr.bf16.mxu1 %v12080_v14  ;;  %v12134_v14 = vld [vmem:[%s14888_s10 + $0x1a8] sm:$0xff]  }
0x31d5   : > { %8592 = vadd.xlane.f32.xlu1 %v8587_v0  ;;  %8880 = vmatpush1.bf16.msra.mxu1 %v12078_v4  ;;  %v12136_v4 = vld [vmem:[%s14888_s10 + $0x1f0] sm:$0xff]  }
0x31d6   : > { %8881 = vmatprep.subr.bf16.mxu1 %v12086_v60  ;;  %v12142_v60 = vld [vmem:[%s14888_s10 + $0x1b8] sm:$0xff]  }
0x31d9   : > { %8882 = vmatpush1.bf16.msra.mxu1 %v12084_v10  ;;  %v8657_v10 = vrot.slane %v8651_v17, %v13505_v41 }
0x31da   : > { %8883 = vmatprep.subr.bf16.mxu1 %v12092_v26  ;;  %v8661_v26 = vrot.slane %v8651_v17, %v13509_v43 }
0x31dd   : > { %8884 = vmatpush1.bf16.msra.mxu1 %v12090_v19 }
0x31de   : > { %8885 = vmatprep.subr.bf16.mxu1 %v12098_v46 }
0x31e1   : > { %8886 = vmatpush1.bf16.msra.mxu1 %v12096_v36 }
0x31e2   : > { %8887 = vmatprep.subr.bf16.mxu1 %v12104_v34 }
0x31e5   : > { %8888 = vmatpush1.bf16.msra.mxu1 %v12102_v27 }
0x31e6   : > { %8889 = vmatprep.subr.bf16.mxu1 %v12110_v39 }
0x31e9   : > { %8890 = vmatpush1.bf16.msra.mxu1 %v12108_v59 }
0x31ea   : > { %10859 = vmatprep.subr.bf16.mxu1 %v12112_v63 }
0x3262   : > { %v8593_v25 = vpop.xlane.xlu1 %8592 }
0x3263   : > { %v8594_v11 = vmul.f32 0.0078125, %v8593_v25  ;;  %v12137_v25 = vld [vmem:[%s14888_s10 + $0x130] sm:$0xff]  }
0x3265   : > { %v8595_v12 = vsub.f32 %v8587_v0, %v8594_v11  ;;  %v12124_v0 = vld [vmem:[%s14888_s10 + $0x1d8] sm:$0xff]   ;;  %v12138_v11 = vld [vmem:[%s14888_s10 + $0x1b0] sm:$0xff]  }
0x3267   : > { %v8596_v52 = vmul.f32 %v8595_v12, %v8595_v12 }
0x3269   : > { %8597 = vadd.xlane.f32.xlu0 %v8596_v52  ;;  %v12140_v52 = vld [vmem:[%s14888_s10 + $0x1f8] sm:$0xff]  }
0x32f6   : > { %v8598_v24 = vpop.xlane.xlu0 %8597 }
0x32f7   : > { %v8599_v13 = vmul.f32 0.0078125, %v8598_v24 }
0x32f9   : > { %v8600_v54 = vadd.f32 1e-12, %v8599_v13 }
0x32fb   : > { %12319 = vrsqrt.f32 %v8600_v54 }
0x3305   : > { %v12320_v56 = vpop.eup %12319 }
0x3306   : > { %v8602_v21 = vmul.f32 %v12320_v56, %v8595_v12  ;;  %v12139_v12 = vld [vmem:[%s14888_s10 + $0x178] sm:$0xff]  }
0x3308   : > { %v8609_v37 = vmul.f32 %v10320_v29, %v8602_v21 }
0x330a   : > { %v14638_v40 = vadd.f32 %v10321_v31, %v8609_v37 }
0x330c   : > { %v8652_v62 = vpack.c.bf16 %v14638_v40, %v14638_v40 }
0x330e   : > { %8867 = vmatmul.mubr.bf16.vlgmr.msra.gmra.mrb[148].mxu0 %v8652_v62  ;;  %8908 = vmatmul.mubr.bf16.vlgmr.msra.gmra.mrb[144].mxu1 %v8652_v62 }
0x330f   : > { %10838 = vmatpush3.bf16.msra.mxu0 %v12113_v42  ;;  %10860 = vmatpush3.bf16.msra.mxu1 %v12114_v48 }
0x3310   : > { %10839 = vmatprep.subr.bf16.mxu0 %v12115_v61  ;;  %10861 = vmatprep.subr.bf16.mxu1 %v12116_v15 }
0x3313   : > { %10840 = vmatpush3.bf16.msra.mxu0 %v12117_v51  ;;  %10862 = vmatpush3.bf16.msra.mxu1 %v12118_v38 }
0x3314   : > { %10841 = vmatprep.subr.bf16.mxu0 %v12119_v57  ;;  %10863 = vmatprep.subr.bf16.mxu1 %v12120_v49 }
0x3317   : > { %10842 = vmatpush3.bf16.msra.mxu0 %v12121_v50  ;;  %10864 = vmatpush3.bf16.msra.mxu1 %v12122_v44 }
0x3318   : > { %10843 = vmatprep.subr.bf16.mxu0 %v12123_v32  ;;  %10865 = vmatprep.subr.bf16.mxu1 %v12124_v0 }
0x331b   : > { %10844 = vmatpush3.bf16.msra.mxu0 %v12125_v47  ;;  %10866 = vmatpush3.bf16.msra.mxu1 %v12126_v2 }
0x331c   : > { %10845 = vmatprep.subr.bf16.mxu0 %v12127_v6  ;;  %10867 = vmatprep.subr.bf16.mxu1 %v12128_v22 }
0x331f   : > { %10846 = vmatpush3.bf16.msra.mxu0 %v12129_v1  ;;  %10868 = vmatpush3.bf16.msra.mxu1 %v12130_v8 }
0x3320   : > { %10847 = vmatprep.subr.bf16.mxu0 %v12131_v55  ;;  %10869 = vmatprep.subr.bf16.mxu1 %v12132_v33 }
0x3323   : > { %10848 = vmatpush3.bf16.msra.mxu0 %v12133_v35  ;;  %10870 = vmatpush3.bf16.msra.mxu1 %v12134_v14 }
0x3324   : > { %10849 = vmatprep.subr.bf16.mxu0 %v12135_v9  ;;  %10871 = vmatprep.subr.bf16.mxu1 %v12136_v4 }
0x3327   : > { %10850 = vmatpush3.bf16.msra.mxu0 %v12137_v25  ;;  %10872 = vmatpush3.bf16.msra.mxu1 %v12138_v11 }
0x3328   : > { %10851 = vmatprep.subr.bf16.mxu0 %v12139_v12  ;;  %10873 = vmatprep.subr.bf16.mxu1 %v12140_v52  ;;  %v10450_v12 = vld [vmem:[#allocation23 + $0x1] ss:$0 sm:$0xff] }
0x332b   : > { %10852 = vmatpush3.bf16.msra.mxu0 %v12141_v16  ;;  %10874 = vmatpush3.bf16.msra.mxu1 %v12142_v60 }
0x33e1   : > { %v8868_v19 = vpop.f32.mrb[148].mxu0  ;;  %v8909_v5 = vpop.f32.mrb[144].mxu1 }
0x33e2   : > { %v8869_v20 = vadd.f32 %v8868_v19, %v8657_v10  ;;  %v8910_v36 = vadd.f32 %v8909_v5, %v8665_v23  ;;  %v8870_v46 = vpop.f32.mrb[149].mxu0  ;;  %v8911_v58 = vpop.f32.mrb[145].mxu1 }
0x33e3   : > { %v8871_v34 = vadd.f32 %v8870_v46, %v8661_v26  ;;  %v8912_v30 = vadd.f32 %v8911_v58, %v8669_v53  ;;  %v8872_v27 = vpop.f32.mrb[150].mxu0  ;;  %v8913_v28 = vpop.f32.mrb[146].mxu1 }
0x33e4   : > { %v8920_v39 = vmul.f32 0.044715, %v8869_v20  ;;  %v8922_v7 = vmul.f32 0.044715, %v8910_v36  ;;  %v8873_v59 = vpop.f32.mrb[151].mxu0  ;;  %v8914_v41 = vpop.f32.mrb[147].mxu1 }
0x33e5   : > { %v8921_v24 = vmul.f32 0.044715, %v8871_v34  ;;  %v8923_v3 = vmul.f32 0.044715, %v8912_v30  ;;  %v8916_v57 = vmul.f32 0.5, %v8869_v20  ;;  %v8917_v44 = vmul.f32 0.5, %v8871_v34 }
0x33e6   : > { %v8924_v13 = vmul.f32 %v8920_v39, %v8869_v20  ;;  %v8926_v43 = vmul.f32 %v8922_v7, %v8910_v36  ;;  %v8919_v47 = vmul.f32 0.5, %v8912_v30  ;;  %v8918_v1 = vmul.f32 0.5, %v8910_v36  ;;  %v10483_v7 = vld [vmem:[#allocation24 + $0x1] ss:$0 sm:$0xff]  ;;  %v10484_v41 = vld [vmem:[#allocation26 + $0x1] ss:$0 sm:$0xff] }
0x33e7   : > { %v8925_v54 = vmul.f32 %v8921_v24, %v8871_v34  ;;  %v8927_v18 = vmul.f32 %v8923_v3, %v8912_v30 }
0x33e8   : > { %v8928_v56 = vmul.f32 %v8924_v13, %v8869_v20  ;;  %v8930_v29 = vmul.f32 %v8926_v43, %v8910_v36 }
0x33e9   : > { %v8929_v21 = vmul.f32 %v8925_v54, %v8871_v34  ;;  %v8931_v31 = vmul.f32 %v8927_v18, %v8912_v30 }
0x33ea   : > { %v8932_v37 = vadd.f32 %v8928_v56, %v8869_v20  ;;  %v8934_v62 = vadd.f32 %v8930_v29, %v8910_v36 }
0x33eb   : > { %v8933_v45 = vadd.f32 %v8929_v21, %v8871_v34  ;;  %v8935_v63 = vadd.f32 %v8931_v31, %v8912_v30 }
0x33ec   : > { %v8936_v42 = vmul.f32 0.7978846, %v8932_v37  ;;  %v8938_v15 = vmul.f32 0.7978846, %v8934_v62 }
0x33ed   : > { %v8937_v48 = vmul.f32 0.7978846, %v8933_v45  ;;  %v8939_v61 = vmul.f32 0.7978846, %v8935_v63 }
0x33ee   : > { %12321 = vtanh.f32 %v8936_v42 }
0x33ef   : > { %12323 = vtanh.f32 %v8937_v48 }
0x33f0   : > { %12325 = vtanh.f32 %v8939_v61 }
0x33f1   : > { %12327 = vtanh.f32 %v8938_v15 }
0x33f8   : > { %v12322_v51 = vpop.eup %12321 }
0x33f9   : > { %v12324_v38 = vpop.eup %12323  ;;  %v8944_v49 = vadd.f32 1.0, %v12322_v51 }
0x33fa   : > { %v12326_v50 = vpop.eup %12325  ;;  %v8945_v32 = vadd.f32 1.0, %v12324_v38 }
0x33fb   : > { %v12328_v0 = vpop.eup %12327  ;;  %v8947_v2 = vadd.f32 1.0, %v12326_v50  ;;  %v8948_v6 = vmul.f32 %v8944_v49, %v8916_v57 }
0x33fc   : > { %v8949_v22 = vmul.f32 %v8945_v32, %v8917_v44  ;;  %v8946_v8 = vadd.f32 1.0, %v12328_v0 }
0x33fd   : > { %v8951_v55 = vmul.f32 %v8947_v2, %v8919_v47  ;;  %v9019_v9 = vpack.c.bf16 %v8948_v6, %v8948_v6 }
0x33fe   : > { %v9020_v33 = vpack.c.bf16 %v8949_v22, %v8949_v22  ;;  %v8950_v35 = vmul.f32 %v8946_v8, %v8918_v1 }
0x33ff   : > { %v9022_v14 = vpack.c.bf16 %v8951_v55, %v8951_v55 }
0x3400   : > { %9253 = vmatprep.mubr.bf16.mxu0 %v9020_v33  ;;  %v9021_v4 = vpack.c.bf16 %v8950_v35, %v8950_v35 }
0x3401   : > { %9293 = vmatprep.mubr.bf16.mxu1 %v9022_v14  ;;  %9254 = vmatmul.mubr.bf16.vlgmr.msra.gmra.mrb[152].mxu0 %v9019_v9 }
0x3402   : > { %9294 = vmatmul.mubr.bf16.vlgmr.msra.gmra.mrb[148].mxu1 %v9021_v4 }
0x34d4   : > { %v10853_v25 = vpop.f32.mrb[152].mxu0 }
0x34d5   : > { %v10875_v11 = vpop.f32.mrb[148].mxu1  ;;  %v10854_v52 = vpop.f32.mrb[153].mxu0 }
0x34d6   : > { %v10855_v16 = vadd.f32 %v10854_v52, %v10853_v25  ;;  %v10876_v60 = vpop.f32.mrb[149].mxu1  ;;  %v10856_v17 = vpop.f32.mrb[154].mxu0 }
0x34d7   : > { %v10877_v10 = vadd.f32 %v10876_v60, %v10875_v11  ;;  %v10878_v23 = vpop.f32.mrb[150].mxu1  ;;  %v10857_v26 = vpop.f32.mrb[155].mxu0 }
0x34d8   : > { %v9256_v53 = vadd.f32 %v10855_v16, %v10450_v12  ;;  %v10879_v19 = vpop.f32.mrb[151].mxu1 }
0x34da   : > { %v9296_v5 = vadd.f32 %v10877_v10, %v9256_v53 }
0x34dc   : > { %v9301_v20 = vadd.f32 %v9296_v5, %v14638_v40 }
0x34de   : > { %9306 = vadd.xlane.f32.xlu1 %v9301_v20 }
0x356b   : > { %v9307_v36 = vpop.xlane.xlu1 %9306 }
0x356c   : > { %v9308_v46 = vmul.f32 0.0078125, %v9307_v36 }
0x356e   : > { %v9309_v58 = vsub.f32 %v9301_v20, %v9308_v46 }
0x3570   : > { %v9310_v34 = vmul.f32 %v9309_v58, %v9309_v58 }
0x3572   : > { %9311 = vadd.xlane.f32.xlu1 %v9310_v34 }
0x35ff   : > { %v9312_v30 = vpop.xlane.xlu1 %9311 }
0x3600   : > { %v9313_v27 = vmul.f32 0.0078125, %v9312_v30 }
0x3602   : > { %v9314_v28 = vadd.f32 1e-12, %v9313_v27 }
0x3604   : > { %12329 = vrsqrt.f32 %v9314_v28 }
0x360e   : > { %v12330_v39 = vpop.eup %12329 }
0x360f   : > { %v9316_v59 = vmul.f32 %v12330_v39, %v9309_v58 }
0x3611   : > { %v9323_v40 = vmul.f32 %v10483_v7, %v9316_v59 }
0x3613   : > { %v9330_v24 = vadd.f32 %v10484_v41, %v9323_v40 }
0x3615   : > { %9331 = vst [vmem:[%s1470_s1] sm:$0x1] %v9330_v24 }
0x3616   : > { %12764 = shalt.err (!%p12761_p7)
}
0x3617   : > { %s12765_s1 = scalar_lea.hbm %s14682_s3, 16  ;;  %s12769_s6 = scalar_lea.hbm %s13133_s25, 32 }
0x3618   : > { %p12766_p8 = scmp.ne.s32.totalorder %s14682_s3, %s12765_s1  ;;  %p12770_p1 = scmp.lt.u32.totalorder %s14682_s3, %s13133_s25 }
0x3619   : > { %p12771_p0 = scmp.lt.u32.totalorder %s12769_s6, %s12765_s1  ;;  %p12773_p3 = scmp.lt.u32.totalorder %s12765_s1, %s14682_s3 }
0x361a   : > { %p12767_p11 = pnand %p12766_p8, %p14889_p4 }
0x361b   : > { %p12772_p2 = por %p12771_p0, %p12770_p1 }
0x361c   : > { %p12768_p13 = pneg %p12767_p11 }
0x361d   : > { %p12774_p12 = por %p12773_p3, %p12772_p2 }
0x361f   : > { %p12775_p5 = pnand %p12774_p12, %p12768_p13 }
0x3621   : > { %12778 = shalt.err (!%p12775_p5)
}
0x3622   : > { %11389 = dma.vmem_to_hbm [thread:$0]  (%p14889_p4), %s14684_s2, 16, %s14682_s3, %s9333_s4  }
0x3623 PF: > { %s14890_s5 = sld [smem:[#allocation73_spill]]  ;;  %s14891_s8 = sld [smem:[#allocation71_spill]] }
0x3624   : > { %s14892_s18 = sld [smem:[#allocation76_spill]] }
0x3629   : > { %p11471_p6 = scmp.ge.s32.totalorder %s14890_s5, 2  ;;  %s9357_s15 = sand.u32 1, %s14891_s8  }
0x362a   : > { %p14893_p9 = scmp.ne.s32.totalorder %s14892_s18, 0  ;;  %s9358_s0 = scalar_lea.sflag [#allocation5], %s9357_s15 }
0x362c   : > { %p11438_p10 = pnand %p11471_p6, %p14893_p9 }
0x362e   : > { %12828 = dma.done.wait (!%p11438_p10), %s9358_s0, 16  }
0x362f   : > { %12830 = vsyncadd (!%p11438_p10), %s9358_s0, 4294967280  ;;  %s14894_s1 = sld [smem:[#allocation74_spill]]  ;;  %s14895_s6 = sld [smem:[#allocation72_spill]] }
0x3630   : > { %s14896_s18 = sld [smem:[#allocation75_spill]]  ;;  %s14897_s15 = smov %s12837_s16 }
0x3635   : > { %p103_p7 = scmp.ge.s32.totalorder %s14894_s1, 4   ;;  %s14898_s16 = smov %s14895_s6 }
0x3636   : > { %14899 = sst [smem:[#allocation71_spill]] %s14894_s1 }
0x3637   :  { %105 = sbr.rel (!%p103_p7) target bundleno = 95 (0x5f), region = 358 }
0x363e   :  { %9362 = vsyncpa [#allocation4], 1 }
0x363f   :  { %9364 = vsyncpa [#allocation4 + $0x1], 1 }
0x3640   :  { %9365 = vsyncpa [#allocation7], 1 }
0x3641   :  { %9366 = vsyncpa [#allocation10], 1 }
0x3642   :  { %9367 = vsyncpa [#allocation13], 1 }
0x3643   :  { %9368 = vsyncpa [#allocation16], 1 }
0x3644   :  { %9369 = vsyncpa [#allocation19], 1 }
0x3645   :  { %9370 = vsyncpa [#allocation22], 1 }
0x3646   :  { %9371 = vsyncpa [#allocation25], 1 }
0x3647   :  { %9372 = vsyncpa [#allocation5], 1 }
0x3648   :  { %9374 = vsyncpa [#allocation5 + $0x1], 1 }

</bundles_post_ra>
